<compile_context>
chip_gen: v7x
topology: tpu7x:2x2x1
jax: 0.10.0
libtpu: 0.0.40
codegen_flags: <defaults>
</compile_context>

<pallas_src>
import jax
import jax.numpy as jnp
import numpy as np
from jax.experimental import pallas as pl
from jax.experimental.pallas import tpu as pltpu

BN_EPS = 1e-5


def _elu(v):
    # ELU(alpha=1): x if x > 0 else exp(x) - 1
    return jnp.where(v > 0, v, jnp.exp(jnp.minimum(v, 0.0)) - 1.0)


def _round_up(a, b):
    return (a + b - 1) // b * b


def _vmem_estimate(BB, S0, Chans, x_itemsize):
    """Rough per-grid-step VMEM footprint (lane-padded, incl. double buffers)."""
    lp = lambda c: _round_up(c, 128)
    P1, P2, P3 = S0 // 2, S0 // 4, S0 // 8
    est = 2 * BB * S0 * lp(Chans) * x_itemsize          # double-buffered input block
    est += 2 * BB * P3 * 128 * 4                        # double-buffered output block
    est += BB * S0 * lp(25) * 4                         # scrA (block1 pre-pool)
    est += BB * P1 * (lp(25) + lp(50)) * 4              # scrB, scrC
    est += BB * P2 * (lp(50) + 128) * 4                 # scrD, scrE
    est += 4 * BB * S0 * 128 * 4                        # headroom: big matmul/pool temps
    est += 2 << 20                                      # weights, semaphores, misc
    return est


def _make_kernel(BB, S0, Chans):
    P1, P2, P3 = S0 // 2, S0 // 4, S0 // 8
    M1, M2, M3 = BB * S0 - 4, BB * P1 - 4, BB * P2 - 4
    C3 = 128   # block3 channel dim padded 100 -> 128 (lane-dense output)

    def kernel(x_ref, w12_ref, w3_ref, w4_ref, aff_ref, out_ref,
               scrA, scrB, scrC, scrD, scrE):
        cdt = w12_ref.dtype                       # matmul compute dtype (f32 or bf16)
        sc1, of1 = aff_ref[0:1, 0:25], aff_ref[1:2, 0:25]
        sc2, of2 = aff_ref[2:3, 0:50], aff_ref[3:4, 0:50]
        sc3, of3 = aff_ref[4:5, :], aff_ref[5:6, :]

        # ---- block1: fused conv(1,5)+conv(Chans,1) as 5 shifted matmuls over the
        # stacked (BB*S0, Chans) slab; conv bias folded into the BN(eval) affine.
        # Rows past each sample's valid region mix neighbouring samples; they are
        # never read for valid downstream outputs (pool/conv windows stay inside).
        h = jnp.dot(x_ref[pl.ds(0, M1), :].astype(cdt), w12_ref[0],
                    preferred_element_type=jnp.float32)
        for k in range(1, 5):
            h = h + jnp.dot(x_ref[pl.ds(k, M1), :].astype(cdt), w12_ref[k],
                            preferred_element_type=jnp.float32)
        scrA[pl.ds(0, M1), :] = _elu(h * sc1 + of1)
        scrA[pl.ds(M1, 4), :] = jnp.zeros((4, 25), jnp.float32)   # deterministic tail
        # maxpool(1,2): one whole-buffer stride-2 max. Per-sample chunk stride S0 is
        # even, so pooling pairs never straddle a sample chunk.
        scrB[...] = jnp.maximum(scrA[pl.ds(0, BB * P1, stride=2), :],
                                scrA[pl.ds(1, BB * P1, stride=2), :])
        # Dropout -> identity (eval mode)

        # ---- block2: conv(1,5) -> BN -> ELU -> pool
        h = jnp.dot(scrB[pl.ds(0, M2), :].astype(cdt), w3_ref[0],
                    preferred_element_type=jnp.float32)
        for k in range(1, 5):
            h = h + jnp.dot(scrB[pl.ds(k, M2), :].astype(cdt), w3_ref[k],
                            preferred_element_type=jnp.float32)
        scrC[pl.ds(0, M2), :] = _elu(h * sc2 + of2)
        scrC[pl.ds(M2, 4), :] = jnp.zeros((4, 50), jnp.float32)
        scrD[...] = jnp.maximum(scrC[pl.ds(0, BB * P2, stride=2), :],
                                scrC[pl.ds(1, BB * P2, stride=2), :])

        # ---- block3: conv(1,5) -> BN -> ELU -> pool (channels lane-padded to 128)
        h = jnp.dot(scrD[pl.ds(0, M3), :].astype(cdt), w4_ref[0],
                    preferred_element_type=jnp.float32)
        for k in range(1, 5):
            h = h + jnp.dot(scrD[pl.ds(k, M3), :].astype(cdt), w4_ref[k],
                            preferred_element_type=jnp.float32)
        scrE[pl.ds(0, M3), :] = _elu(h * sc3 + of3)
        scrE[pl.ds(M3, 4), :] = jnp.zeros((4, C3), jnp.float32)
        # pooled block3 features go straight to the (lane-dense) kernel output;
        # the MaskLinear classifier runs in XLA in the wrapper (review option b).
        out_ref[...] = jnp.maximum(scrE[pl.ds(0, BB * P3, stride=2), :],
                                   scrE[pl.ds(1, BB * P3, stride=2), :])

    return kernel


def deepconvnet_forward(x_nchw, params, *, block_b=None,
                        matmul_dtype=jnp.float32,
                        vmem_budget_bytes=36 << 20):
    """x_nchw: (B, 1, Chans, Samples) float32. Returns (B, n_classes) float32."""
    f32 = jnp.float32
    B = x_nchw.shape[0]
    Chans = x_nchw.shape[2]
    S = x_nchw.shape[3]
    T1f = S - 4
    T1 = T1f // 2
    T2f = T1 - 4
    T2 = T2f // 2
    T3f = T2 - 4
    T3 = T3f // 2
    assert T3 >= 1, "Samples too small for DeepConvNet"
    n_classes = params['bl'].shape[0]

    # pad the time axis so every per-sample chunk stride (S0, S0/2, S0/4) is even
    S0 = _round_up(S, 8)
    P1, P2, P3 = S0 // 2, S0 // 4, S0 // 8
    C3 = 128

    # ---- batch-block size: largest multiple of 8 (<=64) that fits the VMEM budget
    if block_b is None:
        BB = min(64, _round_up(B, 8))
    else:
        BB = max(8, (block_b // 8) * 8)
        BB = min(BB, _round_up(B, 8))
    while BB > 8 and _vmem_estimate(BB, S0, Chans, 4) > vmem_budget_bytes:
        BB -= 8
    Bpad = _round_up(B, BB)
    grid = Bpad // BB
    est = _vmem_estimate(BB, S0, Chans, 4)
    vmem_limit = int(min(max(int(est * 1.25) + (4 << 20), 32 << 20), 52 << 20))

    # ---------------- glue: layout packing (pure JAX, outside the kernel)
    x_t = jnp.transpose(x_nchw[:, 0, :, :], (0, 2, 1)).astype(f32)   # (B, S, C)
    if Bpad != B:
        x_t = jnp.concatenate(
            [x_t, jnp.zeros((Bpad - B, S, Chans), f32)], axis=0)
    if S0 != S:
        x_t = jnp.concatenate(
            [x_t, jnp.zeros((Bpad, S0 - S, Chans), f32)], axis=1)
    X = x_t.reshape(Bpad * S0, Chans)
    # TODO(synk): X could be cast to bf16 to halve input DMA on v6e/v7x, but the
    # 5 tap slices then need unaligned packed-sublane loads; kept f32 here.

    # fused conv1(1x5)+conv2(Chans x 1), per temporal tap k: W12[k,c,j]
    w1m = (params['w1'] * params['m1'])[:, 0, 0, :]                  # (25, 5)
    w2m = (params['w2'] * params['m2'])[:, :, :, 0]                  # (25, 25, C)
    W12 = jnp.einsum('ik,jic->kcj', w1m, w2m)                        # (5, C, 25)
    b12 = jnp.einsum('jic,i->j', w2m, params['b1']) + params['b2']   # (25,)

    def bn_fold(prefix, bias):
        g, bt = params[f'{prefix}_g'], params[f'{prefix}_b']
        m, v = params[f'{prefix}_m'], params[f'{prefix}_v']
        scale = g / jnp.sqrt(v + BN_EPS)
        return scale, (bias - m) * scale + bt        # conv bias folded in

    sc1, of1 = bn_fold('bn1', b12)
    sc2, of2 = bn_fold('bn2', params['b3'])
    sc3, of3 = bn_fold('bn3', params['b4'])

    W3 = jnp.transpose((params['w3'] * params['m3'])[:, :, 0, :], (2, 1, 0))  # (5,25,50)
    W4 = jnp.transpose((params['w4'] * params['m4'])[:, :, 0, :], (2, 1, 0))  # (5,50,100)
    W4p = jnp.concatenate([W4, jnp.zeros((5, 50, C3 - 100), f32)], axis=-1)   # (5,50,128)
    sc3p = jnp.concatenate([sc3, jnp.ones((C3 - 100,), f32)])
    of3p = jnp.concatenate([of3, jnp.zeros((C3 - 100,), f32)])

    # all per-layer (1,F) affine vectors packed into one (8,128) operand
    AFF = jnp.zeros((8, 128), f32)
    AFF = AFF.at[0, :25].set(sc1).at[1, :25].set(of1)
    AFF = AFF.at[2, :50].set(sc2).at[3, :50].set(of2)
    AFF = AFF.at[4, :].set(sc3p).at[5, :].set(of3p)

    cdt = matmul_dtype
    W12 = W12.astype(cdt)
    W3 = W3.astype(cdt)
    W4p = W4p.astype(cdt)

    kernel = _make_kernel(BB, S0, Chans)
    out = pl.pallas_call(
        kernel,
        out_shape=jax.ShapeDtypeStruct((Bpad * P3, C3), f32),
        grid=(grid,),
        in_specs=[
            pl.BlockSpec((BB * S0, Chans), lambda i: (i, 0)),   # stacked input slab
            pl.BlockSpec((5, Chans, 25), lambda i: (0, 0, 0)),  # fused block1 weights
            pl.BlockSpec((5, 25, 50), lambda i: (0, 0, 0)),     # block2 weights
            pl.BlockSpec((5, 50, C3), lambda i: (0, 0, 0)),     # block3 weights (padded)
            pl.BlockSpec((8, 128), lambda i: (0, 0)),           # packed BN affines
        ],
        out_specs=pl.BlockSpec((BB * P3, C3), lambda i: (i, 0)),
        scratch_shapes=[
            pltpu.VMEM((BB * S0, 25), f32),       # block1 pre-pool
            pltpu.VMEM((BB * P1, 25), f32),       # block1 pooled
            pltpu.VMEM((BB * P1, 50), f32),       # block2 pre-pool
            pltpu.VMEM((BB * P2, 50), f32),       # block2 pooled
            pltpu.VMEM((BB * P2, C3), f32),       # block3 pre-pool
        ],
        compiler_params=pltpu.CompilerParams(
            dimension_semantics=("parallel",),
            vmem_limit_bytes=vmem_limit),
    )(X, W12, W3, W4p, AFF)

    # ---------------- classifier (MaskLinear) on the pooled block-3 features.
    # Channel-major flatten matches torch's reshape of (B, 100, 1, T3).
    feats = out.reshape(Bpad, P3, C3)[:B, :T3, :100]                 # (B, T3, 100)
    flat = jnp.transpose(feats, (0, 2, 1)).reshape(B, 100 * T3)      # (B, 100*T3)
    logits = flat @ (params['wl'] * params['ml']).T + params['bl'][None, :]
    return logits.astype(f32)


# ----------------- deterministic parameter init (shapes per DeepConvNet.__init__)
def init_params(key, Chans, Samples, n_classes):
    T1 = (Samples - 4) // 2
    T2 = (T1 - 4) // 2
    T3 = (T2 - 4) // 2
    feat = 100 * T3  # == 100 * CalculateOutSize(...)
    ks = jax.random.split(key, 16)
    f32 = jnp.float32

    def w(k, shape, s=0.15):
        return s * jax.random.normal(k, shape, f32)

    p = {}
    p['w1'], p['b1'] = w(ks[0], (25, 1, 1, 5)), w(ks[1], (25,))
    p['m1'] = jnp.ones((25, 1, 1, 5), f32)             # neuron_mask (init.ones_)
    p['w2'], p['b2'] = w(ks[2], (25, 25, Chans, 1)), w(ks[3], (25,))
    p['m2'] = jnp.ones((25, 25, Chans, 1), f32)
    p['w3'], p['b3'] = w(ks[4], (50, 25, 1, 5)), w(ks[5], (50,))
    p['m3'] = jnp.ones((50, 25, 1, 5), f32)
    p['w4'], p['b4'] = w(ks[6], (100, 50, 1, 5)), w(ks[7], (100,))
    p['m4'] = jnp.ones((100, 50, 1, 5), f32)
    p['wl'], p['bl'] = w(ks[8], (n_classes, feat)), w(ks[9], (n_classes,))
    p['ml'] = jnp.ones((n_classes, feat), f32)
    for i, C, k in ((1, 25, ks[10]), (2, 50, ks[11]), (3, 100, ks[12])):
        kk = jax.random.split(k, 4)
        p[f'bn{i}_g'] = 1.0 + 0.1 * jax.random.normal(kk[0], (C,), f32)
        p[f'bn{i}_b'] = 0.1 * jax.random.normal(kk[1], (C,), f32)
        p[f'bn{i}_m'] = 0.1 * jax.random.normal(kk[2], (C,), f32)
        p[f'bn{i}_v'] = 1.0 + 0.1 * jnp.abs(jax.random.normal(kk[3], (C,), f32))
    return p


# ----------------- pure-JAX reference (same eval-mode semantics), for checking
def reference_forward(x, p):
    def conv(h, w, b):
        y = jax.lax.conv_general_dilated(h, w, window_strides=(1, 1), padding='VALID',
                                         dimension_numbers=('NCHW', 'OIHW', 'NCHW'))
        return y + b[None, :, None, None]

    def bn(h, i):
        g = p[f'bn{i}_g'][None, :, None, None]
        bt = p[f'bn{i}_b'][None, :, None, None]
        m = p[f'bn{i}_m'][None, :, None, None]
        v = p[f'bn{i}_v'][None, :, None, None]
        return (h - m) / jnp.sqrt(v + BN_EPS) * g + bt

    def elu(h):
        return jnp.where(h > 0, h, jnp.exp(jnp.minimum(h, 0.0)) - 1.0)

    def pool(h):
        B, C, H, W = h.shape
        T = W // 2
        return jnp.max(h[..., :2 * T].reshape(B, C, H, T, 2), axis=-1)

    h = conv(x, p['w1'] * p['m1'], p['b1'])
    h = conv(h, p['w2'] * p['m2'], p['b2'])
    h = pool(elu(bn(h, 1)))
    h = conv(h, p['w3'] * p['m3'], p['b3'])
    h = pool(elu(bn(h, 2)))
    h = conv(h, p['w4'] * p['m4'], p['b4'])
    h = pool(elu(bn(h, 3)))
    h = h.reshape(h.shape[0], -1)
    return h @ (p['wl'] * p['ml']).T + p['bl'][None, :]


if __name__ == "__main__":
    B, Chans, Samples, n_classes = 12, 4, 64, 4
    key = jax.random.PRNGKey(0)
    kx, kp = jax.random.split(key)
    x = jax.random.normal(kx, (B, 1, Chans, Samples), jnp.float32)
    params = init_params(kp, Chans, Samples, n_classes)

    ref = jax.block_until_ready(reference_forward(x, params))

    # f32 matmul path (default): tight tolerance.
    out = jax.block_until_ready(deepconvnet_forward(x, params))
    assert out.shape == (B, n_classes), out.shape
    if not np.allclose(np.asarray(out), np.asarray(ref), atol=2e-3, rtol=2e-3):
        raise AssertionError(
            "f32 mismatch: max abs diff "
            f"{np.max(np.abs(np.asarray(out) - np.asarray(ref)))}")

    # bf16 matmul fast path (v6e/v7x suggestion): looser tolerance, same semantics.
    out_bf = jax.block_until_ready(
        deepconvnet_forward(x, params, matmul_dtype=jnp.bfloat16))
    assert out_bf.shape == (B, n_classes), out_bf.shape
    if not np.allclose(np.asarray(out_bf), np.asarray(ref), atol=2e-1, rtol=5e-2):
        raise AssertionError(
            "bf16 mismatch: max abs diff "
            f"{np.max(np.abs(np.asarray(out_bf) - np.asarray(ref)))}")

    print("KERNEL_OK")
</pallas_src>

<mosaic_0001>
module attributes {stable_mosaic.version = 11 : i64} {
  func.func @kernel(%arg0: i32, %arg1: memref<1024x4xf32, #tpu.memory_space<vmem>>, %arg2: memref<5x4x25xf32, #tpu.memory_space<vmem>>, %arg3: memref<5x25x50xf32, #tpu.memory_space<vmem>>, %arg4: memref<5x50x128xf32, #tpu.memory_space<vmem>>, %arg5: memref<8x128xf32, #tpu.memory_space<vmem>>, %arg6: memref<128x128xf32, #tpu.memory_space<vmem>>, %arg7: memref<1024x25xf32, #tpu.memory_space<vmem>>, %arg8: memref<512x25xf32, #tpu.memory_space<vmem>>, %arg9: memref<512x50xf32, #tpu.memory_space<vmem>>, %arg10: memref<256x50xf32, #tpu.memory_space<vmem>>, %arg11: memref<256x128xf32, #tpu.memory_space<vmem>>) attributes {dimension_semantics = [#tpu.dimension_semantics<parallel>], iteration_bounds = array<i64: 1>, scalar_prefetch = 0 : i64, scratch_operands = 5 : i64, tpu.core_type = #tpu.core_type<tc>, window_params = [{transform_indices = @transform_0, window_bounds = array<i64: 1024, 4>}, {pipeline_mode = #tpu.pipeline_mode<synchronous>, transform_indices = @transform_1, window_bounds = array<i64: 5, 4, 25>}, {pipeline_mode = #tpu.pipeline_mode<synchronous>, transform_indices = @transform_2, window_bounds = array<i64: 5, 25, 50>}, {pipeline_mode = #tpu.pipeline_mode<synchronous>, transform_indices = @transform_3, window_bounds = array<i64: 5, 50, 128>}, {pipeline_mode = #tpu.pipeline_mode<synchronous>, transform_indices = @transform_4, window_bounds = array<i64: 8, 128>}, {transform_indices = @transform_5, window_bounds = array<i64: 128, 128>}]} {
    %c0 = arith.constant 0 : index
    %c0_0 = arith.constant 0 : index
    %0 = vector.load %arg5[%c0, %c0_0] : memref<8x128xf32, #tpu.memory_space<vmem>>, vector<1x25xf32>
    %c1 = arith.constant 1 : index
    %c0_1 = arith.constant 0 : index
    %1 = vector.load %arg5[%c1, %c0_1] : memref<8x128xf32, #tpu.memory_space<vmem>>, vector<1x25xf32>
    %c2 = arith.constant 2 : index
    %c0_2 = arith.constant 0 : index
    %2 = vector.load %arg5[%c2, %c0_2] : memref<8x128xf32, #tpu.memory_space<vmem>>, vector<1x50xf32>
    %c3 = arith.constant 3 : index
    %c0_3 = arith.constant 0 : index
    %3 = vector.load %arg5[%c3, %c0_3] : memref<8x128xf32, #tpu.memory_space<vmem>>, vector<1x50xf32>
    %c4 = arith.constant 4 : index
    %c0_4 = arith.constant 0 : index
    %4 = vector.load %arg5[%c4, %c0_4] : memref<8x128xf32, #tpu.memory_space<vmem>>, vector<1x128xf32>
    %c5 = arith.constant 5 : index
    %c0_5 = arith.constant 0 : index
    %5 = vector.load %arg5[%c5, %c0_5] : memref<8x128xf32, #tpu.memory_space<vmem>>, vector<1x128xf32>
    %c0_6 = arith.constant 0 : index
    %c0_7 = arith.constant 0 : index
    %6 = vector.load %arg1[%c0_6, %c0_7] : memref<1024x4xf32, #tpu.memory_space<vmem>>, vector<1020x4xf32>
    %c0_8 = arith.constant 0 : index
    %c0_9 = arith.constant 0 : index
    %c0_10 = arith.constant 0 : index
    %7 = vector.load %arg2[%c0_8, %c0_9, %c0_10] : memref<5x4x25xf32, #tpu.memory_space<vmem>>, vector<1x4x25xf32>
    %8 = vector.shape_cast %7 : vector<1x4x25xf32> to vector<4x25xf32>
    %cst = arith.constant dense<0.000000e+00> : vector<1020x25xf32>
    %9 = tpu.matmul %6, %8, %cst {dimension_numbers = #tpu.dot_dimension_numbers<[1], [0], [0], [1], [0, 0, 1, 1], [], []>} : vector<1020x4xf32>, vector<4x25xf32>, vector<1020x25xf32> -> vector<1020x25xf32>
    %c1_11 = arith.constant 1 : index
    %c0_12 = arith.constant 0 : index
    %10 = vector.load %arg1[%c1_11, %c0_12] : memref<1024x4xf32, #tpu.memory_space<vmem>>, vector<1020x4xf32>
    %c1_13 = arith.constant 1 : index
    %c0_14 = arith.constant 0 : index
    %c0_15 = arith.constant 0 : index
    %11 = vector.load %arg2[%c1_13, %c0_14, %c0_15] : memref<5x4x25xf32, #tpu.memory_space<vmem>>, vector<1x4x25xf32>
    %12 = vector.shape_cast %11 : vector<1x4x25xf32> to vector<4x25xf32>
    %cst_16 = arith.constant dense<0.000000e+00> : vector<1020x25xf32>
    %13 = tpu.matmul %10, %12, %cst_16 {dimension_numbers = #tpu.dot_dimension_numbers<[1], [0], [0], [1], [0, 0, 1, 1], [], []>} : vector<1020x4xf32>, vector<4x25xf32>, vector<1020x25xf32> -> vector<1020x25xf32>
    %14 = arith.addf %9, %13 : vector<1020x25xf32>
    %c2_17 = arith.constant 2 : index
    %c0_18 = arith.constant 0 : index
    %15 = vector.load %arg1[%c2_17, %c0_18] : memref<1024x4xf32, #tpu.memory_space<vmem>>, vector<1020x4xf32>
    %c2_19 = arith.constant 2 : index
    %c0_20 = arith.constant 0 : index
    %c0_21 = arith.constant 0 : index
    %16 = vector.load %arg2[%c2_19, %c0_20, %c0_21] : memref<5x4x25xf32, #tpu.memory_space<vmem>>, vector<1x4x25xf32>
    %17 = vector.shape_cast %16 : vector<1x4x25xf32> to vector<4x25xf32>
    %cst_22 = arith.constant dense<0.000000e+00> : vector<1020x25xf32>
    %18 = tpu.matmul %15, %17, %cst_22 {dimension_numbers = #tpu.dot_dimension_numbers<[1], [0], [0], [1], [0, 0, 1, 1], [], []>} : vector<1020x4xf32>, vector<4x25xf32>, vector<1020x25xf32> -> vector<1020x25xf32>
    %19 = arith.addf %14, %18 : vector<1020x25xf32>
    %c3_23 = arith.constant 3 : index
    %c0_24 = arith.constant 0 : index
    %20 = vector.load %arg1[%c3_23, %c0_24] : memref<1024x4xf32, #tpu.memory_space<vmem>>, vector<1020x4xf32>
    %c3_25 = arith.constant 3 : index
    %c0_26 = arith.constant 0 : index
    %c0_27 = arith.constant 0 : index
    %21 = vector.load %arg2[%c3_25, %c0_26, %c0_27] : memref<5x4x25xf32, #tpu.memory_space<vmem>>, vector<1x4x25xf32>
    %22 = vector.shape_cast %21 : vector<1x4x25xf32> to vector<4x25xf32>
    %cst_28 = arith.constant dense<0.000000e+00> : vector<1020x25xf32>
    %23 = tpu.matmul %20, %22, %cst_28 {dimension_numbers = #tpu.dot_dimension_numbers<[1], [0], [0], [1], [0, 0, 1, 1], [], []>} : vector<1020x4xf32>, vector<4x25xf32>, vector<1020x25xf32> -> vector<1020x25xf32>
    %24 = arith.addf %19, %23 : vector<1020x25xf32>
    %c4_29 = arith.constant 4 : index
    %c0_30 = arith.constant 0 : index
    %25 = vector.load %arg1[%c4_29, %c0_30] : memref<1024x4xf32, #tpu.memory_space<vmem>>, vector<1020x4xf32>
    %c4_31 = arith.constant 4 : index
    %c0_32 = arith.constant 0 : index
    %c0_33 = arith.constant 0 : index
    %26 = vector.load %arg2[%c4_31, %c0_32, %c0_33] : memref<5x4x25xf32, #tpu.memory_space<vmem>>, vector<1x4x25xf32>
    %27 = vector.shape_cast %26 : vector<1x4x25xf32> to vector<4x25xf32>
    %cst_34 = arith.constant dense<0.000000e+00> : vector<1020x25xf32>
    %28 = tpu.matmul %25, %27, %cst_34 {dimension_numbers = #tpu.dot_dimension_numbers<[1], [0], [0], [1], [0, 0, 1, 1], [], []>} : vector<1020x4xf32>, vector<4x25xf32>, vector<1020x25xf32> -> vector<1020x25xf32>
    %29 = arith.addf %24, %28 : vector<1020x25xf32>
    %30 = vector.broadcast %0 : vector<1x25xf32> to vector<1020x25xf32>
    %31 = arith.mulf %29, %30 : vector<1020x25xf32>
    %32 = vector.broadcast %1 : vector<1x25xf32> to vector<1020x25xf32>
    %33 = arith.addf %31, %32 : vector<1020x25xf32>
    %cst_35 = arith.constant 0.000000e+00 : f32
    %34 = vector.broadcast %cst_35 : f32 to vector<1020x25xf32>
    %35 = arith.cmpf ogt, %33, %34 : vector<1020x25xf32>
    %cst_36 = arith.constant 0.000000e+00 : f32
    %36 = vector.broadcast %cst_36 : f32 to vector<1020x25xf32>
    %37 = arith.minimumf %33, %36 : vector<1020x25xf32>
    %38 = math.exp %37 : vector<1020x25xf32>
    %cst_37 = arith.constant 1.000000e+00 : f32
    %39 = vector.broadcast %cst_37 : f32 to vector<1020x25xf32>
    %40 = arith.subf %38, %39 : vector<1020x25xf32>
    %41 = arith.select %35, %33, %40 : vector<1020x25xi1>, vector<1020x25xf32>
    %c0_38 = arith.constant 0 : index
    %c0_39 = arith.constant 0 : index
    %42 = vector.load %arg7[%c0_38, %c0_39] : memref<1024x25xf32, #tpu.memory_space<vmem>>, vector<1020x25xf32>
    tpu.vector_store %arg7[%c0_38, %c0_39], %41 {strides = array<i32>} : memref<1024x25xf32, #tpu.memory_space<vmem>>, vector<1020x25xf32>,
    %cst_40 = arith.constant 0.000000e+00 : f32
    %43 = vector.broadcast %cst_40 : f32 to vector<4x25xf32>
    %c1020 = arith.constant 1020 : index
    %c0_41 = arith.constant 0 : index
    %44 = vector.load %arg7[%c1020, %c0_41] : memref<1024x25xf32, #tpu.memory_space<vmem>>, vector<4x25xf32>
    tpu.vector_store %arg7[%c1020, %c0_41], %43 {strides = array<i32>} : memref<1024x25xf32, #tpu.memory_space<vmem>>, vector<4x25xf32>,
    %c0_42 = arith.constant 0 : index
    %c0_43 = arith.constant 0 : index
    %45 = tpu.strided_load %arg7[%c0_42, %c0_43] {strides = array<i32: 2, 1>} : memref<1024x25xf32, #tpu.memory_space<vmem>>, vector<512x25xf32>
    %c1_44 = arith.constant 1 : index
    %c0_45 = arith.constant 0 : index
    %46 = tpu.strided_load %arg7[%c1_44, %c0_45] {strides = array<i32: 2, 1>} : memref<1024x25xf32, #tpu.memory_space<vmem>>, vector<512x25xf32>
    %47 = arith.maximumf %45, %46 : vector<512x25xf32>
    %c0_46 = arith.constant 0 : index
    %c0_47 = arith.constant 0 : index
    %48 = vector.load %arg8[%c0_46, %c0_47] : memref<512x25xf32, #tpu.memory_space<vmem>>, vector<512x25xf32>
    tpu.vector_store %arg8[%c0_46, %c0_47], %47 {strides = array<i32>} : memref<512x25xf32, #tpu.memory_space<vmem>>, vector<512x25xf32>,
    %c0_48 = arith.constant 0 : index
    %c0_49 = arith.constant 0 : index
    %49 = vector.load %arg8[%c0_48, %c0_49] : memref<512x25xf32, #tpu.memory_space<vmem>>, vector<508x25xf32>
    %c0_50 = arith.constant 0 : index
    %c0_51 = arith.constant 0 : index
    %c0_52 = arith.constant 0 : index
    %50 = vector.load %arg3[%c0_50, %c0_51, %c0_52] : memref<5x25x50xf32, #tpu.memory_space<vmem>>, vector<1x25x50xf32>
    %51 = vector.shape_cast %50 : vector<1x25x50xf32> to vector<25x50xf32>
    %cst_53 = arith.constant dense<0.000000e+00> : vector<508x50xf32>
    %52 = tpu.matmul %49, %51, %cst_53 {dimension_numbers = #tpu.dot_dimension_numbers<[1], [0], [0], [1], [0, 0, 1, 1], [], []>} : vector<508x25xf32>, vector<25x50xf32>, vector<508x50xf32> -> vector<508x50xf32>
    %c1_54 = arith.constant 1 : index
    %c0_55 = arith.constant 0 : index
    %53 = vector.load %arg8[%c1_54, %c0_55] : memref<512x25xf32, #tpu.memory_space<vmem>>, vector<508x25xf32>
    %c1_56 = arith.constant 1 : index
    %c0_57 = arith.constant 0 : index
    %c0_58 = arith.constant 0 : index
    %54 = vector.load %arg3[%c1_56, %c0_57, %c0_58] : memref<5x25x50xf32, #tpu.memory_space<vmem>>, vector<1x25x50xf32>
    %55 = vector.shape_cast %54 : vector<1x25x50xf32> to vector<25x50xf32>
    %cst_59 = arith.constant dense<0.000000e+00> : vector<508x50xf32>
    %56 = tpu.matmul %53, %55, %cst_59 {dimension_numbers = #tpu.dot_dimension_numbers<[1], [0], [0], [1], [0, 0, 1, 1], [], []>} : vector<508x25xf32>, vector<25x50xf32>, vector<508x50xf32> -> vector<508x50xf32>
    %57 = arith.addf %52, %56 : vector<508x50xf32>
    %c2_60 = arith.constant 2 : index
    %c0_61 = arith.constant 0 : index
    %58 = vector.load %arg8[%c2_60, %c0_61] : memref<512x25xf32, #tpu.memory_space<vmem>>, vector<508x25xf32>
    %c2_62 = arith.constant 2 : index
    %c0_63 = arith.constant 0 : index
    %c0_64 = arith.constant 0 : index
    %59 = vector.load %arg3[%c2_62, %c0_63, %c0_64] : memref<5x25x50xf32, #tpu.memory_space<vmem>>, vector<1x25x50xf32>
    %60 = vector.shape_cast %59 : vector<1x25x50xf32> to vector<25x50xf32>
    %cst_65 = arith.constant dense<0.000000e+00> : vector<508x50xf32>
    %61 = tpu.matmul %58, %60, %cst_65 {dimension_numbers = #tpu.dot_dimension_numbers<[1], [0], [0], [1], [0, 0, 1, 1], [], []>} : vector<508x25xf32>, vector<25x50xf32>, vector<508x50xf32> -> vector<508x50xf32>
    %62 = arith.addf %57, %61 : vector<508x50xf32>
    %c3_66 = arith.constant 3 : index
    %c0_67 = arith.constant 0 : index
    %63 = vector.load %arg8[%c3_66, %c0_67] : memref<512x25xf32, #tpu.memory_space<vmem>>, vector<508x25xf32>
    %c3_68 = arith.constant 3 : index
    %c0_69 = arith.constant 0 : index
    %c0_70 = arith.constant 0 : index
    %64 = vector.load %arg3[%c3_68, %c0_69, %c0_70] : memref<5x25x50xf32, #tpu.memory_space<vmem>>, vector<1x25x50xf32>
    %65 = vector.shape_cast %64 : vector<1x25x50xf32> to vector<25x50xf32>
    %cst_71 = arith.constant dense<0.000000e+00> : vector<508x50xf32>
    %66 = tpu.matmul %63, %65, %cst_71 {dimension_numbers = #tpu.dot_dimension_numbers<[1], [0], [0], [1], [0, 0, 1, 1], [], []>} : vector<508x25xf32>, vector<25x50xf32>, vector<508x50xf32> -> vector<508x50xf32>
    %67 = arith.addf %62, %66 : vector<508x50xf32>
    %c4_72 = arith.constant 4 : index
    %c0_73 = arith.constant 0 : index
    %68 = vector.load %arg8[%c4_72, %c0_73] : memref<512x25xf32, #tpu.memory_space<vmem>>, vector<508x25xf32>
    %c4_74 = arith.constant 4 : index
    %c0_75 = arith.constant 0 : index
    %c0_76 = arith.constant 0 : index
    %69 = vector.load %arg3[%c4_74, %c0_75, %c0_76] : memref<5x25x50xf32, #tpu.memory_space<vmem>>, vector<1x25x50xf32>
    %70 = vector.shape_cast %69 : vector<1x25x50xf32> to vector<25x50xf32>
    %cst_77 = arith.constant dense<0.000000e+00> : vector<508x50xf32>
    %71 = tpu.matmul %68, %70, %cst_77 {dimension_numbers = #tpu.dot_dimension_numbers<[1], [0], [0], [1], [0, 0, 1, 1], [], []>} : vector<508x25xf32>, vector<25x50xf32>, vector<508x50xf32> -> vector<508x50xf32>
    %72 = arith.addf %67, %71 : vector<508x50xf32>
    %73 = vector.broadcast %2 : vector<1x50xf32> to vector<508x50xf32>
    %74 = arith.mulf %72, %73 : vector<508x50xf32>
    %75 = vector.broadcast %3 : vector<1x50xf32> to vector<508x50xf32>
    %76 = arith.addf %74, %75 : vector<508x50xf32>
    %cst_78 = arith.constant 0.000000e+00 : f32
    %77 = vector.broadcast %cst_78 : f32 to vector<508x50xf32>
    %78 = arith.cmpf ogt, %76, %77 : vector<508x50xf32>
    %cst_79 = arith.constant 0.000000e+00 : f32
    %79 = vector.broadcast %cst_79 : f32 to vector<508x50xf32>
    %80 = arith.minimumf %76, %79 : vector<508x50xf32>
    %81 = math.exp %80 : vector<508x50xf32>
    %cst_80 = arith.constant 1.000000e+00 : f32
    %82 = vector.broadcast %cst_80 : f32 to vector<508x50xf32>
    %83 = arith.subf %81, %82 : vector<508x50xf32>
    %84 = arith.select %78, %76, %83 : vector<508x50xi1>, vector<508x50xf32>
    %c0_81 = arith.constant 0 : index
    %c0_82 = arith.constant 0 : index
    %85 = vector.load %arg9[%c0_81, %c0_82] : memref<512x50xf32, #tpu.memory_space<vmem>>, vector<508x50xf32>
    tpu.vector_store %arg9[%c0_81, %c0_82], %84 {strides = array<i32>} : memref<512x50xf32, #tpu.memory_space<vmem>>, vector<508x50xf32>,
    %cst_83 = arith.constant 0.000000e+00 : f32
    %86 = vector.broadcast %cst_83 : f32 to vector<4x50xf32>
    %c508 = arith.constant 508 : index
    %c0_84 = arith.constant 0 : index
    %87 = vector.load %arg9[%c508, %c0_84] : memref<512x50xf32, #tpu.memory_space<vmem>>, vector<4x50xf32>
    tpu.vector_store %arg9[%c508, %c0_84], %86 {strides = array<i32>} : memref<512x50xf32, #tpu.memory_space<vmem>>, vector<4x50xf32>,
    %c0_85 = arith.constant 0 : index
    %c0_86 = arith.constant 0 : index
    %88 = tpu.strided_load %arg9[%c0_85, %c0_86] {strides = array<i32: 2, 1>} : memref<512x50xf32, #tpu.memory_space<vmem>>, vector<256x50xf32>
    %c1_87 = arith.constant 1 : index
    %c0_88 = arith.constant 0 : index
    %89 = tpu.strided_load %arg9[%c1_87, %c0_88] {strides = array<i32: 2, 1>} : memref<512x50xf32, #tpu.memory_space<vmem>>, vector<256x50xf32>
    %90 = arith.maximumf %88, %89 : vector<256x50xf32>
    %c0_89 = arith.constant 0 : index
    %c0_90 = arith.constant 0 : index
    %91 = vector.load %arg10[%c0_89, %c0_90] : memref<256x50xf32, #tpu.memory_space<vmem>>, vector<256x50xf32>
    tpu.vector_store %arg10[%c0_89, %c0_90], %90 {strides = array<i32>} : memref<256x50xf32, #tpu.memory_space<vmem>>, vector<256x50xf32>,
    %c0_91 = arith.constant 0 : index
    %c0_92 = arith.constant 0 : index
    %92 = vector.load %arg10[%c0_91, %c0_92] : memref<256x50xf32, #tpu.memory_space<vmem>>, vector<252x50xf32>
    %c0_93 = arith.constant 0 : index
    %c0_94 = arith.constant 0 : index
    %c0_95 = arith.constant 0 : index
    %93 = vector.load %arg4[%c0_93, %c0_94, %c0_95] : memref<5x50x128xf32, #tpu.memory_space<vmem>>, vector<1x50x128xf32>
    %94 = vector.shape_cast %93 : vector<1x50x128xf32> to vector<50x128xf32>
    %cst_96 = arith.constant dense<0.000000e+00> : vector<252x128xf32>
    %95 = tpu.matmul %92, %94, %cst_96 {dimension_numbers = #tpu.dot_dimension_numbers<[1], [0], [0], [1], [0, 0, 1, 1], [], []>} : vector<252x50xf32>, vector<50x128xf32>, vector<252x128xf32> -> vector<252x128xf32>
    %c1_97 = arith.constant 1 : index
    %c0_98 = arith.constant 0 : index
    %96 = vector.load %arg10[%c1_97, %c0_98] : memref<256x50xf32, #tpu.memory_space<vmem>>, vector<252x50xf32>
    %c1_99 = arith.constant 1 : index
    %c0_100 = arith.constant 0 : index
    %c0_101 = arith.constant 0 : index
    %97 = vector.load %arg4[%c1_99, %c0_100, %c0_101] : memref<5x50x128xf32, #tpu.memory_space<vmem>>, vector<1x50x128xf32>
    %98 = vector.shape_cast %97 : vector<1x50x128xf32> to vector<50x128xf32>
    %cst_102 = arith.constant dense<0.000000e+00> : vector<252x128xf32>
    %99 = tpu.matmul %96, %98, %cst_102 {dimension_numbers = #tpu.dot_dimension_numbers<[1], [0], [0], [1], [0, 0, 1, 1], [], []>} : vector<252x50xf32>, vector<50x128xf32>, vector<252x128xf32> -> vector<252x128xf32>
    %100 = arith.addf %95, %99 : vector<252x128xf32>
    %c2_103 = arith.constant 2 : index
    %c0_104 = arith.constant 0 : index
    %101 = vector.load %arg10[%c2_103, %c0_104] : memref<256x50xf32, #tpu.memory_space<vmem>>, vector<252x50xf32>
    %c2_105 = arith.constant 2 : index
    %c0_106 = arith.constant 0 : index
    %c0_107 = arith.constant 0 : index
    %102 = vector.load %arg4[%c2_105, %c0_106, %c0_107] : memref<5x50x128xf32, #tpu.memory_space<vmem>>, vector<1x50x128xf32>
    %103 = vector.shape_cast %102 : vector<1x50x128xf32> to vector<50x128xf32>
    %cst_108 = arith.constant dense<0.000000e+00> : vector<252x128xf32>
    %104 = tpu.matmul %101, %103, %cst_108 {dimension_numbers = #tpu.dot_dimension_numbers<[1], [0], [0], [1], [0, 0, 1, 1], [], []>} : vector<252x50xf32>, vector<50x128xf32>, vector<252x128xf32> -> vector<252x128xf32>
    %105 = arith.addf %100, %104 : vector<252x128xf32>
    %c3_109 = arith.constant 3 : index
    %c0_110 = arith.constant 0 : index
    %106 = vector.load %arg10[%c3_109, %c0_110] : memref<256x50xf32, #tpu.memory_space<vmem>>, vector<252x50xf32>
    %c3_111 = arith.constant 3 : index
    %c0_112 = arith.constant 0 : index
    %c0_113 = arith.constant 0 : index
    %107 = vector.load %arg4[%c3_111, %c0_112, %c0_113] : memref<5x50x128xf32, #tpu.memory_space<vmem>>, vector<1x50x128xf32>
    %108 = vector.shape_cast %107 : vector<1x50x128xf32> to vector<50x128xf32>
    %cst_114 = arith.constant dense<0.000000e+00> : vector<252x128xf32>
    %109 = tpu.matmul %106, %108, %cst_114 {dimension_numbers = #tpu.dot_dimension_numbers<[1], [0], [0], [1], [0, 0, 1, 1], [], []>} : vector<252x50xf32>, vector<50x128xf32>, vector<252x128xf32> -> vector<252x128xf32>
    %110 = arith.addf %105, %109 : vector<252x128xf32>
    %c4_115 = arith.constant 4 : index
    %c0_116 = arith.constant 0 : index
    %111 = vector.load %arg10[%c4_115, %c0_116] : memref<256x50xf32, #tpu.memory_space<vmem>>, vector<252x50xf32>
    %c4_117 = arith.constant 4 : index
    %c0_118 = arith.constant 0 : index
    %c0_119 = arith.constant 0 : index
    %112 = vector.load %arg4[%c4_117, %c0_118, %c0_119] : memref<5x50x128xf32, #tpu.memory_space<vmem>>, vector<1x50x128xf32>
    %113 = vector.shape_cast %112 : vector<1x50x128xf32> to vector<50x128xf32>
    %cst_120 = arith.constant dense<0.000000e+00> : vector<252x128xf32>
    %114 = tpu.matmul %111, %113, %cst_120 {dimension_numbers = #tpu.dot_dimension_numbers<[1], [0], [0], [1], [0, 0, 1, 1], [], []>} : vector<252x50xf32>, vector<50x128xf32>, vector<252x128xf32> -> vector<252x128xf32>
    %115 = arith.addf %110, %114 : vector<252x128xf32>
    %116 = vector.broadcast %4 : vector<1x128xf32> to vector<252x128xf32>
    %117 = arith.mulf %115, %116 : vector<252x128xf32>
    %118 = vector.broadcast %5 : vector<1x128xf32> to vector<252x128xf32>
    %119 = arith.addf %117, %118 : vector<252x128xf32>
    %cst_121 = arith.constant 0.000000e+00 : f32
    %120 = vector.broadcast %cst_121 : f32 to vector<252x128xf32>
    %121 = arith.cmpf ogt, %119, %120 : vector<252x128xf32>
    %cst_122 = arith.constant 0.000000e+00 : f32
    %122 = vector.broadcast %cst_122 : f32 to vector<252x128xf32>
    %123 = arith.minimumf %119, %122 : vector<252x128xf32>
    %124 = math.exp %123 : vector<252x128xf32>
    %cst_123 = arith.constant 1.000000e+00 : f32
    %125 = vector.broadcast %cst_123 : f32 to vector<252x128xf32>
    %126 = arith.subf %124, %125 : vector<252x128xf32>
    %127 = arith.select %121, %119, %126 : vector<252x128xi1>, vector<252x128xf32>
    %c0_124 = arith.constant 0 : index
    %c0_125 = arith.constant 0 : index
    %128 = vector.load %arg11[%c0_124, %c0_125] : memref<256x128xf32, #tpu.memory_space<vmem>>, vector<252x128xf32>
    tpu.vector_store %arg11[%c0_124, %c0_125], %127 {strides = array<i32>} : memref<256x128xf32, #tpu.memory_space<vmem>>, vector<252x128xf32>,
    %cst_126 = arith.constant 0.000000e+00 : f32
    %129 = vector.broadcast %cst_126 : f32 to vector<4x128xf32>
    %c252 = arith.constant 252 : index
    %c0_127 = arith.constant 0 : index
    %130 = vector.load %arg11[%c252, %c0_127] : memref<256x128xf32, #tpu.memory_space<vmem>>, vector<4x128xf32>
    tpu.vector_store %arg11[%c252, %c0_127], %129 {strides = array<i32>} : memref<256x128xf32, #tpu.memory_space<vmem>>, vector<4x128xf32>,
    %c0_128 = arith.constant 0 : index
    %c0_129 = arith.constant 0 : index
    %131 = tpu.strided_load %arg11[%c0_128, %c0_129] {strides = array<i32: 2, 1>} : memref<256x128xf32, #tpu.memory_space<vmem>>, vector<128x128xf32>
    %c1_130 = arith.constant 1 : index
    %c0_131 = arith.constant 0 : index
    %132 = tpu.strided_load %arg11[%c1_130, %c0_131] {strides = array<i32: 2, 1>} : memref<256x128xf32, #tpu.memory_space<vmem>>, vector<128x128xf32>
    %133 = arith.maximumf %131, %132 : vector<128x128xf32>
    %c0_132 = arith.constant 0 : index
    %c0_133 = arith.constant 0 : index
    %134 = vector.load %arg6[%c0_132, %c0_133] : memref<128x128xf32, #tpu.memory_space<vmem>>, vector<128x128xf32>
    tpu.vector_store %arg6[%c0_132, %c0_133], %133 {strides = array<i32>} : memref<128x128xf32, #tpu.memory_space<vmem>>, vector<128x128xf32>,
    return
  }
  func.func @transform_0(%arg0: i32) -> (i32, i32) {
    %c0_i32 = arith.constant 0 : i32
    %c0_i32_0 = arith.constant 0 : i32
    return %arg0, %c0_i32 : i32, i32
  }
  func.func @transform_1(%arg0: i32) -> (i32, i32, i32) {
    %c0_i32 = arith.constant 0 : i32
    %c0_i32_0 = arith.constant 0 : i32
    %c0_i32_1 = arith.constant 0 : i32
    %c0_i32_2 = arith.constant 0 : i32
    return %c0_i32, %c0_i32_0, %c0_i32_1 : i32, i32, i32
  }
  func.func @transform_2(%arg0: i32) -> (i32, i32, i32) {
    %c0_i32 = arith.constant 0 : i32
    %c0_i32_0 = arith.constant 0 : i32
    %c0_i32_1 = arith.constant 0 : i32
    %c0_i32_2 = arith.constant 0 : i32
    return %c0_i32, %c0_i32_0, %c0_i32_1 : i32, i32, i32
  }
  func.func @transform_3(%arg0: i32) -> (i32, i32, i32) {
    %c0_i32 = arith.constant 0 : i32
    %c0_i32_0 = arith.constant 0 : i32
    %c0_i32_1 = arith.constant 0 : i32
    %c0_i32_2 = arith.constant 0 : i32
    return %c0_i32, %c0_i32_0, %c0_i32_1 : i32, i32, i32
  }
  func.func @transform_4(%arg0: i32) -> (i32, i32) {
    %c0_i32 = arith.constant 0 : i32
    %c0_i32_0 = arith.constant 0 : i32
    %c0_i32_1 = arith.constant 0 : i32
    return %c0_i32, %c0_i32_0 : i32, i32
  }
  func.func @transform_5(%arg0: i32) -> (i32, i32) {
    %c0_i32 = arith.constant 0 : i32
    %c0_i32_0 = arith.constant 0 : i32
    return %arg0, %c0_i32 : i32, i32
  }
}

</mosaic_0001>

<bundles_post_ra>
// kernel: tpu_custom_call.1
= control target key start
LH: loop header
LB: loop body
LE: loop exit
PB: predicated region body
PF: predicated region fallthrough
CT: control target
= control target key end

     0   :  { %vm671_vm0 = vcmask 1043456   ;;  %vm286_vm1 = vcmask 31744   ;;  %s26570_s0 = inlined_call_operand.vmem [shape: f32[1024,4], index: 0, kind: input, shape index: {}]   ;;  %s26571_s1 = inlined_call_operand.vmem [shape: f32[5,4,25], index: 1, kind: input, shape index: {}]   ;;  %s26572_s2 = inlined_call_operand.vmem [shape: f32[5,25,50], index: 2, kind: input, shape index: {}]   ;;  %s26573_s3 = inlined_call_operand.vmem [shape: f32[5,50,128], index: 3, kind: input, shape index: {}]   ;;  %s26574_s4 = inlined_call_operand.vmem [shape: f32[8,128], index: 4, kind: input, shape index: {}]   ;;  %s26575_s5 = inlined_call_operand.hbm [shape: f32[128,128], index: 5, kind: output, shape index: {}]  }
   0x1   :  { %v14607_v0 = vld [vmem:[%s26571_s1 + $0x4] sm:$0xf]  ;;  %v157_v2 = vld [vmem:[%s26570_s0 + $0x9] sm:$0xff]  ;;  %v155_v3 = vld [vmem:[%s26571_s1] sm:$0xf] }
   0x2   :  { %v156_v1 = vld [vmem:[%s26570_s0 + $0x1] sm:$0xff]  ;;  %17200 = vmatprep.subr.msk.mxu0 %vm671_vm0, %v14607_v0  ;;  %v158_v4 = vld [vmem:[%s26570_s0 + $0x11] sm:$0xff]  ;;  %19110 = vmatprep.subr.msk.mxu1 %vm671_vm0, %v14607_v0  ;;  %v159_v5 = vld [vmem:[%s26570_s0 + $0x19] sm:$0xff] }
   0x3   :  { %17202 = vmatprep.mubr.msk.f32.mxu0 %vm286_vm1, %v156_v1  ;;  %17201 = vmatpush3.msk.msra.mxu0 %vm671_vm0, %v14607_v0  ;;  %v160_v6 = vld [vmem:[%s26570_s0 + $0x21] sm:$0xff]  ;;  %v161_v7 = vld [vmem:[%s26570_s0 + $0x29] sm:$0xff]  ;;  %v162_v8 = vld [vmem:[%s26570_s0 + $0x31] sm:$0xff] }
   0x4   :  { %17203 = vmatmul.mubr.msk.f32.vlgmr.msra.gmra.mrb[0].mxu0 %vm286_vm1, %v157_v2  ;;  %17394 = vmatprep.subr.msk.mxu0 %vm671_vm0, %v155_v3  ;;  %v163_v9 = vld [vmem:[%s26570_s0 + $0x39] sm:$0xff]  ;;  %v164_v10 = vld [vmem:[%s26570_s0 + $0x41] sm:$0xff]  ;;  %v165_v11 = vld [vmem:[%s26570_s0 + $0x49] sm:$0xff] }
   0x5   :  { %17395 = vmatpush3.msk.msra.mxu0 %vm671_vm0, %v155_v3  ;;  %17205 = vmatprep.mubr.msk.f32.mxu0 %vm286_vm1, %v158_v4  ;;  %v166_v12 = vld [vmem:[%s26570_s0 + $0x51] sm:$0xff]  ;;  %v20585_v13 = vld [vmem:[%s26571_s1 + $0x8] sm:$0xf]  ;;  %v167_v14 = vld [vmem:[%s26570_s0 + $0x59] sm:$0xff] }
   0x6   :  { %19111 = vmatpush3.msk.msra.mxu1 %vm671_vm0, %v14607_v0  ;;  %17588 = vmatprep.subr.msk.mxu0 %vm671_vm0, %v20585_v13  ;;  %v168_v15 = vld [vmem:[%s26570_s0 + $0x61] sm:$0xff]  ;;  %v169_v16 = vld [vmem:[%s26570_s0 + $0x69] sm:$0xff]  ;;  %v170_v17 = vld [vmem:[%s26570_s0 + $0x71] sm:$0xff] }
   0x8   :  { %17206 = vmatmul.mubr.msk.f32.gmra.mrb[2].mxu0 %vm286_vm1, %v159_v5 }
   0x9   :  { %17208 = vmatprep.mubr.msk.f32.mxu0 %vm286_vm1, %v160_v6 }
   0xc   :  { %17209 = vmatmul.mubr.msk.f32.gmra.mrb[4].mxu0 %vm286_vm1, %v161_v7 }
   0xd   :  { %17211 = vmatprep.mubr.msk.f32.mxu0 %vm286_vm1, %v162_v8 }
  0x10   :  { %17212 = vmatmul.mubr.msk.f32.gmra.mrb[6].mxu0 %vm286_vm1, %v163_v9 }
  0x11   :  { %17214 = vmatprep.mubr.msk.f32.mxu0 %vm286_vm1, %v164_v10 }
  0x14   :  { %17215 = vmatmul.mubr.msk.f32.gmra.mrb[8].mxu0 %vm286_vm1, %v165_v11 }
  0x15   :  { %17217 = vmatprep.mubr.msk.f32.mxu0 %vm286_vm1, %v166_v12 }
  0x18   :  { %17218 = vmatmul.mubr.msk.f32.gmra.mrb[10].mxu0 %vm286_vm1, %v167_v14 }
  0x19   :  { %17220 = vmatprep.mubr.msk.f32.mxu0 %vm286_vm1, %v168_v15 }
  0x1c   :  { %17221 = vmatmul.mubr.msk.f32.gmra.mrb[12].mxu0 %vm286_vm1, %v169_v16 }
  0x1d   :  { %10 = vsyncpa [#allocation8], 0  ;;  %17223 = vmatprep.mubr.msk.f32.mxu0 %vm286_vm1, %v170_v17  ;;  %v171_v18 = vld [vmem:[%s26570_s0 + $0x79] sm:$0xff]  ;;  %v172_v19 = vld [vmem:[%s26570_s0 + $0x81] sm:$0xff]  ;;  %vm8397_vm2 = vcmask 1040384   ;;  %vm20493_vm3 = vmmov 1  }
  0x1e   :  { %v173_v20 = vld [vmem:[%s26570_s0 + $0x89] sm:$0xff]  ;;  %v174_v21 = vld [vmem:[%s26570_s0 + $0x91] sm:$0xff]  ;;  %v175_v22 = vld [vmem:[%s26570_s0 + $0x99] sm:$0xff]  ;;  %vm7554_vm5 = vcmask 203776  }
  0x1f   :  { %v176_v23 = vld [vmem:[%s26570_s0 + $0xa1] sm:$0xff]  ;;  %v177_v24 = vld [vmem:[%s26570_s0 + $0xa9] sm:$0xff]  ;;  %v178_v25 = vld [vmem:[%s26570_s0 + $0xb1] sm:$0xff] }
  0x20   :  { %17224 = vmatmul.mubr.msk.f32.gmra.mrb[14].mxu0 %vm286_vm1, %v171_v18  ;;  %v179_v26 = vld [vmem:[%s26570_s0 + $0xb9] sm:$0xff]  ;;  %v180_v27 = vld [vmem:[%s26570_s0 + $0xc1] sm:$0xff]  ;;  %v181_v28 = vld [vmem:[%s26570_s0 + $0xc9] sm:$0xff] }
  0x21   :  { %17226 = vmatprep.mubr.msk.f32.mxu0 %vm286_vm1, %v172_v19  ;;  %v182_v29 = vld [vmem:[%s26570_s0 + $0xd1] sm:$0xff]  ;;  %v183_v30 = vld [vmem:[%s26570_s0 + $0xd9] sm:$0xff]  ;;  %v184_v31 = vld [vmem:[%s26570_s0 + $0xe1] sm:$0xff] }
  0x22   :  { %v185_v32 = vld [vmem:[%s26570_s0 + $0xe9] sm:$0xff]  ;;  %v186_v33 = vld [vmem:[%s26570_s0 + $0xf1] sm:$0xff]  ;;  %v187_v34 = vld [vmem:[%s26570_s0 + $0xf9] sm:$0xff] }
  0x23   :  { %v188_v35 = vld [vmem:[%s26570_s0 + $0x101] sm:$0xff]  ;;  %v189_v36 = vld [vmem:[%s26570_s0 + $0x109] sm:$0xff]  ;;  %v190_v37 = vld [vmem:[%s26570_s0 + $0x111] sm:$0xff] }
  0x24   :  { %17227 = vmatmul.mubr.msk.f32.gmra.mrb[16].mxu0 %vm286_vm1, %v173_v20  ;;  %v191_v38 = vld [vmem:[%s26570_s0 + $0x119] sm:$0xff]  ;;  %v192_v39 = vld [vmem:[%s26570_s0 + $0x121] sm:$0xff]  ;;  %v193_v40 = vld [vmem:[%s26570_s0 + $0x129] sm:$0xff] }
  0x25   :  { %17229 = vmatprep.mubr.msk.f32.mxu0 %vm286_vm1, %v174_v21  ;;  %v194_v41 = vld [vmem:[%s26570_s0 + $0x131] sm:$0xff]  ;;  %v195_v42 = vld [vmem:[%s26570_s0 + $0x139] sm:$0xff]  ;;  %v196_v43 = vld [vmem:[%s26570_s0 + $0x141] sm:$0xff] }
  0x26   :  { %v197_v44 = vld [vmem:[%s26570_s0 + $0x149] sm:$0xff]  ;;  %v198_v45 = vld [vmem:[%s26570_s0 + $0x151] sm:$0xff]  ;;  %v199_v46 = vld [vmem:[%s26570_s0 + $0x159] sm:$0xff] }
  0x27   :  { %v200_v47 = vld [vmem:[%s26570_s0 + $0x161] sm:$0xff]  ;;  %v201_v48 = vld [vmem:[%s26570_s0 + $0x169] sm:$0xff]  ;;  %v202_v49 = vld [vmem:[%s26570_s0 + $0x171] sm:$0xff] }
  0x28   :  { %17230 = vmatmul.mubr.msk.f32.gmra.mrb[18].mxu0 %vm286_vm1, %v175_v22  ;;  %v203_v50 = vld [vmem:[%s26570_s0 + $0x179] sm:$0xff]  ;;  %v28_v52 = vld [vmem:[%s26570_s0 + $0x8] sm:$0xff]  ;;  %v29_v53 = vld [vmem:[%s26570_s0 + $0x10] sm:$0xff] }
  0x29   :  { %17232 = vmatprep.mubr.msk.f32.mxu0 %vm286_vm1, %v176_v23  ;;  %v27_v51 = vld [vmem:[%s26570_s0] sm:$0xff]  ;;  %v30_v54 = vld [vmem:[%s26570_s0 + $0x18] sm:$0xff]  ;;  %v32_v56 = vld [vmem:[%s26570_s0 + $0x28] sm:$0xff] }
  0x2a   :  { %v31_v55 = vld [vmem:[%s26570_s0 + $0x20] sm:$0xff]  ;;  %v33_v57 = vld [vmem:[%s26570_s0 + $0x30] sm:$0xff]  ;;  %v34_v58 = vld [vmem:[%s26570_s0 + $0x38] sm:$0xff] }
  0x2b   :  { %v35_v59 = vld [vmem:[%s26570_s0 + $0x40] sm:$0xff]  ;;  %v36_v60 = vld [vmem:[%s26570_s0 + $0x48] sm:$0xff]  ;;  %v37_v61 = vld [vmem:[%s26570_s0 + $0x50] sm:$0xff] }
  0x2c   :  { %17233 = vmatmul.mubr.msk.f32.gmra.mrb[20].mxu0 %vm286_vm1, %v177_v24  ;;  %v38_v62 = vld [vmem:[%s26570_s0 + $0x58] sm:$0xff]  ;;  %v39_v63 = vld [vmem:[%s26570_s0 + $0x60] sm:$0xff]  ;;  %v40_v0 = vld [vmem:[%s26570_s0 + $0x68] sm:$0xff] }
  0x2d   :  { %17235 = vmatprep.mubr.msk.f32.mxu0 %vm286_vm1, %v178_v25  ;;  %v41_v1 = vld [vmem:[%s26570_s0 + $0x70] sm:$0xff]  ;;  %v42_v2 = vld [vmem:[%s26570_s0 + $0x78] sm:$0xff]  ;;  %v43_v3 = vld [vmem:[%s26570_s0 + $0x80] sm:$0xff] }
  0x2e   :  { %v44_v4 = vld [vmem:[%s26570_s0 + $0x88] sm:$0xff]  ;;  %v45_v5 = vld [vmem:[%s26570_s0 + $0x90] sm:$0xff]  ;;  %v46_v6 = vld [vmem:[%s26570_s0 + $0x98] sm:$0xff] }
  0x2f   :  { %v47_v7 = vld [vmem:[%s26570_s0 + $0xa0] sm:$0xff]  ;;  %v48_v8 = vld [vmem:[%s26570_s0 + $0xa8] sm:$0xff]  ;;  %v49_v9 = vld [vmem:[%s26570_s0 + $0xb0] sm:$0xff] }
  0x30   :  { %17236 = vmatmul.mubr.msk.f32.gmra.mrb[22].mxu0 %vm286_vm1, %v179_v26  ;;  %v50_v10 = vld [vmem:[%s26570_s0 + $0xb8] sm:$0xff]  ;;  %v51_v11 = vld [vmem:[%s26570_s0 + $0xc0] sm:$0xff]  ;;  %v52_v12 = vld [vmem:[%s26570_s0 + $0xc8] sm:$0xff] }
  0x31   :  { %17238 = vmatprep.mubr.msk.f32.mxu0 %vm286_vm1, %v180_v27  ;;  %v54_v14 = vld [vmem:[%s26570_s0 + $0xd8] sm:$0xff]  ;;  %v55_v15 = vld [vmem:[%s26570_s0 + $0xe0] sm:$0xff]  ;;  %v56_v16 = vld [vmem:[%s26570_s0 + $0xe8] sm:$0xff] }
  0x32   :  { %v57_v17 = vld [vmem:[%s26570_s0 + $0xf0] sm:$0xff]  ;;  %v58_v18 = vld [vmem:[%s26570_s0 + $0xf8] sm:$0xff]  ;;  %v59_v19 = vld [vmem:[%s26570_s0 + $0x100] sm:$0xff] }
  0x33   :  { %v60_v20 = vld [vmem:[%s26570_s0 + $0x108] sm:$0xff]  ;;  %v61_v21 = vld [vmem:[%s26570_s0 + $0x110] sm:$0xff]  ;;  %v62_v22 = vld [vmem:[%s26570_s0 + $0x118] sm:$0xff] }
  0x34   :  { %17239 = vmatmul.mubr.msk.f32.gmra.mrb[24].mxu0 %vm286_vm1, %v181_v28  ;;  %v63_v23 = vld [vmem:[%s26570_s0 + $0x120] sm:$0xff]  ;;  %v64_v24 = vld [vmem:[%s26570_s0 + $0x128] sm:$0xff]  ;;  %v65_v25 = vld [vmem:[%s26570_s0 + $0x130] sm:$0xff] }
  0x35   :  { %17241 = vmatprep.mubr.msk.f32.mxu0 %vm286_vm1, %v182_v29  ;;  %v66_v26 = vld [vmem:[%s26570_s0 + $0x138] sm:$0xff]  ;;  %v67_v27 = vld [vmem:[%s26570_s0 + $0x140] sm:$0xff]  ;;  %v68_v28 = vld [vmem:[%s26570_s0 + $0x148] sm:$0xff] }
  0x36   :  { %v69_v29 = vld [vmem:[%s26570_s0 + $0x150] sm:$0xff]  ;;  %vm22901_vm4 = vmpackc.low %vm8397_vm2, %vm20493_vm3 }
  0x38   :  { %17242 = vmatmul.mubr.msk.f32.gmra.mrb[26].mxu0 %vm286_vm1, %v183_v30  ;;  %v70_v30 = vld [vmem:[%s26570_s0 + $0x158] sm:$0xff] }
  0x39   :  { %17244 = vmatprep.mubr.msk.f32.mxu0 %vm286_vm1, %v184_v31  ;;  %v71_v31 = vld [vmem:[%s26570_s0 + $0x160] sm:$0xff] }
  0x3c   :  { %17245 = vmatmul.mubr.msk.f32.gmra.mrb[28].mxu0 %vm286_vm1, %v185_v32  ;;  %v72_v32 = vld [vmem:[%s26570_s0 + $0x168] sm:$0xff] }
  0x3d   :  { %17247 = vmatprep.mubr.msk.f32.mxu0 %vm286_vm1, %v186_v33  ;;  %v73_v33 = vld [vmem:[%s26570_s0 + $0x170] sm:$0xff] }
  0x40   :  { %17248 = vmatmul.mubr.msk.f32.gmra.mrb[30].mxu0 %vm286_vm1, %v187_v34  ;;  %v74_v34 = vld [vmem:[%s26570_s0 + $0x178] sm:$0xff] }
  0x41   :  { %17250 = vmatprep.mubr.msk.f32.mxu0 %vm286_vm1, %v188_v35  ;;  %v75_v35 = vld [vmem:[%s26570_s0 + $0x180] sm:$0xff] }
  0x44   :  { %17251 = vmatmul.mubr.msk.f32.gmra.mrb[32].mxu0 %vm286_vm1, %v189_v36  ;;  %v76_v36 = vld [vmem:[%s26570_s0 + $0x188] sm:$0xff] }
  0x45   :  { %17253 = vmatprep.mubr.msk.f32.mxu0 %vm286_vm1, %v190_v37  ;;  %v77_v37 = vld [vmem:[%s26570_s0 + $0x190] sm:$0xff] }
  0x48   :  { %17254 = vmatmul.mubr.msk.f32.gmra.mrb[34].mxu0 %vm286_vm1, %v191_v38  ;;  %v78_v38 = vld [vmem:[%s26570_s0 + $0x198] sm:$0xff] }
  0x49   :  { %17256 = vmatprep.mubr.msk.f32.mxu0 %vm286_vm1, %v192_v39  ;;  %v79_v39 = vld [vmem:[%s26570_s0 + $0x1a0] sm:$0xff] }
  0x4c   :  { %17257 = vmatmul.mubr.msk.f32.gmra.mrb[36].mxu0 %vm286_vm1, %v193_v40  ;;  %v80_v40 = vld [vmem:[%s26570_s0 + $0x1a8] sm:$0xff] }
  0x4d   :  { %17259 = vmatprep.mubr.msk.f32.mxu0 %vm286_vm1, %v194_v41  ;;  %v81_v41 = vld [vmem:[%s26570_s0 + $0x1b0] sm:$0xff] }
  0x50   :  { %17260 = vmatmul.mubr.msk.f32.gmra.mrb[38].mxu0 %vm286_vm1, %v195_v42  ;;  %v82_v42 = vld [vmem:[%s26570_s0 + $0x1b8] sm:$0xff] }
  0x51   :  { %17262 = vmatprep.mubr.msk.f32.mxu0 %vm286_vm1, %v196_v43  ;;  %v83_v43 = vld [vmem:[%s26570_s0 + $0x1c0] sm:$0xff] }
  0x54   :  { %17263 = vmatmul.mubr.msk.f32.gmra.mrb[40].mxu0 %vm286_vm1, %v197_v44  ;;  %v84_v44 = vld [vmem:[%s26570_s0 + $0x1c8] sm:$0xff] }
  0x55   :  { %17265 = vmatprep.mubr.msk.f32.mxu0 %vm286_vm1, %v198_v45  ;;  %v85_v45 = vld [vmem:[%s26570_s0 + $0x1d0] sm:$0xff] }
  0x58   :  { %17266 = vmatmul.mubr.msk.f32.gmra.mrb[42].mxu0 %vm286_vm1, %v199_v46  ;;  %v86_v46 = vld [vmem:[%s26570_s0 + $0x1d8] sm:$0xff] }
  0x59   :  { %17268 = vmatprep.mubr.msk.f32.mxu0 %vm286_vm1, %v200_v47  ;;  %v87_v47 = vld [vmem:[%s26570_s0 + $0x1e0] sm:$0xff] }
  0x5c   :  { %17269 = vmatmul.mubr.msk.f32.gmra.mrb[44].mxu0 %vm286_vm1, %v201_v48  ;;  %v88_v48 = vld [vmem:[%s26570_s0 + $0x1e8] sm:$0xff] }
  0x5d   :  { %17271 = vmatprep.mubr.msk.f32.mxu0 %vm286_vm1, %v202_v49  ;;  %v89_v49 = vld [vmem:[%s26570_s0 + $0x1f0] sm:$0xff] }
  0x60   :  { %17272 = vmatmul.mubr.msk.f32.gmra.mrb[46].mxu0 %vm286_vm1, %v203_v50  ;;  %v90_v50 = vld [vmem:[%s26570_s0 + $0x1f8] sm:$0xff] }
  0x61   :  { %17396 = vmatprep.mubr.msk.f32.mxu0 %vm286_vm1, %v27_v51  ;;  %v91_v51 = vld [vmem:[%s26570_s0 + $0x200] sm:$0xff] }
  0x64   :  { %17397 = vmatmul.mubr.msk.f32.vlgmr.msra.gmra.mrb[0].mxu0 %vm286_vm1, %v28_v52  ;;  %v92_v52 = vld [vmem:[%s26570_s0 + $0x208] sm:$0xff] }
  0x65   :  { %17589 = vmatpush3.msk.msra.mxu0 %vm671_vm0, %v20585_v13  ;;  %17399 = vmatprep.mubr.msk.f32.mxu0 %vm286_vm1, %v29_v53  ;;  %v53_v13 = vld [vmem:[%s26570_s0 + $0xd0] sm:$0xff] }
  0x66   :  { %v93_v53 = vld [vmem:[%s26570_s0 + $0x210] sm:$0xff] }
  0x68   :  { %17400 = vmatmul.mubr.msk.f32.gmra.mrb[2].mxu0 %vm286_vm1, %v30_v54  ;;  %v21011_v54 = vld [vmem:[%s26571_s1 + $0xc] sm:$0xf] }
  0x69   :  { %17402 = vmatprep.mubr.msk.f32.mxu0 %vm286_vm1, %v31_v55  ;;  %v94_v55 = vld [vmem:[%s26570_s0 + $0x218] sm:$0xff]  ;;  %17782 = vmatprep.subr.msk.mxu0 %vm671_vm0, %v21011_v54 }
  0x6c   :  { %17403 = vmatmul.mubr.msk.f32.gmra.mrb[4].mxu0 %vm286_vm1, %v32_v56  ;;  %v95_v56 = vld [vmem:[%s26570_s0 + $0x220] sm:$0xff] }
  0x6d   :  { %17405 = vmatprep.mubr.msk.f32.mxu0 %vm286_vm1, %v33_v57  ;;  %v96_v57 = vld [vmem:[%s26570_s0 + $0x228] sm:$0xff] }
  0x70   :  { %17406 = vmatmul.mubr.msk.f32.gmra.mrb[6].mxu0 %vm286_vm1, %v34_v58  ;;  %v97_v58 = vld [vmem:[%s26570_s0 + $0x230] sm:$0xff] }
  0x71   :  { %17408 = vmatprep.mubr.msk.f32.mxu0 %vm286_vm1, %v35_v59  ;;  %v98_v59 = vld [vmem:[%s26570_s0 + $0x238] sm:$0xff] }
  0x74   :  { %17409 = vmatmul.mubr.msk.f32.gmra.mrb[8].mxu0 %vm286_vm1, %v36_v60  ;;  %v99_v60 = vld [vmem:[%s26570_s0 + $0x240] sm:$0xff] }
  0x75   :  { %17411 = vmatprep.mubr.msk.f32.mxu0 %vm286_vm1, %v37_v61  ;;  %v100_v61 = vld [vmem:[%s26570_s0 + $0x248] sm:$0xff] }
  0x78   :  { %17412 = vmatmul.mubr.msk.f32.gmra.mrb[10].mxu0 %vm286_vm1, %v38_v62  ;;  %v101_v62 = vld [vmem:[%s26570_s0 + $0x250] sm:$0xff] }
  0x79   :  { %17414 = vmatprep.mubr.msk.f32.mxu0 %vm286_vm1, %v39_v63  ;;  %v102_v63 = vld [vmem:[%s26570_s0 + $0x258] sm:$0xff] }
  0x7c   :  { %17415 = vmatmul.mubr.msk.f32.gmra.mrb[12].mxu0 %vm286_vm1, %v40_v0  ;;  %v103_v0 = vld [vmem:[%s26570_s0 + $0x260] sm:$0xff] }
  0x7d   :  { %17417 = vmatprep.mubr.msk.f32.mxu0 %vm286_vm1, %v41_v1  ;;  %v104_v1 = vld [vmem:[%s26570_s0 + $0x268] sm:$0xff] }
  0x80   :  { %17418 = vmatmul.mubr.msk.f32.gmra.mrb[14].mxu0 %vm286_vm1, %v42_v2  ;;  %v105_v2 = vld [vmem:[%s26570_s0 + $0x270] sm:$0xff] }
  0x81   :  { %17420 = vmatprep.mubr.msk.f32.mxu0 %vm286_vm1, %v43_v3  ;;  %v106_v3 = vld [vmem:[%s26570_s0 + $0x278] sm:$0xff] }
  0x84   :  { %17421 = vmatmul.mubr.msk.f32.gmra.mrb[16].mxu0 %vm286_vm1, %v44_v4  ;;  %v107_v4 = vld [vmem:[%s26570_s0 + $0x280] sm:$0xff] }
  0x85   :  { %17423 = vmatprep.mubr.msk.f32.mxu0 %vm286_vm1, %v45_v5  ;;  %v108_v5 = vld [vmem:[%s26570_s0 + $0x288] sm:$0xff] }
  0x88   :  { %17424 = vmatmul.mubr.msk.f32.gmra.mrb[18].mxu0 %vm286_vm1, %v46_v6  ;;  %v109_v6 = vld [vmem:[%s26570_s0 + $0x290] sm:$0xff] }
  0x89   :  { %17426 = vmatprep.mubr.msk.f32.mxu0 %vm286_vm1, %v47_v7  ;;  %v110_v7 = vld [vmem:[%s26570_s0 + $0x298] sm:$0xff] }
  0x8c   :  { %17427 = vmatmul.mubr.msk.f32.gmra.mrb[20].mxu0 %vm286_vm1, %v48_v8  ;;  %v111_v8 = vld [vmem:[%s26570_s0 + $0x2a0] sm:$0xff] }
  0x8d   :  { %17429 = vmatprep.mubr.msk.f32.mxu0 %vm286_vm1, %v49_v9  ;;  %v112_v9 = vld [vmem:[%s26570_s0 + $0x2a8] sm:$0xff] }
  0x90   :  { %17430 = vmatmul.mubr.msk.f32.gmra.mrb[22].mxu0 %vm286_vm1, %v50_v10  ;;  %v113_v10 = vld [vmem:[%s26570_s0 + $0x2b0] sm:$0xff] }
  0x91   :  { %17432 = vmatprep.mubr.msk.f32.mxu0 %vm286_vm1, %v51_v11  ;;  %v114_v11 = vld [vmem:[%s26570_s0 + $0x2b8] sm:$0xff] }
  0x94   :  { %17433 = vmatmul.mubr.msk.f32.gmra.mrb[24].mxu0 %vm286_vm1, %v52_v12  ;;  %v115_v12 = vld [vmem:[%s26570_s0 + $0x2c0] sm:$0xff] }
  0x95   :  { %17435 = vmatprep.mubr.msk.f32.mxu0 %vm286_vm1, %v53_v13  ;;  %v116_v13 = vld [vmem:[%s26570_s0 + $0x2c8] sm:$0xff] }
  0x98   :  { %17436 = vmatmul.mubr.msk.f32.gmra.mrb[26].mxu0 %vm286_vm1, %v54_v14  ;;  %v117_v14 = vld [vmem:[%s26570_s0 + $0x2d0] sm:$0xff] }
  0x99   :  { %17438 = vmatprep.mubr.msk.f32.mxu0 %vm286_vm1, %v55_v15  ;;  %v118_v15 = vld [vmem:[%s26570_s0 + $0x2d8] sm:$0xff] }
  0x9c   :  { %17439 = vmatmul.mubr.msk.f32.gmra.mrb[28].mxu0 %vm286_vm1, %v56_v16  ;;  %v119_v16 = vld [vmem:[%s26570_s0 + $0x2e0] sm:$0xff] }
  0x9d   :  { %17441 = vmatprep.mubr.msk.f32.mxu0 %vm286_vm1, %v57_v17  ;;  %v120_v17 = vld [vmem:[%s26570_s0 + $0x2e8] sm:$0xff] }
  0xa0   :  { %17442 = vmatmul.mubr.msk.f32.gmra.mrb[30].mxu0 %vm286_vm1, %v58_v18  ;;  %v121_v18 = vld [vmem:[%s26570_s0 + $0x2f0] sm:$0xff] }
  0xa1   :  { %17444 = vmatprep.mubr.msk.f32.mxu0 %vm286_vm1, %v59_v19  ;;  %v122_v19 = vld [vmem:[%s26570_s0 + $0x2f8] sm:$0xff] }
  0xa4   :  { %17445 = vmatmul.mubr.msk.f32.gmra.mrb[32].mxu0 %vm286_vm1, %v60_v20  ;;  %v123_v20 = vld [vmem:[%s26570_s0 + $0x300] sm:$0xff] }
  0xa5   :  { %17447 = vmatprep.mubr.msk.f32.mxu0 %vm286_vm1, %v61_v21  ;;  %v124_v21 = vld [vmem:[%s26570_s0 + $0x308] sm:$0xff] }
  0xa8   :  { %17448 = vmatmul.mubr.msk.f32.gmra.mrb[34].mxu0 %vm286_vm1, %v62_v22  ;;  %v125_v22 = vld [vmem:[%s26570_s0 + $0x310] sm:$0xff] }
  0xa9   :  { %17450 = vmatprep.mubr.msk.f32.mxu0 %vm286_vm1, %v63_v23  ;;  %v126_v23 = vld [vmem:[%s26570_s0 + $0x318] sm:$0xff] }
  0xac   :  { %17451 = vmatmul.mubr.msk.f32.gmra.mrb[36].mxu0 %vm286_vm1, %v64_v24  ;;  %v127_v24 = vld [vmem:[%s26570_s0 + $0x320] sm:$0xff] }
  0xad   :  { %17453 = vmatprep.mubr.msk.f32.mxu0 %vm286_vm1, %v65_v25  ;;  %v128_v25 = vld [vmem:[%s26570_s0 + $0x328] sm:$0xff] }
  0xb0   :  { %17454 = vmatmul.mubr.msk.f32.gmra.mrb[38].mxu0 %vm286_vm1, %v66_v26  ;;  %v129_v26 = vld [vmem:[%s26570_s0 + $0x330] sm:$0xff] }
  0xb1   :  { %17456 = vmatprep.mubr.msk.f32.mxu0 %vm286_vm1, %v67_v27  ;;  %v130_v27 = vld [vmem:[%s26570_s0 + $0x338] sm:$0xff] }
  0xb4   :  { %17457 = vmatmul.mubr.msk.f32.gmra.mrb[40].mxu0 %vm286_vm1, %v68_v28  ;;  %v131_v28 = vld [vmem:[%s26570_s0 + $0x340] sm:$0xff] }
  0xb5   :  { %17459 = vmatprep.mubr.msk.f32.mxu0 %vm286_vm1, %v69_v29  ;;  %v132_v29 = vld [vmem:[%s26570_s0 + $0x348] sm:$0xff] }
  0xb8   :  { %17460 = vmatmul.mubr.msk.f32.gmra.mrb[42].mxu0 %vm286_vm1, %v70_v30  ;;  %v133_v30 = vld [vmem:[%s26570_s0 + $0x350] sm:$0xff] }
  0xb9   :  { %17462 = vmatprep.mubr.msk.f32.mxu0 %vm286_vm1, %v71_v31  ;;  %v134_v31 = vld [vmem:[%s26570_s0 + $0x358] sm:$0xff] }
  0xbc   :  { %17463 = vmatmul.mubr.msk.f32.gmra.mrb[44].mxu0 %vm286_vm1, %v72_v32  ;;  %v135_v32 = vld [vmem:[%s26570_s0 + $0x360] sm:$0xff] }
  0xbd   :  { %17465 = vmatprep.mubr.msk.f32.mxu0 %vm286_vm1, %v73_v33  ;;  %v136_v33 = vld [vmem:[%s26570_s0 + $0x368] sm:$0xff] }
  0xc0   :  { %17466 = vmatmul.mubr.msk.f32.gmra.mrb[46].mxu0 %vm286_vm1, %v74_v34  ;;  %v137_v34 = vld [vmem:[%s26570_s0 + $0x370] sm:$0xff] }
  0xc1   :  { %17468 = vmatprep.mubr.msk.f32.mxu0 %vm286_vm1, %v75_v35  ;;  %v138_v35 = vld [vmem:[%s26570_s0 + $0x378] sm:$0xff] }
  0xc4   :  { %17469 = vmatmul.mubr.msk.f32.gmra.mrb[48].mxu0 %vm286_vm1, %v76_v36  ;;  %v139_v36 = vld [vmem:[%s26570_s0 + $0x380] sm:$0xff] }
  0xc5   :  { %17471 = vmatprep.mubr.msk.f32.mxu0 %vm286_vm1, %v77_v37  ;;  %v140_v37 = vld [vmem:[%s26570_s0 + $0x388] sm:$0xff] }
  0xc8   :  { %17472 = vmatmul.mubr.msk.f32.gmra.mrb[50].mxu0 %vm286_vm1, %v78_v38  ;;  %v141_v38 = vld [vmem:[%s26570_s0 + $0x390] sm:$0xff] }
  0xc9   :  { %17474 = vmatprep.mubr.msk.f32.mxu0 %vm286_vm1, %v79_v39  ;;  %v142_v39 = vld [vmem:[%s26570_s0 + $0x398] sm:$0xff] }
  0xcc   :  { %17475 = vmatmul.mubr.msk.f32.gmra.mrb[52].mxu0 %vm286_vm1, %v80_v40  ;;  %v143_v40 = vld [vmem:[%s26570_s0 + $0x3a0] sm:$0xff] }
  0xcd   :  { %17477 = vmatprep.mubr.msk.f32.mxu0 %vm286_vm1, %v81_v41  ;;  %v144_v41 = vld [vmem:[%s26570_s0 + $0x3a8] sm:$0xff] }
  0xd0   :  { %17478 = vmatmul.mubr.msk.f32.gmra.mrb[54].mxu0 %vm286_vm1, %v82_v42  ;;  %v145_v42 = vld [vmem:[%s26570_s0 + $0x3b0] sm:$0xff] }
  0xd1   :  { %17480 = vmatprep.mubr.msk.f32.mxu0 %vm286_vm1, %v83_v43  ;;  %v146_v43 = vld [vmem:[%s26570_s0 + $0x3b8] sm:$0xff] }
  0xd4   :  { %17481 = vmatmul.mubr.msk.f32.gmra.mrb[56].mxu0 %vm286_vm1, %v84_v44  ;;  %v147_v44 = vld [vmem:[%s26570_s0 + $0x3c0] sm:$0xff] }
  0xd5   :  { %17483 = vmatprep.mubr.msk.f32.mxu0 %vm286_vm1, %v85_v45  ;;  %v148_v45 = vld [vmem:[%s26570_s0 + $0x3c8] sm:$0xff] }
  0xd8   :  { %17484 = vmatmul.mubr.msk.f32.gmra.mrb[58].mxu0 %vm286_vm1, %v86_v46  ;;  %v149_v46 = vld [vmem:[%s26570_s0 + $0x3d0] sm:$0xff] }
  0xd9   :  { %17486 = vmatprep.mubr.msk.f32.mxu0 %vm286_vm1, %v87_v47  ;;  %v150_v47 = vld [vmem:[%s26570_s0 + $0x3d8] sm:$0xff] }
  0xdc   :  { %17487 = vmatmul.mubr.msk.f32.gmra.mrb[60].mxu0 %vm286_vm1, %v88_v48  ;;  %v151_v48 = vld [vmem:[%s26570_s0 + $0x3e0] sm:$0xff] }
  0xdd   :  { %17489 = vmatprep.mubr.msk.f32.mxu0 %vm286_vm1, %v89_v49  ;;  %v152_v49 = vld [vmem:[%s26570_s0 + $0x3e8] sm:$0xff] }
  0xe0   :  { %17490 = vmatmul.mubr.msk.f32.gmra.mrb[62].mxu0 %vm286_vm1, %v90_v50  ;;  %v153_v50 = vld [vmem:[%s26570_s0 + $0x3f0] sm:$0xff] }
  0xe1   :  { %17492 = vmatprep.mubr.msk.f32.mxu0 %vm286_vm1, %v91_v51  ;;  %v154_v51 = vld [vmem:[%s26570_s0 + $0x3f8] sm:$0xf] }
  0xe4   :  { %17493 = vmatmul.mubr.msk.f32.gmra.mrb[64].mxu0 %vm286_vm1, %v92_v52  ;;  %v2472_v52 = vld [vmem:[%s26570_s0 + $0x2] sm:$0xff] }
  0xe5   :  { %17495 = vmatprep.mubr.msk.f32.mxu0 %vm286_vm1, %v93_v53  ;;  %v2473_v53 = vld [vmem:[%s26570_s0 + $0xa] sm:$0xff] }
  0xe8   :  { %17496 = vmatmul.mubr.msk.f32.gmra.mrb[66].mxu0 %vm286_vm1, %v94_v55  ;;  %v2474_v55 = vld [vmem:[%s26570_s0 + $0x12] sm:$0xff] }
  0xe9   :  { %17498 = vmatprep.mubr.msk.f32.mxu0 %vm286_vm1, %v95_v56  ;;  %v2475_v56 = vld [vmem:[%s26570_s0 + $0x1a] sm:$0xff] }
  0xec   :  { %17499 = vmatmul.mubr.msk.f32.gmra.mrb[68].mxu0 %vm286_vm1, %v96_v57  ;;  %v2476_v57 = vld [vmem:[%s26570_s0 + $0x22] sm:$0xff] }
  0xed   :  { %17501 = vmatprep.mubr.msk.f32.mxu0 %vm286_vm1, %v97_v58  ;;  %v2477_v58 = vld [vmem:[%s26570_s0 + $0x2a] sm:$0xff] }
  0xf0   :  { %17502 = vmatmul.mubr.msk.f32.gmra.mrb[70].mxu0 %vm286_vm1, %v98_v59  ;;  %v2479_v59 = vld [vmem:[%s26570_s0 + $0x3a] sm:$0xff] }
  0xf1   :  { %17504 = vmatprep.mubr.msk.f32.mxu0 %vm286_vm1, %v99_v60  ;;  %v2480_v60 = vld [vmem:[%s26570_s0 + $0x42] sm:$0xff] }
  0xf4   :  { %17505 = vmatmul.mubr.msk.f32.gmra.mrb[72].mxu0 %vm286_vm1, %v100_v61  ;;  %v2481_v61 = vld [vmem:[%s26570_s0 + $0x4a] sm:$0xff] }
  0xf5   :  { %17507 = vmatprep.mubr.msk.f32.mxu0 %vm286_vm1, %v101_v62  ;;  %v2482_v62 = vld [vmem:[%s26570_s0 + $0x52] sm:$0xff] }
  0xf8   :  { %17508 = vmatmul.mubr.msk.f32.gmra.mrb[74].mxu0 %vm286_vm1, %v102_v63  ;;  %v2483_v63 = vld [vmem:[%s26570_s0 + $0x5a] sm:$0xff] }
  0xf9   :  { %17510 = vmatprep.mubr.msk.f32.mxu0 %vm286_vm1, %v103_v0  ;;  %v2484_v0 = vld [vmem:[%s26570_s0 + $0x62] sm:$0xff] }
  0xfc   :  { %17511 = vmatmul.mubr.msk.f32.gmra.mrb[76].mxu0 %vm286_vm1, %v104_v1  ;;  %v2485_v1 = vld [vmem:[%s26570_s0 + $0x6a] sm:$0xff] }
  0xfd   :  { %17513 = vmatprep.mubr.msk.f32.mxu0 %vm286_vm1, %v105_v2  ;;  %v2486_v2 = vld [vmem:[%s26570_s0 + $0x72] sm:$0xff] }
 0x100   :  { %17514 = vmatmul.mubr.msk.f32.gmra.mrb[78].mxu0 %vm286_vm1, %v106_v3  ;;  %v2487_v3 = vld [vmem:[%s26570_s0 + $0x7a] sm:$0xff] }
 0x101   :  { %17516 = vmatprep.mubr.msk.f32.mxu0 %vm286_vm1, %v107_v4  ;;  %v2488_v4 = vld [vmem:[%s26570_s0 + $0x82] sm:$0xff] }
 0x104   :  { %17517 = vmatmul.mubr.msk.f32.gmra.mrb[80].mxu0 %vm286_vm1, %v108_v5  ;;  %v2489_v5 = vld [vmem:[%s26570_s0 + $0x8a] sm:$0xff] }
 0x105   :  { %17519 = vmatprep.mubr.msk.f32.mxu0 %vm286_vm1, %v109_v6  ;;  %v2490_v6 = vld [vmem:[%s26570_s0 + $0x92] sm:$0xff] }
 0x108   :  { %17520 = vmatmul.mubr.msk.f32.gmra.mrb[82].mxu0 %vm286_vm1, %v110_v7  ;;  %v2491_v7 = vld [vmem:[%s26570_s0 + $0x9a] sm:$0xff] }
 0x109   :  { %17522 = vmatprep.mubr.msk.f32.mxu0 %vm286_vm1, %v111_v8  ;;  %v2492_v8 = vld [vmem:[%s26570_s0 + $0xa2] sm:$0xff] }
 0x10c   :  { %17523 = vmatmul.mubr.msk.f32.gmra.mrb[84].mxu0 %vm286_vm1, %v112_v9  ;;  %v2493_v9 = vld [vmem:[%s26570_s0 + $0xaa] sm:$0xff] }
 0x10d   :  { %17525 = vmatprep.mubr.msk.f32.mxu0 %vm286_vm1, %v113_v10  ;;  %v2494_v10 = vld [vmem:[%s26570_s0 + $0xb2] sm:$0xff] }
 0x110   :  { %17526 = vmatmul.mubr.msk.f32.gmra.mrb[86].mxu0 %vm286_vm1, %v114_v11  ;;  %v2495_v11 = vld [vmem:[%s26570_s0 + $0xba] sm:$0xff] }
 0x111   :  { %17528 = vmatprep.mubr.msk.f32.mxu0 %vm286_vm1, %v115_v12  ;;  %v2496_v12 = vld [vmem:[%s26570_s0 + $0xc2] sm:$0xff] }
 0x114   :  { %17529 = vmatmul.mubr.msk.f32.gmra.mrb[88].mxu0 %vm286_vm1, %v116_v13  ;;  %v2497_v13 = vld [vmem:[%s26570_s0 + $0xca] sm:$0xff] }
 0x115   :  { %17531 = vmatprep.mubr.msk.f32.mxu0 %vm286_vm1, %v117_v14  ;;  %v2498_v14 = vld [vmem:[%s26570_s0 + $0xd2] sm:$0xff] }
 0x118   :  { %17532 = vmatmul.mubr.msk.f32.gmra.mrb[90].mxu0 %vm286_vm1, %v118_v15  ;;  %v2499_v15 = vld [vmem:[%s26570_s0 + $0xda] sm:$0xff] }
 0x119   :  { %17534 = vmatprep.mubr.msk.f32.mxu0 %vm286_vm1, %v119_v16  ;;  %v2500_v16 = vld [vmem:[%s26570_s0 + $0xe2] sm:$0xff] }
 0x11c   :  { %17535 = vmatmul.mubr.msk.f32.gmra.mrb[92].mxu0 %vm286_vm1, %v120_v17  ;;  %v2501_v17 = vld [vmem:[%s26570_s0 + $0xea] sm:$0xff] }
 0x11d   :  { %17537 = vmatprep.mubr.msk.f32.mxu0 %vm286_vm1, %v121_v18  ;;  %v2502_v18 = vld [vmem:[%s26570_s0 + $0xf2] sm:$0xff] }
 0x120   :  { %17538 = vmatmul.mubr.msk.f32.gmra.mrb[94].mxu0 %vm286_vm1, %v122_v19  ;;  %v2503_v19 = vld [vmem:[%s26570_s0 + $0xfa] sm:$0xff] }
 0x121   :  { %17540 = vmatprep.mubr.msk.f32.mxu0 %vm286_vm1, %v123_v20  ;;  %v2504_v20 = vld [vmem:[%s26570_s0 + $0x102] sm:$0xff] }
 0x124   :  { %17541 = vmatmul.mubr.msk.f32.gmra.mrb[96].mxu0 %vm286_vm1, %v124_v21  ;;  %v2505_v21 = vld [vmem:[%s26570_s0 + $0x10a] sm:$0xff] }
 0x125   :  { %17543 = vmatprep.mubr.msk.f32.mxu0 %vm286_vm1, %v125_v22  ;;  %v2506_v22 = vld [vmem:[%s26570_s0 + $0x112] sm:$0xff] }
 0x128   :  { %17544 = vmatmul.mubr.msk.f32.gmra.mrb[98].mxu0 %vm286_vm1, %v126_v23  ;;  %v2507_v23 = vld [vmem:[%s26570_s0 + $0x11a] sm:$0xff] }
 0x129   :  { %17546 = vmatprep.mubr.msk.f32.mxu0 %vm286_vm1, %v127_v24  ;;  %v2508_v24 = vld [vmem:[%s26570_s0 + $0x122] sm:$0xff] }
 0x12c   :  { %17547 = vmatmul.mubr.msk.f32.gmra.mrb[100].mxu0 %vm286_vm1, %v128_v25  ;;  %v2509_v25 = vld [vmem:[%s26570_s0 + $0x12a] sm:$0xff] }
 0x12d   :  { %17549 = vmatprep.mubr.msk.f32.mxu0 %vm286_vm1, %v129_v26  ;;  %v2510_v26 = vld [vmem:[%s26570_s0 + $0x132] sm:$0xff] }
 0x130   :  { %17550 = vmatmul.mubr.msk.f32.gmra.mrb[102].mxu0 %vm286_vm1, %v130_v27  ;;  %v2511_v27 = vld [vmem:[%s26570_s0 + $0x13a] sm:$0xff] }
 0x131   :  { %17552 = vmatprep.mubr.msk.f32.mxu0 %vm286_vm1, %v131_v28  ;;  %v2512_v28 = vld [vmem:[%s26570_s0 + $0x142] sm:$0xff] }
 0x134   :  { %17553 = vmatmul.mubr.msk.f32.gmra.mrb[104].mxu0 %vm286_vm1, %v132_v29  ;;  %v2513_v29 = vld [vmem:[%s26570_s0 + $0x14a] sm:$0xff] }
 0x135   :  { %17555 = vmatprep.mubr.msk.f32.mxu0 %vm286_vm1, %v133_v30  ;;  %v2514_v30 = vld [vmem:[%s26570_s0 + $0x152] sm:$0xff] }
 0x138   :  { %17556 = vmatmul.mubr.msk.f32.gmra.mrb[106].mxu0 %vm286_vm1, %v134_v31  ;;  %v2515_v31 = vld [vmem:[%s26570_s0 + $0x15a] sm:$0xff] }
 0x139   :  { %17558 = vmatprep.mubr.msk.f32.mxu0 %vm286_vm1, %v135_v32  ;;  %v2516_v32 = vld [vmem:[%s26570_s0 + $0x162] sm:$0xff] }
 0x13c   :  { %17559 = vmatmul.mubr.msk.f32.gmra.mrb[108].mxu0 %vm286_vm1, %v136_v33  ;;  %v2517_v33 = vld [vmem:[%s26570_s0 + $0x16a] sm:$0xff] }
 0x13d   :  { %17561 = vmatprep.mubr.msk.f32.mxu0 %vm286_vm1, %v137_v34  ;;  %v2518_v34 = vld [vmem:[%s26570_s0 + $0x172] sm:$0xff] }
 0x140   :  { %17562 = vmatmul.mubr.msk.f32.gmra.mrb[110].mxu0 %vm286_vm1, %v138_v35  ;;  %v2519_v35 = vld [vmem:[%s26570_s0 + $0x17a] sm:$0xff] }
 0x141   :  { %17564 = vmatprep.mubr.msk.f32.mxu0 %vm286_vm1, %v139_v36  ;;  %v2520_v36 = vld [vmem:[%s26570_s0 + $0x182] sm:$0xff] }
 0x144   :  { %17565 = vmatmul.mubr.msk.f32.gmra.mrb[112].mxu0 %vm286_vm1, %v140_v37  ;;  %v2521_v37 = vld [vmem:[%s26570_s0 + $0x18a] sm:$0xff] }
 0x145   :  { %17567 = vmatprep.mubr.msk.f32.mxu0 %vm286_vm1, %v141_v38  ;;  %v2522_v38 = vld [vmem:[%s26570_s0 + $0x192] sm:$0xff] }
 0x148   :  { %17568 = vmatmul.mubr.msk.f32.gmra.mrb[114].mxu0 %vm286_vm1, %v142_v39  ;;  %v2523_v39 = vld [vmem:[%s26570_s0 + $0x19a] sm:$0xff] }
 0x149   :  { %17570 = vmatprep.mubr.msk.f32.mxu0 %vm286_vm1, %v143_v40  ;;  %v2524_v40 = vld [vmem:[%s26570_s0 + $0x1a2] sm:$0xff] }
 0x14c   :  { %17571 = vmatmul.mubr.msk.f32.gmra.mrb[116].mxu0 %vm286_vm1, %v144_v41  ;;  %v2525_v41 = vld [vmem:[%s26570_s0 + $0x1aa] sm:$0xff] }
 0x14d   :  { %17573 = vmatprep.mubr.msk.f32.mxu0 %vm286_vm1, %v145_v42  ;;  %v2526_v42 = vld [vmem:[%s26570_s0 + $0x1b2] sm:$0xff] }
 0x150   :  { %17574 = vmatmul.mubr.msk.f32.gmra.mrb[118].mxu0 %vm286_vm1, %v146_v43  ;;  %v2527_v43 = vld [vmem:[%s26570_s0 + $0x1ba] sm:$0xff] }
 0x151   :  { %17576 = vmatprep.mubr.msk.f32.mxu0 %vm286_vm1, %v147_v44  ;;  %v2528_v44 = vld [vmem:[%s26570_s0 + $0x1c2] sm:$0xff] }
 0x154   :  { %17577 = vmatmul.mubr.msk.f32.gmra.mrb[120].mxu0 %vm286_vm1, %v148_v45  ;;  %v2529_v45 = vld [vmem:[%s26570_s0 + $0x1ca] sm:$0xff] }
 0x155   :  { %17579 = vmatprep.mubr.msk.f32.mxu0 %vm286_vm1, %v149_v46  ;;  %v2530_v46 = vld [vmem:[%s26570_s0 + $0x1d2] sm:$0xff] }
 0x158   :  { %17580 = vmatmul.mubr.msk.f32.gmra.mrb[122].mxu0 %vm286_vm1, %v150_v47  ;;  %v2531_v47 = vld [vmem:[%s26570_s0 + $0x1da] sm:$0xff] }
 0x159   :  { %17582 = vmatprep.mubr.msk.f32.mxu0 %vm286_vm1, %v151_v48  ;;  %v2532_v48 = vld [vmem:[%s26570_s0 + $0x1e2] sm:$0xff] }
 0x15c   :  { %17583 = vmatmul.mubr.msk.f32.gmra.mrb[124].mxu0 %vm286_vm1, %v152_v49  ;;  %v2533_v49 = vld [vmem:[%s26570_s0 + $0x1ea] sm:$0xff] }
 0x15d   :  { %17585 = vmatprep.mubr.msk.f32.mxu0 %vm286_vm1, %v153_v50  ;;  %v2534_v50 = vld [vmem:[%s26570_s0 + $0x1f2] sm:$0xff] }
 0x160   :  { %17586 = vmatmul.mubr.msk.f32.gmra.mrb[126].mxu0 %vm286_vm1, %v154_v51  ;;  %v2535_v51 = vld [vmem:[%s26570_s0 + $0x1fa] sm:$0xff] }
 0x161   :  { %17590 = vmatprep.mubr.msk.f32.mxu0 %vm286_vm1, %v2472_v52  ;;  %v2536_v52 = vld [vmem:[%s26570_s0 + $0x202] sm:$0xff] }
 0x164   :  { %17591 = vmatmul.mubr.msk.f32.vlgmr.msra.gmra.mrb[0].mxu0 %vm286_vm1, %v2473_v53  ;;  %v2537_v53 = vld [vmem:[%s26570_s0 + $0x20a] sm:$0xff] }
 0x165   :  { %17783 = vmatpush3.msk.msra.mxu0 %vm671_vm0, %v21011_v54  ;;  %17593 = vmatprep.mubr.msk.f32.mxu0 %vm286_vm1, %v2474_v55  ;;  %v2478_v54 = vld [vmem:[%s26570_s0 + $0x32] sm:$0xff] }
 0x166   :  { %v2538_v55 = vld [vmem:[%s26570_s0 + $0x212] sm:$0xff] }
 0x168   :  { %17594 = vmatmul.mubr.msk.f32.gmra.mrb[2].mxu0 %vm286_vm1, %v2475_v56  ;;  %v21532_v56 = vld [vmem:[%s26571_s1 + $0x10] sm:$0xf] }
 0x169   :  { %17596 = vmatprep.mubr.msk.f32.mxu0 %vm286_vm1, %v2476_v57  ;;  %v2539_v57 = vld [vmem:[%s26570_s0 + $0x21a] sm:$0xff]  ;;  %17976 = vmatprep.subr.msk.mxu0 %vm671_vm0, %v21532_v56 }
 0x16c   :  { %17597 = vmatmul.mubr.msk.f32.gmra.mrb[4].mxu0 %vm286_vm1, %v2477_v58  ;;  %v2540_v58 = vld [vmem:[%s26570_s0 + $0x222] sm:$0xff] }
 0x16d   :  { %17599 = vmatprep.mubr.msk.f32.mxu0 %vm286_vm1, %v2478_v54  ;;  %v2541_v54 = vld [vmem:[%s26570_s0 + $0x22a] sm:$0xff] }
 0x170   :  { %17600 = vmatmul.mubr.msk.f32.gmra.mrb[6].mxu0 %vm286_vm1, %v2479_v59  ;;  %v2542_v59 = vld [vmem:[%s26570_s0 + $0x232] sm:$0xff] }
 0x171   :  { %17602 = vmatprep.mubr.msk.f32.mxu0 %vm286_vm1, %v2480_v60  ;;  %v2543_v60 = vld [vmem:[%s26570_s0 + $0x23a] sm:$0xff] }
 0x174   :  { %17603 = vmatmul.mubr.msk.f32.gmra.mrb[8].mxu0 %vm286_vm1, %v2481_v61  ;;  %v2544_v61 = vld [vmem:[%s26570_s0 + $0x242] sm:$0xff] }
 0x175   :  { %17605 = vmatprep.mubr.msk.f32.mxu0 %vm286_vm1, %v2482_v62  ;;  %v2545_v62 = vld [vmem:[%s26570_s0 + $0x24a] sm:$0xff] }
 0x178   :  { %17606 = vmatmul.mubr.msk.f32.gmra.mrb[10].mxu0 %vm286_vm1, %v2483_v63  ;;  %v2546_v63 = vld [vmem:[%s26570_s0 + $0x252] sm:$0xff] }
 0x179   :  { %17608 = vmatprep.mubr.msk.f32.mxu0 %vm286_vm1, %v2484_v0  ;;  %v2547_v0 = vld [vmem:[%s26570_s0 + $0x25a] sm:$0xff] }
 0x17c   :  { %17609 = vmatmul.mubr.msk.f32.gmra.mrb[12].mxu0 %vm286_vm1, %v2485_v1  ;;  %v2548_v1 = vld [vmem:[%s26570_s0 + $0x262] sm:$0xff] }
 0x17d   :  { %17611 = vmatprep.mubr.msk.f32.mxu0 %vm286_vm1, %v2486_v2  ;;  %v2549_v2 = vld [vmem:[%s26570_s0 + $0x26a] sm:$0xff] }
 0x180   :  { %17612 = vmatmul.mubr.msk.f32.gmra.mrb[14].mxu0 %vm286_vm1, %v2487_v3  ;;  %v2550_v3 = vld [vmem:[%s26570_s0 + $0x272] sm:$0xff] }
 0x181   :  { %17614 = vmatprep.mubr.msk.f32.mxu0 %vm286_vm1, %v2488_v4  ;;  %v2551_v4 = vld [vmem:[%s26570_s0 + $0x27a] sm:$0xff] }
 0x184   :  { %17615 = vmatmul.mubr.msk.f32.gmra.mrb[16].mxu0 %vm286_vm1, %v2489_v5  ;;  %v2552_v5 = vld [vmem:[%s26570_s0 + $0x282] sm:$0xff] }
 0x185   :  { %17617 = vmatprep.mubr.msk.f32.mxu0 %vm286_vm1, %v2490_v6  ;;  %v2553_v6 = vld [vmem:[%s26570_s0 + $0x28a] sm:$0xff] }
 0x188   :  { %17618 = vmatmul.mubr.msk.f32.gmra.mrb[18].mxu0 %vm286_vm1, %v2491_v7  ;;  %v2554_v7 = vld [vmem:[%s26570_s0 + $0x292] sm:$0xff] }
 0x189   :  { %17620 = vmatprep.mubr.msk.f32.mxu0 %vm286_vm1, %v2492_v8  ;;  %v2555_v8 = vld [vmem:[%s26570_s0 + $0x29a] sm:$0xff] }
 0x18c   :  { %17621 = vmatmul.mubr.msk.f32.gmra.mrb[20].mxu0 %vm286_vm1, %v2493_v9  ;;  %v2556_v9 = vld [vmem:[%s26570_s0 + $0x2a2] sm:$0xff] }
 0x18d   :  { %17623 = vmatprep.mubr.msk.f32.mxu0 %vm286_vm1, %v2494_v10  ;;  %v2557_v10 = vld [vmem:[%s26570_s0 + $0x2aa] sm:$0xff] }
 0x190   :  { %17624 = vmatmul.mubr.msk.f32.gmra.mrb[22].mxu0 %vm286_vm1, %v2495_v11  ;;  %v2558_v11 = vld [vmem:[%s26570_s0 + $0x2b2] sm:$0xff] }
 0x191   :  { %17626 = vmatprep.mubr.msk.f32.mxu0 %vm286_vm1, %v2496_v12  ;;  %v2559_v12 = vld [vmem:[%s26570_s0 + $0x2ba] sm:$0xff] }
 0x194   :  { %17627 = vmatmul.mubr.msk.f32.gmra.mrb[24].mxu0 %vm286_vm1, %v2497_v13  ;;  %v2560_v13 = vld [vmem:[%s26570_s0 + $0x2c2] sm:$0xff] }
 0x195   :  { %17629 = vmatprep.mubr.msk.f32.mxu0 %vm286_vm1, %v2498_v14  ;;  %v2561_v14 = vld [vmem:[%s26570_s0 + $0x2ca] sm:$0xff] }
 0x198   :  { %17630 = vmatmul.mubr.msk.f32.gmra.mrb[26].mxu0 %vm286_vm1, %v2499_v15  ;;  %v2562_v15 = vld [vmem:[%s26570_s0 + $0x2d2] sm:$0xff] }
 0x199   :  { %17632 = vmatprep.mubr.msk.f32.mxu0 %vm286_vm1, %v2500_v16  ;;  %v2563_v16 = vld [vmem:[%s26570_s0 + $0x2da] sm:$0xff] }
 0x19c   :  { %17633 = vmatmul.mubr.msk.f32.gmra.mrb[28].mxu0 %vm286_vm1, %v2501_v17  ;;  %v2564_v17 = vld [vmem:[%s26570_s0 + $0x2e2] sm:$0xff] }
 0x19d   :  { %17635 = vmatprep.mubr.msk.f32.mxu0 %vm286_vm1, %v2502_v18  ;;  %v2565_v18 = vld [vmem:[%s26570_s0 + $0x2ea] sm:$0xff] }
 0x1a0   :  { %17636 = vmatmul.mubr.msk.f32.gmra.mrb[30].mxu0 %vm286_vm1, %v2503_v19  ;;  %v2566_v19 = vld [vmem:[%s26570_s0 + $0x2f2] sm:$0xff] }
 0x1a1   :  { %17638 = vmatprep.mubr.msk.f32.mxu0 %vm286_vm1, %v2504_v20  ;;  %v2567_v20 = vld [vmem:[%s26570_s0 + $0x2fa] sm:$0xff] }
 0x1a4   :  { %17639 = vmatmul.mubr.msk.f32.gmra.mrb[32].mxu0 %vm286_vm1, %v2505_v21  ;;  %v2568_v21 = vld [vmem:[%s26570_s0 + $0x302] sm:$0xff] }
 0x1a5   :  { %17641 = vmatprep.mubr.msk.f32.mxu0 %vm286_vm1, %v2506_v22  ;;  %v2569_v22 = vld [vmem:[%s26570_s0 + $0x30a] sm:$0xff] }
 0x1a8   :  { %17642 = vmatmul.mubr.msk.f32.gmra.mrb[34].mxu0 %vm286_vm1, %v2507_v23  ;;  %v2570_v23 = vld [vmem:[%s26570_s0 + $0x312] sm:$0xff] }
 0x1a9   :  { %17644 = vmatprep.mubr.msk.f32.mxu0 %vm286_vm1, %v2508_v24  ;;  %v2571_v24 = vld [vmem:[%s26570_s0 + $0x31a] sm:$0xff] }
 0x1ac   :  { %17645 = vmatmul.mubr.msk.f32.gmra.mrb[36].mxu0 %vm286_vm1, %v2509_v25  ;;  %v2572_v25 = vld [vmem:[%s26570_s0 + $0x322] sm:$0xff] }
 0x1ad   :  { %17647 = vmatprep.mubr.msk.f32.mxu0 %vm286_vm1, %v2510_v26  ;;  %v2573_v26 = vld [vmem:[%s26570_s0 + $0x32a] sm:$0xff] }
 0x1b0   :  { %17648 = vmatmul.mubr.msk.f32.gmra.mrb[38].mxu0 %vm286_vm1, %v2511_v27  ;;  %v2574_v27 = vld [vmem:[%s26570_s0 + $0x332] sm:$0xff] }
 0x1b1   :  { %17650 = vmatprep.mubr.msk.f32.mxu0 %vm286_vm1, %v2512_v28  ;;  %v2575_v28 = vld [vmem:[%s26570_s0 + $0x33a] sm:$0xff] }
 0x1b4   :  { %17651 = vmatmul.mubr.msk.f32.gmra.mrb[40].mxu0 %vm286_vm1, %v2513_v29  ;;  %v2576_v29 = vld [vmem:[%s26570_s0 + $0x342] sm:$0xff] }
 0x1b5   :  { %17653 = vmatprep.mubr.msk.f32.mxu0 %vm286_vm1, %v2514_v30  ;;  %v2577_v30 = vld [vmem:[%s26570_s0 + $0x34a] sm:$0xff] }
 0x1b8   :  { %17654 = vmatmul.mubr.msk.f32.gmra.mrb[42].mxu0 %vm286_vm1, %v2515_v31  ;;  %v2578_v31 = vld [vmem:[%s26570_s0 + $0x352] sm:$0xff] }
 0x1b9   :  { %17656 = vmatprep.mubr.msk.f32.mxu0 %vm286_vm1, %v2516_v32  ;;  %v2579_v32 = vld [vmem:[%s26570_s0 + $0x35a] sm:$0xff] }
 0x1bc   :  { %17657 = vmatmul.mubr.msk.f32.gmra.mrb[44].mxu0 %vm286_vm1, %v2517_v33  ;;  %v2580_v33 = vld [vmem:[%s26570_s0 + $0x362] sm:$0xff] }
 0x1bd   :  { %17659 = vmatprep.mubr.msk.f32.mxu0 %vm286_vm1, %v2518_v34  ;;  %v2581_v34 = vld [vmem:[%s26570_s0 + $0x36a] sm:$0xff] }
 0x1c0   :  { %17660 = vmatmul.mubr.msk.f32.gmra.mrb[46].mxu0 %vm286_vm1, %v2519_v35  ;;  %v2582_v35 = vld [vmem:[%s26570_s0 + $0x372] sm:$0xff] }
 0x1c1   :  { %17662 = vmatprep.mubr.msk.f32.mxu0 %vm286_vm1, %v2520_v36  ;;  %v2583_v36 = vld [vmem:[%s26570_s0 + $0x37a] sm:$0xff] }
 0x1c4   :  { %17663 = vmatmul.mubr.msk.f32.gmra.mrb[48].mxu0 %vm286_vm1, %v2521_v37  ;;  %v2584_v37 = vld [vmem:[%s26570_s0 + $0x382] sm:$0xff] }
 0x1c5   :  { %17665 = vmatprep.mubr.msk.f32.mxu0 %vm286_vm1, %v2522_v38  ;;  %v2585_v38 = vld [vmem:[%s26570_s0 + $0x38a] sm:$0xff] }
 0x1c8   :  { %17666 = vmatmul.mubr.msk.f32.gmra.mrb[50].mxu0 %vm286_vm1, %v2523_v39  ;;  %v2586_v39 = vld [vmem:[%s26570_s0 + $0x392] sm:$0xff] }
 0x1c9   :  { %17668 = vmatprep.mubr.msk.f32.mxu0 %vm286_vm1, %v2524_v40  ;;  %v2587_v40 = vld [vmem:[%s26570_s0 + $0x39a] sm:$0xff] }
 0x1cc   :  { %17669 = vmatmul.mubr.msk.f32.gmra.mrb[52].mxu0 %vm286_vm1, %v2525_v41  ;;  %v2588_v41 = vld [vmem:[%s26570_s0 + $0x3a2] sm:$0xff] }
 0x1cd   :  { %17671 = vmatprep.mubr.msk.f32.mxu0 %vm286_vm1, %v2526_v42  ;;  %v2589_v42 = vld [vmem:[%s26570_s0 + $0x3aa] sm:$0xff] }
 0x1d0   :  { %17672 = vmatmul.mubr.msk.f32.gmra.mrb[54].mxu0 %vm286_vm1, %v2527_v43  ;;  %v2590_v43 = vld [vmem:[%s26570_s0 + $0x3b2] sm:$0xff] }
 0x1d1   :  { %17674 = vmatprep.mubr.msk.f32.mxu0 %vm286_vm1, %v2528_v44  ;;  %v2591_v44 = vld [vmem:[%s26570_s0 + $0x3ba] sm:$0xff] }
 0x1d4   :  { %17675 = vmatmul.mubr.msk.f32.gmra.mrb[56].mxu0 %vm286_vm1, %v2529_v45  ;;  %v2592_v45 = vld [vmem:[%s26570_s0 + $0x3c2] sm:$0xff] }
 0x1d5   :  { %17677 = vmatprep.mubr.msk.f32.mxu0 %vm286_vm1, %v2530_v46  ;;  %v2593_v46 = vld [vmem:[%s26570_s0 + $0x3ca] sm:$0xff] }
 0x1d8   :  { %17678 = vmatmul.mubr.msk.f32.gmra.mrb[58].mxu0 %vm286_vm1, %v2531_v47  ;;  %v2594_v47 = vld [vmem:[%s26570_s0 + $0x3d2] sm:$0xff] }
 0x1d9   :  { %17680 = vmatprep.mubr.msk.f32.mxu0 %vm286_vm1, %v2532_v48  ;;  %v2595_v48 = vld [vmem:[%s26570_s0 + $0x3da] sm:$0xff] }
 0x1dc   :  { %17681 = vmatmul.mubr.msk.f32.gmra.mrb[60].mxu0 %vm286_vm1, %v2533_v49  ;;  %v2596_v49 = vld [vmem:[%s26570_s0 + $0x3e2] sm:$0xff] }
 0x1dd   :  { %17683 = vmatprep.mubr.msk.f32.mxu0 %vm286_vm1, %v2534_v50  ;;  %v2597_v50 = vld [vmem:[%s26570_s0 + $0x3ea] sm:$0xff] }
 0x1e0   :  { %17684 = vmatmul.mubr.msk.f32.gmra.mrb[62].mxu0 %vm286_vm1, %v2535_v51  ;;  %v2598_v51 = vld [vmem:[%s26570_s0 + $0x3f2] sm:$0xff] }
 0x1e1   :  { %17686 = vmatprep.mubr.msk.f32.mxu0 %vm286_vm1, %v2536_v52  ;;  %v2599_v52 = vld [vmem:[%s26570_s0 + $0x3fa] sm:$0xf] }
 0x1e4   :  { %17687 = vmatmul.mubr.msk.f32.gmra.mrb[64].mxu0 %vm286_vm1, %v2537_v53  ;;  %v3822_v53 = vld [vmem:[%s26570_s0 + $0x3] sm:$0xff] }
 0x1e5   :  { %17689 = vmatprep.mubr.msk.f32.mxu0 %vm286_vm1, %v2538_v55  ;;  %v3823_v55 = vld [vmem:[%s26570_s0 + $0xb] sm:$0xff] }
 0x1e8   :  { %17690 = vmatmul.mubr.msk.f32.gmra.mrb[66].mxu0 %vm286_vm1, %v2539_v57  ;;  %v3824_v57 = vld [vmem:[%s26570_s0 + $0x13] sm:$0xff] }
 0x1e9   :  { %17692 = vmatprep.mubr.msk.f32.mxu0 %vm286_vm1, %v2540_v58  ;;  %v3825_v58 = vld [vmem:[%s26570_s0 + $0x1b] sm:$0xff] }
 0x1ec   :  { %17693 = vmatmul.mubr.msk.f32.gmra.mrb[68].mxu0 %vm286_vm1, %v2541_v54  ;;  %v3826_v54 = vld [vmem:[%s26570_s0 + $0x23] sm:$0xff] }
 0x1ed   :  { %17695 = vmatprep.mubr.msk.f32.mxu0 %vm286_vm1, %v2542_v59  ;;  %v3827_v59 = vld [vmem:[%s26570_s0 + $0x2b] sm:$0xff] }
 0x1f0   :  { %17696 = vmatmul.mubr.msk.f32.gmra.mrb[70].mxu0 %vm286_vm1, %v2543_v60  ;;  %v3829_v60 = vld [vmem:[%s26570_s0 + $0x3b] sm:$0xff] }
 0x1f1   :  { %17698 = vmatprep.mubr.msk.f32.mxu0 %vm286_vm1, %v2544_v61  ;;  %v3830_v61 = vld [vmem:[%s26570_s0 + $0x43] sm:$0xff] }
 0x1f4   :  { %17699 = vmatmul.mubr.msk.f32.gmra.mrb[72].mxu0 %vm286_vm1, %v2545_v62  ;;  %v3831_v62 = vld [vmem:[%s26570_s0 + $0x4b] sm:$0xff] }
 0x1f5   :  { %17701 = vmatprep.mubr.msk.f32.mxu0 %vm286_vm1, %v2546_v63  ;;  %v3832_v63 = vld [vmem:[%s26570_s0 + $0x53] sm:$0xff] }
 0x1f8   :  { %17702 = vmatmul.mubr.msk.f32.gmra.mrb[74].mxu0 %vm286_vm1, %v2547_v0  ;;  %v3833_v0 = vld [vmem:[%s26570_s0 + $0x5b] sm:$0xff] }
 0x1f9   :  { %17704 = vmatprep.mubr.msk.f32.mxu0 %vm286_vm1, %v2548_v1  ;;  %v3834_v1 = vld [vmem:[%s26570_s0 + $0x63] sm:$0xff] }
 0x1fc   :  { %17705 = vmatmul.mubr.msk.f32.gmra.mrb[76].mxu0 %vm286_vm1, %v2549_v2  ;;  %v3835_v2 = vld [vmem:[%s26570_s0 + $0x6b] sm:$0xff] }
 0x1fd   :  { %17707 = vmatprep.mubr.msk.f32.mxu0 %vm286_vm1, %v2550_v3  ;;  %v3836_v3 = vld [vmem:[%s26570_s0 + $0x73] sm:$0xff] }
 0x200   :  { %17708 = vmatmul.mubr.msk.f32.gmra.mrb[78].mxu0 %vm286_vm1, %v2551_v4  ;;  %v3837_v4 = vld [vmem:[%s26570_s0 + $0x7b] sm:$0xff] }
 0x201   :  { %17710 = vmatprep.mubr.msk.f32.mxu0 %vm286_vm1, %v2552_v5  ;;  %v3838_v5 = vld [vmem:[%s26570_s0 + $0x83] sm:$0xff] }
 0x204   :  { %17711 = vmatmul.mubr.msk.f32.gmra.mrb[80].mxu0 %vm286_vm1, %v2553_v6  ;;  %v3839_v6 = vld [vmem:[%s26570_s0 + $0x8b] sm:$0xff] }
 0x205   :  { %17713 = vmatprep.mubr.msk.f32.mxu0 %vm286_vm1, %v2554_v7  ;;  %v3840_v7 = vld [vmem:[%s26570_s0 + $0x93] sm:$0xff] }
 0x208   :  { %17714 = vmatmul.mubr.msk.f32.gmra.mrb[82].mxu0 %vm286_vm1, %v2555_v8  ;;  %v3841_v8 = vld [vmem:[%s26570_s0 + $0x9b] sm:$0xff] }
 0x209   :  { %17716 = vmatprep.mubr.msk.f32.mxu0 %vm286_vm1, %v2556_v9  ;;  %v3842_v9 = vld [vmem:[%s26570_s0 + $0xa3] sm:$0xff] }
 0x20c   :  { %17717 = vmatmul.mubr.msk.f32.gmra.mrb[84].mxu0 %vm286_vm1, %v2557_v10  ;;  %v3843_v10 = vld [vmem:[%s26570_s0 + $0xab] sm:$0xff] }
 0x20d   :  { %17719 = vmatprep.mubr.msk.f32.mxu0 %vm286_vm1, %v2558_v11  ;;  %v3844_v11 = vld [vmem:[%s26570_s0 + $0xb3] sm:$0xff] }
 0x210   :  { %17720 = vmatmul.mubr.msk.f32.gmra.mrb[86].mxu0 %vm286_vm1, %v2559_v12  ;;  %v3845_v12 = vld [vmem:[%s26570_s0 + $0xbb] sm:$0xff] }
 0x211   :  { %17722 = vmatprep.mubr.msk.f32.mxu0 %vm286_vm1, %v2560_v13  ;;  %v3846_v13 = vld [vmem:[%s26570_s0 + $0xc3] sm:$0xff] }
 0x214   :  { %17723 = vmatmul.mubr.msk.f32.gmra.mrb[88].mxu0 %vm286_vm1, %v2561_v14  ;;  %v3847_v14 = vld [vmem:[%s26570_s0 + $0xcb] sm:$0xff] }
 0x215   :  { %17725 = vmatprep.mubr.msk.f32.mxu0 %vm286_vm1, %v2562_v15  ;;  %v3848_v15 = vld [vmem:[%s26570_s0 + $0xd3] sm:$0xff] }
 0x218   :  { %17726 = vmatmul.mubr.msk.f32.gmra.mrb[90].mxu0 %vm286_vm1, %v2563_v16  ;;  %v3849_v16 = vld [vmem:[%s26570_s0 + $0xdb] sm:$0xff] }
 0x219   :  { %17728 = vmatprep.mubr.msk.f32.mxu0 %vm286_vm1, %v2564_v17  ;;  %v3850_v17 = vld [vmem:[%s26570_s0 + $0xe3] sm:$0xff] }
 0x21c   :  { %17729 = vmatmul.mubr.msk.f32.gmra.mrb[92].mxu0 %vm286_vm1, %v2565_v18  ;;  %v3851_v18 = vld [vmem:[%s26570_s0 + $0xeb] sm:$0xff] }
 0x21d   :  { %17731 = vmatprep.mubr.msk.f32.mxu0 %vm286_vm1, %v2566_v19  ;;  %v3852_v19 = vld [vmem:[%s26570_s0 + $0xf3] sm:$0xff] }
 0x220   :  { %17732 = vmatmul.mubr.msk.f32.gmra.mrb[94].mxu0 %vm286_vm1, %v2567_v20  ;;  %v3853_v20 = vld [vmem:[%s26570_s0 + $0xfb] sm:$0xff] }
 0x221   :  { %17734 = vmatprep.mubr.msk.f32.mxu0 %vm286_vm1, %v2568_v21  ;;  %v3854_v21 = vld [vmem:[%s26570_s0 + $0x103] sm:$0xff] }
 0x224   :  { %17735 = vmatmul.mubr.msk.f32.gmra.mrb[96].mxu0 %vm286_vm1, %v2569_v22  ;;  %v3855_v22 = vld [vmem:[%s26570_s0 + $0x10b] sm:$0xff] }
 0x225   :  { %17737 = vmatprep.mubr.msk.f32.mxu0 %vm286_vm1, %v2570_v23  ;;  %v3856_v23 = vld [vmem:[%s26570_s0 + $0x113] sm:$0xff] }
 0x228   :  { %17738 = vmatmul.mubr.msk.f32.gmra.mrb[98].mxu0 %vm286_vm1, %v2571_v24  ;;  %v3857_v24 = vld [vmem:[%s26570_s0 + $0x11b] sm:$0xff] }
 0x229   :  { %17740 = vmatprep.mubr.msk.f32.mxu0 %vm286_vm1, %v2572_v25  ;;  %v3858_v25 = vld [vmem:[%s26570_s0 + $0x123] sm:$0xff] }
 0x22c   :  { %17741 = vmatmul.mubr.msk.f32.gmra.mrb[100].mxu0 %vm286_vm1, %v2573_v26  ;;  %v3859_v26 = vld [vmem:[%s26570_s0 + $0x12b] sm:$0xff] }
 0x22d   :  { %17743 = vmatprep.mubr.msk.f32.mxu0 %vm286_vm1, %v2574_v27  ;;  %v3860_v27 = vld [vmem:[%s26570_s0 + $0x133] sm:$0xff] }
 0x230   :  { %17744 = vmatmul.mubr.msk.f32.gmra.mrb[102].mxu0 %vm286_vm1, %v2575_v28  ;;  %v3861_v28 = vld [vmem:[%s26570_s0 + $0x13b] sm:$0xff] }
 0x231   :  { %17746 = vmatprep.mubr.msk.f32.mxu0 %vm286_vm1, %v2576_v29  ;;  %v3862_v29 = vld [vmem:[%s26570_s0 + $0x143] sm:$0xff] }
 0x234   :  { %17747 = vmatmul.mubr.msk.f32.gmra.mrb[104].mxu0 %vm286_vm1, %v2577_v30  ;;  %v3863_v30 = vld [vmem:[%s26570_s0 + $0x14b] sm:$0xff] }
 0x235   :  { %17749 = vmatprep.mubr.msk.f32.mxu0 %vm286_vm1, %v2578_v31  ;;  %v3864_v31 = vld [vmem:[%s26570_s0 + $0x153] sm:$0xff] }
 0x238   :  { %17750 = vmatmul.mubr.msk.f32.gmra.mrb[106].mxu0 %vm286_vm1, %v2579_v32  ;;  %v3865_v32 = vld [vmem:[%s26570_s0 + $0x15b] sm:$0xff] }
 0x239   :  { %17752 = vmatprep.mubr.msk.f32.mxu0 %vm286_vm1, %v2580_v33  ;;  %v3866_v33 = vld [vmem:[%s26570_s0 + $0x163] sm:$0xff] }
 0x23c   :  { %17753 = vmatmul.mubr.msk.f32.gmra.mrb[108].mxu0 %vm286_vm1, %v2581_v34  ;;  %v3867_v34 = vld [vmem:[%s26570_s0 + $0x16b] sm:$0xff] }
 0x23d   :  { %17755 = vmatprep.mubr.msk.f32.mxu0 %vm286_vm1, %v2582_v35  ;;  %v3868_v35 = vld [vmem:[%s26570_s0 + $0x173] sm:$0xff] }
 0x240   :  { %17756 = vmatmul.mubr.msk.f32.gmra.mrb[110].mxu0 %vm286_vm1, %v2583_v36  ;;  %v3869_v36 = vld [vmem:[%s26570_s0 + $0x17b] sm:$0xff] }
 0x241   :  { %17758 = vmatprep.mubr.msk.f32.mxu0 %vm286_vm1, %v2584_v37  ;;  %v3870_v37 = vld [vmem:[%s26570_s0 + $0x183] sm:$0xff] }
 0x244   :  { %17759 = vmatmul.mubr.msk.f32.gmra.mrb[112].mxu0 %vm286_vm1, %v2585_v38  ;;  %v3871_v38 = vld [vmem:[%s26570_s0 + $0x18b] sm:$0xff] }
 0x245   :  { %17761 = vmatprep.mubr.msk.f32.mxu0 %vm286_vm1, %v2586_v39  ;;  %v3872_v39 = vld [vmem:[%s26570_s0 + $0x193] sm:$0xff] }
 0x248   :  { %17762 = vmatmul.mubr.msk.f32.gmra.mrb[114].mxu0 %vm286_vm1, %v2587_v40  ;;  %v3873_v40 = vld [vmem:[%s26570_s0 + $0x19b] sm:$0xff] }
 0x249   :  { %17764 = vmatprep.mubr.msk.f32.mxu0 %vm286_vm1, %v2588_v41  ;;  %v3874_v41 = vld [vmem:[%s26570_s0 + $0x1a3] sm:$0xff] }
 0x24c   :  { %17765 = vmatmul.mubr.msk.f32.gmra.mrb[116].mxu0 %vm286_vm1, %v2589_v42  ;;  %v3875_v42 = vld [vmem:[%s26570_s0 + $0x1ab] sm:$0xff] }
 0x24d   :  { %17767 = vmatprep.mubr.msk.f32.mxu0 %vm286_vm1, %v2590_v43  ;;  %v3876_v43 = vld [vmem:[%s26570_s0 + $0x1b3] sm:$0xff] }
 0x250   :  { %17768 = vmatmul.mubr.msk.f32.gmra.mrb[118].mxu0 %vm286_vm1, %v2591_v44  ;;  %v3877_v44 = vld [vmem:[%s26570_s0 + $0x1bb] sm:$0xff] }
 0x251   :  { %17770 = vmatprep.mubr.msk.f32.mxu0 %vm286_vm1, %v2592_v45  ;;  %v3878_v45 = vld [vmem:[%s26570_s0 + $0x1c3] sm:$0xff] }
 0x254   :  { %17771 = vmatmul.mubr.msk.f32.gmra.mrb[120].mxu0 %vm286_vm1, %v2593_v46  ;;  %v3879_v46 = vld [vmem:[%s26570_s0 + $0x1cb] sm:$0xff] }
 0x255   :  { %17773 = vmatprep.mubr.msk.f32.mxu0 %vm286_vm1, %v2594_v47  ;;  %v3880_v47 = vld [vmem:[%s26570_s0 + $0x1d3] sm:$0xff] }
 0x258   :  { %17774 = vmatmul.mubr.msk.f32.gmra.mrb[122].mxu0 %vm286_vm1, %v2595_v48  ;;  %v3881_v48 = vld [vmem:[%s26570_s0 + $0x1db] sm:$0xff] }
 0x259   :  { %17776 = vmatprep.mubr.msk.f32.mxu0 %vm286_vm1, %v2596_v49  ;;  %v3882_v49 = vld [vmem:[%s26570_s0 + $0x1e3] sm:$0xff] }
 0x25c   :  { %17777 = vmatmul.mubr.msk.f32.gmra.mrb[124].mxu0 %vm286_vm1, %v2597_v50  ;;  %v3883_v50 = vld [vmem:[%s26570_s0 + $0x1eb] sm:$0xff] }
 0x25d   :  { %17779 = vmatprep.mubr.msk.f32.mxu0 %vm286_vm1, %v2598_v51  ;;  %v3884_v51 = vld [vmem:[%s26570_s0 + $0x1f3] sm:$0xff] }
 0x260   :  { %17780 = vmatmul.mubr.msk.f32.gmra.mrb[126].mxu0 %vm286_vm1, %v2599_v52  ;;  %v3885_v52 = vld [vmem:[%s26570_s0 + $0x1fb] sm:$0xff] }
 0x261   :  { %17784 = vmatprep.mubr.msk.f32.mxu0 %vm286_vm1, %v3822_v53  ;;  %v3886_v53 = vld [vmem:[%s26570_s0 + $0x203] sm:$0xff] }
 0x264   :  { %17785 = vmatmul.mubr.msk.f32.vlgmr.msra.gmra.mrb[0].mxu0 %vm286_vm1, %v3823_v55  ;;  %v3887_v55 = vld [vmem:[%s26570_s0 + $0x20b] sm:$0xff] }
 0x265   :  { %17977 = vmatpush3.msk.msra.mxu0 %vm671_vm0, %v21532_v56  ;;  %17787 = vmatprep.mubr.msk.f32.mxu0 %vm286_vm1, %v3824_v57  ;;  %v3828_v56 = vld [vmem:[%s26570_s0 + $0x33] sm:$0xff] }
 0x266   :  { %v3888_v57 = vld [vmem:[%s26570_s0 + $0x213] sm:$0xff] }
 0x268   :  { %17788 = vmatmul.mubr.msk.f32.gmra.mrb[2].mxu0 %vm286_vm1, %v3825_v58  ;;  %v3889_v58 = vld [vmem:[%s26570_s0 + $0x21b] sm:$0xff] }
 0x269   :  { %17790 = vmatprep.mubr.msk.f32.mxu0 %vm286_vm1, %v3826_v54  ;;  %v3890_v54 = vld [vmem:[%s26570_s0 + $0x223] sm:$0xff] }
 0x26c   :  { %17791 = vmatmul.mubr.msk.f32.gmra.mrb[4].mxu0 %vm286_vm1, %v3827_v59  ;;  %v3891_v59 = vld [vmem:[%s26570_s0 + $0x22b] sm:$0xff] }
 0x26d   :  { %17793 = vmatprep.mubr.msk.f32.mxu0 %vm286_vm1, %v3828_v56  ;;  %v3892_v56 = vld [vmem:[%s26570_s0 + $0x233] sm:$0xff] }
 0x270   :  { %17794 = vmatmul.mubr.msk.f32.gmra.mrb[6].mxu0 %vm286_vm1, %v3829_v60  ;;  %v3893_v60 = vld [vmem:[%s26570_s0 + $0x23b] sm:$0xff] }
 0x271   :  { %17796 = vmatprep.mubr.msk.f32.mxu0 %vm286_vm1, %v3830_v61  ;;  %v3894_v61 = vld [vmem:[%s26570_s0 + $0x243] sm:$0xff] }
 0x274   :  { %17797 = vmatmul.mubr.msk.f32.gmra.mrb[8].mxu0 %vm286_vm1, %v3831_v62  ;;  %v3895_v62 = vld [vmem:[%s26570_s0 + $0x24b] sm:$0xff] }
 0x275   :  { %17799 = vmatprep.mubr.msk.f32.mxu0 %vm286_vm1, %v3832_v63  ;;  %v3896_v63 = vld [vmem:[%s26570_s0 + $0x253] sm:$0xff] }
 0x278   :  { %17800 = vmatmul.mubr.msk.f32.gmra.mrb[10].mxu0 %vm286_vm1, %v3833_v0  ;;  %v3897_v0 = vld [vmem:[%s26570_s0 + $0x25b] sm:$0xff] }
 0x279   :  { %17802 = vmatprep.mubr.msk.f32.mxu0 %vm286_vm1, %v3834_v1  ;;  %v3898_v1 = vld [vmem:[%s26570_s0 + $0x263] sm:$0xff] }
 0x27c   :  { %17803 = vmatmul.mubr.msk.f32.gmra.mrb[12].mxu0 %vm286_vm1, %v3835_v2  ;;  %v3899_v2 = vld [vmem:[%s26570_s0 + $0x26b] sm:$0xff] }
 0x27d   :  { %17805 = vmatprep.mubr.msk.f32.mxu0 %vm286_vm1, %v3836_v3  ;;  %v3900_v3 = vld [vmem:[%s26570_s0 + $0x273] sm:$0xff] }
 0x280   :  { %17806 = vmatmul.mubr.msk.f32.gmra.mrb[14].mxu0 %vm286_vm1, %v3837_v4  ;;  %v3901_v4 = vld [vmem:[%s26570_s0 + $0x27b] sm:$0xff] }
 0x281   :  { %17808 = vmatprep.mubr.msk.f32.mxu0 %vm286_vm1, %v3838_v5  ;;  %v3902_v5 = vld [vmem:[%s26570_s0 + $0x283] sm:$0xff] }
 0x284   :  { %17809 = vmatmul.mubr.msk.f32.gmra.mrb[16].mxu0 %vm286_vm1, %v3839_v6  ;;  %v3903_v6 = vld [vmem:[%s26570_s0 + $0x28b] sm:$0xff] }
 0x285   :  { %17811 = vmatprep.mubr.msk.f32.mxu0 %vm286_vm1, %v3840_v7  ;;  %v3904_v7 = vld [vmem:[%s26570_s0 + $0x293] sm:$0xff] }
 0x288   :  { %17812 = vmatmul.mubr.msk.f32.gmra.mrb[18].mxu0 %vm286_vm1, %v3841_v8  ;;  %v3905_v8 = vld [vmem:[%s26570_s0 + $0x29b] sm:$0xff] }
 0x289   :  { %17814 = vmatprep.mubr.msk.f32.mxu0 %vm286_vm1, %v3842_v9  ;;  %v3906_v9 = vld [vmem:[%s26570_s0 + $0x2a3] sm:$0xff] }
 0x28c   :  { %17815 = vmatmul.mubr.msk.f32.gmra.mrb[20].mxu0 %vm286_vm1, %v3843_v10  ;;  %v3907_v10 = vld [vmem:[%s26570_s0 + $0x2ab] sm:$0xff] }
 0x28d   :  { %17817 = vmatprep.mubr.msk.f32.mxu0 %vm286_vm1, %v3844_v11  ;;  %v3908_v11 = vld [vmem:[%s26570_s0 + $0x2b3] sm:$0xff] }
 0x290   :  { %17818 = vmatmul.mubr.msk.f32.gmra.mrb[22].mxu0 %vm286_vm1, %v3845_v12  ;;  %v3909_v12 = vld [vmem:[%s26570_s0 + $0x2bb] sm:$0xff] }
 0x291   :  { %17820 = vmatprep.mubr.msk.f32.mxu0 %vm286_vm1, %v3846_v13  ;;  %v3910_v13 = vld [vmem:[%s26570_s0 + $0x2c3] sm:$0xff] }
 0x294   :  { %17821 = vmatmul.mubr.msk.f32.gmra.mrb[24].mxu0 %vm286_vm1, %v3847_v14  ;;  %v3911_v14 = vld [vmem:[%s26570_s0 + $0x2cb] sm:$0xff] }
 0x295   :  { %17823 = vmatprep.mubr.msk.f32.mxu0 %vm286_vm1, %v3848_v15  ;;  %v3912_v15 = vld [vmem:[%s26570_s0 + $0x2d3] sm:$0xff] }
 0x298   :  { %17824 = vmatmul.mubr.msk.f32.gmra.mrb[26].mxu0 %vm286_vm1, %v3849_v16  ;;  %v3913_v16 = vld [vmem:[%s26570_s0 + $0x2db] sm:$0xff] }
 0x299   :  { %17826 = vmatprep.mubr.msk.f32.mxu0 %vm286_vm1, %v3850_v17  ;;  %v3914_v17 = vld [vmem:[%s26570_s0 + $0x2e3] sm:$0xff] }
 0x29c   :  { %17827 = vmatmul.mubr.msk.f32.gmra.mrb[28].mxu0 %vm286_vm1, %v3851_v18  ;;  %v3915_v18 = vld [vmem:[%s26570_s0 + $0x2eb] sm:$0xff] }
 0x29d   :  { %17829 = vmatprep.mubr.msk.f32.mxu0 %vm286_vm1, %v3852_v19  ;;  %v3916_v19 = vld [vmem:[%s26570_s0 + $0x2f3] sm:$0xff] }
 0x2a0   :  { %17830 = vmatmul.mubr.msk.f32.gmra.mrb[30].mxu0 %vm286_vm1, %v3853_v20  ;;  %v3917_v20 = vld [vmem:[%s26570_s0 + $0x2fb] sm:$0xff] }
 0x2a1   :  { %17832 = vmatprep.mubr.msk.f32.mxu0 %vm286_vm1, %v3854_v21  ;;  %v3918_v21 = vld [vmem:[%s26570_s0 + $0x303] sm:$0xff] }
 0x2a4   :  { %17833 = vmatmul.mubr.msk.f32.gmra.mrb[32].mxu0 %vm286_vm1, %v3855_v22  ;;  %v3919_v22 = vld [vmem:[%s26570_s0 + $0x30b] sm:$0xff] }
 0x2a5   :  { %17835 = vmatprep.mubr.msk.f32.mxu0 %vm286_vm1, %v3856_v23  ;;  %v3920_v23 = vld [vmem:[%s26570_s0 + $0x313] sm:$0xff] }
 0x2a8   :  { %17836 = vmatmul.mubr.msk.f32.gmra.mrb[34].mxu0 %vm286_vm1, %v3857_v24  ;;  %v3921_v24 = vld [vmem:[%s26570_s0 + $0x31b] sm:$0xff] }
 0x2a9   :  { %17838 = vmatprep.mubr.msk.f32.mxu0 %vm286_vm1, %v3858_v25  ;;  %v3922_v25 = vld [vmem:[%s26570_s0 + $0x323] sm:$0xff] }
 0x2ac   :  { %17839 = vmatmul.mubr.msk.f32.gmra.mrb[36].mxu0 %vm286_vm1, %v3859_v26  ;;  %v3923_v26 = vld [vmem:[%s26570_s0 + $0x32b] sm:$0xff] }
 0x2ad   :  { %17841 = vmatprep.mubr.msk.f32.mxu0 %vm286_vm1, %v3860_v27  ;;  %v3924_v27 = vld [vmem:[%s26570_s0 + $0x333] sm:$0xff] }
 0x2b0   :  { %17842 = vmatmul.mubr.msk.f32.gmra.mrb[38].mxu0 %vm286_vm1, %v3861_v28  ;;  %v3925_v28 = vld [vmem:[%s26570_s0 + $0x33b] sm:$0xff] }
 0x2b1   :  { %17844 = vmatprep.mubr.msk.f32.mxu0 %vm286_vm1, %v3862_v29  ;;  %v3926_v29 = vld [vmem:[%s26570_s0 + $0x343] sm:$0xff] }
 0x2b4   :  { %17845 = vmatmul.mubr.msk.f32.gmra.mrb[40].mxu0 %vm286_vm1, %v3863_v30  ;;  %v3927_v30 = vld [vmem:[%s26570_s0 + $0x34b] sm:$0xff] }
 0x2b5   :  { %17847 = vmatprep.mubr.msk.f32.mxu0 %vm286_vm1, %v3864_v31  ;;  %v3928_v31 = vld [vmem:[%s26570_s0 + $0x353] sm:$0xff] }
 0x2b8   :  { %17848 = vmatmul.mubr.msk.f32.gmra.mrb[42].mxu0 %vm286_vm1, %v3865_v32  ;;  %v3929_v32 = vld [vmem:[%s26570_s0 + $0x35b] sm:$0xff] }
 0x2b9   :  { %17850 = vmatprep.mubr.msk.f32.mxu0 %vm286_vm1, %v3866_v33  ;;  %v3930_v33 = vld [vmem:[%s26570_s0 + $0x363] sm:$0xff] }
 0x2bc   :  { %17851 = vmatmul.mubr.msk.f32.gmra.mrb[44].mxu0 %vm286_vm1, %v3867_v34  ;;  %v3931_v34 = vld [vmem:[%s26570_s0 + $0x36b] sm:$0xff] }
 0x2bd   :  { %17853 = vmatprep.mubr.msk.f32.mxu0 %vm286_vm1, %v3868_v35  ;;  %v3932_v35 = vld [vmem:[%s26570_s0 + $0x373] sm:$0xff] }
 0x2c0   :  { %17854 = vmatmul.mubr.msk.f32.gmra.mrb[46].mxu0 %vm286_vm1, %v3869_v36  ;;  %v3933_v36 = vld [vmem:[%s26570_s0 + $0x37b] sm:$0xff] }
 0x2c1   :  { %17856 = vmatprep.mubr.msk.f32.mxu0 %vm286_vm1, %v3870_v37  ;;  %v3934_v37 = vld [vmem:[%s26570_s0 + $0x383] sm:$0xff] }
 0x2c4   :  { %17857 = vmatmul.mubr.msk.f32.gmra.mrb[48].mxu0 %vm286_vm1, %v3871_v38  ;;  %v204_v38 = vld [vmem:[%s26570_s0 + $0x181] sm:$0xff] }
 0x2c5   :  { %17859 = vmatprep.mubr.msk.f32.mxu0 %vm286_vm1, %v3872_v39  ;;  %v3935_v39 = vld [vmem:[%s26570_s0 + $0x38b] sm:$0xff]  ;;  %17274 = vmatprep.mubr.msk.f32.mxu1 %vm286_vm1, %v204_v38  ;;  %v236_v38 = vld [vmem:[%s26570_s0 + $0x281] sm:$0xff] }
 0x2c8   :  { %17860 = vmatmul.mubr.msk.f32.gmra.mrb[50].mxu0 %vm286_vm1, %v3873_v40  ;;  %v205_v40 = vld [vmem:[%s26570_s0 + $0x189] sm:$0xff] }
 0x2c9   :  { %17862 = vmatprep.mubr.msk.f32.mxu0 %vm286_vm1, %v3874_v41  ;;  %v3936_v41 = vld [vmem:[%s26570_s0 + $0x393] sm:$0xff]  ;;  %17275 = vmatmul.mubr.msk.f32.vlgmr.msra.gmra.mrb[0].mxu1 %vm286_vm1, %v205_v40  ;;  %v237_v40 = vld [vmem:[%s26570_s0 + $0x289] sm:$0xff] }
 0x2cc   :  { %17863 = vmatmul.mubr.msk.f32.gmra.mrb[52].mxu0 %vm286_vm1, %v3875_v42  ;;  %v206_v42 = vld [vmem:[%s26570_s0 + $0x191] sm:$0xff] }
 0x2cd   :  { %17865 = vmatprep.mubr.msk.f32.mxu0 %vm286_vm1, %v3876_v43  ;;  %v3937_v43 = vld [vmem:[%s26570_s0 + $0x39b] sm:$0xff]  ;;  %17277 = vmatprep.mubr.msk.f32.mxu1 %vm286_vm1, %v206_v42  ;;  %v238_v42 = vld [vmem:[%s26570_s0 + $0x291] sm:$0xff] }
 0x2d0   :  { %17866 = vmatmul.mubr.msk.f32.gmra.mrb[54].mxu0 %vm286_vm1, %v3877_v44  ;;  %v207_v44 = vld [vmem:[%s26570_s0 + $0x199] sm:$0xff] }
 0x2d1   :  { %17868 = vmatprep.mubr.msk.f32.mxu0 %vm286_vm1, %v3878_v45  ;;  %v3938_v45 = vld [vmem:[%s26570_s0 + $0x3a3] sm:$0xff]  ;;  %17278 = vmatmul.mubr.msk.f32.gmra.mrb[2].mxu1 %vm286_vm1, %v207_v44  ;;  %v239_v44 = vld [vmem:[%s26570_s0 + $0x299] sm:$0xff] }
 0x2d4   :  { %17869 = vmatmul.mubr.msk.f32.gmra.mrb[56].mxu0 %vm286_vm1, %v3879_v46  ;;  %v208_v46 = vld [vmem:[%s26570_s0 + $0x1a1] sm:$0xff] }
 0x2d5   :  { %17871 = vmatprep.mubr.msk.f32.mxu0 %vm286_vm1, %v3880_v47  ;;  %v3939_v47 = vld [vmem:[%s26570_s0 + $0x3ab] sm:$0xff]  ;;  %17280 = vmatprep.mubr.msk.f32.mxu1 %vm286_vm1, %v208_v46  ;;  %v240_v46 = vld [vmem:[%s26570_s0 + $0x2a1] sm:$0xff] }
 0x2d8   :  { %17872 = vmatmul.mubr.msk.f32.gmra.mrb[58].mxu0 %vm286_vm1, %v3881_v48  ;;  %v209_v48 = vld [vmem:[%s26570_s0 + $0x1a9] sm:$0xff] }
 0x2d9   :  { %17874 = vmatprep.mubr.msk.f32.mxu0 %vm286_vm1, %v3882_v49  ;;  %v3940_v49 = vld [vmem:[%s26570_s0 + $0x3b3] sm:$0xff]  ;;  %17281 = vmatmul.mubr.msk.f32.gmra.mrb[4].mxu1 %vm286_vm1, %v209_v48  ;;  %v241_v48 = vld [vmem:[%s26570_s0 + $0x2a9] sm:$0xff] }
 0x2dc   :  { %17875 = vmatmul.mubr.msk.f32.gmra.mrb[60].mxu0 %vm286_vm1, %v3883_v50  ;;  %v210_v50 = vld [vmem:[%s26570_s0 + $0x1b1] sm:$0xff] }
 0x2dd   :  { %17877 = vmatprep.mubr.msk.f32.mxu0 %vm286_vm1, %v3884_v51  ;;  %v3941_v51 = vld [vmem:[%s26570_s0 + $0x3bb] sm:$0xff]  ;;  %17283 = vmatprep.mubr.msk.f32.mxu1 %vm286_vm1, %v210_v50  ;;  %v242_v50 = vld [vmem:[%s26570_s0 + $0x2b1] sm:$0xff] }
 0x2e0   :  { %17878 = vmatmul.mubr.msk.f32.gmra.mrb[62].mxu0 %vm286_vm1, %v3885_v52  ;;  %v211_v52 = vld [vmem:[%s26570_s0 + $0x1b9] sm:$0xff] }
 0x2e1   :  { %17880 = vmatprep.mubr.msk.f32.mxu0 %vm286_vm1, %v3886_v53  ;;  %v3942_v53 = vld [vmem:[%s26570_s0 + $0x3c3] sm:$0xff]  ;;  %17284 = vmatmul.mubr.msk.f32.gmra.mrb[6].mxu1 %vm286_vm1, %v211_v52  ;;  %v243_v52 = vld [vmem:[%s26570_s0 + $0x2b9] sm:$0xff] }
 0x2e4   :  { %17881 = vmatmul.mubr.msk.f32.gmra.mrb[64].mxu0 %vm286_vm1, %v3887_v55  ;;  %v212_v55 = vld [vmem:[%s26570_s0 + $0x1c1] sm:$0xff] }
 0x2e5   :  { %17883 = vmatprep.mubr.msk.f32.mxu0 %vm286_vm1, %v3888_v57  ;;  %v3943_v57 = vld [vmem:[%s26570_s0 + $0x3cb] sm:$0xff]  ;;  %17286 = vmatprep.mubr.msk.f32.mxu1 %vm286_vm1, %v212_v55  ;;  %v244_v55 = vld [vmem:[%s26570_s0 + $0x2c1] sm:$0xff] }
 0x2e8   :  { %17884 = vmatmul.mubr.msk.f32.gmra.mrb[66].mxu0 %vm286_vm1, %v3889_v58  ;;  %v213_v58 = vld [vmem:[%s26570_s0 + $0x1c9] sm:$0xff] }
 0x2e9   :  { %17886 = vmatprep.mubr.msk.f32.mxu0 %vm286_vm1, %v3890_v54  ;;  %v3944_v54 = vld [vmem:[%s26570_s0 + $0x3d3] sm:$0xff]  ;;  %17287 = vmatmul.mubr.msk.f32.gmra.mrb[8].mxu1 %vm286_vm1, %v213_v58  ;;  %v245_v58 = vld [vmem:[%s26570_s0 + $0x2c9] sm:$0xff] }
 0x2ec   :  { %17887 = vmatmul.mubr.msk.f32.gmra.mrb[68].mxu0 %vm286_vm1, %v3891_v59  ;;  %v214_v59 = vld [vmem:[%s26570_s0 + $0x1d1] sm:$0xff] }
 0x2ed   :  { %17889 = vmatprep.mubr.msk.f32.mxu0 %vm286_vm1, %v3892_v56  ;;  %v3945_v56 = vld [vmem:[%s26570_s0 + $0x3db] sm:$0xff]  ;;  %17289 = vmatprep.mubr.msk.f32.mxu1 %vm286_vm1, %v214_v59  ;;  %v246_v59 = vld [vmem:[%s26570_s0 + $0x2d1] sm:$0xff] }
 0x2f0   :  { %17890 = vmatmul.mubr.msk.f32.gmra.mrb[70].mxu0 %vm286_vm1, %v3893_v60  ;;  %v215_v60 = vld [vmem:[%s26570_s0 + $0x1d9] sm:$0xff] }
 0x2f1   :  { %17892 = vmatprep.mubr.msk.f32.mxu0 %vm286_vm1, %v3894_v61  ;;  %v3946_v61 = vld [vmem:[%s26570_s0 + $0x3e3] sm:$0xff]  ;;  %17290 = vmatmul.mubr.msk.f32.gmra.mrb[10].mxu1 %vm286_vm1, %v215_v60  ;;  %v247_v60 = vld [vmem:[%s26570_s0 + $0x2d9] sm:$0xff] }
 0x2f4   :  { %17893 = vmatmul.mubr.msk.f32.gmra.mrb[72].mxu0 %vm286_vm1, %v3895_v62  ;;  %v216_v62 = vld [vmem:[%s26570_s0 + $0x1e1] sm:$0xff] }
 0x2f5   :  { %17895 = vmatprep.mubr.msk.f32.mxu0 %vm286_vm1, %v3896_v63  ;;  %v3947_v63 = vld [vmem:[%s26570_s0 + $0x3eb] sm:$0xff]  ;;  %17292 = vmatprep.mubr.msk.f32.mxu1 %vm286_vm1, %v216_v62  ;;  %v248_v62 = vld [vmem:[%s26570_s0 + $0x2e1] sm:$0xff] }
 0x2f8   :  { %17896 = vmatmul.mubr.msk.f32.gmra.mrb[74].mxu0 %vm286_vm1, %v3897_v0  ;;  %v217_v0 = vld [vmem:[%s26570_s0 + $0x1e9] sm:$0xff] }
 0x2f9   :  { %17898 = vmatprep.mubr.msk.f32.mxu0 %vm286_vm1, %v3898_v1  ;;  %v3948_v1 = vld [vmem:[%s26570_s0 + $0x3f3] sm:$0xff]  ;;  %17293 = vmatmul.mubr.msk.f32.gmra.mrb[12].mxu1 %vm286_vm1, %v217_v0  ;;  %v249_v0 = vld [vmem:[%s26570_s0 + $0x2e9] sm:$0xff] }
 0x2fc   :  { %17899 = vmatmul.mubr.msk.f32.gmra.mrb[76].mxu0 %vm286_vm1, %v3899_v2  ;;  %v218_v2 = vld [vmem:[%s26570_s0 + $0x1f1] sm:$0xff] }
 0x2fd   :  { %17901 = vmatprep.mubr.msk.f32.mxu0 %vm286_vm1, %v3900_v3  ;;  %v3949_v3 = vld [vmem:[%s26570_s0 + $0x3fb] sm:$0xf]  ;;  %17295 = vmatprep.mubr.msk.f32.mxu1 %vm286_vm1, %v218_v2  ;;  %v250_v2 = vld [vmem:[%s26570_s0 + $0x2f1] sm:$0xff] }
 0x300   :  { %17902 = vmatmul.mubr.msk.f32.gmra.mrb[78].mxu0 %vm286_vm1, %v3901_v4  ;;  %v219_v4 = vld [vmem:[%s26570_s0 + $0x1f9] sm:$0xff] }
 0x301   :  { %17904 = vmatprep.mubr.msk.f32.mxu0 %vm286_vm1, %v3902_v5  ;;  %v5172_v5 = vld [vmem:[%s26570_s0 + $0x4] sm:$0xff]  ;;  %17296 = vmatmul.mubr.msk.f32.gmra.mrb[14].mxu1 %vm286_vm1, %v219_v4  ;;  %v251_v4 = vld [vmem:[%s26570_s0 + $0x2f9] sm:$0xff] }
 0x304   :  { %17905 = vmatmul.mubr.msk.f32.gmra.mrb[80].mxu0 %vm286_vm1, %v3903_v6  ;;  %v220_v6 = vld [vmem:[%s26570_s0 + $0x201] sm:$0xff] }
 0x305   :  { %17907 = vmatprep.mubr.msk.f32.mxu0 %vm286_vm1, %v3904_v7  ;;  %v5173_v7 = vld [vmem:[%s26570_s0 + $0xc] sm:$0xff]  ;;  %17298 = vmatprep.mubr.msk.f32.mxu1 %vm286_vm1, %v220_v6  ;;  %v252_v6 = vld [vmem:[%s26570_s0 + $0x301] sm:$0xff] }
 0x308   :  { %17908 = vmatmul.mubr.msk.f32.gmra.mrb[82].mxu0 %vm286_vm1, %v3905_v8  ;;  %v221_v8 = vld [vmem:[%s26570_s0 + $0x209] sm:$0xff] }
 0x309   :  { %17910 = vmatprep.mubr.msk.f32.mxu0 %vm286_vm1, %v3906_v9  ;;  %v5174_v9 = vld [vmem:[%s26570_s0 + $0x14] sm:$0xff]  ;;  %17299 = vmatmul.mubr.msk.f32.gmra.mrb[16].mxu1 %vm286_vm1, %v221_v8  ;;  %v253_v8 = vld [vmem:[%s26570_s0 + $0x309] sm:$0xff] }
 0x30c   :  { %17911 = vmatmul.mubr.msk.f32.gmra.mrb[84].mxu0 %vm286_vm1, %v3907_v10  ;;  %v222_v10 = vld [vmem:[%s26570_s0 + $0x211] sm:$0xff] }
 0x30d   :  { %17913 = vmatprep.mubr.msk.f32.mxu0 %vm286_vm1, %v3908_v11  ;;  %v5175_v11 = vld [vmem:[%s26570_s0 + $0x1c] sm:$0xff]  ;;  %17301 = vmatprep.mubr.msk.f32.mxu1 %vm286_vm1, %v222_v10  ;;  %v254_v10 = vld [vmem:[%s26570_s0 + $0x311] sm:$0xff] }
 0x310   :  { %17914 = vmatmul.mubr.msk.f32.gmra.mrb[86].mxu0 %vm286_vm1, %v3909_v12  ;;  %v223_v12 = vld [vmem:[%s26570_s0 + $0x219] sm:$0xff] }
 0x311   :  { %17916 = vmatprep.mubr.msk.f32.mxu0 %vm286_vm1, %v3910_v13  ;;  %v5176_v13 = vld [vmem:[%s26570_s0 + $0x24] sm:$0xff]  ;;  %17302 = vmatmul.mubr.msk.f32.gmra.mrb[18].mxu1 %vm286_vm1, %v223_v12  ;;  %v255_v12 = vld [vmem:[%s26570_s0 + $0x319] sm:$0xff] }
 0x314   :  { %17917 = vmatmul.mubr.msk.f32.gmra.mrb[88].mxu0 %vm286_vm1, %v3911_v14  ;;  %v224_v14 = vld [vmem:[%s26570_s0 + $0x221] sm:$0xff] }
 0x315   :  { %17919 = vmatprep.mubr.msk.f32.mxu0 %vm286_vm1, %v3912_v15  ;;  %v5177_v15 = vld [vmem:[%s26570_s0 + $0x2c] sm:$0xff]  ;;  %17304 = vmatprep.mubr.msk.f32.mxu1 %vm286_vm1, %v224_v14  ;;  %v256_v14 = vld [vmem:[%s26570_s0 + $0x321] sm:$0xff] }
 0x318   :  { %17920 = vmatmul.mubr.msk.f32.gmra.mrb[90].mxu0 %vm286_vm1, %v3913_v16  ;;  %v225_v16 = vld [vmem:[%s26570_s0 + $0x229] sm:$0xff] }
 0x319   :  { %17922 = vmatprep.mubr.msk.f32.mxu0 %vm286_vm1, %v3914_v17  ;;  %v5178_v17 = vld [vmem:[%s26570_s0 + $0x34] sm:$0xff]  ;;  %17305 = vmatmul.mubr.msk.f32.gmra.mrb[20].mxu1 %vm286_vm1, %v225_v16  ;;  %v257_v16 = vld [vmem:[%s26570_s0 + $0x329] sm:$0xff] }
 0x31c   :  { %17923 = vmatmul.mubr.msk.f32.gmra.mrb[92].mxu0 %vm286_vm1, %v3915_v18  ;;  %v226_v18 = vld [vmem:[%s26570_s0 + $0x231] sm:$0xff] }
 0x31d   :  { %17925 = vmatprep.mubr.msk.f32.mxu0 %vm286_vm1, %v3916_v19  ;;  %v5179_v19 = vld [vmem:[%s26570_s0 + $0x3c] sm:$0xff]  ;;  %17307 = vmatprep.mubr.msk.f32.mxu1 %vm286_vm1, %v226_v18  ;;  %v258_v18 = vld [vmem:[%s26570_s0 + $0x331] sm:$0xff] }
 0x320   :  { %17926 = vmatmul.mubr.msk.f32.gmra.mrb[94].mxu0 %vm286_vm1, %v3917_v20  ;;  %v227_v20 = vld [vmem:[%s26570_s0 + $0x239] sm:$0xff] }
 0x321   :  { %17928 = vmatprep.mubr.msk.f32.mxu0 %vm286_vm1, %v3918_v21  ;;  %v5180_v21 = vld [vmem:[%s26570_s0 + $0x44] sm:$0xff]  ;;  %17308 = vmatmul.mubr.msk.f32.gmra.mrb[22].mxu1 %vm286_vm1, %v227_v20  ;;  %v259_v20 = vld [vmem:[%s26570_s0 + $0x339] sm:$0xff] }
 0x324   :  { %17929 = vmatmul.mubr.msk.f32.gmra.mrb[96].mxu0 %vm286_vm1, %v3919_v22  ;;  %v228_v22 = vld [vmem:[%s26570_s0 + $0x241] sm:$0xff] }
 0x325   :  { %17931 = vmatprep.mubr.msk.f32.mxu0 %vm286_vm1, %v3920_v23  ;;  %v5181_v23 = vld [vmem:[%s26570_s0 + $0x4c] sm:$0xff]  ;;  %17310 = vmatprep.mubr.msk.f32.mxu1 %vm286_vm1, %v228_v22  ;;  %v260_v22 = vld [vmem:[%s26570_s0 + $0x341] sm:$0xff] }
 0x328   :  { %17932 = vmatmul.mubr.msk.f32.gmra.mrb[98].mxu0 %vm286_vm1, %v3921_v24  ;;  %v229_v24 = vld [vmem:[%s26570_s0 + $0x249] sm:$0xff] }
 0x329   :  { %17934 = vmatprep.mubr.msk.f32.mxu0 %vm286_vm1, %v3922_v25  ;;  %v5182_v25 = vld [vmem:[%s26570_s0 + $0x54] sm:$0xff]  ;;  %17311 = vmatmul.mubr.msk.f32.gmra.mrb[24].mxu1 %vm286_vm1, %v229_v24  ;;  %v261_v24 = vld [vmem:[%s26570_s0 + $0x349] sm:$0xff] }
 0x32c   :  { %17935 = vmatmul.mubr.msk.f32.gmra.mrb[100].mxu0 %vm286_vm1, %v3923_v26  ;;  %v230_v26 = vld [vmem:[%s26570_s0 + $0x251] sm:$0xff] }
 0x32d   :  { %17937 = vmatprep.mubr.msk.f32.mxu0 %vm286_vm1, %v3924_v27  ;;  %v5183_v27 = vld [vmem:[%s26570_s0 + $0x5c] sm:$0xff]  ;;  %17313 = vmatprep.mubr.msk.f32.mxu1 %vm286_vm1, %v230_v26  ;;  %v262_v26 = vld [vmem:[%s26570_s0 + $0x351] sm:$0xff] }
 0x330   :  { %17938 = vmatmul.mubr.msk.f32.gmra.mrb[102].mxu0 %vm286_vm1, %v3925_v28  ;;  %v231_v28 = vld [vmem:[%s26570_s0 + $0x259] sm:$0xff] }
 0x331   :  { %17940 = vmatprep.mubr.msk.f32.mxu0 %vm286_vm1, %v3926_v29  ;;  %v5184_v29 = vld [vmem:[%s26570_s0 + $0x64] sm:$0xff]  ;;  %17314 = vmatmul.mubr.msk.f32.gmra.mrb[26].mxu1 %vm286_vm1, %v231_v28 }
 0x332   :  { %v5216_v28 = vld [vmem:[%s26570_s0 + $0x164] sm:$0xff] }
 0x334   :  { %17941 = vmatmul.mubr.msk.f32.gmra.mrb[104].mxu0 %vm286_vm1, %v3927_v30  ;;  %v232_v30 = vld [vmem:[%s26570_s0 + $0x261] sm:$0xff] }
 0x335   :  { %17943 = vmatprep.mubr.msk.f32.mxu0 %vm286_vm1, %v3928_v31  ;;  %v5185_v31 = vld [vmem:[%s26570_s0 + $0x6c] sm:$0xff]  ;;  %17316 = vmatprep.mubr.msk.f32.mxu1 %vm286_vm1, %v232_v30 }
 0x336   :  { %v5217_v30 = vld [vmem:[%s26570_s0 + $0x16c] sm:$0xff] }
 0x338   :  { %17944 = vmatmul.mubr.msk.f32.gmra.mrb[106].mxu0 %vm286_vm1, %v3929_v32  ;;  %v233_v32 = vld [vmem:[%s26570_s0 + $0x269] sm:$0xff] }
 0x339   :  { %17946 = vmatprep.mubr.msk.f32.mxu0 %vm286_vm1, %v3930_v33  ;;  %v5186_v33 = vld [vmem:[%s26570_s0 + $0x74] sm:$0xff]  ;;  %17317 = vmatmul.mubr.msk.f32.gmra.mrb[28].mxu1 %vm286_vm1, %v233_v32 }
 0x33a   :  { %v5218_v32 = vld [vmem:[%s26570_s0 + $0x174] sm:$0xff] }
 0x33c   :  { %17947 = vmatmul.mubr.msk.f32.gmra.mrb[108].mxu0 %vm286_vm1, %v3931_v34  ;;  %v234_v34 = vld [vmem:[%s26570_s0 + $0x271] sm:$0xff] }
 0x33d   :  { %17949 = vmatprep.mubr.msk.f32.mxu0 %vm286_vm1, %v3932_v35  ;;  %v5187_v35 = vld [vmem:[%s26570_s0 + $0x7c] sm:$0xff]  ;;  %17319 = vmatprep.mubr.msk.f32.mxu1 %vm286_vm1, %v234_v34 }
 0x33e   :  { %v5219_v34 = vld [vmem:[%s26570_s0 + $0x17c] sm:$0xff] }
 0x340   :  { %17950 = vmatmul.mubr.msk.f32.gmra.mrb[110].mxu0 %vm286_vm1, %v3933_v36  ;;  %v235_v36 = vld [vmem:[%s26570_s0 + $0x279] sm:$0xff] }
 0x341   :  { %17952 = vmatprep.mubr.msk.f32.mxu0 %vm286_vm1, %v3934_v37  ;;  %v5188_v37 = vld [vmem:[%s26570_s0 + $0x84] sm:$0xff]  ;;  %17320 = vmatmul.mubr.msk.f32.gmra.mrb[30].mxu1 %vm286_vm1, %v235_v36 }
 0x342   :  { %17322 = vmatprep.mubr.msk.f32.mxu1 %vm286_vm1, %v236_v38  ;;  %v5220_v36 = vld [vmem:[%s26570_s0 + $0x184] sm:$0xff]  ;;  %v5221_v38 = vld [vmem:[%s26570_s0 + $0x18c] sm:$0xff] }
 0x344   :  { %17953 = vmatmul.mubr.msk.f32.gmra.mrb[112].mxu0 %vm286_vm1, %v3935_v39  ;;  %v5189_v39 = vld [vmem:[%s26570_s0 + $0x8c] sm:$0xff] }
 0x345   :  { %17955 = vmatprep.mubr.msk.f32.mxu0 %vm286_vm1, %v3936_v41  ;;  %v5190_v41 = vld [vmem:[%s26570_s0 + $0x94] sm:$0xff]  ;;  %17323 = vmatmul.mubr.msk.f32.gmra.mrb[32].mxu1 %vm286_vm1, %v237_v40 }
 0x346   :  { %17325 = vmatprep.mubr.msk.f32.mxu1 %vm286_vm1, %v238_v42  ;;  %v5222_v40 = vld [vmem:[%s26570_s0 + $0x194] sm:$0xff]  ;;  %v5223_v42 = vld [vmem:[%s26570_s0 + $0x19c] sm:$0xff] }
 0x348   :  { %17956 = vmatmul.mubr.msk.f32.gmra.mrb[114].mxu0 %vm286_vm1, %v3937_v43  ;;  %v5191_v43 = vld [vmem:[%s26570_s0 + $0x9c] sm:$0xff] }
 0x349   :  { %17958 = vmatprep.mubr.msk.f32.mxu0 %vm286_vm1, %v3938_v45  ;;  %v5192_v45 = vld [vmem:[%s26570_s0 + $0xa4] sm:$0xff]  ;;  %17326 = vmatmul.mubr.msk.f32.gmra.mrb[34].mxu1 %vm286_vm1, %v239_v44 }
 0x34a   :  { %17328 = vmatprep.mubr.msk.f32.mxu1 %vm286_vm1, %v240_v46  ;;  %v5224_v44 = vld [vmem:[%s26570_s0 + $0x1a4] sm:$0xff]  ;;  %v5225_v46 = vld [vmem:[%s26570_s0 + $0x1ac] sm:$0xff] }
 0x34c   :  { %17959 = vmatmul.mubr.msk.f32.gmra.mrb[116].mxu0 %vm286_vm1, %v3939_v47  ;;  %v5193_v47 = vld [vmem:[%s26570_s0 + $0xac] sm:$0xff] }
 0x34d   :  { %17961 = vmatprep.mubr.msk.f32.mxu0 %vm286_vm1, %v3940_v49  ;;  %v5194_v49 = vld [vmem:[%s26570_s0 + $0xb4] sm:$0xff]  ;;  %17329 = vmatmul.mubr.msk.f32.gmra.mrb[36].mxu1 %vm286_vm1, %v241_v48 }
 0x34e   :  { %17331 = vmatprep.mubr.msk.f32.mxu1 %vm286_vm1, %v242_v50  ;;  %v5226_v48 = vld [vmem:[%s26570_s0 + $0x1b4] sm:$0xff]  ;;  %v5227_v50 = vld [vmem:[%s26570_s0 + $0x1bc] sm:$0xff] }
 0x350   :  { %17962 = vmatmul.mubr.msk.f32.gmra.mrb[118].mxu0 %vm286_vm1, %v3941_v51  ;;  %v5195_v51 = vld [vmem:[%s26570_s0 + $0xbc] sm:$0xff] }
 0x351   :  { %17964 = vmatprep.mubr.msk.f32.mxu0 %vm286_vm1, %v3942_v53  ;;  %v5196_v53 = vld [vmem:[%s26570_s0 + $0xc4] sm:$0xff]  ;;  %17332 = vmatmul.mubr.msk.f32.gmra.mrb[38].mxu1 %vm286_vm1, %v243_v52  ;;  %v274_v52 = vld [vmem:[%s26570_s0 + $0x3b1] sm:$0xff] }
 0x352   :  { %17334 = vmatprep.mubr.msk.f32.mxu1 %vm286_vm1, %v244_v55  ;;  %v5229_v55 = vld [vmem:[%s26570_s0 + $0x1cc] sm:$0xff] }
 0x354   :  { %17965 = vmatmul.mubr.msk.f32.gmra.mrb[120].mxu0 %vm286_vm1, %v3943_v57  ;;  %v5197_v57 = vld [vmem:[%s26570_s0 + $0xcc] sm:$0xff] }
 0x355   :  { %17967 = vmatprep.mubr.msk.f32.mxu0 %vm286_vm1, %v3944_v54  ;;  %v5198_v54 = vld [vmem:[%s26570_s0 + $0xd4] sm:$0xff]  ;;  %17335 = vmatmul.mubr.msk.f32.gmra.mrb[40].mxu1 %vm286_vm1, %v245_v58  ;;  %v276_v58 = vld [vmem:[%s26570_s0 + $0x3c1] sm:$0xff] }
 0x356   :  { %17337 = vmatprep.mubr.msk.f32.mxu1 %vm286_vm1, %v246_v59  ;;  %v5231_v59 = vld [vmem:[%s26570_s0 + $0x1dc] sm:$0xff] }
 0x358   :  { %17968 = vmatmul.mubr.msk.f32.gmra.mrb[122].mxu0 %vm286_vm1, %v3945_v56  ;;  %v5199_v56 = vld [vmem:[%s26570_s0 + $0xdc] sm:$0xff] }
 0x359   :  { %17970 = vmatprep.mubr.msk.f32.mxu0 %vm286_vm1, %v3946_v61  ;;  %v5200_v61 = vld [vmem:[%s26570_s0 + $0xe4] sm:$0xff]  ;;  %17338 = vmatmul.mubr.msk.f32.gmra.mrb[42].mxu1 %vm286_vm1, %v247_v60  ;;  %v278_v60 = vld [vmem:[%s26570_s0 + $0x3d1] sm:$0xff] }
 0x35a   :  { %17340 = vmatprep.mubr.msk.f32.mxu1 %vm286_vm1, %v248_v62  ;;  %v279_v62 = vld [vmem:[%s26570_s0 + $0x3d9] sm:$0xff] }
 0x35c   :  { %17971 = vmatmul.mubr.msk.f32.gmra.mrb[124].mxu0 %vm286_vm1, %v3947_v63  ;;  %v5201_v63 = vld [vmem:[%s26570_s0 + $0xec] sm:$0xff] }
 0x35d   :  { %17973 = vmatprep.mubr.msk.f32.mxu0 %vm286_vm1, %v3948_v1  ;;  %v5202_v1 = vld [vmem:[%s26570_s0 + $0xf4] sm:$0xff]  ;;  %17341 = vmatmul.mubr.msk.f32.gmra.mrb[44].mxu1 %vm286_vm1, %v249_v0  ;;  %v280_v0 = vld [vmem:[%s26570_s0 + $0x3e1] sm:$0xff] }
 0x35e   :  { %17343 = vmatprep.mubr.msk.f32.mxu1 %vm286_vm1, %v250_v2  ;;  %v281_v2 = vld [vmem:[%s26570_s0 + $0x3e9] sm:$0xff] }
 0x360   :  { %17974 = vmatmul.mubr.msk.f32.gmra.mrb[126].mxu0 %vm286_vm1, %v3949_v3  ;;  %v5203_v3 = vld [vmem:[%s26570_s0 + $0xfc] sm:$0xff] }
 0x361   :  { %17978 = vmatprep.mubr.msk.f32.mxu0 %vm286_vm1, %v5172_v5  ;;  %v5204_v5 = vld [vmem:[%s26570_s0 + $0x104] sm:$0xff]  ;;  %17344 = vmatmul.mubr.msk.f32.gmra.mrb[46].mxu1 %vm286_vm1, %v251_v4 }
 0x362   :  { %17346 = vmatprep.mubr.msk.f32.mxu1 %vm286_vm1, %v252_v6  ;;  %v15386_v4 = vld [vmem:[%s26572_s2 + $0x20] sm:$0xff] }
 0x364   :  { %17979 = vmatmul.mubr.msk.f32.vlgmr.msra.gmra.mrb[0].mxu0 %vm286_vm1, %v5173_v7  ;;  %v5205_v7 = vld [vmem:[%s26570_s0 + $0x10c] sm:$0xff] }
 0x365   :  { %17981 = vmatprep.mubr.msk.f32.mxu0 %vm286_vm1, %v5174_v9  ;;  %v5206_v9 = vld [vmem:[%s26570_s0 + $0x114] sm:$0xff]  ;;  %17347 = vmatmul.mubr.msk.f32.gmra.mrb[48].mxu1 %vm286_vm1, %v253_v8  ;;  %v5237_v8 = vld [vmem:[%s26570_s0 + $0x20c] sm:$0xff] }
 0x366   :  { %17349 = vmatprep.mubr.msk.f32.mxu1 %vm286_vm1, %v254_v10  ;;  %v5238_v10 = vld [vmem:[%s26570_s0 + $0x214] sm:$0xff] }
 0x368   :  { %17982 = vmatmul.mubr.msk.f32.gmra.mrb[2].mxu0 %vm286_vm1, %v5175_v11  ;;  %v5207_v11 = vld [vmem:[%s26570_s0 + $0x11c] sm:$0xff] }
 0x369   :  { %17984 = vmatprep.mubr.msk.f32.mxu0 %vm286_vm1, %v5176_v13  ;;  %v5208_v13 = vld [vmem:[%s26570_s0 + $0x124] sm:$0xff]  ;;  %17350 = vmatmul.mubr.msk.f32.gmra.mrb[50].mxu1 %vm286_vm1, %v255_v12  ;;  %v15388_v12 = vld [vmem:[%s26572_s2 + $0x30] sm:$0xff] }
 0x36a   :  { %17352 = vmatprep.mubr.msk.f32.mxu1 %vm286_vm1, %v256_v14  ;;  %v5240_v14 = vld [vmem:[%s26570_s0 + $0x224] sm:$0xff] }
 0x36c   :  { %17985 = vmatmul.mubr.msk.f32.gmra.mrb[4].mxu0 %vm286_vm1, %v5177_v15  ;;  %v5209_v15 = vld [vmem:[%s26570_s0 + $0x12c] sm:$0xff] }
 0x36d   :  { %17987 = vmatprep.mubr.msk.f32.mxu0 %vm286_vm1, %v5178_v17  ;;  %v5210_v17 = vld [vmem:[%s26570_s0 + $0x134] sm:$0xff]  ;;  %17353 = vmatmul.mubr.msk.f32.gmra.mrb[52].mxu1 %vm286_vm1, %v257_v16  ;;  %v26578_v16 = vmov 0 }
 0x36e   :  { %17355 = vmatprep.mubr.msk.f32.mxu1 %vm286_vm1, %v258_v18  ;;  %v26579_v16 = vsel %vm22901_vm4, 4294967295, %v26578_v16  ;;  %v5242_v18 = vld [vmem:[%s26570_s0 + $0x234] sm:$0xff] }
 0x36f   :  { %26580 = vst [vmem:[#allocation10_spill] sm:$0xff] %v26579_v16 }
 0x370   :  { %17988 = vmatmul.mubr.msk.f32.gmra.mrb[6].mxu0 %vm286_vm1, %v5179_v19  ;;  %v5211_v19 = vld [vmem:[%s26570_s0 + $0x13c] sm:$0xff] }
 0x371   :  { %17990 = vmatprep.mubr.msk.f32.mxu0 %vm286_vm1, %v5180_v21  ;;  %v5212_v21 = vld [vmem:[%s26570_s0 + $0x144] sm:$0xff]  ;;  %17356 = vmatmul.mubr.msk.f32.gmra.mrb[54].mxu1 %vm286_vm1, %v259_v20 }
 0x372   :  { %17358 = vmatprep.mubr.msk.f32.mxu1 %vm286_vm1, %v260_v22  ;;  %v5244_v20 = vld [vmem:[%s26570_s0 + $0x244] sm:$0xff]  ;;  %v5246_v22 = vld [vmem:[%s26570_s0 + $0x254] sm:$0xff] }
 0x374   :  { %17991 = vmatmul.mubr.msk.f32.gmra.mrb[8].mxu0 %vm286_vm1, %v5181_v23  ;;  %v5213_v23 = vld [vmem:[%s26570_s0 + $0x14c] sm:$0xff] }
 0x375   :  { %17993 = vmatprep.mubr.msk.f32.mxu0 %vm286_vm1, %v5182_v25  ;;  %v5214_v25 = vld [vmem:[%s26570_s0 + $0x154] sm:$0xff]  ;;  %17359 = vmatmul.mubr.msk.f32.gmra.mrb[56].mxu1 %vm286_vm1, %v261_v24  ;;  %v5248_v24 = vld [vmem:[%s26570_s0 + $0x264] sm:$0xff] }
 0x376   :  { %17361 = vmatprep.mubr.msk.f32.mxu1 %vm286_vm1, %v262_v26  ;;  %v5250_v26 = vld [vmem:[%s26570_s0 + $0x274] sm:$0xff] }
 0x378   :  { %17994 = vmatmul.mubr.msk.f32.gmra.mrb[10].mxu0 %vm286_vm1, %v5183_v27  ;;  %v5215_v27 = vld [vmem:[%s26570_s0 + $0x15c] sm:$0xff] }
 0x379   :  { %17996 = vmatprep.mubr.msk.f32.mxu0 %vm286_vm1, %v5184_v29  ;;  %v263_v29 = vld [vmem:[%s26570_s0 + $0x359] sm:$0xff] }
 0x37a   :  { %17362 = vmatmul.mubr.msk.f32.gmra.mrb[58].mxu1 %vm286_vm1, %v263_v29  ;;  %v5253_v29 = vld [vmem:[%s26570_s0 + $0x28c] sm:$0xff] }
 0x37c   :  { %17997 = vmatmul.mubr.msk.f32.gmra.mrb[12].mxu0 %vm286_vm1, %v5185_v31  ;;  %v264_v31 = vld [vmem:[%s26570_s0 + $0x361] sm:$0xff] }
 0x37d   :  { %17999 = vmatprep.mubr.msk.f32.mxu0 %vm286_vm1, %v5186_v33  ;;  %17364 = vmatprep.mubr.msk.f32.mxu1 %vm286_vm1, %v264_v31  ;;  %v265_v33 = vld [vmem:[%s26570_s0 + $0x369] sm:$0xff]  ;;  %v5255_v31 = vld [vmem:[%s26570_s0 + $0x29c] sm:$0xff] }
 0x37e   :  { %17365 = vmatmul.mubr.msk.f32.gmra.mrb[60].mxu1 %vm286_vm1, %v265_v33  ;;  %v5257_v33 = vld [vmem:[%s26570_s0 + $0x2ac] sm:$0xff] }
 0x380   :  { %18000 = vmatmul.mubr.msk.f32.gmra.mrb[14].mxu0 %vm286_vm1, %v5187_v35  ;;  %v266_v35 = vld [vmem:[%s26570_s0 + $0x371] sm:$0xff] }
 0x381   :  { %18002 = vmatprep.mubr.msk.f32.mxu0 %vm286_vm1, %v5188_v37  ;;  %17367 = vmatprep.mubr.msk.f32.mxu1 %vm286_vm1, %v266_v35  ;;  %v267_v37 = vld [vmem:[%s26570_s0 + $0x379] sm:$0xff] }
 0x382   :  { %17368 = vmatmul.mubr.msk.f32.gmra.mrb[62].mxu1 %vm286_vm1, %v267_v37  ;;  %v5259_v35 = vld [vmem:[%s26570_s0 + $0x2bc] sm:$0xff]  ;;  %v5261_v37 = vld [vmem:[%s26570_s0 + $0x2cc] sm:$0xff] }
 0x384   :  { %18003 = vmatmul.mubr.msk.f32.gmra.mrb[16].mxu0 %vm286_vm1, %v5189_v39  ;;  %v268_v39 = vld [vmem:[%s26570_s0 + $0x381] sm:$0xff] }
 0x385   :  { %18005 = vmatprep.mubr.msk.f32.mxu0 %vm286_vm1, %v5190_v41  ;;  %17370 = vmatprep.mubr.msk.f32.mxu1 %vm286_vm1, %v268_v39  ;;  %v269_v41 = vld [vmem:[%s26570_s0 + $0x389] sm:$0xff]  ;;  %v5263_v39 = vld [vmem:[%s26570_s0 + $0x2dc] sm:$0xff] }
 0x386   :  { %17371 = vmatmul.mubr.msk.f32.gmra.mrb[64].mxu1 %vm286_vm1, %v269_v41  ;;  %v5265_v41 = vld [vmem:[%s26570_s0 + $0x2ec] sm:$0xff] }
 0x388   :  { %18006 = vmatmul.mubr.msk.f32.gmra.mrb[18].mxu0 %vm286_vm1, %v5191_v43  ;;  %v270_v43 = vld [vmem:[%s26570_s0 + $0x391] sm:$0xff] }
 0x389   :  { %18008 = vmatprep.mubr.msk.f32.mxu0 %vm286_vm1, %v5192_v45  ;;  %17373 = vmatprep.mubr.msk.f32.mxu1 %vm286_vm1, %v270_v43  ;;  %v271_v45 = vld [vmem:[%s26570_s0 + $0x399] sm:$0xff] }
 0x38a   :  { %17374 = vmatmul.mubr.msk.f32.gmra.mrb[66].mxu1 %vm286_vm1, %v271_v45  ;;  %v5267_v43 = vld [vmem:[%s26570_s0 + $0x2fc] sm:$0xff]  ;;  %v5269_v45 = vld [vmem:[%s26570_s0 + $0x30c] sm:$0xff] }
 0x38c   :  { %18009 = vmatmul.mubr.msk.f32.gmra.mrb[20].mxu0 %vm286_vm1, %v5193_v47  ;;  %v272_v47 = vld [vmem:[%s26570_s0 + $0x3a1] sm:$0xff] }
 0x38d   :  { %18011 = vmatprep.mubr.msk.f32.mxu0 %vm286_vm1, %v5194_v49  ;;  %17376 = vmatprep.mubr.msk.f32.mxu1 %vm286_vm1, %v272_v47  ;;  %v273_v49 = vld [vmem:[%s26570_s0 + $0x3a9] sm:$0xff]  ;;  %v5271_v47 = vld [vmem:[%s26570_s0 + $0x31c] sm:$0xff] }
 0x38e   :  { %17377 = vmatmul.mubr.msk.f32.gmra.mrb[68].mxu1 %vm286_vm1, %v273_v49 }
 0x38f   :  { %17379 = vmatprep.mubr.msk.f32.mxu1 %vm286_vm1, %v274_v52  ;;  %v5274_v52 = vld [vmem:[%s26570_s0 + $0x334] sm:$0xff] }
 0x390   :  { %18012 = vmatmul.mubr.msk.f32.gmra.mrb[22].mxu0 %vm286_vm1, %v5195_v51  ;;  %v5228_v51 = vld [vmem:[%s26570_s0 + $0x1c4] sm:$0xff] }
 0x391   :  { %18014 = vmatprep.mubr.msk.f32.mxu0 %vm286_vm1, %v5196_v53  ;;  %v275_v53 = vld [vmem:[%s26570_s0 + $0x3b9] sm:$0xff] }
 0x392   :  { %17380 = vmatmul.mubr.msk.f32.gmra.mrb[70].mxu1 %vm286_vm1, %v275_v53 }
 0x393   :  { %17382 = vmatprep.mubr.msk.f32.mxu1 %vm286_vm1, %v276_v58  ;;  %v5276_v58 = vld [vmem:[%s26570_s0 + $0x344] sm:$0xff] }
 0x394   :  { %18015 = vmatmul.mubr.msk.f32.gmra.mrb[24].mxu0 %vm286_vm1, %v5197_v57  ;;  %v5230_v57 = vld [vmem:[%s26570_s0 + $0x1d4] sm:$0xff] }
 0x395   :  { %18017 = vmatprep.mubr.msk.f32.mxu0 %vm286_vm1, %v5198_v54  ;;  %v277_v54 = vld [vmem:[%s26570_s0 + $0x3c9] sm:$0xff] }
 0x396   :  { %17383 = vmatmul.mubr.msk.f32.gmra.mrb[72].mxu1 %vm286_vm1, %v277_v54 }
 0x397   :  { %17385 = vmatprep.mubr.msk.f32.mxu1 %vm286_vm1, %v278_v60  ;;  %v5278_v60 = vld [vmem:[%s26570_s0 + $0x354] sm:$0xff] }
 0x398   :  { %18018 = vmatmul.mubr.msk.f32.gmra.mrb[26].mxu0 %vm286_vm1, %v5199_v56  ;;  %v5232_v56 = vld [vmem:[%s26570_s0 + $0x1e4] sm:$0xff] }
 0x399   :  { %18020 = vmatprep.mubr.msk.f32.mxu0 %vm286_vm1, %v5200_v61  ;;  %v5233_v61 = vld [vmem:[%s26570_s0 + $0x1ec] sm:$0xff] }
 0x39a   :  { %17386 = vmatmul.mubr.msk.f32.gmra.mrb[74].mxu1 %vm286_vm1, %v279_v62  ;;  %v5279_v62 = vld [vmem:[%s26570_s0 + $0x35c] sm:$0xff] }
 0x39b   :  { %17388 = vmatprep.mubr.msk.f32.mxu1 %vm286_vm1, %v280_v0 }
 0x39c   :  { %18021 = vmatmul.mubr.msk.f32.gmra.mrb[28].mxu0 %vm286_vm1, %v5201_v63  ;;  %v5234_v63 = vld [vmem:[%s26570_s0 + $0x1f4] sm:$0xff]  ;;  %v23037_v49 = vpop.f32.mrb[0].mxu1 }
 0x39d   :  { %18023 = vmatprep.mubr.msk.f32.mxu0 %vm286_vm1, %v5202_v1  ;;  %v5235_v1 = vld [vmem:[%s26570_s0 + $0x1fc] sm:$0xff] }
 0x39e   :  { %17389 = vmatmul.mubr.msk.f32.gmra.mrb[76].mxu1 %vm286_vm1, %v281_v2 }
 0x3a0   :  { %18024 = vmatmul.mubr.msk.f32.gmra.mrb[30].mxu0 %vm286_vm1, %v5203_v3  ;;  %v5236_v3 = vld [vmem:[%s26570_s0 + $0x204] sm:$0xff] }
 0x3a1   :  { %18026 = vmatprep.mubr.msk.f32.mxu0 %vm286_vm1, %v5204_v5  ;;  %v15387_v5 = vld [vmem:[%s26572_s2 + $0x28] sm:$0xff] }
 0x3a2   :  { %v19000_v6 = vpack.c.bf16 %v15387_v5, %v15386_v4 }
 0x3a4   :  { %18027 = vmatmul.mubr.msk.f32.gmra.mrb[32].mxu0 %vm286_vm1, %v5205_v7  ;;  %v282_v7 = vld [vmem:[%s26570_s0 + $0x3f1] sm:$0xff]  ;;  %19001 = vmatprep.subr.bf16.mxu1 %v19000_v6 }
 0x3a5   :  { %18029 = vmatprep.mubr.msk.f32.mxu0 %vm286_vm1, %v5206_v9  ;;  %v283_v9 = vld [vmem:[%s26570_s0 + $0x3f9] sm:$0xf]  ;;  %19003 = vmatpush3.bf16.msra.mxu1 %v19000_v6 }
 0x3a6   :  { %17391 = vmatprep.mubr.msk.f32.mxu1 %vm286_vm1, %v282_v7  ;;  %v5281_v7 = vld [vmem:[%s26570_s0 + $0x36c] sm:$0xff] }
 0x3a7   :  { %17392 = vmatmul.mubr.msk.f32.gmra.mrb[78].mxu1 %vm286_vm1, %v283_v9  ;;  %v5282_v9 = vld [vmem:[%s26570_s0 + $0x374] sm:$0xff] }
 0x3a8   :  { %18030 = vmatmul.mubr.msk.f32.gmra.mrb[34].mxu0 %vm286_vm1, %v5207_v11  ;;  %v5239_v11 = vld [vmem:[%s26570_s0 + $0x21c] sm:$0xff] }
 0x3a9   :  { %18032 = vmatprep.mubr.msk.f32.mxu0 %vm286_vm1, %v5208_v13  ;;  %v15389_v13 = vld [vmem:[%s26572_s2 + $0x38] sm:$0x1] }
 0x3ac   :  { %18033 = vmatmul.mubr.msk.f32.gmra.mrb[36].mxu0 %vm286_vm1, %v5209_v15  ;;  %v19004_v15 = vpack.c.bf16 %v15389_v13, %v15388_v12 }
 0x3ad   :  { %18035 = vmatprep.mubr.msk.f32.mxu0 %vm286_vm1, %v5210_v17  ;;  %v5241_v17 = vld [vmem:[%s26570_s0 + $0x22c] sm:$0xff] }
 0x3ae   :  { %19006 = vmatprep.subr.msk.bf16.mxu1 %vm22901_vm4, %v19004_v15 }
 0x3af   :  { %19009 = vmatpush3.bf16.msk.msra.mxu1 %vm22901_vm4, %v19004_v15 }
 0x3b0   :  { %18036 = vmatmul.mubr.msk.f32.gmra.mrb[38].mxu0 %vm286_vm1, %v5211_v19  ;;  %v5243_v19 = vld [vmem:[%s26570_s0 + $0x23c] sm:$0xff] }
 0x3b1   :  { %18038 = vmatprep.mubr.msk.f32.mxu0 %vm286_vm1, %v5212_v21  ;;  %v5245_v21 = vld [vmem:[%s26570_s0 + $0x24c] sm:$0xff] }
 0x3b4   :  { %18039 = vmatmul.mubr.msk.f32.gmra.mrb[40].mxu0 %vm286_vm1, %v5213_v23  ;;  %v5247_v23 = vld [vmem:[%s26570_s0 + $0x25c] sm:$0xff] }
 0x3b5   :  { %18041 = vmatprep.mubr.msk.f32.mxu0 %vm286_vm1, %v5214_v25  ;;  %v5249_v25 = vld [vmem:[%s26570_s0 + $0x26c] sm:$0xff] }
 0x3b8   :  { %18042 = vmatmul.mubr.msk.f32.gmra.mrb[42].mxu0 %vm286_vm1, %v5215_v27  ;;  %v5251_v27 = vld [vmem:[%s26570_s0 + $0x27c] sm:$0xff] }
 0x3b9   :  { %18044 = vmatprep.mubr.msk.f32.mxu0 %vm286_vm1, %v5216_v28  ;;  %v5252_v28 = vld [vmem:[%s26570_s0 + $0x284] sm:$0xff] }
 0x3bc   :  { %18045 = vmatmul.mubr.msk.f32.gmra.mrb[44].mxu0 %vm286_vm1, %v5217_v30  ;;  %v5254_v30 = vld [vmem:[%s26570_s0 + $0x294] sm:$0xff] }
 0x3bd   :  { %18047 = vmatprep.mubr.msk.f32.mxu0 %vm286_vm1, %v5218_v32  ;;  %v5256_v32 = vld [vmem:[%s26570_s0 + $0x2a4] sm:$0xff] }
 0x3c0   :  { %18048 = vmatmul.mubr.msk.f32.gmra.mrb[46].mxu0 %vm286_vm1, %v5219_v34  ;;  %v5258_v34 = vld [vmem:[%s26570_s0 + $0x2b4] sm:$0xff] }
 0x3c1   :  { %18050 = vmatprep.mubr.msk.f32.mxu0 %vm286_vm1, %v5220_v36  ;;  %v5260_v36 = vld [vmem:[%s26570_s0 + $0x2c4] sm:$0xff] }
 0x3c4   :  { %18051 = vmatmul.mubr.msk.f32.gmra.mrb[48].mxu0 %vm286_vm1, %v5221_v38  ;;  %v5262_v38 = vld [vmem:[%s26570_s0 + $0x2d4] sm:$0xff] }
 0x3c5   :  { %18053 = vmatprep.mubr.msk.f32.mxu0 %vm286_vm1, %v5222_v40  ;;  %v5264_v40 = vld [vmem:[%s26570_s0 + $0x2e4] sm:$0xff] }
 0x3c8   :  { %18054 = vmatmul.mubr.msk.f32.gmra.mrb[50].mxu0 %vm286_vm1, %v5223_v42  ;;  %v5266_v42 = vld [vmem:[%s26570_s0 + $0x2f4] sm:$0xff] }
 0x3c9   :  { %18056 = vmatprep.mubr.msk.f32.mxu0 %vm286_vm1, %v5224_v44  ;;  %v5268_v44 = vld [vmem:[%s26570_s0 + $0x304] sm:$0xff] }
 0x3cc   :  { %18057 = vmatmul.mubr.msk.f32.gmra.mrb[52].mxu0 %vm286_vm1, %v5225_v46  ;;  %v5270_v46 = vld [vmem:[%s26570_s0 + $0x314] sm:$0xff] }
 0x3cd   :  { %18059 = vmatprep.mubr.msk.f32.mxu0 %vm286_vm1, %v5226_v48  ;;  %v5272_v48 = vld [vmem:[%s26570_s0 + $0x324] sm:$0xff] }
 0x3d0   :  { %18060 = vmatmul.mubr.msk.f32.gmra.mrb[54].mxu0 %vm286_vm1, %v5227_v50  ;;  %v23039_v50 = vpop.f32.mrb[1].mxu1 }
 0x3d1   :  { %18062 = vmatprep.mubr.msk.f32.mxu0 %vm286_vm1, %v5228_v51  ;;  %v5273_v51 = vld [vmem:[%s26570_s0 + $0x32c] sm:$0xff]  ;;  %v23049_v53 = vpop.f32.mrb[2].mxu1 }
 0x3d4   :  { %18063 = vmatmul.mubr.msk.f32.gmra.mrb[56].mxu0 %vm286_vm1, %v5229_v55  ;;  %v23052_v55 = vpop.f32.mrb[3].mxu1 }
 0x3d5   :  { %18065 = vmatprep.mubr.msk.f32.mxu0 %vm286_vm1, %v5230_v57  ;;  %v5275_v57 = vld [vmem:[%s26570_s0 + $0x33c] sm:$0xff]  ;;  %v23061_v54 = vpop.f32.mrb[4].mxu1 }
 0x3d8   :  { %18066 = vmatmul.mubr.msk.f32.gmra.mrb[58].mxu0 %vm286_vm1, %v5231_v59  ;;  %v23064_v59 = vpop.f32.mrb[5].mxu1 }
 0x3d9   :  { %18068 = vmatprep.mubr.msk.f32.mxu0 %vm286_vm1, %v5232_v56  ;;  %v5277_v56 = vld [vmem:[%s26570_s0 + $0x34c] sm:$0xff]  ;;  %v23086_v0 = vpop.f32.mrb[6].mxu1 }
 0x3dc   :  { %18069 = vmatmul.mubr.msk.f32.gmra.mrb[60].mxu0 %vm286_vm1, %v5233_v61  ;;  %v23077_v61 = vld [vmem:[%s26574_s4] ss:$0 sm:$0xff] }
 0x3dd   :  { %18071 = vmatprep.mubr.msk.f32.mxu0 %vm286_vm1, %v5234_v63  ;;  %v5280_v63 = vld [vmem:[%s26570_s0 + $0x364] sm:$0xff] }
 0x3e0   :  { %18072 = vmatmul.mubr.msk.f32.gmra.mrb[62].mxu0 %vm286_vm1, %v5235_v1  ;;  %v23091_v1 = vld [vmem:[%s26574_s4 + $0x1] ss:$0 sm:$0xff] }
 0x3e1   :  { %18074 = vmatprep.mubr.msk.f32.mxu0 %vm286_vm1, %v5236_v3  ;;  %v23093_v3 = vpop.f32.mrb[7].mxu1 }
 0x3e4   :  { %18075 = vmatmul.mubr.msk.f32.gmra.mrb[64].mxu0 %vm286_vm1, %v5237_v8 }
 0x3e5   :  { %18077 = vmatprep.mubr.msk.f32.mxu0 %vm286_vm1, %v5238_v10  ;;  %v23108_v10 = vpop.f32.mrb[8].mxu1 }
 0x3e6   :  { %v23113_v13 = vpop.f32.mrb[9].mxu1 }
 0x3e8   :  { %18078 = vmatmul.mubr.msk.f32.gmra.mrb[66].mxu0 %vm286_vm1, %v5239_v11 }
 0x3e9   :  { %18080 = vmatprep.mubr.msk.f32.mxu0 %vm286_vm1, %v5240_v14 }
 0x3ec   :  { %18081 = vmatmul.mubr.msk.f32.gmra.mrb[68].mxu0 %vm286_vm1, %v5241_v17 }
 0x3ed   :  { %18083 = vmatprep.mubr.msk.f32.mxu0 %vm286_vm1, %v5242_v18 }
 0x3f0   :  { %18084 = vmatmul.mubr.msk.f32.gmra.mrb[70].mxu0 %vm286_vm1, %v5243_v19 }
 0x3f1   :  { %18086 = vmatprep.mubr.msk.f32.mxu0 %vm286_vm1, %v5244_v20  ;;  %v5283_v20 = vld [vmem:[%s26570_s0 + $0x37c] sm:$0xff] }
 0x3f4   :  { %18087 = vmatmul.mubr.msk.f32.gmra.mrb[72].mxu0 %vm286_vm1, %v5245_v21 }
 0x3f5   :  { %18089 = vmatprep.mubr.msk.f32.mxu0 %vm286_vm1, %v5246_v22 }
 0x3f8   :  { %18090 = vmatmul.mubr.msk.f32.gmra.mrb[74].mxu0 %vm286_vm1, %v5247_v23  ;;  %v5284_v23 = vld [vmem:[%s26570_s0 + $0x384] sm:$0xff] }
 0x3f9   :  { %18092 = vmatprep.mubr.msk.f32.mxu0 %vm286_vm1, %v5248_v24  ;;  %v23130_v24 = vpop.f32.mrb[10].mxu1 }
 0x3fc   :  { %18093 = vmatmul.mubr.msk.f32.gmra.mrb[76].mxu0 %vm286_vm1, %v5249_v25 }
 0x3fd   :  { %18095 = vmatprep.mubr.msk.f32.mxu0 %vm286_vm1, %v5250_v26 }
 0x400   :  { %18096 = vmatmul.mubr.msk.f32.gmra.mrb[78].mxu0 %vm286_vm1, %v5251_v27 }
 0x401   :  { %18098 = vmatprep.mubr.msk.f32.mxu0 %vm286_vm1, %v5252_v28  ;;  %v23135_v28 = vpop.f32.mrb[11].mxu1 }
 0x404   :  { %18099 = vmatmul.mubr.msk.f32.gmra.mrb[80].mxu0 %vm286_vm1, %v5253_v29 }
 0x405   :  { %18101 = vmatprep.mubr.msk.f32.mxu0 %vm286_vm1, %v5254_v30 }
 0x408   :  { %18102 = vmatmul.mubr.msk.f32.gmra.mrb[82].mxu0 %vm286_vm1, %v5255_v31 }
 0x409   :  { %18104 = vmatprep.mubr.msk.f32.mxu0 %vm286_vm1, %v5256_v32 }
 0x40c   :  { %18105 = vmatmul.mubr.msk.f32.gmra.mrb[84].mxu0 %vm286_vm1, %v5257_v33 }
 0x40d   :  { %18107 = vmatprep.mubr.msk.f32.mxu0 %vm286_vm1, %v5258_v34  ;;  %v5285_v34 = vld [vmem:[%s26570_s0 + $0x38c] sm:$0xff] }
 0x410   :  { %18108 = vmatmul.mubr.msk.f32.gmra.mrb[86].mxu0 %vm286_vm1, %v5259_v35 }
 0x411   :  { %18110 = vmatprep.mubr.msk.f32.mxu0 %vm286_vm1, %v5260_v36 }
 0x414   :  { %18111 = vmatmul.mubr.msk.f32.gmra.mrb[88].mxu0 %vm286_vm1, %v5261_v37  ;;  %v5286_v37 = vld [vmem:[%s26570_s0 + $0x394] sm:$0xff] }
 0x415   :  { %18113 = vmatprep.mubr.msk.f32.mxu0 %vm286_vm1, %v5262_v38  ;;  %v23152_v38 = vpop.f32.mrb[12].mxu1 }
 0x418   :  { %18114 = vmatmul.mubr.msk.f32.gmra.mrb[90].mxu0 %vm286_vm1, %v5263_v39 }
 0x419   :  { %18116 = vmatprep.mubr.msk.f32.mxu0 %vm286_vm1, %v5264_v40 }
 0x41c   :  { %18117 = vmatmul.mubr.msk.f32.gmra.mrb[92].mxu0 %vm286_vm1, %v5265_v41 }
 0x41d   :  { %18119 = vmatprep.mubr.msk.f32.mxu0 %vm286_vm1, %v5266_v42  ;;  %v23157_v42 = vpop.f32.mrb[13].mxu1 }
 0x420   :  { %18120 = vmatmul.mubr.msk.f32.gmra.mrb[94].mxu0 %vm286_vm1, %v5267_v43 }
 0x421   :  { %18122 = vmatprep.mubr.msk.f32.mxu0 %vm286_vm1, %v5268_v44 }
 0x424   :  { %18123 = vmatmul.mubr.msk.f32.gmra.mrb[96].mxu0 %vm286_vm1, %v5269_v45 }
 0x425   :  { %18125 = vmatprep.mubr.msk.f32.mxu0 %vm286_vm1, %v5270_v46 }
 0x428   :  { %18126 = vmatmul.mubr.msk.f32.gmra.mrb[98].mxu0 %vm286_vm1, %v5271_v47 }
 0x429   :  { %18128 = vmatprep.mubr.msk.f32.mxu0 %vm286_vm1, %v5272_v48  ;;  %v5287_v48 = vld [vmem:[%s26570_s0 + $0x39c] sm:$0xff] }
 0x42c   :  { %18129 = vmatmul.mubr.msk.f32.gmra.mrb[100].mxu0 %vm286_vm1, %v5273_v51 }
 0x42d   :  { %18131 = vmatprep.mubr.msk.f32.mxu0 %vm286_vm1, %v5274_v52 }
 0x430   :  { %18132 = vmatmul.mubr.msk.f32.gmra.mrb[102].mxu0 %vm286_vm1, %v5275_v57  ;;  %v5288_v57 = vld [vmem:[%s26570_s0 + $0x3a4] sm:$0xff] }
 0x431   :  { %18134 = vmatprep.mubr.msk.f32.mxu0 %vm286_vm1, %v5276_v58 }
 0x434   :  { %18135 = vmatmul.mubr.msk.f32.gmra.mrb[104].mxu0 %vm286_vm1, %v5277_v56 }
 0x435   :  { %18137 = vmatprep.mubr.msk.f32.mxu0 %vm286_vm1, %v5278_v60 }
 0x437   :  { %v17980_v2 = vpop.f32.mrb[0].mxu0 }
 0x438   :  { %v6527_v4 = vmul.f32 %v17980_v2, %v23077_v61  ;;  %v5755_v5 = vpop.f32.mrb[1].mxu0  ;;  %18138 = vmatmul.mubr.msk.f32.gmra.mrb[106].mxu0 %vm286_vm1, %v5279_v62  ;;  %v23177_v62 = vpop.f32.mrb[14].mxu1 }
 0x439   :  { %v6526_v6 = vmul.f32 %v23077_v61, %v5755_v5  ;;  %18140 = vmatprep.mubr.msk.f32.mxu0 %vm286_vm1, %v5280_v63  ;;  %v23182_v5 = vpop.f32.mrb[15].mxu1 }
 0x43a   :  { %v23103_v8 = vadd.f32 %v23091_v1, %v6527_v4 }
 0x43b   :  { %v23111_v11 = vadd.f32 %v23091_v1, %v6526_v6  ;;  %v17983_v12 = vpop.f32.mrb[2].mxu0 }
 0x43c   :  { %v6915_v14 = vmin.f32 %v23103_v8, 0.0  ;;  %v6529_v15 = vmul.f32 %v17983_v12, %v23077_v61  ;;  %v5765_v17 = vpop.f32.mrb[3].mxu0  ;;  %18141 = vmatmul.mubr.msk.f32.gmra.mrb[108].mxu0 %vm286_vm1, %v5281_v7  ;;  %vm6787_vm6 = vcmp.gt.f32.partialorder %v23103_v8, 0.0 }
 0x43d   :  { %v6914_v18 = vmin.f32 %v23111_v11, 0.0  ;;  %v6528_v19 = vmul.f32 %v23077_v61, %v5765_v17  ;;  %18143 = vmatprep.mubr.msk.f32.mxu0 %vm286_vm1, %v5282_v9  ;;  %v5289_v9 = vld [vmem:[%s26570_s0 + $0x3ac] sm:$0xff]  ;;  %v5290_v17 = vld [vmem:[%s26570_s0 + $0x3b4] sm:$0xff]  ;;  %vm6786_vm7 = vcmp.gt.f32.partialorder %v23111_v11, 0.0 }
 0x43e   :  { %v7044_v21 = vmul.f32 1.442695, %v6915_v14  ;;  %v23125_v22 = vadd.f32 %v23091_v1, %v6529_v15 }
 0x43f   :  { %v7042_v25 = vmul.f32 1.442695, %v6914_v18  ;;  %v23133_v26 = vadd.f32 %v23091_v1, %v6528_v19  ;;  %v17986_v27 = vpop.f32.mrb[4].mxu0 }
 0x440   :  { %20013 = vpow2.f32 %v7044_v21  ;;  %v6917_v29 = vmin.f32 %v23125_v22, 0.0  ;;  %v6531_v30 = vmul.f32 %v17986_v27, %v23077_v61  ;;  %v5775_v31 = vpop.f32.mrb[5].mxu0  ;;  %18144 = vmatmul.mubr.msk.f32.gmra.mrb[110].mxu0 %vm286_vm1, %v5283_v20  ;;  %vm6789_vm8 = vcmp.gt.f32.partialorder %v23125_v22, 0.0 }
 0x441   :  { %20015 = vpow2.f32 %v7042_v25  ;;  %v6916_v32 = vmin.f32 %v23133_v26, 0.0  ;;  %v6530_v33 = vmul.f32 %v23077_v61, %v5775_v31  ;;  %18146 = vmatprep.mubr.msk.f32.mxu0 %vm286_vm1, %v5284_v23  ;;  %v23199_v25 = vpop.f32.mrb[16].mxu1  ;;  %vm6788_vm9 = vcmp.gt.f32.partialorder %v23133_v26, 0.0 }
 0x442   :  { %v7048_v35 = vmul.f32 1.442695, %v6917_v29  ;;  %v23147_v36 = vadd.f32 %v23091_v1, %v6531_v30  ;;  %v23204_v31 = vpop.f32.mrb[17].mxu1 }
 0x443   :  { %v7046_v39 = vmul.f32 1.442695, %v6916_v32  ;;  %v23155_v40 = vadd.f32 %v23091_v1, %v6530_v33  ;;  %v17989_v41 = vpop.f32.mrb[6].mxu0 }
 0x444   :  { %20017 = vpow2.f32 %v7048_v35  ;;  %v6919_v43 = vmin.f32 %v23147_v36, 0.0  ;;  %v6533_v44 = vmul.f32 %v17989_v41, %v23077_v61  ;;  %v5785_v45 = vpop.f32.mrb[7].mxu0  ;;  %18147 = vmatmul.mubr.msk.f32.gmra.mrb[112].mxu0 %vm286_vm1, %v5285_v34  ;;  %v5291_v34 = vld [vmem:[%s26570_s0 + $0x3bc] sm:$0xff]  ;;  %vm6791_vm10 = vcmp.gt.f32.partialorder %v23147_v36, 0.0 }
 0x445   :  { %20019 = vpow2.f32 %v7046_v39  ;;  %v6918_v46 = vmin.f32 %v23155_v40, 0.0  ;;  %v6532_v47 = vmul.f32 %v23077_v61, %v5785_v45  ;;  %18149 = vmatprep.mubr.msk.f32.mxu0 %vm286_vm1, %v5286_v37  ;;  %vm6790_vm11 = vcmp.gt.f32.partialorder %v23155_v40, 0.0 }
 0x446   :  { %v7052_v51 = vmul.f32 1.442695, %v6919_v43  ;;  %v23169_v52 = vadd.f32 %v23091_v1, %v6533_v44  ;;  %v5292_v43 = vld [vmem:[%s26570_s0 + $0x3c4] sm:$0xff] }
 0x447   :  { %v7050_v58 = vmul.f32 1.442695, %v6918_v46  ;;  %v23175_v56 = vadd.f32 %v23091_v1, %v6532_v47  ;;  %v17992_v60 = vpop.f32.mrb[8].mxu0 }
 0x448   :  { %20021 = vpow2.f32 %v7052_v51  ;;  %v6921_v63 = vmin.f32 %v23169_v52, 0.0  ;;  %v6535_v2 = vmul.f32 %v17992_v60, %v23077_v61  ;;  %v5795_v4 = vpop.f32.mrb[9].mxu0  ;;  %18150 = vmatmul.mubr.msk.f32.gmra.mrb[114].mxu0 %vm286_vm1, %v5287_v48  ;;  %vm6793_vm12 = vcmp.gt.f32.partialorder %v23169_v52, 0.0 }
 0x449   :  { %20023 = vpow2.f32 %v7050_v58  ;;  %v6920_v6 = vmin.f32 %v23175_v56, 0.0  ;;  %v6534_v7 = vmul.f32 %v23077_v61, %v5795_v4  ;;  %18152 = vmatprep.mubr.msk.f32.mxu0 %vm286_vm1, %v5288_v57  ;;  %v23237_v4 = vpop.f32.mrb[18].mxu1  ;;  %vm6792_vm13 = vcmp.gt.f32.partialorder %v23175_v56, 0.0 }
 0x44a   :  { %v20014_v12 = vpop.eup %20013  ;;  %v7056_v14 = vmul.f32 1.442695, %v6921_v63  ;;  %v23191_v15 = vadd.f32 %v23091_v1, %v6535_v2  ;;  %v5293_v2 = vld [vmem:[%s26570_s0 + $0x3cc] sm:$0xff] }
 0x44b   :  { %v20016_v18 = vpop.eup %20015  ;;  %v15259_v19 = vadd.f32 -1.0, %v20014_v12  ;;  %v7054_v20 = vmul.f32 1.442695, %v6920_v6  ;;  %v23197_v21 = vadd.f32 %v23091_v1, %v6534_v7  ;;  %v17995_v23 = vpop.f32.mrb[10].mxu0 }
 0x44c   :  { %v15258_v27 = vadd.f32 -1.0, %v20016_v18  ;;  %20025 = vpow2.f32 %v7056_v14  ;;  %v6923_v29 = vmin.f32 %v23191_v15, 0.0  ;;  %v5805_v30 = vpop.f32.mrb[11].mxu0  ;;  %18153 = vmatmul.mubr.msk.f32.gmra.mrb[116].mxu0 %vm286_vm1, %v5289_v9  ;;  %v6537_v41 = vmul.f32 %v17995_v23, %v23077_v61  ;;  %v5294_v9 = vld [vmem:[%s26570_s0 + $0x3d4] sm:$0xff]  ;;  %v23249_v12 = vpop.f32.mrb[19].mxu1 }
 0x44d   :  { %v7427_v32 = vsel %vm6787_vm6, %v23103_v8, %v15259_v19  ;;  %20027 = vpow2.f32 %v7054_v20  ;;  %v6922_v33 = vmin.f32 %v23197_v21, 0.0  ;;  %18155 = vmatprep.mubr.msk.f32.mxu0 %vm286_vm1, %v5290_v17  ;;  %v6536_v8 = vmul.f32 %v23077_v61, %v5805_v30 }
 0x44e   :  { %v20018_v35 = vpop.eup %20017  ;;  %7556 = vst.msk [vmem:[#allocation2 + $0x8] sm:$0xff] %vm7554_vm5, %v7427_v32  ;;  %v7426_v37 = vsel %vm6786_vm7, %v23111_v11, %v15258_v27  ;;  %v7060_v39 = vmul.f32 1.442695, %v6923_v29  ;;  %v23224_v48 = vadd.f32 %v23091_v1, %v6537_v41  ;;  %vm6795_vm14 = vcmp.gt.f32.partialorder %v23191_v15, 0.0 }
 0x44f   :  { %v20020_v44 = vpop.eup %20019  ;;  %7555 = vst.msk [vmem:[#allocation2] sm:$0xff] %vm7554_vm5, %v7426_v37  ;;  %v15261_v45 = vadd.f32 -1.0, %v20018_v35  ;;  %v7058_v46 = vmul.f32 1.442695, %v6922_v33  ;;  %v17998_v47 = vpop.f32.mrb[12].mxu0  ;;  %v23227_v51 = vadd.f32 %v23091_v1, %v6536_v8  ;;  %v5295_v35 = vld [vmem:[%s26570_s0 + $0x3dc] sm:$0xff] }
 0x450   :  { %v15260_v11 = vadd.f32 -1.0, %v20020_v44  ;;  %20029 = vpow2.f32 %v7060_v39  ;;  %v5815_v57 = vpop.f32.mrb[13].mxu0  ;;  %18156 = vmatmul.mubr.msk.f32.gmra.mrb[118].mxu0 %vm286_vm1, %v5291_v34  ;;  %v6539_v60 = vmul.f32 %v17998_v47, %v23077_v61  ;;  %v6925_v7 = vmin.f32 %v23224_v48, 0.0  ;;  %v23271_v37 = vpop.f32.mrb[20].mxu1  ;;  %v5296_v8 = vld [vmem:[%s26570_s0 + $0x3e4] sm:$0xff] }
 0x451   :  { %v7429_v58 = vsel %vm6789_vm8, %v23125_v22, %v15261_v45  ;;  %20031 = vpow2.f32 %v7058_v46  ;;  %v6538_v63 = vmul.f32 %v23077_v61, %v5815_v57  ;;  %18158 = vmatprep.mubr.msk.f32.mxu0 %vm286_vm1, %v5292_v43  ;;  %v6924_v18 = vmin.f32 %v23227_v51, 0.0 }
 0x452   :  { %v20022_v6 = vpop.eup %20021  ;;  %7558 = vst.msk [vmem:[#allocation2 + $0x18] sm:$0xff] %vm7554_vm5, %v7429_v58  ;;  %v7428_v22 = vsel %vm6788_vm9, %v23133_v26, %v15260_v11  ;;  %v23254_v26 = vadd.f32 %v23091_v1, %v6539_v60  ;;  %v7064_v27 = vmul.f32 1.442695, %v6925_v7  ;;  %v23286_v11 = vpop.f32.mrb[21].mxu1  ;;  %vm6794_vm15 = vcmp.gt.f32.partialorder %v23197_v21, 0.0 }
 0x453   :  { %v20024_v14 = vpop.eup %20023  ;;  %7557 = vst.msk [vmem:[#allocation2 + $0x10] sm:$0xff] %vm7554_vm5, %v7428_v22  ;;  %v15263_v17 = vadd.f32 -1.0, %v20022_v6  ;;  %v23257_v19 = vadd.f32 %v23091_v1, %v6538_v63  ;;  %v18001_v20 = vpop.f32.mrb[14].mxu0  ;;  %v7062_v33 = vmul.f32 1.442695, %v6924_v18  ;;  %vm6797_vm0 = vcmp.gt.f32.partialorder %v23224_v48, 0.0 }
 0x454   :  { %v15262_v23 = vadd.f32 -1.0, %v20024_v14  ;;  %v6541_v29 = vmul.f32 %v18001_v20, %v23077_v61  ;;  %v5825_v30 = vpop.f32.mrb[15].mxu0  ;;  %18159 = vmatmul.mubr.msk.f32.gmra.mrb[120].mxu0 %vm286_vm1, %v5293_v2  ;;  %v6927_v34 = vmin.f32 %v23254_v26, 0.0  ;;  %20033 = vpow2.f32 %v7064_v27  ;;  %v23300_v14 = vpop.f32.mrb[22].mxu1 }
 0x455   :  { %v7431_v32 = vsel %vm6791_vm10, %v23147_v36, %v15263_v17  ;;  %18161 = vmatprep.mubr.msk.f32.mxu0 %vm286_vm1, %v5294_v9  ;;  %v6926_v41 = vmin.f32 %v23257_v19, 0.0  ;;  %20035 = vpow2.f32 %v7062_v33  ;;  %v6540_v60 = vmul.f32 %v23077_v61, %v5825_v30  ;;  %v5297_v9 = vld [vmem:[%s26570_s0 + $0x3ec] sm:$0xff] }
 0x456   :  { %v20026_v39 = vpop.eup %20025  ;;  %7560 = vst.msk [vmem:[#allocation2 + $0x28] sm:$0xff] %vm7554_vm5, %v7431_v32  ;;  %v7430_v36 = vsel %vm6790_vm11, %v23155_v40, %v15262_v23  ;;  %v7685_v43 = vld [vmem:[#allocation2] ss:$2 sm:$0xff]  ;;  %v7068_v46 = vmul.f32 1.442695, %v6927_v34  ;;  %v23284_v47 = vadd.f32 %v23091_v1, %v6541_v29  ;;  %v5298_v23 = vld [vmem:[%s26570_s0 + $0x3f4] sm:$0xff] }
 0x457   :  { %v20028_v44 = vpop.eup %20027  ;;  %7559 = vst.msk [vmem:[#allocation2 + $0x20] sm:$0xff] %vm7554_vm5, %v7430_v36  ;;  %v15265_v45 = vadd.f32 -1.0, %v20026_v39  ;;  %v18004_v40 = vpop.f32.mrb[16].mxu0  ;;  %v7066_v58 = vmul.f32 1.442695, %v6926_v41  ;;  %v23307_v18 = vadd.f32 %v23091_v1, %v6540_v60  ;;  %vm6796_vm2 = vcmp.gt.f32.partialorder %v23227_v51, 0.0 }
 0x458   :  { %v15264_v57 = vadd.f32 -1.0, %v20028_v44  ;;  %v6543_v63 = vmul.f32 %v18004_v40, %v23077_v61  ;;  %v5835_v2 = vpop.f32.mrb[17].mxu0  ;;  %18162 = vmatmul.mubr.msk.f32.gmra.mrb[122].mxu0 %vm286_vm1, %v5295_v35  ;;  %v7813_v6 = vld [vmem:[#allocation2 + $0x1] ss:$2 sm:$0xff]  ;;  %20037 = vpow2.f32 %v7068_v46  ;;  %v6929_v7 = vmin.f32 %v23284_v47, 0.0  ;;  %v23317_v34 = vpop.f32.mrb[23].mxu1 }
 0x459   :  { %v7433_v22 = vsel %vm6793_vm12, %v23169_v52, %v15265_v45  ;;  %18164 = vmatprep.mubr.msk.f32.mxu0 %vm286_vm1, %v5296_v8  ;;  %20039 = vpow2.f32 %v7066_v58  ;;  %v6542_v32 = vmul.f32 %v23077_v61, %v5835_v2  ;;  %v6928_v39 = vmin.f32 %v23307_v18, 0.0  ;;  %v5299_v44 = vld [vmem:[%s26570_s0 + $0x3fc] sm:$0xf] }
 0x45a   :  { %v20030_v17 = vpop.eup %20029  ;;  %7562 = vst.msk [vmem:[#allocation2 + $0x38] sm:$0xff] %vm7554_vm5, %v7433_v22  ;;  %v7432_v52 = vsel %vm6792_vm13, %v23175_v56, %v15264_v57  ;;  %v23310_v20 = vadd.f32 %v23091_v1, %v6543_v63  ;;  %v7072_v30 = vmul.f32 1.442695, %v6929_v7  ;;  %v7940_v56 = vmax.f32 %v7685_v43, %v7813_v6  ;;  %v23344_v22 = vpop.f32.mrb[24].mxu1 }
 0x45b   :  { %v20032_v27 = vpop.eup %20031  ;;  %7561 = vst.msk [vmem:[#allocation2 + $0x30] sm:$0xff] %vm7554_vm5, %v7432_v52  ;;  %v15267_v29 = vadd.f32 -1.0, %v20030_v17  ;;  %v18007_v33 = vpop.f32.mrb[18].mxu0  ;;  %v23328_v43 = vadd.f32 %v23091_v1, %v6542_v32  ;;  %v7070_v40 = vmul.f32 1.442695, %v6928_v39  ;;  %vm6799_vm3 = vcmp.gt.f32.partialorder %v23254_v26, 0.0 }
 0x45c   :  { %v15266_v35 = vadd.f32 -1.0, %v20032_v27  ;;  %v5845_v36 = vpop.f32.mrb[19].mxu0  ;;  %18165 = vmatmul.mubr.msk.f32.gmra.mrb[124].mxu0 %vm286_vm1, %v5297_v9  ;;  %20041 = vpow2.f32 %v7072_v30  ;;  %v6931_v8 = vmin.f32 %v23310_v20, 0.0  ;;  %8004 = vst.msk [vmem:[#allocation3] sm:$0xff] %vm7554_vm5, %v7940_v56  ;;  %v6545_v57 = vmul.f32 %v18007_v33, %v23077_v61 }
 0x45d   :  { %v7435_v41 = vsel %vm6795_vm14, %v23191_v15, %v15267_v29  ;;  %18167 = vmatprep.mubr.msk.f32.mxu0 %vm286_vm1, %v5298_v23  ;;  %v6544_v58 = vmul.f32 %v23077_v61, %v5845_v36  ;;  %v6930_v2 = vmin.f32 %v23328_v43, 0.0  ;;  %20043 = vpow2.f32 %v7070_v40  ;;  %v23354_v23 = vpop.f32.mrb[25].mxu1 }
 0x45e   :  { %v7689_v45 = vld [vmem:[#allocation2 + $0x20] ss:$2 sm:$0xff]  ;;  %v7817_v46 = vld [vmem:[#allocation2 + $0x21] ss:$2 sm:$0xff]  ;;  %7564 = vst.msk [vmem:[#allocation2 + $0x48] sm:$0xff] %vm7554_vm5, %v7435_v41  ;;  %v7434_v15 = vsel %vm6794_vm15, %v23197_v21, %v15266_v35  ;;  %v20034_v7 = vpop.eup %20033  ;;  %v23347_v21 = vadd.f32 %v23091_v1, %v6545_v57  ;;  %vm6798_vm6 = vcmp.gt.f32.partialorder %v23257_v19, 0.0 }
 0x45f   :  { %v7942_v60 = vmax.f32 %v7689_v45, %v7817_v46  ;;  %7563 = vst.msk [vmem:[#allocation2 + $0x40] sm:$0xff] %vm7554_vm5, %v7434_v15  ;;  %v7076_v63 = vmul.f32 1.442695, %v6931_v8  ;;  %v18010_v6 = vpop.f32.mrb[20].mxu0  ;;  %v23350_v9 = vadd.f32 %v23091_v1, %v6544_v58  ;;  %v20036_v27 = vpop.eup %20035  ;;  %v15269_v29 = vadd.f32 -1.0, %v20034_v7 }
 0x460   :  { %v6547_v17 = vmul.f32 %v18010_v6, %v23077_v61  ;;  %v5855_v52 = vpop.f32.mrb[21].mxu0  ;;  %18168 = vmatmul.mubr.msk.f32.gmra.mrb[126].mxu0 %vm286_vm1, %v5299_v44  ;;  %v7074_v30 = vmul.f32 1.442695, %v6930_v2  ;;  %v15268_v33 = vadd.f32 -1.0, %v20036_v27  ;;  %vm6801_vm7 = vcmp.gt.f32.partialorder %v23284_v47, 0.0  ;;  %v23368_v46 = vpop.f32.mrb[26].mxu1 }
 0x461   :  { %8006 = vst.msk [vmem:[#allocation3 + $0x10] sm:$0xff] %vm7554_vm5, %v7942_v60  ;;  %20045 = vpow2.f32 %v7076_v63  ;;  %v6546_v32 = vmul.f32 %v23077_v61, %v5855_v52  ;;  %v6933_v56 = vmin.f32 %v23347_v21, 0.0  ;;  %v7437_v39 = vsel %vm6797_vm0, %v23224_v48, %v15269_v29  ;;  %v7687_v44 = vld [vmem:[#allocation2 + $0x10] ss:$2 sm:$0xff]  ;;  %v7815_v45 = vld [vmem:[#allocation2 + $0x11] ss:$2 sm:$0xff] }
 0x462   :  { %v20038_v35 = vpop.eup %20037  ;;  %20047 = vpow2.f32 %v7074_v30  ;;  %v6932_v36 = vmin.f32 %v23350_v9, 0.0  ;;  %v23366_v41 = vadd.f32 %v23091_v1, %v6547_v17  ;;  %7566 = vst.msk [vmem:[#allocation2 + $0x58] sm:$0xff] %vm7554_vm5, %v7437_v39  ;;  %v7436_v40 = vsel %vm6796_vm2, %v23227_v51, %v15268_v33  ;;  %v23377_v63 = vpop.f32.mrb[27].mxu1  ;;  %v7691_v52 = vld [vmem:[#allocation2 + $0x30] ss:$2 sm:$0xff] }
 0x463   :  { %v18013_v8 = vpop.f32.mrb[22].mxu0  ;;  %v20040_v15 = vpop.eup %20039  ;;  %v15271_v57 = vadd.f32 -1.0, %v20038_v35  ;;  %v7080_v48 = vmul.f32 1.442695, %v6933_v56  ;;  %v23375_v58 = vadd.f32 %v23091_v1, %v6546_v32  ;;  %7565 = vst.msk [vmem:[#allocation2 + $0x50] sm:$0xff] %vm7554_vm5, %v7436_v40  ;;  %vm6800_vm1 = vcmp.gt.f32.partialorder %v23307_v18, 0.0 }
 0x464   :  { %v5865_v60 = vpop.f32.mrb[23].mxu0  ;;  %v15270_v2 = vadd.f32 -1.0, %v20040_v15  ;;  %v7078_v6 = vmul.f32 1.442695, %v6932_v36  ;;  %v6935_v7 = vmin.f32 %v23366_v41, 0.0  ;;  %vm6803_vm8 = vcmp.gt.f32.partialorder %v23310_v20, 0.0 }
 0x465   :  { %v7439_v51 = vsel %vm6799_vm3, %v23254_v26, %v15271_v57  ;;  %20049 = vpow2.f32 %v7080_v48  ;;  %v6934_v17 = vmin.f32 %v23375_v58, 0.0  ;;  %v6549_v32 = vmul.f32 %v18013_v8, %v23077_v61  ;;  %v7819_v56 = vld [vmem:[#allocation2 + $0x31] ss:$2 sm:$0xff]  ;;  %v23392_v26 = vpop.f32.mrb[28].mxu1 }
 0x466   :  { %v20042_v27 = vpop.eup %20041  ;;  %7568 = vst.msk [vmem:[#allocation2 + $0x68] sm:$0xff] %vm7554_vm5, %v7439_v51  ;;  %v7438_v29 = vsel %vm6798_vm6, %v23257_v19, %v15270_v2  ;;  %20051 = vpow2.f32 %v7078_v6  ;;  %v7084_v30 = vmul.f32 1.442695, %v6935_v7  ;;  %v6548_v36 = vmul.f32 %v23077_v61, %v5865_v60  ;;  %v23396_v57 = vpop.f32.mrb[29].mxu1 }
 0x467   :  { %v18016_v33 = vpop.f32.mrb[24].mxu0  ;;  %7567 = vst.msk [vmem:[#allocation2 + $0x60] sm:$0xff] %vm7554_vm5, %v7438_v29  ;;  %v15273_v35 = vadd.f32 -1.0, %v20042_v27  ;;  %v7082_v39 = vmul.f32 1.442695, %v6934_v17  ;;  %v7941_v15 = vmax.f32 %v7687_v44, %v7815_v45  ;;  %v23399_v19 = vadd.f32 %v23091_v1, %v6549_v32  ;;  %v20044_v2 = vpop.eup %20043 }
 0x468   :  { %v5875_v40 = vpop.f32.mrb[25].mxu0  ;;  %20053 = vpow2.f32 %v7084_v30  ;;  %v6551_v8 = vmul.f32 %v18016_v33, %v23077_v61  ;;  %v23407_v60 = vadd.f32 %v23091_v1, %v6548_v36  ;;  %v7943_v44 = vmax.f32 %v7691_v52, %v7819_v56 }
 0x469   :  { %v6550_v48 = vmul.f32 %v23077_v61, %v5875_v40  ;;  %v7441_v6 = vsel %vm6801_vm7, %v23284_v47, %v15273_v35  ;;  %20055 = vpow2.f32 %v7082_v39  ;;  %8005 = vst.msk [vmem:[#allocation3 + $0x8] sm:$0xff] %vm7554_vm5, %v7941_v15  ;;  %v15272_v7 = vadd.f32 -1.0, %v20044_v2  ;;  %v23416_v47 = vpop.f32.mrb[30].mxu1 }
 0x46a   :  { %7570 = vst.msk [vmem:[#allocation2 + $0x78] sm:$0xff] %vm7554_vm5, %v7441_v6  ;;  %vm6802_vm9 = vcmp.gt.f32.partialorder %v23328_v43, 0.0  ;;  %v6937_v51 = vmin.f32 %v23399_v19, 0.0  ;;  %v23414_v17 = vadd.f32 %v23091_v1, %v6551_v8  ;;  %vm6805_vm10 = vcmp.gt.f32.partialorder %v23347_v21, 0.0  ;;  %8007 = vst.msk [vmem:[#allocation3 + $0x18] sm:$0xff] %vm7554_vm5, %v7943_v44  ;;  %v23434_v8 = vpop.f32.mrb[31].mxu1 }
 0x46b   :  { %v20046_v45 = vpop.eup %20045  ;;  %v18019_v27 = vpop.f32.mrb[26].mxu0  ;;  %v6936_v30 = vmin.f32 %v23407_v60, 0.0  ;;  %v23421_v52 = vadd.f32 %v23091_v1, %v6550_v48  ;;  %v7440_v56 = vsel %vm6800_vm1, %v23307_v18, %v15272_v7  ;;  %vm6804_vm11 = vcmp.gt.f32.partialorder %v23350_v9, 0.0  ;;  %26581 = vst [vmem:[#allocation11_spill] sm:$0xff] %v23434_v8  ;;  %v7695_v16 = vld [vmem:[#allocation2 + $0x50] ss:$2 sm:$0xff] }
 0x46c   :  { %v15275_v29 = vadd.f32 -1.0, %v20046_v45  ;;  %v5885_v32 = vpop.f32.mrb[27].mxu0  ;;  %v20048_v33 = vpop.eup %20047  ;;  %v7088_v35 = vmul.f32 1.442695, %v6937_v51  ;;  %v6939_v39 = vmin.f32 %v23414_v17, 0.0  ;;  %7569 = vst.msk [vmem:[#allocation2 + $0x70] sm:$0xff] %vm7554_vm5, %v7440_v56  ;;  %v6553_v2 = vmul.f32 %v18019_v27, %v23077_v61 }
 0x46d   :  { %v15274_v15 = vadd.f32 -1.0, %v20048_v33  ;;  %vm6807_vm12 = vcmp.gt.f32.partialorder %v23366_v41, 0.0  ;;  %v7086_v40 = vmul.f32 1.442695, %v6936_v30  ;;  %v6938_v48 = vmin.f32 %v23421_v52, 0.0 }
 0x46e   :  { %v7443_v36 = vsel %vm6803_vm8, %v23310_v20, %v15275_v29  ;;  %20057 = vpow2.f32 %v7088_v35  ;;  %v7092_v18 = vmul.f32 1.442695, %v6939_v39  ;;  %v6552_v45 = vmul.f32 %v23077_v61, %v5885_v32  ;;  %v23448_v39 = vpop.f32.mrb[32].mxu1 }
 0x46f   :  { %7572 = vst.msk [vmem:[#allocation2 + $0x88] sm:$0xff] %vm7554_vm5, %v7443_v36  ;;  %v18022_v6 = vpop.f32.mrb[28].mxu0  ;;  %v20050_v44 = vpop.eup %20049  ;;  %v7442_v20 = vsel %vm6802_vm9, %v23328_v43, %v15274_v15  ;;  %20059 = vpow2.f32 %v7086_v40  ;;  %v7090_v56 = vmul.f32 1.442695, %v6938_v48  ;;  %v23446_v35 = vadd.f32 %v23091_v1, %v6553_v2  ;;  %26582 = vst [vmem:[#allocation12_spill] sm:$0xff] %v23448_v39 }
 0x470   :  { %v6555_v7 = vmul.f32 %v18022_v6, %v23077_v61  ;;  %v5895_v51 = vpop.f32.mrb[29].mxu0  ;;  %v20052_v29 = vpop.eup %20051  ;;  %7571 = vst.msk [vmem:[#allocation2 + $0x80] sm:$0xff] %vm7554_vm5, %v7442_v20  ;;  %v15277_v30 = vadd.f32 -1.0, %v20050_v44  ;;  %v8136_v33 = vld [vmem:[#allocation3 + $0x1] sm:$0xff]  ;;  %20061 = vpow2.f32 %v7092_v18  ;;  %v8137_v27 = vld [vmem:[#allocation3 + $0x9] sm:$0xff]  ;;  %v23452_v32 = vadd.f32 %v23091_v1, %v6552_v45 }
 0x471   :  { %v15276_v43 = vadd.f32 -1.0, %v20052_v29  ;;  %18178 = vmatprep.mubr.msk.f32.mxu1 %vm7554_vm5, %v8136_v33  ;;  %v6554_v15 = vmul.f32 %v23077_v61, %v5895_v51  ;;  %v7693_v40 = vld [vmem:[#allocation2 + $0x40] ss:$2 sm:$0xff]  ;;  %v23458_v18 = vpop.f32.mrb[33].mxu1  ;;  %vm6806_vm13 = vcmp.gt.f32.partialorder %v23375_v58, 0.0  ;;  %20063 = vpow2.f32 %v7090_v56  ;;  %v8138_v44 = vld [vmem:[#allocation3 + $0x11] sm:$0xff] }
 0x472   :  { %v23455_v36 = vadd.f32 %v23091_v1, %v6555_v7  ;;  %26583 = vst [vmem:[#allocation13_spill] sm:$0xff] %v23458_v18  ;;  %v20054_v48 = vpop.eup %20053  ;;  %v7445_v2 = vsel %vm6805_vm10, %v23347_v21, %v15277_v30  ;;  %18179 = vmatmul.mubr.msk.f32.vlgmr.msra.gmra.mrb[80].mxu1 %vm7554_vm5, %v8137_v27  ;;  %v6941_v6 = vmin.f32 %v23446_v35, 0.0  ;;  %v7821_v20 = vld [vmem:[#allocation2 + $0x41] ss:$2 sm:$0xff]  ;;  %vm6809_vm14 = vcmp.gt.f32.partialorder %v23399_v19, 0.0 }
 0x473   :  { %v18025_v45 = vpop.f32.mrb[30].mxu0  ;;  %v20056_v7 = vpop.eup %20055  ;;  %7574 = vst.msk [vmem:[#allocation2 + $0x98] sm:$0xff] %vm7554_vm5, %v7445_v2  ;;  %v7444_v51 = vsel %vm6804_vm11, %v23350_v9, %v15276_v43  ;;  %v15279_v29 = vadd.f32 -1.0, %v20054_v48  ;;  %v6940_v21 = vmin.f32 %v23452_v32, 0.0  ;;  %18181 = vmatprep.mubr.msk.f32.mxu1 %vm7554_vm5, %v8138_v44  ;;  %vm6808_vm15 = vcmp.gt.f32.partialorder %v23407_v60, 0.0 }
 0x474   :  { %v5905_v30 = vpop.f32.mrb[31].mxu0  ;;  %7573 = vst.msk [vmem:[#allocation2 + $0x90] sm:$0xff] %vm7554_vm5, %v7444_v51  ;;  %v15278_v33 = vadd.f32 -1.0, %v20056_v7  ;;  %v7096_v56 = vmul.f32 1.442695, %v6941_v6  ;;  %v6943_v27 = vmin.f32 %v23455_v36, 0.0  ;;  %v23482_v48 = vadd.f32 %v23091_v1, %v6554_v15 }
 0x475   :  { %v23476_v2 = vpop.f32.mrb[34].mxu1  ;;  %v7447_v9 = vsel %vm6807_vm12, %v23366_v41, %v15279_v29  ;;  %v7094_v43 = vmul.f32 1.442695, %v6940_v21  ;;  %v7944_v44 = vmax.f32 %v7693_v40, %v7821_v20  ;;  %v7823_v18 = vld [vmem:[#allocation2 + $0x51] ss:$2 sm:$0xff]  ;;  %v6557_v51 = vmul.f32 %v18025_v45, %v23077_v61 }
 0x476   :  { %26584 = vst [vmem:[#allocation14_spill] sm:$0xff] %v23476_v2  ;;  %7576 = vst.msk [vmem:[#allocation2 + $0xa8] sm:$0xff] %vm7554_vm5, %v7447_v9  ;;  %v7446_v6 = vsel %vm6806_vm13, %v23375_v58, %v15278_v33  ;;  %20065 = vpow2.f32 %v7096_v56  ;;  %v7100_v7 = vmul.f32 1.442695, %v6943_v27  ;;  %v23489_v39 = vpop.f32.mrb[35].mxu1  ;;  %vm6811_vm0 = vcmp.gt.f32.partialorder %v23414_v17, 0.0 }
 0x477   :  { %v18028_v2 = vpop.f32.mrb[32].mxu0  ;;  %26585 = vst [vmem:[#allocation15_spill] sm:$0xff] %v23489_v39  ;;  %7575 = vst.msk [vmem:[#allocation2 + $0xa0] sm:$0xff] %vm7554_vm5, %v7446_v6  ;;  %20067 = vpow2.f32 %v7094_v43  ;;  %v6942_v41 = vmin.f32 %v23482_v48, 0.0  ;;  %v6556_v15 = vmul.f32 %v23077_v61, %v5905_v30  ;;  %v23497_v20 = vadd.f32 %v23091_v1, %v6557_v51  ;;  %v23500_v21 = vpop.f32.mrb[36].mxu1 }
 0x478   :  { %8008 = vst.msk [vmem:[#allocation3 + $0x20] sm:$0xff] %vm7554_vm5, %v7944_v44  ;;  %v5915_v40 = vpop.f32.mrb[33].mxu0  ;;  %v20058_v58 = vpop.eup %20057  ;;  %20069 = vpow2.f32 %v7100_v7  ;;  %v7945_v45 = vmax.f32 %v7695_v16, %v7823_v18  ;;  %v6559_v29 = vmul.f32 %v18028_v2, %v23077_v61  ;;  %26586 = vst [vmem:[#allocation16_spill] sm:$0xff] %v23500_v21  ;;  %vm6810_vm2 = vcmp.gt.f32.partialorder %v23421_v52, 0.0  ;;  %v7697_v18 = vld [vmem:[#allocation2 + $0x60] ss:$2 sm:$0xff] }
 0x479   :  { %v20060_v33 = vpop.eup %20059  ;;  %v15281_v56 = vadd.f32 -1.0, %v20058_v58  ;;  %v7098_v27 = vmul.f32 1.442695, %v6942_v41  ;;  %v23503_v9 = vadd.f32 %v23091_v1, %v6556_v15  ;;  %v6558_v43 = vmul.f32 %v23077_v61, %v5915_v40  ;;  %v7825_v41 = vld [vmem:[#allocation2 + $0x61] ss:$2 sm:$0xff] }
 0x47a   :  { %v20062_v30 = vpop.eup %20061  ;;  %v15280_v44 = vadd.f32 -1.0, %v20060_v33  ;;  %v6945_v6 = vmin.f32 %v23497_v20, 0.0  ;;  %8009 = vst.msk [vmem:[#allocation3 + $0x28] sm:$0xff] %vm7554_vm5, %v7945_v45  ;;  %v23510_v16 = vadd.f32 %v23091_v1, %v6559_v29  ;;  %vm6813_vm3 = vcmp.gt.f32.partialorder %v23446_v35, 0.0  ;;  %v7699_v33 = vld [vmem:[#allocation2 + $0x70] ss:$2 sm:$0xff] }
 0x47b   :  { %v18031_v2 = vpop.f32.mrb[34].mxu0  ;;  %v7449_v7 = vsel %vm6809_vm14, %v23399_v19, %v15281_v56  ;;  %v15283_v51 = vadd.f32 -1.0, %v20062_v30  ;;  %20071 = vpow2.f32 %v7098_v27  ;;  %v20064_v40 = vpop.eup %20063  ;;  %vm6812_vm6 = vcmp.gt.f32.partialorder %v23452_v32, 0.0 }
 0x47c   :  { %v5925_v15 = vpop.f32.mrb[35].mxu0  ;;  %7578 = vst.msk [vmem:[#allocation2 + $0xb8] sm:$0xff] %vm7554_vm5, %v7449_v7  ;;  %v7448_v58 = vsel %vm6808_vm15, %v23407_v60, %v15280_v44  ;;  %v7104_v45 = vmul.f32 1.442695, %v6945_v6  ;;  %v6944_v29 = vmin.f32 %v23503_v9, 0.0  ;;  %v15282_v56 = vadd.f32 -1.0, %v20064_v40 }
 0x47d   :  { %7577 = vst.msk [vmem:[#allocation2 + $0xb0] sm:$0xff] %vm7554_vm5, %v7448_v58  ;;  %v7451_v19 = vsel %vm6811_vm0, %v23414_v17, %v15283_v51  ;;  %v6947_v27 = vmin.f32 %v23510_v16, 0.0  ;;  %v23528_v30 = vadd.f32 %v23091_v1, %v6558_v43  ;;  %v7827_v7 = vld [vmem:[#allocation2 + $0x71] ss:$2 sm:$0xff]  ;;  %v23530_v60 = vpop.f32.mrb[37].mxu1  ;;  %v7946_v21 = vmax.f32 %v7697_v18, %v7825_v41 }
 0x47e   :  { %26587 = vst [vmem:[#allocation17_spill] sm:$0xff] %v23530_v60  ;;  %7580 = vst.msk [vmem:[#allocation2 + $0xc8] sm:$0xff] %vm7554_vm5, %v7451_v19  ;;  %20073 = vpow2.f32 %v7104_v45  ;;  %v7102_v6 = vmul.f32 1.442695, %v6944_v29  ;;  %v6561_v58 = vmul.f32 %v18031_v2, %v23077_v61  ;;  %v7450_v17 = vsel %vm6810_vm2, %v23421_v52, %v15282_v56  ;;  %v23540_v19 = vpop.f32.mrb[38].mxu1 }
 0x47f   :  { %v8139_v44 = vld [vmem:[#allocation3 + $0x19] sm:$0xff]  ;;  %v18034_v39 = vpop.f32.mrb[36].mxu0  ;;  %vm6815_vm7 = vcmp.gt.f32.partialorder %v23455_v36, 0.0  ;;  %v7108_v43 = vmul.f32 1.442695, %v6947_v27  ;;  %v6946_v51 = vmin.f32 %v23528_v30, 0.0  ;;  %v6560_v52 = vmul.f32 %v23077_v61, %v5925_v15 }
 0x480   :  { %18182 = vmatmul.mubr.msk.f32.gmra.mrb[82].mxu1 %vm7554_vm5, %v8139_v44  ;;  %v5935_v40 = vpop.f32.mrb[37].mxu0  ;;  %26588 = vst [vmem:[#allocation18_spill] sm:$0xff] %v23540_v19  ;;  %v20066_v45 = vpop.eup %20065  ;;  %7579 = vst.msk [vmem:[#allocation2 + $0xc0] sm:$0xff] %vm7554_vm5, %v7450_v17  ;;  %20075 = vpow2.f32 %v7102_v6  ;;  %v23545_v18 = vadd.f32 %v23091_v1, %v6561_v58  ;;  %v7947_v2 = vmax.f32 %v7699_v33, %v7827_v7  ;;  %vm6814_vm1 = vcmp.gt.f32.partialorder %v23482_v48, 0.0  ;;  %v7701_v33 = vld [vmem:[#allocation2 + $0x80] ss:$2 sm:$0xff] }
 0x481   :  { %8010 = vst.msk [vmem:[#allocation3 + $0x30] sm:$0xff] %vm7554_vm5, %v7946_v21  ;;  %v23548_v41 = vpop.f32.mrb[39].mxu1  ;;  %v20068_v29 = vpop.eup %20067  ;;  %v15285_v56 = vadd.f32 -1.0, %v20066_v45  ;;  %v8140_v27 = vld [vmem:[#allocation3 + $0x21] sm:$0xff]  ;;  %20077 = vpow2.f32 %v7108_v43  ;;  %v7106_v44 = vmul.f32 1.442695, %v6946_v51  ;;  %v6563_v19 = vmul.f32 %v18034_v39, %v23077_v61 }
 0x482   :  { %26589 = vst [vmem:[#allocation19_spill] sm:$0xff] %v23548_v41  ;;  %v20070_v60 = vpop.eup %20069  ;;  %v15284_v17 = vadd.f32 -1.0, %v20068_v29  ;;  %18184 = vmatprep.mubr.msk.f32.mxu1 %vm7554_vm5, %v8140_v27  ;;  %v6949_v21 = vmin.f32 %v23545_v18, 0.0  ;;  %v23555_v15 = vadd.f32 %v23091_v1, %v6560_v52  ;;  %8011 = vst.msk [vmem:[#allocation3 + $0x38] sm:$0xff] %vm7554_vm5, %v7947_v2  ;;  %v7829_v43 = vld [vmem:[#allocation2 + $0x81] ss:$2 sm:$0xff] }
 0x483   :  { %v18037_v7 = vpop.f32.mrb[38].mxu0  ;;  %v7453_v6 = vsel %vm6813_vm3, %v23446_v35, %v15285_v56  ;;  %v15287_v39 = vadd.f32 -1.0, %v20070_v60  ;;  %20079 = vpow2.f32 %v7106_v44  ;;  %v23562_v58 = vadd.f32 %v23091_v1, %v6563_v19  ;;  %v23564_v45 = vpop.f32.mrb[40].mxu1  ;;  %v7703_v27 = vld [vmem:[#allocation2 + $0x90] ss:$2 sm:$0xff] }
 0x484   :  { %v5945_v51 = vpop.f32.mrb[39].mxu0  ;;  %26590 = vst [vmem:[#allocation20_spill] sm:$0xff] %v23564_v45  ;;  %7582 = vst.msk [vmem:[#allocation2 + $0xd8] sm:$0xff] %vm7554_vm5, %v7453_v6  ;;  %v7452_v52 = vsel %vm6812_vm6, %v23452_v32, %v15284_v17  ;;  %vm6817_vm8 = vcmp.gt.f32.partialorder %v23497_v20, 0.0  ;;  %v7112_v2 = vmul.f32 1.442695, %v6949_v21  ;;  %v6562_v56 = vmul.f32 %v23077_v61, %v5935_v40 }
 0x485   :  { %v6948_v35 = vmin.f32 %v23555_v15, 0.0  ;;  %v20072_v60 = vpop.eup %20071  ;;  %7581 = vst.msk [vmem:[#allocation2 + $0xd0] sm:$0xff] %vm7554_vm5, %v7452_v52  ;;  %v7455_v19 = vsel %vm6815_vm7, %v23455_v36, %v15287_v39  ;;  %vm6816_vm9 = vcmp.gt.f32.partialorder %v23503_v9, 0.0  ;;  %v6951_v29 = vmin.f32 %v23562_v58, 0.0  ;;  %v7831_v32 = vld [vmem:[#allocation2 + $0x91] ss:$2 sm:$0xff] }
 0x486   :  { %7584 = vst.msk [vmem:[#allocation2 + $0xe8] sm:$0xff] %vm7554_vm5, %v7455_v19  ;;  %v15286_v44 = vadd.f32 -1.0, %v20072_v60  ;;  %20081 = vpow2.f32 %v7112_v2  ;;  %v7948_v21 = vmax.f32 %v7701_v33, %v7829_v43  ;;  %v23581_v41 = vadd.f32 %v23091_v1, %v6562_v56  ;;  %v23593_v1 = vld [vmem:[%s26574_s4] ss:$0 sm:$0xff]  ;;  %v7833_v43 = vld [vmem:[#allocation2 + $0xa1] ss:$2 sm:$0xff] }
 0x487   :  { %v7110_v17 = vmul.f32 1.442695, %v6948_v35  ;;  %v18040_v6 = vpop.f32.mrb[40].mxu0  ;;  %v7116_v45 = vmul.f32 1.442695, %v6951_v29  ;;  %v6565_v36 = vmul.f32 %v18037_v7, %v23077_v61  ;;  %v6564_v39 = vmul.f32 %v23077_v61, %v5945_v51  ;;  %v23596_v51 = vpop.f32.mrb[41].mxu1 }
 0x488   :  { %v8141_v52 = vld [vmem:[#allocation3 + $0x29] sm:$0xff]  ;;  %v5955_v8 = vpop.f32.mrb[41].mxu0  ;;  %v20074_v40 = vpop.eup %20073  ;;  %v7454_v19 = vsel %vm6814_vm1, %v23482_v48, %v15286_v44  ;;  %8012 = vst.msk [vmem:[#allocation3 + $0x40] sm:$0xff] %vm7554_vm5, %v7948_v21  ;;  %v7949_v33 = vmax.f32 %v7703_v27, %v7831_v32  ;;  %v6567_v7 = vmul.f32 %v23593_v1, %v18040_v6  ;;  %26591 = vst [vmem:[#allocation21_spill] sm:$0xff] %v23596_v51  ;;  %vm6819_vm10 = vcmp.gt.f32.partialorder %v23510_v16, 0.0 }
 0x489   :  { %18185 = vmatmul.mubr.msk.f32.gmra.mrb[84].mxu1 %vm7554_vm5, %v8141_v52  ;;  %20083 = vpow2.f32 %v7110_v17  ;;  %v7705_v61 = vld [vmem:[#allocation2 + $0xa0] ss:$2 sm:$0xff]  ;;  %7583 = vst.msk [vmem:[#allocation2 + $0xe0] sm:$0xff] %vm7554_vm5, %v7454_v19  ;;  %v15289_v48 = vadd.f32 -1.0, %v20074_v40  ;;  %v8142_v2 = vld [vmem:[#allocation3 + $0x31] sm:$0xff]  ;;  %v6950_v35 = vmin.f32 %v23581_v41, 0.0  ;;  %v6566_v32 = vmul.f32 %v23593_v1, %v5955_v8 }
 0x48a   :  { %20085 = vpow2.f32 %v7116_v45  ;;  %v20076_v60 = vpop.eup %20075  ;;  %18187 = vmatprep.mubr.msk.f32.mxu1 %vm7554_vm5, %v8142_v2  ;;  %v23605_v29 = vld [vmem:[%s26574_s4 + $0x1] ss:$0 sm:$0xff]  ;;  %8013 = vst.msk [vmem:[#allocation3 + $0x48] sm:$0xff] %vm7554_vm5, %v7949_v33  ;;  %v23618_v17 = vpop.f32.mrb[42].mxu1  ;;  %v7950_v40 = vmax.f32 %v7705_v61, %v7833_v43  ;;  %vm6818_vm11 = vcmp.gt.f32.partialorder %v23528_v30, 0.0  ;;  %vm6821_vm12 = vcmp.gt.f32.partialorder %v23545_v18, 0.0 }
 0x48b   :  { %v23608_v56 = vadd.f32 %v23605_v29, %v6565_v36  ;;  %v23611_v27 = vadd.f32 %v23605_v29, %v6564_v39  ;;  %v23615_v45 = vadd.f32 %v23605_v29, %v6567_v7  ;;  %v18043_v44 = vpop.f32.mrb[42].mxu0  ;;  %26592 = vst [vmem:[#allocation22_spill] sm:$0xff] %v23618_v17  ;;  %v20078_v21 = vpop.eup %20077  ;;  %v7457_v6 = vsel %vm6817_vm8, %v23497_v20, %v15289_v48  ;;  %v7707_v43 = vld [vmem:[#allocation2 + $0xb0] ss:$2 sm:$0xff]  ;;  %v7835_v48 = vld [vmem:[#allocation2 + $0xb1] ss:$2 sm:$0xff] }
 0x48c   :  { %v15288_v52 = vadd.f32 -1.0, %v20076_v60  ;;  %v7114_v36 = vmul.f32 1.442695, %v6950_v35  ;;  %v5965_v39 = vpop.f32.mrb[43].mxu0  ;;  %v23623_v19 = vpop.f32.mrb[43].mxu1  ;;  %7586 = vst.msk [vmem:[#allocation2 + $0xf8] sm:$0xff] %vm7554_vm5, %v7457_v6 }
 0x48d   :  { %26593 = vst [vmem:[#allocation23_spill] sm:$0xff] %v23623_v19  ;;  %v15291_v33 = vadd.f32 -1.0, %v20078_v21  ;;  %v6953_v8 = vmin.f32 %v23608_v56, 0.0  ;;  %v20080_v7 = vpop.eup %20079  ;;  %vm6820_vm13 = vcmp.gt.f32.partialorder %v23555_v15, 0.0  ;;  %v6952_v61 = vmin.f32 %v23611_v27, 0.0  ;;  %8014 = vst.msk [vmem:[#allocation3 + $0x50] sm:$0xff] %vm7554_vm5, %v7950_v40 }
 0x48e   :  { %v7456_v20 = vsel %vm6816_vm9, %v23503_v9, %v15288_v52  ;;  %20087 = vpow2.f32 %v7114_v36  ;;  %v15290_v35 = vadd.f32 -1.0, %v20080_v7  ;;  %v6955_v21 = vmin.f32 %v23615_v45, 0.0  ;;  %v23640_v6 = vpop.f32.mrb[44].mxu1 }
 0x48f   :  { %7585 = vst.msk [vmem:[#allocation2 + $0xf0] sm:$0xff] %vm7554_vm5, %v7456_v20  ;;  %v7459_v2 = vsel %vm6819_vm10, %v23510_v16, %v15291_v33  ;;  %v7120_v60 = vmul.f32 1.442695, %v6953_v8  ;;  %v18046_v9 = vpop.f32.mrb[44].mxu0  ;;  %26594 = vst [vmem:[#allocation24_spill] sm:$0xff] %v23640_v6  ;;  %v8143_v52 = vld [vmem:[#allocation3 + $0x39] sm:$0xff]  ;;  %v23644_v40 = vadd.f32 %v23605_v29, %v6566_v32  ;;  %v6569_v20 = vmul.f32 %v23593_v1, %v18043_v44 }
 0x490   :  { %7588 = vst.msk [vmem:[#allocation2 + $0x108] sm:$0xff] %vm7554_vm5, %v7459_v2  ;;  %v7118_v36 = vmul.f32 1.442695, %v6952_v61  ;;  %v6568_v19 = vmul.f32 %v23593_v1, %v5965_v39  ;;  %v5975_v17 = vpop.f32.mrb[45].mxu0  ;;  %v20082_v16 = vpop.eup %20081  ;;  %v7458_v33 = vsel %vm6818_vm11, %v23528_v30, %v15290_v35  ;;  %18188 = vmatmul.mubr.msk.f32.gmra.mrb[86].mxu1 %vm7554_vm5, %v8143_v52  ;;  %v7124_v8 = vmul.f32 1.442695, %v6955_v21 }
 0x491   :  { %20089 = vpow2.f32 %v7120_v60  ;;  %v7951_v7 = vmax.f32 %v7707_v43, %v7835_v48  ;;  %7587 = vst.msk [vmem:[#allocation2 + $0x100] sm:$0xff] %vm7554_vm5, %v7458_v33  ;;  %v15293_v61 = vadd.f32 -1.0, %v20082_v16  ;;  %vm6823_vm14 = vcmp.gt.f32.partialorder %v23562_v58, 0.0  ;;  %v8144_v32 = vld [vmem:[#allocation3 + $0x41] sm:$0xff]  ;;  %v23655_v39 = vpop.f32.mrb[45].mxu1 }
 0x492   :  { %20091 = vpow2.f32 %v7118_v36  ;;  %v6954_v44 = vmin.f32 %v23644_v40, 0.0  ;;  %26595 = vst [vmem:[#allocation25_spill] sm:$0xff] %v23655_v39  ;;  %18190 = vmatprep.mubr.msk.f32.mxu1 %vm7554_vm5, %v8144_v32  ;;  %v23659_v30 = vadd.f32 %v23605_v29, %v6569_v20  ;;  %v23662_v43 = vadd.f32 %v23605_v29, %v6568_v19  ;;  %v7709_v35 = vld [vmem:[#allocation2 + $0xc0] ss:$2 sm:$0xff]  ;;  %v7837_v60 = vld [vmem:[#allocation2 + $0xc1] ss:$2 sm:$0xff] }
 0x493   :  { %v20084_v2 = vpop.eup %20083  ;;  %20093 = vpow2.f32 %v7124_v8  ;;  %8015 = vst.msk [vmem:[#allocation3 + $0x58] sm:$0xff] %vm7554_vm5, %v7951_v7  ;;  %v6571_v48 = vmul.f32 %v23593_v1, %v18046_v9  ;;  %v18049_v21 = vpop.f32.mrb[46].mxu0  ;;  %v7461_v16 = vsel %vm6821_vm12, %v23545_v18, %v15293_v61  ;;  %v6570_v8 = vmul.f32 %v23593_v1, %v5975_v17  ;;  %v7839_v39 = vld [vmem:[#allocation2 + $0xd1] ss:$2 sm:$0xff] }
 0x494   :  { %v23666_v52 = vpop.f32.mrb[46].mxu1  ;;  %v20086_v36 = vpop.eup %20085  ;;  %v15292_v33 = vadd.f32 -1.0, %v20084_v2  ;;  %v7122_v20 = vmul.f32 1.442695, %v6954_v44  ;;  %7590 = vst.msk [vmem:[#allocation2 + $0x118] sm:$0xff] %vm7554_vm5, %v7461_v16  ;;  %vm6822_vm15 = vcmp.gt.f32.partialorder %v23581_v41, 0.0 }
 0x495   :  { %26596 = vst [vmem:[#allocation26_spill] sm:$0xff] %v23666_v52  ;;  %v5985_v19 = vpop.f32.mrb[47].mxu0  ;;  %v23672_v32 = vpop.f32.mrb[47].mxu1  ;;  %v15295_v9 = vadd.f32 -1.0, %v20086_v36  ;;  %vm6825_vm0 = vcmp.gt.f32.partialorder %v23608_v56, 0.0  ;;  %v8145_v7 = vld [vmem:[#allocation3 + $0x49] sm:$0xff]  ;;  %v23685_v61 = vadd.f32 %v23605_v29, %v6571_v48  ;;  %v23692_v36 = vadd.f32 %v23605_v29, %v6570_v8 }
 0x496   :  { %26597 = vst [vmem:[#allocation27_spill] sm:$0xff] %v23672_v32  ;;  %v6957_v52 = vmin.f32 %v23659_v30, 0.0  ;;  %v7460_v18 = vsel %vm6820_vm13, %v23555_v15, %v15292_v33  ;;  %vm6824_vm2 = vcmp.gt.f32.partialorder %v23611_v27, 0.0  ;;  %20095 = vpow2.f32 %v7122_v20  ;;  %18191 = vmatmul.mubr.msk.f32.gmra.mrb[88].mxu1 %vm7554_vm5, %v8145_v7  ;;  %v7711_v16 = vld [vmem:[#allocation2 + $0xd0] ss:$2 sm:$0xff]  ;;  %v23694_v20 = vpop.f32.mrb[48].mxu1 }
 0x497   :  { %v6956_v17 = vmin.f32 %v23662_v43, 0.0  ;;  %7589 = vst.msk [vmem:[#allocation2 + $0x110] sm:$0xff] %vm7554_vm5, %v7460_v18  ;;  %v7463_v44 = vsel %vm6823_vm14, %v23562_v58, %v15295_v9  ;;  %v7952_v15 = vmax.f32 %v7709_v35, %v7837_v60  ;;  %v18052_v33 = vpop.f32.mrb[48].mxu0  ;;  %26598 = vst [vmem:[#allocation28_spill] sm:$0xff] %v23694_v20  ;;  %v6959_v32 = vmin.f32 %v23685_v61, 0.0 }
 0x498   :  { %v7128_v2 = vmul.f32 1.442695, %v6957_v52  ;;  %v20088_v7 = vpop.eup %20087  ;;  %7592 = vst.msk [vmem:[#allocation2 + $0x128] sm:$0xff] %vm7554_vm5, %v7463_v44  ;;  %v6573_v18 = vmul.f32 %v23593_v1, %v18049_v21  ;;  %v5995_v6 = vpop.f32.mrb[49].mxu0  ;;  %vm6827_vm3 = vcmp.gt.f32.partialorder %v23615_v45, 0.0  ;;  %v6958_v35 = vmin.f32 %v23692_v36, 0.0 }
 0x499   :  { %v7126_v48 = vmul.f32 1.442695, %v6956_v17  ;;  %v15294_v58 = vadd.f32 -1.0, %v20088_v7  ;;  %8016 = vst.msk [vmem:[#allocation3 + $0x60] sm:$0xff] %vm7554_vm5, %v7952_v15  ;;  %v7132_v52 = vmul.f32 1.442695, %v6959_v32  ;;  %v6572_v9 = vmul.f32 %v23593_v1, %v5985_v19 }
 0x49a   :  { %20097 = vpow2.f32 %v7128_v2  ;;  %v8146_v60 = vld [vmem:[#allocation3 + $0x51] sm:$0xff]  ;;  %v23703_v8 = vadd.f32 %v23605_v29, %v6573_v18  ;;  %v23706_v17 = vpop.f32.mrb[49].mxu1  ;;  %v7130_v2 = vmul.f32 1.442695, %v6958_v35  ;;  %v7953_v7 = vmax.f32 %v7711_v16, %v7839_v39  ;;  %v7713_v39 = vld [vmem:[#allocation2 + $0xe0] ss:$2 sm:$0xff] }
 0x49b   :  { %20099 = vpow2.f32 %v7126_v48  ;;  %26599 = vst [vmem:[#allocation29_spill] sm:$0xff] %v23706_v17  ;;  %v20090_v21 = vpop.eup %20089  ;;  %v7462_v44 = vsel %vm6822_vm15, %v23581_v41, %v15294_v58  ;;  %18193 = vmatprep.mubr.msk.f32.mxu1 %vm7554_vm5, %v8146_v60  ;;  %v19112_v15 = vadd.f32 %v18052_v33, %v23037_v49  ;;  %v18055_v48 = vpop.f32.mrb[50].mxu0  ;;  %vm6826_vm6 = vcmp.gt.f32.partialorder %v23644_v40, 0.0  ;;  %v7841_v16 = vld [vmem:[#allocation2 + $0xe1] ss:$2 sm:$0xff] }
 0x49c   :  { %v20092_v32 = vpop.eup %20091  ;;  %7591 = vst.msk [vmem:[#allocation2 + $0x120] sm:$0xff] %vm7554_vm5, %v7462_v44  ;;  %v15297_v18 = vadd.f32 -1.0, %v20090_v21  ;;  %20101 = vpow2.f32 %v7132_v52  ;;  %v6961_v19 = vmin.f32 %v23703_v8, 0.0  ;;  %v6005_v17 = vpop.f32.mrb[51].mxu0  ;;  %vm6829_vm7 = vcmp.gt.f32.partialorder %v23659_v30, 0.0  ;;  %8017 = vst.msk [vmem:[#allocation3 + $0x68] sm:$0xff] %vm7554_vm5, %v7953_v7 }
 0x49d   :  { %v20094_v20 = vpop.eup %20093  ;;  %v15296_v51 = vadd.f32 -1.0, %v20092_v32  ;;  %20103 = vpow2.f32 %v7130_v2  ;;  %v23718_v41 = vadd.f32 %v23605_v29, %v6572_v9  ;;  %v6575_v49 = vmul.f32 %v23593_v1, %v19112_v15  ;;  %v23722_v33 = vpop.f32.mrb[50].mxu1 }
 0x49e   :  { %v7465_v58 = vsel %vm6825_vm0, %v23608_v56, %v15297_v18  ;;  %v15299_v35 = vadd.f32 -1.0, %v20094_v20  ;;  %vm6828_vm1 = vcmp.gt.f32.partialorder %v23662_v43, 0.0  ;;  %v7136_v60 = vmul.f32 1.442695, %v6961_v19  ;;  %v23729_v9 = vpop.f32.mrb[51].mxu1 }
 0x49f   :  { %v19113_v52 = vadd.f32 %v5995_v6, %v23039_v50  ;;  %7594 = vst.msk [vmem:[#allocation2 + $0x138] sm:$0xff] %vm7554_vm5, %v7465_v58  ;;  %v7464_v21 = vsel %vm6824_vm2, %v23611_v27, %v15296_v51  ;;  %v6960_v44 = vmin.f32 %v23718_v41, 0.0  ;;  %v23737_v2 = vadd.f32 %v23605_v29, %v6575_v49  ;;  %v7715_v56 = vld [vmem:[#allocation2 + $0xf0] ss:$2 sm:$0xff]  ;;  %v7843_v20 = vld [vmem:[#allocation2 + $0xf1] ss:$2 sm:$0xff] }
 0x4a0   :  { %v18058_v7 = vpop.f32.mrb[52].mxu0  ;;  %v20096_v15 = vpop.eup %20095  ;;  %7593 = vst.msk [vmem:[#allocation2 + $0x130] sm:$0xff] %vm7554_vm5, %v7464_v21  ;;  %v7467_v50 = vsel %vm6827_vm3, %v23615_v45, %v15299_v35  ;;  %v8147_v6 = vld [vmem:[#allocation3 + $0x59] sm:$0xff]  ;;  %20105 = vpow2.f32 %v7136_v60  ;;  %v7954_v51 = vmax.f32 %v7713_v39, %v7841_v16  ;;  %vm6831_vm8 = vcmp.gt.f32.partialorder %v23685_v61, 0.0 }
 0x4a1   :  { %v6574_v32 = vmul.f32 %v23593_v1, %v19113_v52  ;;  %v6015_v27 = vpop.f32.mrb[53].mxu0  ;;  %7596 = vst.msk [vmem:[#allocation2 + $0x148] sm:$0xff] %vm7554_vm5, %v7467_v50  ;;  %v15298_v18 = vadd.f32 -1.0, %v20096_v15  ;;  %18194 = vmatmul.mubr.msk.f32.gmra.mrb[90].mxu1 %vm7554_vm5, %v8147_v6  ;;  %v7134_v19 = vmul.f32 1.442695, %v6960_v44  ;;  %v6963_v49 = vmin.f32 %v23737_v2, 0.0 }
 0x4a2   :  { %v23748_v58 = vpop.f32.mrb[52].mxu1  ;;  %8018 = vst.msk [vmem:[#allocation3 + $0x70] sm:$0xff] %vm7554_vm5, %v7954_v51  ;;  %v19114_v39 = vadd.f32 %v18055_v48, %v23049_v53  ;;  %v19115_v16 = vadd.f32 %v6005_v17, %v23052_v55  ;;  %v7955_v35 = vmax.f32 %v7715_v56, %v7843_v20  ;;  %v19116_v44 = vadd.f32 %v18058_v7, %v23061_v54 }
 0x4a3   :  { %v23751_v45 = vadd.f32 %v23605_v29, %v6574_v32  ;;  %v7466_v52 = vsel %vm6826_vm6, %v23644_v40, %v15298_v18  ;;  %20107 = vpow2.f32 %v7134_v19  ;;  %v7140_v21 = vmul.f32 1.442695, %v6963_v49  ;;  %v18061_v15 = vpop.f32.mrb[54].mxu0  ;;  %v8148_v53 = vld [vmem:[#allocation3 + $0x61] sm:$0xff]  ;;  %v23775_v19 = vpop.f32.mrb[53].mxu1 }
 0x4a4   :  { %v20098_v60 = vpop.eup %20097  ;;  %7595 = vst.msk [vmem:[#allocation2 + $0x140] sm:$0xff] %vm7554_vm5, %v7466_v52  ;;  %vm6830_vm9 = vcmp.gt.f32.partialorder %v23692_v36, 0.0  ;;  %v6577_v17 = vmul.f32 %v23593_v1, %v19114_v39  ;;  %8019 = vst.msk [vmem:[#allocation3 + $0x78] sm:$0xff] %vm7554_vm5, %v7955_v35  ;;  %v6025_v48 = vpop.f32.mrb[55].mxu0  ;;  %18196 = vmatprep.mubr.msk.f32.mxu1 %vm7554_vm5, %v8148_v53  ;;  %v6576_v54 = vmul.f32 %v23593_v1, %v19115_v16  ;;  %vm6833_vm10 = vcmp.gt.f32.partialorder %v23703_v8, 0.0 }
 0x4a5   :  { %v20100_v50 = vpop.eup %20099  ;;  %v15301_v6 = vadd.f32 -1.0, %v20098_v60  ;;  %v6962_v55 = vmin.f32 %v23751_v45, 0.0  ;;  %20109 = vpow2.f32 %v7140_v21  ;;  %v6579_v56 = vmul.f32 %v23593_v1, %v19116_v44  ;;  %v7717_v60 = vld [vmem:[#allocation2 + $0x100] ss:$2 sm:$0xff]  ;;  %v7845_v21 = vld [vmem:[#allocation2 + $0x101] ss:$2 sm:$0xff] }
 0x4a6   :  { %v15300_v40 = vadd.f32 -1.0, %v20100_v50  ;;  %v20102_v20 = vpop.eup %20101  ;;  %v23772_v51 = vadd.f32 %v23605_v29, %v6577_v17  ;;  %v19117_v18 = vadd.f32 %v6015_v27, %v23064_v59  ;;  %v23782_v35 = vadd.f32 %v23605_v29, %v6576_v54  ;;  %v7719_v53 = vld [vmem:[#allocation2 + $0x110] ss:$2 sm:$0xff] }
 0x4a7   :  { %v7469_v7 = vsel %vm6829_vm7, %v23659_v30, %v15301_v6  ;;  %v7138_v32 = vmul.f32 1.442695, %v6962_v55  ;;  %v20104_v49 = vpop.eup %20103  ;;  %v15303_v16 = vadd.f32 -1.0, %v20102_v20  ;;  %v23785_v30 = vadd.f32 %v23605_v29, %v6579_v56  ;;  %v18064_v52 = vpop.f32.mrb[56].mxu0  ;;  %v7847_v20 = vld [vmem:[#allocation2 + $0x111] ss:$2 sm:$0xff] }
 0x4a8   :  { %7598 = vst.msk [vmem:[#allocation2 + $0x158] sm:$0xff] %vm7554_vm5, %v7469_v7  ;;  %v7468_v39 = vsel %vm6828_vm1, %v23662_v43, %v15300_v40  ;;  %v15302_v59 = vadd.f32 -1.0, %v20104_v49  ;;  %v6965_v27 = vmin.f32 %v23772_v51, 0.0  ;;  %v6035_v44 = vpop.f32.mrb[57].mxu0  ;;  %vm6832_vm11 = vcmp.gt.f32.partialorder %v23718_v41, 0.0  ;;  %v23795_v55 = vpop.f32.mrb[54].mxu1 }
 0x4a9   :  { %7597 = vst.msk [vmem:[#allocation2 + $0x150] sm:$0xff] %vm7554_vm5, %v7468_v39  ;;  %20111 = vpow2.f32 %v7138_v32  ;;  %v7471_v43 = vsel %vm6831_vm8, %v23685_v61, %v15303_v16  ;;  %v8149_v50 = vld [vmem:[#allocation3 + $0x69] sm:$0xff]  ;;  %v6964_v6 = vmin.f32 %v23782_v35, 0.0  ;;  %26600 = vst [vmem:[#allocation30_spill] sm:$0xff] %v23795_v55  ;;  %v6967_v61 = vmin.f32 %v23785_v30, 0.0  ;;  %v23804_v7 = vpop.f32.mrb[55].mxu1 }
 0x4aa   :  { %v20106_v17 = vpop.eup %20105  ;;  %7600 = vst.msk [vmem:[#allocation2 + $0x168] sm:$0xff] %vm7554_vm5, %v7471_v43  ;;  %v7470_v40 = vsel %vm6830_vm9, %v23692_v36, %v15302_v59  ;;  %18197 = vmatmul.mubr.msk.f32.gmra.mrb[92].mxu1 %vm7554_vm5, %v8149_v50  ;;  %v7144_v54 = vmul.f32 1.442695, %v6965_v27  ;;  %v6578_v56 = vmul.f32 %v23593_v1, %v19117_v18  ;;  %v7956_v16 = vmax.f32 %v7717_v60, %v7845_v21  ;;  %v7721_v60 = vld [vmem:[#allocation2 + $0x120] ss:$2 sm:$0xff] }
 0x4ab   :  { %7599 = vst.msk [vmem:[#allocation2 + $0x160] sm:$0xff] %vm7554_vm5, %v7470_v40  ;;  %v15305_v32 = vadd.f32 -1.0, %v20106_v17  ;;  %v7142_v49 = vmul.f32 1.442695, %v6964_v6  ;;  %v8150_v39 = vld [vmem:[#allocation3 + $0x71] sm:$0xff]  ;;  %v19118_v43 = vadd.f32 %v18061_v15, %v23086_v0  ;;  %v18067_v55 = vpop.f32.mrb[58].mxu0  ;;  %v19119_v18 = vadd.f32 %v6025_v48, %v23093_v3 }
 0x4ac   :  { %20113 = vpow2.f32 %v7144_v54  ;;  %18199 = vmatprep.mubr.msk.f32.mxu1 %vm7554_vm5, %v8150_v39  ;;  %v7148_v36 = vmul.f32 1.442695, %v6967_v61  ;;  %v23810_v59 = vadd.f32 %v23605_v29, %v6578_v56  ;;  %v6045_v27 = vpop.f32.mrb[59].mxu0  ;;  %8020 = vst.msk [vmem:[#allocation3 + $0x80] sm:$0xff] %vm7554_vm5, %v7956_v16  ;;  %v7957_v15 = vmax.f32 %v7719_v53, %v7847_v20  ;;  %v7849_v21 = vld [vmem:[#allocation2 + $0x121] ss:$2 sm:$0xff] }
 0x4ad   :  { %v20108_v50 = vpop.eup %20107  ;;  %v7473_v6 = vsel %vm6833_vm10, %v23703_v8, %v15305_v32  ;;  %20115 = vpow2.f32 %v7142_v49  ;;  %v6581_v0 = vmul.f32 %v23593_v1, %v19118_v43  ;;  %v23818_v17 = vpop.f32.mrb[56].mxu1  ;;  %vm6835_vm12 = vcmp.gt.f32.partialorder %v23737_v2, 0.0 }
 0x4ae   :  { %7602 = vst.msk [vmem:[#allocation2 + $0x178] sm:$0xff] %vm7554_vm5, %v7473_v6  ;;  %v15304_v40 = vadd.f32 -1.0, %v20108_v50  ;;  %20117 = vpow2.f32 %v7148_v36  ;;  %v6966_v3 = vmin.f32 %v23810_v59, 0.0  ;;  %v23823_v48 = vpop.f32.mrb[57].mxu1  ;;  %v6580_v53 = vmul.f32 %v23593_v1, %v19119_v18  ;;  %8021 = vst.msk [vmem:[#allocation3 + $0x88] sm:$0xff] %vm7554_vm5, %v7957_v15 }
 0x4af   :  { %v20110_v8 = vpop.eup %20109  ;;  %v23826_v54 = vadd.f32 %v23605_v29, %v6581_v0  ;;  %v19120_v61 = vadd.f32 %v18064_v52, %v23108_v10  ;;  %v19121_v56 = vadd.f32 %v6035_v44, %v23113_v13  ;;  %v18070_v20 = vpop.f32.mrb[60].mxu0  ;;  %v7958_v16 = vmax.f32 %v7721_v60, %v7849_v21  ;;  %v7723_v6 = vld [vmem:[#allocation2 + $0x130] ss:$2 sm:$0xff]  ;;  %v7851_v0 = vld [vmem:[#allocation2 + $0x131] ss:$2 sm:$0xff] }
 0x4b0   :  { %v7472_v32 = vsel %vm6832_vm11, %v23718_v41, %v15304_v40  ;;  %v15307_v49 = vadd.f32 -1.0, %v20110_v8  ;;  %v7146_v39 = vmul.f32 1.442695, %v6966_v3  ;;  %v23835_v43 = vpop.f32.mrb[61].mxu0  ;;  %vm6834_vm13 = vcmp.gt.f32.partialorder %v23751_v45, 0.0  ;;  %v23844_v52 = vpop.f32.mrb[58].mxu1 }
 0x4b1   :  { %7601 = vst.msk [vmem:[#allocation2 + $0x170] sm:$0xff] %vm7554_vm5, %v7472_v32  ;;  %v6969_v36 = vmin.f32 %v23826_v54, 0.0  ;;  %v23841_v10 = vadd.f32 %v23605_v29, %v6580_v53  ;;  %v6583_v13 = vmul.f32 %v23593_v1, %v19120_v61  ;;  %v6582_v18 = vmul.f32 %v23593_v1, %v19121_v56  ;;  %8022 = vst.msk [vmem:[#allocation3 + $0x90] sm:$0xff] %vm7554_vm5, %v7958_v16  ;;  %v23852_v15 = vpop.f32.mrb[59].mxu1 }
 0x4b2   :  { %v7475_v41 = vsel %vm6835_vm12, %v23737_v2, %v15307_v49  ;;  %20119 = vpow2.f32 %v7146_v39  ;;  %v19122_v50 = vadd.f32 %v18067_v55, %v23130_v24  ;;  %vm6837_vm14 = vcmp.gt.f32.partialorder %v23772_v51, 0.0  ;;  %v23873_v39 = vpop.f32.mrb[60].mxu1 }
 0x4b3   :  { %v20112_v44 = vpop.eup %20111  ;;  %7604 = vst.msk [vmem:[#allocation2 + $0x188] sm:$0xff] %vm7554_vm5, %v7475_v41  ;;  %v7152_v21 = vmul.f32 1.442695, %v6969_v36  ;;  %v6968_v40 = vmin.f32 %v23841_v10, 0.0  ;;  %v23857_v2 = vpop.f32.mrb[62].mxu0  ;;  %v8151_v3 = vld [vmem:[#allocation3 + $0x79] sm:$0xff]  ;;  %v23860_v8 = vadd.f32 %v23605_v29, %v6583_v13  ;;  %v23863_v24 = vadd.f32 %v23605_v29, %v6582_v18 }
 0x4b4   :  { %v15306_v60 = vadd.f32 -1.0, %v20112_v44  ;;  %v6585_v55 = vmul.f32 %v23593_v1, %v19122_v50  ;;  %v19123_v53 = vadd.f32 %v6045_v27, %v23135_v28  ;;  %v23867_v61 = vpop.f32.mrb[63].mxu0  ;;  %18200 = vmatmul.mubr.msk.f32.gmra.mrb[94].mxu1 %vm7554_vm5, %v8151_v3  ;;  %v7959_v49 = vmax.f32 %v7723_v6, %v7851_v0  ;;  %v7725_v50 = vld [vmem:[#allocation2 + $0x140] ss:$2 sm:$0xff] }
 0x4b5   :  { %20121 = vpow2.f32 %v7152_v21  ;;  %v7150_v32 = vmul.f32 1.442695, %v6968_v40  ;;  %vm6836_vm15 = vcmp.gt.f32.partialorder %v23782_v35, 0.0  ;;  %vm6839_vm0 = vcmp.gt.f32.partialorder %v23785_v30, 0.0  ;;  %v8152_v28 = vld [vmem:[#allocation3 + $0x81] sm:$0xff] }
 0x4b6   :  { %v7474_v56 = vsel %vm6834_vm13, %v23751_v45, %v15306_v60  ;;  %v20114_v16 = vpop.eup %20113  ;;  %v6971_v27 = vmin.f32 %v23860_v8, 0.0  ;;  %v6970_v36 = vmin.f32 %v23863_v24, 0.0  ;;  %v23880_v45 = vpop.f32.mrb[61].mxu1  ;;  %18202 = vmatprep.mubr.msk.f32.mxu1 %vm7554_vm5, %v8152_v28  ;;  %v23884_v41 = vadd.f32 %v23605_v29, %v6585_v55  ;;  %8023 = vst.msk [vmem:[#allocation3 + $0x98] sm:$0xff] %vm7554_vm5, %v7959_v49 }
 0x4b7   :  { %7603 = vst.msk [vmem:[#allocation2 + $0x180] sm:$0xff] %vm7554_vm5, %v7474_v56  ;;  %v20116_v13 = vpop.eup %20115  ;;  %v15309_v44 = vadd.f32 -1.0, %v20114_v16  ;;  %20123 = vpow2.f32 %v7150_v32  ;;  %v6584_v18 = vmul.f32 %v23593_v1, %v19123_v53  ;;  %v23888_v6 = vpop.f32.mrb[64].mxu0  ;;  %v19124_v3 = vadd.f32 %v18070_v20, %v23152_v38  ;;  %v7853_v16 = vld [vmem:[#allocation2 + $0x141] ss:$2 sm:$0xff] }
 0x4b8   :  { %v20118_v0 = vpop.eup %20117  ;;  %v15308_v60 = vadd.f32 -1.0, %v20116_v13  ;;  %v7156_v21 = vmul.f32 1.442695, %v6971_v27  ;;  %v7154_v40 = vmul.f32 1.442695, %v6970_v36  ;;  %v23891_v56 = vpop.f32.mrb[65].mxu0 }
 0x4b9   :  { %v7477_v55 = vsel %vm6837_vm14, %v23772_v51, %v15309_v44  ;;  %v15311_v32 = vadd.f32 -1.0, %v20118_v0  ;;  %vm6838_vm2 = vcmp.gt.f32.partialorder %v23810_v59, 0.0  ;;  %v8153_v53 = vld [vmem:[#allocation3 + $0x89] sm:$0xff]  ;;  %v6973_v49 = vmin.f32 %v23884_v41, 0.0  ;;  %v23907_v20 = vpop.f32.mrb[62].mxu1 }
 0x4ba   :  { %7606 = vst.msk [vmem:[#allocation2 + $0x198] sm:$0xff] %vm7554_vm5, %v7477_v55  ;;  %v7476_v28 = vsel %vm6836_vm15, %v23782_v35, %v15308_v60  ;;  %20125 = vpow2.f32 %v7156_v21  ;;  %18203 = vmatmul.mubr.msk.f32.gmra.mrb[96].mxu1 %vm7554_vm5, %v8153_v53  ;;  %v23904_v38 = vadd.f32 %v23605_v29, %v6584_v18  ;;  %v6587_v51 = vmul.f32 %v23593_v1, %v19124_v3  ;;  %v7727_v13 = vld [vmem:[#allocation2 + $0x150] ss:$2 sm:$0xff]  ;;  %v23917_v18 = vpop.f32.mrb[63].mxu1 }
 0x4bb   :  { %7605 = vst.msk [vmem:[#allocation2 + $0x190] sm:$0xff] %vm7554_vm5, %v7476_v28  ;;  %v7479_v27 = vsel %vm6839_vm0, %v23785_v30, %v15311_v32  ;;  %20127 = vpow2.f32 %v7154_v40  ;;  %v7160_v36 = vmul.f32 1.442695, %v6973_v49  ;;  %v19125_v35 = vadd.f32 %v23835_v43, %v23157_v42  ;;  %v23915_v44 = vpop.f32.mrb[66].mxu0  ;;  %v7855_v40 = vld [vmem:[#allocation2 + $0x151] ss:$2 sm:$0xff] }
 0x4bc   :  { %v20120_v0 = vpop.eup %20119  ;;  %7608 = vst.msk [vmem:[#allocation2 + $0x1a8] sm:$0xff] %vm7554_vm5, %v7479_v27  ;;  %vm6841_vm3 = vcmp.gt.f32.partialorder %v23826_v54, 0.0  ;;  %v6972_v60 = vmin.f32 %v23904_v38, 0.0  ;;  %v23923_v21 = vadd.f32 %v23605_v29, %v6587_v51  ;;  %v7960_v30 = vmax.f32 %v7725_v50, %v7853_v16  ;;  %v23925_v3 = vpop.f32.mrb[67].mxu0 }
 0x4bd   :  { %v15310_v42 = vadd.f32 -1.0, %v20120_v0  ;;  %20129 = vpow2.f32 %v7160_v36  ;;  %v6586_v43 = vmul.f32 %v23593_v1, %v19125_v35  ;;  %v19126_v55 = vadd.f32 %v23857_v2, %v23177_v62  ;;  %v23930_v32 = vpop.f32.mrb[64].mxu1  ;;  %v8154_v49 = vld [vmem:[#allocation3 + $0x91] sm:$0xff] }
 0x4be   :  { %26601 = vst [vmem:[#allocation31_spill] sm:$0xff] %v23930_v32  ;;  %vm6840_vm6 = vcmp.gt.f32.partialorder %v23841_v10, 0.0  ;;  %v7158_v53 = vmul.f32 1.442695, %v6972_v60  ;;  %v6975_v28 = vmin.f32 %v23923_v21, 0.0  ;;  %8024 = vst.msk [vmem:[#allocation3 + $0xa0] sm:$0xff] %vm7554_vm5, %v7960_v30  ;;  %v19127_v50 = vadd.f32 %v23867_v61, %v23182_v5  ;;  %18205 = vmatprep.mubr.msk.f32.mxu1 %vm7554_vm5, %v8154_v49 }
 0x4bf   :  { %v20122_v16 = vpop.eup %20121  ;;  %v7478_v51 = vsel %vm6838_vm2, %v23810_v59, %v15310_v42  ;;  %v23942_v62 = vadd.f32 %v23605_v29, %v6586_v43  ;;  %v6589_v2 = vmul.f32 %v23593_v1, %v19126_v55  ;;  %v7961_v27 = vmax.f32 %v7727_v13, %v7855_v40  ;;  %v23945_v36 = vpop.f32.mrb[68].mxu0  ;;  %v7857_v49 = vld [vmem:[#allocation2 + $0x161] ss:$2 sm:$0xff] }
 0x4c0   :  { %7607 = vst.msk [vmem:[#allocation2 + $0x1a0] sm:$0xff] %vm7554_vm5, %v7478_v51  ;;  %v15313_v35 = vadd.f32 -1.0, %v20122_v16  ;;  %20131 = vpow2.f32 %v7158_v53  ;;  %v7164_v5 = vmul.f32 1.442695, %v6975_v28  ;;  %v6588_v61 = vmul.f32 %v23593_v1, %v19127_v50  ;;  %v23949_v0 = vpop.f32.mrb[69].mxu0  ;;  %v23959_v40 = vpop.f32.mrb[65].mxu1 }
 0x4c1   :  { %v20124_v59 = vpop.eup %20123  ;;  %vm6843_vm7 = vcmp.gt.f32.partialorder %v23860_v8, 0.0  ;;  %v6974_v60 = vmin.f32 %v23942_v62, 0.0  ;;  %v23954_v30 = vadd.f32 %v23605_v29, %v6589_v2  ;;  %8025 = vst.msk [vmem:[#allocation3 + $0xa8] sm:$0xff] %vm7554_vm5, %v7961_v27  ;;  %v19128_v13 = vadd.f32 %v23888_v6, %v23199_v25  ;;  %26602 = vst [vmem:[#allocation32_spill] sm:$0xff] %v23959_v40  ;;  %v7729_v53 = vld [vmem:[#allocation2 + $0x160] ss:$2 sm:$0xff] }
 0x4c2   :  { %v7481_v42 = vsel %vm6841_vm3, %v23826_v54, %v15313_v35  ;;  %v15312_v43 = vadd.f32 -1.0, %v20124_v59  ;;  %20133 = vpow2.f32 %v7164_v5  ;;  %v23965_v55 = vadd.f32 %v23605_v29, %v6588_v61  ;;  %v7731_v27 = vld [vmem:[#allocation2 + $0x170] ss:$2 sm:$0xff]  ;;  %v23980_v5 = vpop.f32.mrb[66].mxu1 }
 0x4c3   :  { %7610 = vst.msk [vmem:[#allocation2 + $0x1b8] sm:$0xff] %vm7554_vm5, %v7481_v42  ;;  %vm6842_vm1 = vcmp.gt.f32.partialorder %v23863_v24, 0.0  ;;  %v7162_v28 = vmul.f32 1.442695, %v6974_v60  ;;  %v6977_v25 = vmin.f32 %v23954_v30, 0.0  ;;  %v6591_v6 = vmul.f32 %v23593_v1, %v19128_v13  ;;  %v18085_v50 = vpop.f32.mrb[70].mxu0 }
 0x4c4   :  { %v20126_v16 = vpop.eup %20125  ;;  %v7480_v54 = vsel %vm6840_vm6, %v23841_v10, %v15312_v43  ;;  %vm6845_vm8 = vcmp.gt.f32.partialorder %v23884_v41, 0.0  ;;  %v6976_v51 = vmin.f32 %v23965_v55, 0.0  ;;  %v19129_v2 = vadd.f32 %v23891_v56, %v23204_v31  ;;  %v23978_v35 = vpop.f32.mrb[71].mxu0  ;;  %26603 = vst [vmem:[#allocation33_spill] sm:$0xff] %v23980_v5  ;;  %v7859_v5 = vld [vmem:[#allocation2 + $0x171] ss:$2 sm:$0xff] }
 0x4c5   :  { %v20128_v61 = vpop.eup %20127  ;;  %7609 = vst.msk [vmem:[#allocation2 + $0x1b0] sm:$0xff] %vm7554_vm5, %v7480_v54  ;;  %v15315_v59 = vadd.f32 -1.0, %v20126_v16  ;;  %20135 = vpow2.f32 %v7162_v28  ;;  %v8155_v60 = vld [vmem:[#allocation3 + $0x99] sm:$0xff]  ;;  %v7168_v13 = vmul.f32 1.442695, %v6977_v25  ;;  %v23984_v10 = vadd.f32 %v23605_v29, %v6591_v6  ;;  %v23986_v42 = vpop.f32.mrb[67].mxu1 }
 0x4c6   :  { %v15314_v43 = vadd.f32 -1.0, %v20128_v61  ;;  %18206 = vmatmul.mubr.msk.f32.gmra.mrb[98].mxu1 %vm7554_vm5, %v8155_v60  ;;  %v7166_v31 = vmul.f32 1.442695, %v6976_v51  ;;  %v6590_v56 = vmul.f32 %v23593_v1, %v19129_v2  ;;  %v7962_v40 = vmax.f32 %v7729_v53, %v7857_v49  ;;  %v24007_v51 = vpop.f32.mrb[68].mxu1 }
 0x4c7   :  { %v20130_v32 = vpop.eup %20129  ;;  %v7483_v28 = vsel %vm6843_vm7, %v23860_v8, %v15315_v59  ;;  %vm6844_vm9 = vcmp.gt.f32.partialorder %v23904_v38, 0.0  ;;  %20137 = vpow2.f32 %v7168_v13  ;;  %v6979_v25 = vmin.f32 %v23984_v10, 0.0  ;;  %v23995_v6 = vpop.f32.mrb[72].mxu0 }
 0x4c8   :  { %7612 = vst.msk [vmem:[#allocation2 + $0x1c8] sm:$0xff] %vm7554_vm5, %v7483_v28  ;;  %v7482_v16 = vsel %vm6842_vm1, %v23863_v24, %v15314_v43  ;;  %v15317_v53 = vadd.f32 -1.0, %v20130_v32  ;;  %20139 = vpow2.f32 %v7166_v31  ;;  %v8156_v49 = vld [vmem:[#allocation3 + $0xa1] sm:$0xff]  ;;  %v24002_v54 = vadd.f32 %v23605_v29, %v6590_v56  ;;  %8026 = vst.msk [vmem:[#allocation3 + $0xb0] sm:$0xff] %vm7554_vm5, %v7962_v40  ;;  %v24005_v8 = vpop.f32.mrb[73].mxu0  ;;  %v24015_v59 = vpop.f32.mrb[69].mxu1 }
 0x4c9   :  { %7611 = vst.msk [vmem:[#allocation2 + $0x1c0] sm:$0xff] %vm7554_vm5, %v7482_v16  ;;  %18208 = vmatprep.mubr.msk.f32.mxu1 %vm7554_vm5, %v8156_v49  ;;  %v7172_v2 = vmul.f32 1.442695, %v6979_v25  ;;  %v19130_v24 = vadd.f32 %v23915_v44, %v23237_v4  ;;  %v19131_v32 = vadd.f32 %v23925_v3, %v23249_v12  ;;  %v7963_v61 = vmax.f32 %v7731_v27, %v7859_v5  ;;  %v24036_v56 = vpop.f32.mrb[70].mxu1  ;;  %v7861_v49 = vld [vmem:[#allocation2 + $0x181] ss:$2 sm:$0xff] }
 0x4ca   :  { %v20132_v60 = vpop.eup %20131  ;;  %v7485_v40 = vsel %vm6845_vm8, %v23884_v41, %v15317_v53  ;;  %vm6847_vm10 = vcmp.gt.f32.partialorder %v23923_v21, 0.0  ;;  %v6978_v13 = vmin.f32 %v24002_v54, 0.0  ;;  %v19132_v43 = vadd.f32 %v23945_v36, %v23271_v37 }
 0x4cb   :  { %7614 = vst.msk [vmem:[#allocation2 + $0x1d8] sm:$0xff] %vm7554_vm5, %v7485_v40  ;;  %v15316_v4 = vadd.f32 -1.0, %v20132_v60  ;;  %20141 = vpow2.f32 %v7172_v2  ;;  %v6593_v12 = vmul.f32 %v23593_v1, %v19130_v24  ;;  %v6592_v44 = vmul.f32 %v23593_v1, %v19131_v32  ;;  %8027 = vst.msk [vmem:[#allocation3 + $0xb8] sm:$0xff] %vm7554_vm5, %v7963_v61  ;;  %v24028_v3 = vpop.f32.mrb[74].mxu0 }
 0x4cc   :  { %v20134_v41 = vpop.eup %20133  ;;  %v7170_v27 = vmul.f32 1.442695, %v6978_v13  ;;  %v6595_v5 = vmul.f32 %v23593_v1, %v19132_v43  ;;  %v19133_v31 = vadd.f32 %v23949_v0, %v23286_v11  ;;  %v19134_v37 = vadd.f32 %v18085_v50, %v23300_v14  ;;  %v24034_v36 = vpop.f32.mrb[75].mxu0  ;;  %v7733_v50 = vld [vmem:[#allocation2 + $0x180] ss:$2 sm:$0xff] }
 0x4cd   :  { %v7484_v28 = vsel %vm6844_vm9, %v23904_v38, %v15316_v4  ;;  %v15319_v25 = vadd.f32 -1.0, %v20134_v41  ;;  %v24042_v16 = vadd.f32 %v23605_v29, %v6593_v12  ;;  %v24045_v53 = vadd.f32 %v23605_v29, %v6592_v44  ;;  %v24053_v38 = vpop.f32.mrb[71].mxu1 }
 0x4ce   :  { %7613 = vst.msk [vmem:[#allocation2 + $0x1d0] sm:$0xff] %vm7554_vm5, %v7484_v28  ;;  %20143 = vpow2.f32 %v7170_v27  ;;  %v24049_v11 = vadd.f32 %v23605_v29, %v6595_v5  ;;  %v6594_v14 = vmul.f32 %v23593_v1, %v19133_v31  ;;  %v6597_v0 = vmul.f32 %v23593_v1, %v19134_v37  ;;  %v7735_v27 = vld [vmem:[#allocation2 + $0x190] ss:$2 sm:$0xff]  ;;  %v7863_v5 = vld [vmem:[#allocation2 + $0x191] ss:$2 sm:$0xff] }
 0x4cf   :  { %v20136_v2 = vpop.eup %20135  ;;  %v7487_v24 = vsel %vm6847_vm10, %v23923_v21, %v15319_v25  ;;  %vm6846_vm11 = vcmp.gt.f32.partialorder %v23942_v62, 0.0  ;;  %vm6849_vm12 = vcmp.gt.f32.partialorder %v23954_v30, 0.0  ;;  %v8157_v32 = vld [vmem:[#allocation3 + $0xa9] sm:$0xff]  ;;  %v6981_v61 = vmin.f32 %v24042_v16, 0.0  ;;  %v24061_v60 = vpop.f32.mrb[76].mxu0 }
 0x4d0   :  { %7616 = vst.msk [vmem:[#allocation2 + $0x1e8] sm:$0xff] %vm7554_vm5, %v7487_v24  ;;  %v15318_v1 = vadd.f32 -1.0, %v20136_v2  ;;  %vm6848_vm13 = vcmp.gt.f32.partialorder %v23965_v55, 0.0  ;;  %18209 = vmatmul.mubr.msk.f32.gmra.mrb[100].mxu1 %vm7554_vm5, %v8157_v32  ;;  %v6980_v40 = vmin.f32 %v24045_v53, 0.0  ;;  %v6983_v21 = vmin.f32 %v24049_v11, 0.0  ;;  %v24068_v13 = vpop.f32.mrb[77].mxu0 }
 0x4d1   :  { %v20138_v43 = vpop.eup %20137  ;;  %v7176_v4 = vmul.f32 1.442695, %v6981_v61  ;;  %v24071_v12 = vadd.f32 %v23605_v29, %v6594_v14  ;;  %v24074_v44 = vadd.f32 %v23605_v29, %v6597_v0  ;;  %v7964_v41 = vmax.f32 %v7733_v50, %v7861_v49  ;;  %v24086_v0 = vpop.f32.mrb[72].mxu1 }
 0x4d2   :  { %v20140_v31 = vpop.eup %20139  ;;  %v7486_v37 = vsel %vm6846_vm11, %v23942_v62, %v15318_v1  ;;  %v15321_v28 = vadd.f32 -1.0, %v20138_v43  ;;  %v7174_v25 = vmul.f32 1.442695, %v6980_v40  ;;  %v8158_v2 = vld [vmem:[#allocation3 + $0xb1] sm:$0xff]  ;;  %v7180_v24 = vmul.f32 1.442695, %v6983_v21 }
 0x4d3   :  { %7615 = vst.msk [vmem:[#allocation2 + $0x1e0] sm:$0xff] %vm7554_vm5, %v7486_v37  ;;  %v15320_v32 = vadd.f32 -1.0, %v20140_v31  ;;  %vm6851_vm14 = vcmp.gt.f32.partialorder %v23984_v10, 0.0  ;;  %20145 = vpow2.f32 %v7176_v4  ;;  %18211 = vmatprep.mubr.msk.f32.mxu1 %vm7554_vm5, %v8158_v2  ;;  %v6982_v29 = vmin.f32 %v24071_v12, 0.0  ;;  %8028 = vst.msk [vmem:[#allocation3 + $0xc0] sm:$0xff] %vm7554_vm5, %v7964_v41  ;;  %v24084_v14 = vpop.f32.mrb[78].mxu0 }
 0x4d4   :  { %v7489_v62 = vsel %vm6849_vm12, %v23954_v30, %v15321_v28  ;;  %vm6850_vm15 = vcmp.gt.f32.partialorder %v24002_v54, 0.0  ;;  %20147 = vpow2.f32 %v7174_v25  ;;  %v6985_v50 = vmin.f32 %v24074_v44, 0.0  ;;  %v24093_v49 = vpop.f32.mrb[79].mxu0  ;;  %v24095_v61 = vpop.f32.mrb[73].mxu1  ;;  %v7737_v43 = vld [vmem:[#allocation2 + $0x1a0] ss:$2 sm:$0xff] }
 0x4d5   :  { %v20142_v1 = vpop.eup %20141  ;;  %7618 = vst.msk [vmem:[#allocation2 + $0x1f8] sm:$0xff] %vm7554_vm5, %v7489_v62  ;;  %v7488_v40 = vsel %vm6848_vm13, %v23965_v55, %v15320_v32  ;;  %20149 = vpow2.f32 %v7180_v24  ;;  %v7178_v21 = vmul.f32 1.442695, %v6982_v29  ;;  %v19135_v30 = vadd.f32 %v23978_v35, %v23317_v34  ;;  %v7865_v4 = vld [vmem:[#allocation2 + $0x1a1] ss:$2 sm:$0xff]  ;;  %v24106_v25 = vpop.f32.mrb[74].mxu1 }
 0x4d6   :  { %7617 = vst.msk [vmem:[#allocation2 + $0x1f0] sm:$0xff] %vm7554_vm5, %v7488_v40  ;;  %v15323_v41 = vadd.f32 -1.0, %v20142_v1  ;;  %v7184_v31 = vmul.f32 1.442695, %v6985_v50  ;;  %v19136_v37 = vadd.f32 %v23995_v6, %v23344_v22  ;;  %v7965_v28 = vmax.f32 %v7735_v27, %v7863_v5  ;;  %v24111_v55 = vld [vmem:[%s26574_s4] ss:$0 sm:$0xff] }
 0x4d7   :  { %20151 = vpow2.f32 %v7178_v21  ;;  %v6596_v34 = vmul.f32 %v24111_v55, %v19135_v30  ;;  %v19137_v35 = vadd.f32 %v24005_v8, %v23354_v23  ;;  %v19138_v2 = vadd.f32 %v24028_v3, %v23368_v46  ;;  %v7739_v24 = vld [vmem:[#allocation2 + $0x1b0] ss:$2 sm:$0xff]  ;;  %v7867_v32 = vld [vmem:[#allocation2 + $0x1b1] ss:$2 sm:$0xff]  ;;  %v24118_v22 = vpop.f32.mrb[80].mxu0 }
 0x4d8   :  { %v20144_v6 = vpop.eup %20143  ;;  %v7491_v27 = vsel %vm6851_vm14, %v23984_v10, %v15323_v41  ;;  %20153 = vpow2.f32 %v7184_v31  ;;  %v6599_v5 = vmul.f32 %v24111_v55, %v19136_v37  ;;  %8029 = vst.msk [vmem:[#allocation3 + $0xc8] sm:$0xff] %vm7554_vm5, %v7965_v28  ;;  %v7966_v29 = vmax.f32 %v7737_v43, %v7865_v4  ;;  %v24125_v62 = vpop.f32.mrb[81].mxu0  ;;  %v24131_v46 = vld [vmem:[%s26574_s4 + $0x1] ss:$0 sm:$0xff] }
 0x4d9   :  { %7620 = vst.msk [vmem:[#allocation2 + $0x208] sm:$0xff] %vm7554_vm5, %v7491_v27  ;;  %v15322_v23 = vadd.f32 -1.0, %v20144_v6  ;;  %v24134_v8 = vadd.f32 %v24131_v46, %v6596_v34  ;;  %v6598_v10 = vmul.f32 %v24111_v55, %v19137_v35  ;;  %v6601_v3 = vmul.f32 %v24111_v55, %v19138_v2  ;;  %v24146_v43 = vpop.f32.mrb[75].mxu1 }
 0x4da   :  { %v8159_v50 = vld [vmem:[#allocation3 + $0xb9] sm:$0xff]  ;;  %v24139_v1 = vadd.f32 %v24131_v46, %v6599_v5  ;;  %8030 = vst.msk [vmem:[#allocation3 + $0xd0] sm:$0xff] %vm7554_vm5, %v7966_v29  ;;  %v19139_v40 = vadd.f32 %v24034_v36, %v23377_v63  ;;  %v19140_v21 = vadd.f32 %v24061_v60, %v23392_v26  ;;  %v7967_v30 = vmax.f32 %v7739_v24, %v7867_v32 }
 0x4db   :  { %v7490_v4 = vsel %vm6850_vm15, %v24002_v54, %v15322_v23  ;;  %vm6853_vm0 = vcmp.gt.f32.partialorder %v24042_v16, 0.0  ;;  %18212 = vmatmul.mubr.msk.f32.gmra.mrb[102].mxu1 %vm7554_vm5, %v8159_v50  ;;  %v6984_v41 = vmin.f32 %v24134_v8, 0.0  ;;  %v24155_v31 = vadd.f32 %v24131_v46, %v6598_v10  ;;  %v24157_v63 = vpop.f32.mrb[82].mxu0  ;;  %v24179_v50 = vpop.f32.mrb[76].mxu1 }
 0x4dc   :  { %7619 = vst.msk [vmem:[#allocation2 + $0x200] sm:$0xff] %vm7554_vm5, %v7490_v4  ;;  %vm6852_vm2 = vcmp.gt.f32.partialorder %v24045_v53, 0.0  ;;  %v6987_v26 = vmin.f32 %v24139_v1, 0.0  ;;  %v24163_v36 = vadd.f32 %v24131_v46, %v6601_v3  ;;  %v6600_v54 = vmul.f32 %v24111_v55, %v19139_v40  ;;  %8031 = vst.msk [vmem:[#allocation3 + $0xd8] sm:$0xff] %vm7554_vm5, %v7967_v30  ;;  %v24167_v60 = vpop.f32.mrb[83].mxu0 }
 0x4dd   :  { %v20146_v37 = vpop.eup %20145  ;;  %vm6855_vm3 = vcmp.gt.f32.partialorder %v24049_v11, 0.0  ;;  %vm6854_vm6 = vcmp.gt.f32.partialorder %v24071_v12, 0.0  ;;  %v7182_v28 = vmul.f32 1.442695, %v6984_v41  ;;  %v6986_v34 = vmin.f32 %v24155_v31, 0.0  ;;  %26604 = vst [vmem:[#allocation34_spill] sm:$0xff] %v24179_v50 }
 0x4de   :  { %v20148_v35 = vpop.eup %20147  ;;  %v15325_v2 = vadd.f32 -1.0, %v20146_v37  ;;  %v7188_v24 = vmul.f32 1.442695, %v6987_v26  ;;  %v6989_v32 = vmin.f32 %v24163_v36, 0.0  ;;  %v6603_v6 = vmul.f32 %v24111_v55, %v19140_v21  ;;  %v7741_v4 = vld [vmem:[#allocation2 + $0x1c0] ss:$2 sm:$0xff] }
 0x4df   :  { %v20150_v27 = vpop.eup %20149  ;;  %v15324_v5 = vadd.f32 -1.0, %v20148_v35  ;;  %20155 = vpow2.f32 %v7182_v28  ;;  %v8160_v29 = vld [vmem:[#allocation3 + $0xc1] sm:$0xff]  ;;  %v7186_v23 = vmul.f32 1.442695, %v6986_v34  ;;  %v24175_v10 = vadd.f32 %v24131_v46, %v6600_v54  ;;  %v24177_v3 = vpop.f32.mrb[84].mxu0 }
 0x4e0   :  { %v7493_v40 = vsel %vm6853_vm0, %v24042_v16, %v15325_v2  ;;  %v15327_v30 = vadd.f32 -1.0, %v20150_v27  ;;  %20157 = vpow2.f32 %v7188_v24  ;;  %18214 = vmatprep.mubr.msk.f32.mxu1 %vm7554_vm5, %v8160_v29  ;;  %v7192_v21 = vmul.f32 1.442695, %v6989_v32  ;;  %v24185_v41 = vpop.f32.mrb[85].mxu0  ;;  %v7869_v28 = vld [vmem:[#allocation2 + $0x1c1] ss:$2 sm:$0xff] }
 0x4e1   :  { %v20152_v26 = vpop.eup %20151  ;;  %7622 = vst.msk [vmem:[#allocation2 + $0x218] sm:$0xff] %vm7554_vm5, %v7493_v40  ;;  %v7492_v54 = vsel %vm6852_vm2, %v24045_v53, %v15324_v5  ;;  %vm6857_vm7 = vcmp.gt.f32.partialorder %v24074_v44, 0.0  ;;  %20159 = vpow2.f32 %v7186_v23  ;;  %v8161_v37 = vld [vmem:[#allocation3 + $0xc9] sm:$0xff]  ;;  %v6988_v16 = vmin.f32 %v24175_v10, 0.0  ;;  %v24193_v34 = vpop.f32.mrb[77].mxu1 }
 0x4e2   :  { %26605 = vst [vmem:[#allocation35_spill] sm:$0xff] %v24193_v34  ;;  %v20154_v35 = vpop.eup %20153  ;;  %7621 = vst.msk [vmem:[#allocation2 + $0x210] sm:$0xff] %vm7554_vm5, %v7492_v54  ;;  %v7495_v2 = vsel %vm6855_vm3, %v24049_v11, %v15327_v30  ;;  %v15326_v24 = vadd.f32 -1.0, %v20152_v26  ;;  %20161 = vpow2.f32 %v7192_v21  ;;  %18215 = vmatmul.mubr.msk.f32.gmra.mrb[104].mxu1 %vm7554_vm5, %v8161_v37  ;;  %v24201_v53 = vadd.f32 %v24131_v46, %v6603_v6  ;;  %v7743_v32 = vld [vmem:[#allocation2 + $0x1d0] ss:$2 sm:$0xff]  ;;  %v24203_v5 = vpop.f32.mrb[78].mxu1 }
 0x4e3   :  { %v7871_v27 = vld [vmem:[#allocation2 + $0x1d1] ss:$2 sm:$0xff]  ;;  %26606 = vst [vmem:[#allocation36_spill] sm:$0xff] %v24203_v5  ;;  %7624 = vst.msk [vmem:[#allocation2 + $0x228] sm:$0xff] %vm7554_vm5, %v7495_v2  ;;  %v15329_v29 = vadd.f32 -1.0, %v20154_v35  ;;  %v19141_v54 = vadd.f32 %v24068_v13, %v23396_v57  ;;  %v19142_v11 = vadd.f32 %v24084_v14, %v23416_v47  ;;  %v24210_v30 = vpop.f32.mrb[86].mxu0  ;;  %v7968_v37 = vmax.f32 %v7741_v4, %v7869_v28 }
 0x4e4   :  { %v7190_v23 = vmul.f32 1.442695, %v6988_v16  ;;  %v8162_v40 = vld [vmem:[#allocation3 + $0xd1] sm:$0xff]  ;;  %v24212_v21 = vpop.f32.mrb[79].mxu1  ;;  %v7494_v6 = vsel %vm6854_vm6, %v24071_v12, %v15326_v24  ;;  %vm6856_vm1 = vcmp.gt.f32.partialorder %v24134_v8, 0.0  ;;  %v6991_v26 = vmin.f32 %v24201_v53, 0.0 }
 0x4e5   :  { %26607 = vst [vmem:[#allocation37_spill] sm:$0xff] %v24212_v21  ;;  %18217 = vmatprep.mubr.msk.f32.mxu1 %vm7554_vm5, %v8162_v40  ;;  %7623 = vst.msk [vmem:[#allocation2 + $0x220] sm:$0xff] %vm7554_vm5, %v7494_v6  ;;  %v7497_v57 = vsel %vm6857_vm7, %v24074_v44, %v15329_v29  ;;  %v6602_v47 = vmul.f32 %v24111_v55, %v19141_v54  ;;  %v6605_v13 = vmul.f32 %v24111_v55, %v19142_v11  ;;  %v7745_v14 = vld [vmem:[#allocation2 + $0x1e0] ss:$2 sm:$0xff]  ;;  %v7873_v12 = vld [vmem:[#allocation2 + $0x1e1] ss:$2 sm:$0xff] }
 0x4e6   :  { %20163 = vpow2.f32 %v7190_v23  ;;  %v24226_v16 = vpop.f32.mrb[87].mxu0  ;;  %7626 = vst.msk [vmem:[#allocation2 + $0x238] sm:$0xff] %vm7554_vm5, %v7497_v57  ;;  %v7196_v35 = vmul.f32 1.442695, %v6991_v26  ;;  %8032 = vst.msk [vmem:[#allocation3 + $0xe0] sm:$0xff] %vm7554_vm5, %v7968_v37  ;;  %v26608_v4 = vld [vmem:[#allocation11_spill] sm:$0xff]  ;;  %v7969_v24 = vmax.f32 %v7743_v32, %v7871_v27  ;;  %v7970_v32 = vmax.f32 %v7745_v14, %v7873_v12 }
 0x4e7   :  { %v19143_v28 = vadd.f32 %v24093_v49, %v26608_v4  ;;  %v26609_v2 = vld [vmem:[#allocation12_spill] sm:$0xff]  ;;  %v24235_v29 = vadd.f32 %v24131_v46, %v6602_v47  ;;  %v24238_v23 = vadd.f32 %v24131_v46, %v6605_v13  ;;  %v26610_v40 = vld [vmem:[#allocation13_spill] sm:$0xff]  ;;  %v26611_v11 = vld [vmem:[#allocation14_spill] sm:$0xff]  ;;  %v24244_v26 = vpop.f32.mrb[88].mxu0  ;;  %vm6859_vm8 = vcmp.gt.f32.partialorder %v24139_v1, 0.0 }
 0x4e8   :  { %v19144_v44 = vadd.f32 %v24118_v22, %v26609_v2  ;;  %v19145_v54 = vadd.f32 %v24125_v62, %v26610_v40  ;;  %v19146_v6 = vadd.f32 %v24157_v63, %v26611_v11  ;;  %20165 = vpow2.f32 %v7196_v35  ;;  %8033 = vst.msk [vmem:[#allocation3 + $0xe8] sm:$0xff] %vm7554_vm5, %v7969_v24  ;;  %v24249_v27 = vpop.f32.mrb[89].mxu0  ;;  %8034 = vst.msk [vmem:[#allocation3 + $0xf0] sm:$0xff] %vm7554_vm5, %v7970_v32  ;;  %v26618_v34 = vld [vmem:[#allocation21_spill] sm:$0xff] }
 0x4e9   :  { %v6604_v49 = vmul.f32 %v24111_v55, %v19143_v28  ;;  %v20156_v37 = vpop.eup %20155  ;;  %vm6858_vm9 = vcmp.gt.f32.partialorder %v24155_v31, 0.0  ;;  %v6990_v62 = vmin.f32 %v24235_v29, 0.0  ;;  %v6993_v63 = vmin.f32 %v24238_v23, 0.0 }
 0x4ea   :  { %v6607_v22 = vmul.f32 %v24111_v55, %v19144_v44  ;;  %v20158_v57 = vpop.eup %20157  ;;  %v15328_v47 = vadd.f32 -1.0, %v20156_v37  ;;  %v6606_v14 = vmul.f32 %v24111_v55, %v19145_v54  ;;  %v6609_v44 = vmul.f32 %v24111_v55, %v19146_v6 }
 0x4eb   :  { %v24256_v13 = vadd.f32 %v24131_v46, %v6604_v49  ;;  %v20160_v12 = vpop.eup %20159  ;;  %v15331_v4 = vadd.f32 -1.0, %v20158_v57  ;;  %v7194_v28 = vmul.f32 1.442695, %v6990_v62  ;;  %v7200_v2 = vmul.f32 1.442695, %v6993_v63  ;;  %v24264_v24 = vpop.f32.mrb[90].mxu0 }
 0x4ec   :  { %v24259_v35 = vadd.f32 %v24131_v46, %v6607_v22  ;;  %v20162_v40 = vpop.eup %20161  ;;  %v7496_v11 = vsel %vm6856_vm1, %v24134_v8, %v15328_v47  ;;  %v15330_v49 = vadd.f32 -1.0, %v20160_v12  ;;  %vm6861_vm10 = vcmp.gt.f32.partialorder %v24163_v36, 0.0  ;;  %v24271_v22 = vpop.f32.mrb[91].mxu0 }
 0x4ed   :  { %v6992_v54 = vmin.f32 %v24256_v13, 0.0  ;;  %7625 = vst.msk [vmem:[#allocation2 + $0x230] sm:$0xff] %vm7554_vm5, %v7496_v11  ;;  %v7499_v6 = vsel %vm6859_vm8, %v24139_v1, %v15331_v4  ;;  %v15333_v32 = vadd.f32 -1.0, %v20162_v40  ;;  %vm6860_vm11 = vcmp.gt.f32.partialorder %v24175_v10, 0.0  ;;  %v8163_v37 = vld [vmem:[#allocation3 + $0xd9] sm:$0xff] }
 0x4ee   :  { %20167 = vpow2.f32 %v7194_v28  ;;  %7628 = vst.msk [vmem:[#allocation2 + $0x248] sm:$0xff] %vm7554_vm5, %v7499_v6  ;;  %v7498_v8 = vsel %vm6858_vm9, %v24155_v31, %v15330_v49  ;;  %18218 = vmatmul.mubr.msk.f32.gmra.mrb[106].mxu1 %vm7554_vm5, %v8163_v37  ;;  %v6995_v63 = vmin.f32 %v24259_v35, 0.0  ;;  %v24289_v12 = vadd.f32 %v24131_v46, %v6606_v14  ;;  %v26612_v31 = vld [vmem:[#allocation15_spill] sm:$0xff] }
 0x4ef   :  { %20169 = vpow2.f32 %v7200_v2  ;;  %v7198_v62 = vmul.f32 1.442695, %v6992_v54  ;;  %7627 = vst.msk [vmem:[#allocation2 + $0x240] sm:$0xff] %vm7554_vm5, %v7498_v8  ;;  %v7501_v1 = vsel %vm6861_vm10, %v24163_v36, %v15333_v32  ;;  %v8164_v47 = vld [vmem:[#allocation3 + $0xe1] sm:$0xff]  ;;  %v24292_v4 = vadd.f32 %v24131_v46, %v6609_v44  ;;  %v7747_v2 = vld [vmem:[#allocation2 + $0x1f0] ss:$2 sm:$0xff] }
 0x4f0   :  { %v20164_v57 = vpop.eup %20163  ;;  %v19147_v28 = vadd.f32 %v24167_v60, %v26612_v31  ;;  %v24296_v40 = vpop.f32.mrb[92].mxu0  ;;  %7630 = vst.msk [vmem:[#allocation2 + $0x258] sm:$0xff] %vm7554_vm5, %v7501_v1  ;;  %v7204_v49 = vmul.f32 1.442695, %v6995_v63  ;;  %18220 = vmatprep.mubr.msk.f32.mxu1 %vm7554_vm5, %v8164_v47  ;;  %v26613_v36 = vld [vmem:[#allocation16_spill] sm:$0xff]  ;;  %vm6863_vm12 = vcmp.gt.f32.partialorder %v24201_v53, 0.0  ;;  %v19153_v50 = vadd.f32 %v24249_v27, %v26618_v34 }
 0x4f1   :  { %v15332_v11 = vadd.f32 -1.0, %v20164_v57  ;;  %20171 = vpow2.f32 %v7198_v62  ;;  %v19148_v14 = vadd.f32 %v24177_v3, %v26613_v36  ;;  %v7875_v54 = vld [vmem:[#allocation2 + $0x1f1] ss:$2 sm:$0xff]  ;;  %v24302_v6 = vpop.f32.mrb[93].mxu0  ;;  %vm6862_vm13 = vcmp.gt.f32.partialorder %v24235_v29, 0.0  ;;  %v8165_v32 = vld [vmem:[#allocation3 + $0xe9] sm:$0xff] }
 0x4f2   :  { %v6994_v60 = vmin.f32 %v24289_v12, 0.0  ;;  %v6997_v44 = vmin.f32 %v24292_v4, 0.0  ;;  %v20166_v37 = vpop.eup %20165  ;;  %20173 = vpow2.f32 %v7204_v49  ;;  %18221 = vmatmul.mubr.msk.f32.gmra.mrb[108].mxu1 %vm7554_vm5, %v8165_v32  ;;  %v6608_v3 = vmul.f32 %v24111_v55, %v19147_v28  ;;  %v7749_v63 = vld [vmem:[#allocation2 + $0x200] ss:$2 sm:$0xff]  ;;  %v7877_v57 = vld [vmem:[#allocation2 + $0x201] ss:$2 sm:$0xff] }
 0x4f3   :  { %v7500_v8 = vsel %vm6860_vm11, %v24175_v10, %v15332_v11  ;;  %v6611_v62 = vmul.f32 %v24111_v55, %v19148_v14  ;;  %v15335_v1 = vadd.f32 -1.0, %v20166_v37  ;;  %v7971_v36 = vmax.f32 %v7747_v2, %v7875_v54  ;;  %v24315_v21 = vpop.f32.mrb[94].mxu0  ;;  %v26614_v11 = vld [vmem:[#allocation17_spill] sm:$0xff]  ;;  %v26615_v49 = vld [vmem:[#allocation18_spill] sm:$0xff] }
 0x4f4   :  { %7629 = vst.msk [vmem:[#allocation2 + $0x250] sm:$0xff] %vm7554_vm5, %v7500_v8  ;;  %v7202_v47 = vmul.f32 1.442695, %v6994_v60  ;;  %v7208_v31 = vmul.f32 1.442695, %v6997_v44  ;;  %v24318_v5 = vadd.f32 %v24131_v46, %v6608_v3  ;;  %v19149_v28 = vadd.f32 %v24185_v41, %v26614_v11  ;;  %v24327_v32 = vpop.f32.mrb[95].mxu0 }
 0x4f5   :  { %v24321_v10 = vadd.f32 %v24131_v46, %v6611_v62  ;;  %v19150_v14 = vadd.f32 %v24210_v30, %v26615_v49  ;;  %v7503_v2 = vsel %vm6863_vm12, %v24201_v53, %v15335_v1  ;;  %8035 = vst.msk [vmem:[#allocation3 + $0xf8] sm:$0xff] %vm7554_vm5, %v7971_v36  ;;  %v7972_v54 = vmax.f32 %v7749_v63, %v7877_v57  ;;  %v26616_v60 = vld [vmem:[#allocation19_spill] sm:$0xff]  ;;  %v8132_v41 = vld [vmem:[%s26572_s2] sm:$0xff] }
 0x4f6   :  { %20175 = vpow2.f32 %v7202_v47  ;;  %v19151_v44 = vadd.f32 %v24226_v16, %v26616_v60  ;;  %v8133_v30 = vld [vmem:[%s26572_s2 + $0x8] sm:$0xff]  ;;  %7632 = vst.msk [vmem:[#allocation2 + $0x268] sm:$0xff] %vm7554_vm5, %v7503_v2  ;;  %vm6865_vm14 = vcmp.gt.f32.partialorder %v24238_v23, 0.0  ;;  %vm6864_vm15 = vcmp.gt.f32.partialorder %v24256_v13, 0.0  ;;  %v26619_v27 = vld [vmem:[#allocation22_spill] sm:$0xff] }
 0x4f7   :  { %20177 = vpow2.f32 %v7208_v31  ;;  %v6996_v53 = vmin.f32 %v24318_v5, 0.0  ;;  %v6999_v16 = vmin.f32 %v24321_v10, 0.0  ;;  %v6610_v8 = vmul.f32 %v24111_v55, %v19149_v28  ;;  %8036 = vst.msk [vmem:[#allocation3 + $0x100] sm:$0xff] %vm7554_vm5, %v7972_v54  ;;  %v24350_v63 = vpop.f32.mrb[96].mxu0  ;;  %v26617_v31 = vld [vmem:[#allocation20_spill] sm:$0xff] }
 0x4f8   :  { %v20168_v37 = vpop.eup %20167  ;;  %v6613_v3 = vmul.f32 %v24111_v55, %v19150_v14  ;;  %v6612_v62 = vmul.f32 %v24111_v55, %v19151_v44  ;;  %v19010_v36 = vpack.c.bf16 %v8133_v30, %v8132_v41  ;;  %v19152_v11 = vadd.f32 %v24244_v26, %v26617_v31  ;;  %v24354_v49 = vpop.f32.mrb[97].mxu0  ;;  %v7751_v30 = vld [vmem:[#allocation2 + $0x210] ss:$2 sm:$0xff] }
 0x4f9   :  { %v20170_v57 = vpop.eup %20169  ;;  %v15334_v1 = vadd.f32 -1.0, %v20168_v37  ;;  %v7206_v47 = vmul.f32 1.442695, %v6996_v53  ;;  %v7212_v60 = vmul.f32 1.442695, %v6999_v16  ;;  %v24357_v28 = vadd.f32 %v24131_v46, %v6610_v8 }
 0x4fa   :  { %v15337_v2 = vadd.f32 -1.0, %v20170_v57  ;;  %v24360_v14 = vadd.f32 %v24131_v46, %v6613_v3  ;;  %v24366_v41 = vadd.f32 %v24131_v46, %v6612_v62  ;;  %19011 = vmatprep.subr.bf16.mxu1 %v19010_v36  ;;  %v6615_v26 = vmul.f32 %v24111_v55, %v19152_v11  ;;  %v7753_v11 = vld [vmem:[#allocation2 + $0x220] ss:$2 sm:$0xff] }
 0x4fb   :  { %v20172_v54 = vpop.eup %20171  ;;  %v7502_v44 = vsel %vm6862_vm13, %v24235_v29, %v15334_v1  ;;  %20179 = vpow2.f32 %v7206_v47  ;;  %vm6867_vm0 = vcmp.gt.f32.partialorder %v24259_v35, 0.0  ;;  %19013 = vmatpush3.bf16.msra.mxu1 %v19010_v36  ;;  %v7879_v29 = vld [vmem:[#allocation2 + $0x211] ss:$2 sm:$0xff]  ;;  %v24374_v16 = vpop.f32.mrb[98].mxu0  ;;  %vm6866_vm2 = vcmp.gt.f32.partialorder %v24289_v12, 0.0 }
 0x4fc   :  { %7631 = vst.msk [vmem:[#allocation2 + $0x260] sm:$0xff] %vm7554_vm5, %v7502_v44  ;;  %v7505_v53 = vsel %vm6865_vm14, %v24238_v23, %v15337_v2  ;;  %v15336_v37 = vadd.f32 -1.0, %v20172_v54  ;;  %20181 = vpow2.f32 %v7212_v60  ;;  %v20174_v8 = vpop.eup %20173  ;;  %vm6869_vm3 = vcmp.gt.f32.partialorder %v24292_v4, 0.0  ;;  %v8166_v3 = vld [vmem:[#allocation3 + $0xf1] sm:$0xff]  ;;  %v24381_v57 = vpop.f32.mrb[99].mxu0 }
 0x4fd   :  { %7634 = vst.msk [vmem:[#allocation2 + $0x278] sm:$0xff] %vm7554_vm5, %v7505_v53  ;;  %v6998_v62 = vmin.f32 %v24357_v28, 0.0  ;;  %v7001_v23 = vmin.f32 %v24360_v14, 0.0  ;;  %v15339_v47 = vadd.f32 -1.0, %v20174_v8  ;;  %18223 = vmatprep.mubr.msk.f32.mxu1 %vm7554_vm5, %v8166_v3  ;;  %v7000_v36 = vmin.f32 %v24366_v41, 0.0 }
 0x4fe   :  { %v7504_v1 = vsel %vm6864_vm15, %v24256_v13, %v15336_v37  ;;  %v24389_v31 = vadd.f32 %v24131_v46, %v6615_v26  ;;  %v7881_v2 = vld [vmem:[#allocation2 + $0x221] ss:$2 sm:$0xff]  ;;  %v8167_v44 = vld [vmem:[#allocation3 + $0xf9] sm:$0xff]  ;;  %v7973_v53 = vmax.f32 %v7751_v30, %v7879_v29  ;;  %vm6868_vm6 = vcmp.gt.f32.partialorder %v24318_v5, 0.0 }
 0x4ff   :  { %7633 = vst.msk [vmem:[#allocation2 + $0x270] sm:$0xff] %vm7554_vm5, %v7504_v1  ;;  %v7210_v60 = vmul.f32 1.442695, %v6998_v62  ;;  %v7216_v54 = vmul.f32 1.442695, %v7001_v23  ;;  %v7507_v37 = vsel %vm6867_vm0, %v24259_v35, %v15339_v47  ;;  %18224 = vmatmul.mubr.msk.f32.gmra.mrb[110].mxu1 %vm7554_vm5, %v8167_v44  ;;  %v24400_v3 = vpop.f32.mrb[100].mxu0  ;;  %v6614_v34 = vmul.f32 %v24111_v55, %v19153_v50 }
 0x500   :  { %v20176_v13 = vpop.eup %20175  ;;  %v7214_v26 = vmul.f32 1.442695, %v7000_v36  ;;  %v7003_v8 = vmin.f32 %v24389_v31, 0.0  ;;  %7636 = vst.msk [vmem:[#allocation2 + $0x288] sm:$0xff] %vm7554_vm5, %v7507_v37  ;;  %8037 = vst.msk [vmem:[#allocation3 + $0x108] sm:$0xff] %vm7554_vm5, %v7973_v53  ;;  %v19154_v35 = vadd.f32 %v24264_v24, %v26619_v27  ;;  %v24407_v23 = vpop.f32.mrb[101].mxu0  ;;  %v7974_v36 = vmax.f32 %v7753_v11, %v7881_v2 }
 0x501   :  { %v20178_v62 = vpop.eup %20177  ;;  %v15338_v30 = vadd.f32 -1.0, %v20176_v13  ;;  %20183 = vpow2.f32 %v7210_v60  ;;  %v7755_v29 = vld [vmem:[#allocation2 + $0x230] ss:$2 sm:$0xff]  ;;  %v7883_v44 = vld [vmem:[#allocation2 + $0x231] ss:$2 sm:$0xff]  ;;  %v24413_v60 = vadd.f32 %v24131_v46, %v6614_v34  ;;  %v26620_v11 = vld [vmem:[#allocation23_spill] sm:$0xff] }
 0x502   :  { %v15341_v1 = vadd.f32 -1.0, %v20178_v62  ;;  %20185 = vpow2.f32 %v7216_v54  ;;  %v7220_v47 = vmul.f32 1.442695, %v7003_v8  ;;  %v6617_v50 = vmul.f32 %v24111_v55, %v19154_v35  ;;  %8038 = vst.msk [vmem:[#allocation3 + $0x110] sm:$0xff] %vm7554_vm5, %v7974_v36  ;;  %v26621_v54 = vld [vmem:[#allocation24_spill] sm:$0xff]  ;;  %v26622_v27 = vld [vmem:[#allocation25_spill] sm:$0xff] }
 0x503   :  { %v7506_v13 = vsel %vm6866_vm2, %v24289_v12, %v15338_v30  ;;  %20187 = vpow2.f32 %v7214_v26  ;;  %v19155_v2 = vadd.f32 %v24271_v22, %v26620_v11  ;;  %v19156_v12 = vadd.f32 %v24296_v40, %v26621_v54  ;;  %v24425_v53 = vpop.f32.mrb[102].mxu0  ;;  %v7885_v11 = vld [vmem:[#allocation2 + $0x241] ss:$2 sm:$0xff] }
 0x504   :  { %7635 = vst.msk [vmem:[#allocation2 + $0x280] sm:$0xff] %vm7554_vm5, %v7506_v13  ;;  %v7509_v24 = vsel %vm6869_vm3, %v24292_v4, %v15341_v1  ;;  %20189 = vpow2.f32 %v7220_v47  ;;  %vm6871_vm7 = vcmp.gt.f32.partialorder %v24321_v10, 0.0  ;;  %v7002_v26 = vmin.f32 %v24413_v60, 0.0  ;;  %v24433_v62 = vpop.f32.mrb[103].mxu0 }
 0x505   :  { %v20180_v37 = vpop.eup %20179  ;;  %7638 = vst.msk [vmem:[#allocation2 + $0x298] sm:$0xff] %vm7554_vm5, %v7509_v24  ;;  %v24431_v4 = vadd.f32 %v24131_v46, %v6617_v50  ;;  %v7975_v8 = vmax.f32 %v7755_v29, %v7883_v44  ;;  %v6616_v34 = vmul.f32 %v24111_v55, %v19155_v2  ;;  %v6619_v40 = vmul.f32 %v24111_v55, %v19156_v12  ;;  %v7757_v24 = vld [vmem:[#allocation2 + $0x240] ss:$2 sm:$0xff] }
 0x506   :  { %v20182_v30 = vpop.eup %20181  ;;  %v15340_v22 = vadd.f32 -1.0, %v20180_v37  ;;  %v19157_v35 = vadd.f32 %v24302_v6, %v26622_v27  ;;  %vm6870_vm1 = vcmp.gt.f32.partialorder %v24357_v28, 0.0  ;;  %v7218_v47 = vmul.f32 1.442695, %v7002_v26  ;;  %v26623_v12 = vld [vmem:[#allocation26_spill] sm:$0xff] }
 0x507   :  { %v15343_v1 = vadd.f32 -1.0, %v20182_v30  ;;  %v7005_v36 = vmin.f32 %v24431_v4, 0.0  ;;  %8039 = vst.msk [vmem:[#allocation3 + $0x118] sm:$0xff] %vm7554_vm5, %v7975_v8  ;;  %v8168_v44 = vld [vmem:[#allocation3 + $0x101] sm:$0xff]  ;;  %v24446_v13 = vadd.f32 %v24131_v46, %v6616_v34  ;;  %v24449_v50 = vadd.f32 %v24131_v46, %v6619_v40  ;;  %v24452_v2 = vpop.f32.mrb[104].mxu0 }
 0x508   :  { %v7508_v29 = vsel %vm6868_vm6, %v24318_v5, %v15340_v22  ;;  %v6618_v6 = vmul.f32 %v24111_v55, %v19157_v35  ;;  %18226 = vmatprep.mubr.msk.f32.mxu1 %vm7554_vm5, %v8168_v44  ;;  %20191 = vpow2.f32 %v7218_v47  ;;  %v19158_v37 = vadd.f32 %v24315_v21, %v26623_v12  ;;  %v24461_v26 = vpop.f32.mrb[105].mxu0 }
 0x509   :  { %7637 = vst.msk [vmem:[#allocation2 + $0x290] sm:$0xff] %vm7554_vm5, %v7508_v29  ;;  %v7511_v54 = vsel %vm6871_vm7, %v24321_v10, %v15343_v1  ;;  %v7224_v5 = vmul.f32 1.442695, %v7005_v36  ;;  %vm6873_vm8 = vcmp.gt.f32.partialorder %v24360_v14, 0.0  ;;  %vm6872_vm9 = vcmp.gt.f32.partialorder %v24366_v41, 0.0  ;;  %v8169_v22 = vld [vmem:[#allocation3 + $0x109] sm:$0xff] }
 0x50a   :  { %7640 = vst.msk [vmem:[#allocation2 + $0x2a8] sm:$0xff] %vm7554_vm5, %v7511_v54  ;;  %v7004_v8 = vmin.f32 %v24446_v13, 0.0  ;;  %v7007_v30 = vmin.f32 %v24449_v50, 0.0  ;;  %v24469_v34 = vadd.f32 %v24131_v46, %v6618_v6  ;;  %v6621_v21 = vmul.f32 %v24111_v55, %v19158_v37  ;;  %18227 = vmatmul.mubr.msk.f32.gmra.mrb[112].mxu1 %vm7554_vm5, %v8169_v22  ;;  %v26624_v36 = vld [vmem:[#allocation27_spill] sm:$0xff]  ;;  %v7887_v22 = vld [vmem:[#allocation2 + $0x251] ss:$2 sm:$0xff] }
 0x50b   :  { %v20184_v10 = vpop.eup %20183  ;;  %20193 = vpow2.f32 %v7224_v5  ;;  %v7976_v40 = vmax.f32 %v7757_v24, %v7885_v11  ;;  %v19159_v29 = vadd.f32 %v24327_v32, %v26624_v36  ;;  %v24475_v44 = vpop.f32.mrb[106].mxu0  ;;  %vm6875_vm10 = vcmp.gt.f32.partialorder %v24389_v31, 0.0  ;;  %v7761_v36 = vld [vmem:[#allocation2 + $0x260] ss:$2 sm:$0xff] }
 0x50c   :  { %v20186_v27 = vpop.eup %20185  ;;  %v15342_v35 = vadd.f32 -1.0, %v20184_v10  ;;  %v7222_v1 = vmul.f32 1.442695, %v7004_v8  ;;  %v7228_v47 = vmul.f32 1.442695, %v7007_v30  ;;  %v7006_v6 = vmin.f32 %v24469_v34, 0.0 }
 0x50d   :  { %v20188_v54 = vpop.eup %20187  ;;  %v15345_v5 = vadd.f32 -1.0, %v20186_v27  ;;  %v24480_v12 = vadd.f32 %v24131_v46, %v6621_v21  ;;  %8040 = vst.msk [vmem:[#allocation3 + $0x120] sm:$0xff] %vm7554_vm5, %v7976_v40  ;;  %v24483_v24 = vpop.f32.mrb[107].mxu0  ;;  %v6620_v30 = vmul.f32 %v24111_v55, %v19159_v29  ;;  %v7759_v10 = vld [vmem:[#allocation2 + $0x250] ss:$2 sm:$0xff]  ;;  %vm6874_vm11 = vcmp.gt.f32.partialorder %v24413_v60, 0.0 }
 0x50e   :  { %v20190_v11 = vpop.eup %20189  ;;  %v7510_v32 = vsel %vm6870_vm1, %v24357_v28, %v15342_v35  ;;  %v15344_v37 = vadd.f32 -1.0, %v20188_v54  ;;  %20195 = vpow2.f32 %v7222_v1  ;;  %v8170_v8 = vld [vmem:[#allocation3 + $0x111] sm:$0xff]  ;;  %v7226_v27 = vmul.f32 1.442695, %v7006_v6 }
 0x50f   :  { %7639 = vst.msk [vmem:[#allocation2 + $0x2a0] sm:$0xff] %vm7554_vm5, %v7510_v32  ;;  %v7513_v21 = vsel %vm6873_vm8, %v24360_v14, %v15345_v5  ;;  %v15347_v40 = vadd.f32 -1.0, %v20190_v11  ;;  %20197 = vpow2.f32 %v7228_v47  ;;  %18229 = vmatprep.mubr.msk.f32.mxu1 %vm7554_vm5, %v8170_v8  ;;  %v7009_v35 = vmin.f32 %v24480_v12, 0.0  ;;  %v7889_v14 = vld [vmem:[#allocation2 + $0x261] ss:$2 sm:$0xff]  ;;  %v26625_v29 = vld [vmem:[#allocation28_spill] sm:$0xff] }
 0x510   :  { %7642 = vst.msk [vmem:[#allocation2 + $0x2b8] sm:$0xff] %vm7554_vm5, %v7513_v21  ;;  %v7512_v28 = vsel %vm6872_vm9, %v24366_v41, %v15344_v37  ;;  %v24501_v1 = vadd.f32 %v24131_v46, %v6620_v30  ;;  %20199 = vpow2.f32 %v7226_v27  ;;  %v19160_v54 = vadd.f32 %v24350_v63, %v26625_v29  ;;  %v24509_v5 = vpop.f32.mrb[108].mxu0  ;;  %v26626_v32 = vld [vmem:[#allocation29_spill] sm:$0xff] }
 0x511   :  { %7641 = vst.msk [vmem:[#allocation2 + $0x2b0] sm:$0xff] %vm7554_vm5, %v7512_v28  ;;  %v7515_v47 = vsel %vm6875_vm10, %v24389_v31, %v15347_v40  ;;  %v7977_v41 = vmax.f32 %v7759_v10, %v7887_v22  ;;  %vm6877_vm12 = vcmp.gt.f32.partialorder %v24431_v4, 0.0  ;;  %v7232_v6 = vmul.f32 1.442695, %v7009_v35  ;;  %v24516_v8 = vpop.f32.mrb[109].mxu0 }
 0x512   :  { %7644 = vst.msk [vmem:[#allocation2 + $0x2c8] sm:$0xff] %vm7554_vm5, %v7515_v47  ;;  %v7008_v11 = vmin.f32 %v24501_v1, 0.0  ;;  %v19161_v37 = vadd.f32 %v24354_v49, %v26626_v32  ;;  %v20192_v31 = vpop.eup %20191  ;;  %v6623_v30 = vmul.f32 %v24111_v55, %v19160_v54  ;;  %v19162_v63 = vadd.f32 %v24374_v16, %v23722_v33  ;;  %v7763_v32 = vld [vmem:[#allocation2 + $0x270] ss:$2 sm:$0xff] }
 0x513   :  { %8041 = vst.msk [vmem:[#allocation3 + $0x128] sm:$0xff] %vm7554_vm5, %v7977_v41  ;;  %v7978_v10 = vmax.f32 %v7761_v36, %v7889_v14  ;;  %v19163_v22 = vadd.f32 %v24381_v57, %v23729_v9  ;;  %v15346_v21 = vadd.f32 -1.0, %v20192_v31  ;;  %20201 = vpow2.f32 %v7232_v6  ;;  %v24525_v28 = vpop.f32.mrb[110].mxu0 }
 0x514   :  { %v8171_v40 = vld [vmem:[#allocation3 + $0x119] sm:$0xff]  ;;  %v7230_v27 = vmul.f32 1.442695, %v7008_v11  ;;  %v6622_v49 = vmul.f32 %v24111_v55, %v19161_v37  ;;  %v24529_v47 = vadd.f32 %v24131_v46, %v6623_v30  ;;  %v6625_v33 = vmul.f32 %v24111_v55, %v19162_v63  ;;  %v24536_v57 = vpop.f32.mrb[111].mxu0 }
 0x515   :  { %v20194_v35 = vpop.eup %20193  ;;  %18230 = vmatmul.mubr.msk.f32.gmra.mrb[114].mxu1 %vm7554_vm5, %v8171_v40  ;;  %8042 = vst.msk [vmem:[#allocation3 + $0x130] sm:$0xff] %vm7554_vm5, %v7978_v10  ;;  %v6624_v9 = vmul.f32 %v24111_v55, %v19163_v22  ;;  %v19164_v16 = vadd.f32 %v24400_v3, %v23748_v58  ;;  %v7514_v36 = vsel %vm6874_vm11, %v24413_v60, %v15346_v21  ;;  %vm6876_vm13 = vcmp.gt.f32.partialorder %v24446_v13, 0.0  ;;  %v7891_v37 = vld [vmem:[#allocation2 + $0x271] ss:$2 sm:$0xff] }
 0x516   :  { %v15349_v14 = vadd.f32 -1.0, %v20194_v35  ;;  %20203 = vpow2.f32 %v7230_v27  ;;  %v24542_v29 = vadd.f32 %v24131_v46, %v6622_v49  ;;  %7643 = vst.msk [vmem:[#allocation2 + $0x2c0] sm:$0xff] %vm7554_vm5, %v7514_v36  ;;  %v7011_v54 = vmin.f32 %v24529_v47, 0.0  ;;  %v7765_v49 = vld [vmem:[#allocation2 + $0x280] ss:$2 sm:$0xff] }
 0x517   :  { %v24548_v41 = vadd.f32 %v24131_v46, %v6625_v33  ;;  %v24551_v58 = vadd.f32 %v24131_v46, %v6624_v9  ;;  %vm6879_vm14 = vcmp.gt.f32.partialorder %v24449_v50, 0.0  ;;  %v6627_v11 = vmul.f32 %v24111_v55, %v19164_v16  ;;  %v24562_v22 = vpop.f32.mrb[112].mxu0  ;;  %v7893_v35 = vld [vmem:[#allocation2 + $0x281] ss:$2 sm:$0xff] }
 0x518   :  { %v20196_v3 = vpop.eup %20195  ;;  %v7517_v60 = vsel %vm6877_vm12, %v24431_v4, %v15349_v14  ;;  %v7010_v6 = vmin.f32 %v24542_v29, 0.0  ;;  %vm6878_vm15 = vcmp.gt.f32.partialorder %v24469_v34, 0.0  ;;  %v7236_v63 = vmul.f32 1.442695, %v7011_v54  ;;  %v7767_v14 = vld [vmem:[#allocation2 + $0x290] ss:$2 sm:$0xff] }
 0x519   :  { %v20198_v31 = vpop.eup %20197  ;;  %7646 = vst.msk [vmem:[#allocation2 + $0x2d8] sm:$0xff] %vm7554_vm5, %v7517_v60  ;;  %v15348_v30 = vadd.f32 -1.0, %v20196_v3  ;;  %v7013_v10 = vmin.f32 %v24548_v41, 0.0  ;;  %vm6881_vm0 = vcmp.gt.f32.partialorder %v24480_v12, 0.0  ;;  %v7012_v27 = vmin.f32 %v24551_v58, 0.0  ;;  %v24573_v54 = vpop.f32.mrb[113].mxu0 }
 0x51a   :  { %v15351_v4 = vadd.f32 -1.0, %v20198_v31  ;;  %v8172_v21 = vld [vmem:[#allocation3 + $0x121] sm:$0xff]  ;;  %v7234_v40 = vmul.f32 1.442695, %v7010_v6  ;;  %v20200_v33 = vpop.eup %20199  ;;  %20205 = vpow2.f32 %v7236_v63  ;;  %v24571_v36 = vadd.f32 %v24131_v46, %v6627_v11  ;;  %v7895_v63 = vld [vmem:[#allocation2 + $0x291] ss:$2 sm:$0xff] }
 0x51b   :  { %v7516_v9 = vsel %vm6876_vm13, %v24446_v13, %v15348_v30  ;;  %18232 = vmatprep.mubr.msk.f32.mxu1 %vm7554_vm5, %v8172_v21  ;;  %v7240_v16 = vmul.f32 1.442695, %v7013_v10  ;;  %v15350_v60 = vadd.f32 -1.0, %v20200_v33  ;;  %v7238_v13 = vmul.f32 1.442695, %v7012_v27  ;;  %v24579_v31 = vpop.f32.mrb[114].mxu0 }
 0x51c   :  { %7645 = vst.msk [vmem:[#allocation2 + $0x2d0] sm:$0xff] %vm7554_vm5, %v7516_v9  ;;  %v7519_v3 = vsel %vm6879_vm14, %v24449_v50, %v15351_v4  ;;  %20207 = vpow2.f32 %v7234_v40  ;;  %v8173_v6 = vld [vmem:[#allocation3 + $0x129] sm:$0xff]  ;;  %vm6880_vm2 = vcmp.gt.f32.partialorder %v24501_v1, 0.0  ;;  %v7015_v11 = vmin.f32 %v24571_v36, 0.0  ;;  %v24585_v10 = vpop.f32.mrb[115].mxu0  ;;  %v26627_v40 = vld [vmem:[#allocation30_spill] sm:$0xff] }
 0x51d   :  { %7648 = vst.msk [vmem:[#allocation2 + $0x2e8] sm:$0xff] %vm7554_vm5, %v7519_v3  ;;  %20209 = vpow2.f32 %v7240_v16  ;;  %18233 = vmatmul.mubr.msk.f32.gmra.mrb[116].mxu1 %vm7554_vm5, %v8173_v6  ;;  %v7979_v30 = vmax.f32 %v7763_v32, %v7891_v37  ;;  %v20202_v50 = vpop.eup %20201  ;;  %v7518_v4 = vsel %vm6878_vm15, %v24469_v34, %v15350_v60  ;;  %v19165_v21 = vadd.f32 %v24407_v23, %v23775_v19  ;;  %v7897_v60 = vld [vmem:[#allocation2 + $0x2a1] ss:$2 sm:$0xff] }
 0x51e   :  { %20211 = vpow2.f32 %v7238_v13  ;;  %v19166_v27 = vadd.f32 %v24425_v53, %v26627_v40  ;;  %7647 = vst.msk [vmem:[#allocation2 + $0x2e0] sm:$0xff] %vm7554_vm5, %v7518_v4  ;;  %v15353_v33 = vadd.f32 -1.0, %v20202_v50  ;;  %v7244_v9 = vmul.f32 1.442695, %v7015_v11  ;;  %v7769_v53 = vld [vmem:[#allocation2 + $0x2a0] ss:$2 sm:$0xff] }
 0x51f   :  { %8043 = vst.msk [vmem:[#allocation3 + $0x138] sm:$0xff] %vm7554_vm5, %v7979_v30  ;;  %v7980_v32 = vmax.f32 %v7765_v49, %v7893_v35  ;;  %v19167_v37 = vadd.f32 %v24433_v62, %v23804_v7  ;;  %v6626_v34 = vmul.f32 %v24111_v55, %v19165_v21  ;;  %v19168_v19 = vadd.f32 %v24452_v2, %v23818_v17  ;;  %v24602_v6 = vpop.f32.mrb[116].mxu0 }
 0x520   :  { %v20204_v16 = vpop.eup %20203  ;;  %v6629_v3 = vmul.f32 %v24111_v55, %v19166_v27  ;;  %v7981_v23 = vmax.f32 %v7767_v14, %v7895_v63  ;;  %v7521_v49 = vsel %vm6881_vm0, %v24480_v12, %v15353_v33  ;;  %20213 = vpow2.f32 %v7244_v9  ;;  %v24609_v62 = vpop.f32.mrb[117].mxu0 }
 0x521   :  { %v15352_v35 = vadd.f32 -1.0, %v20204_v16  ;;  %8044 = vst.msk [vmem:[#allocation3 + $0x140] sm:$0xff] %vm7554_vm5, %v7980_v32  ;;  %v6628_v7 = vmul.f32 %v24111_v55, %v19167_v37  ;;  %7650 = vst.msk [vmem:[#allocation2 + $0x2f8] sm:$0xff] %vm7554_vm5, %v7521_v49  ;;  %v24613_v17 = vadd.f32 %v24131_v46, %v6626_v34  ;;  %v6631_v14 = vmul.f32 %v24111_v55, %v19168_v19 }
 0x522   :  { %v24616_v2 = vadd.f32 %v24131_v46, %v6629_v3  ;;  %8045 = vst.msk [vmem:[#allocation3 + $0x148] sm:$0xff] %vm7554_vm5, %v7981_v23  ;;  %v19169_v12 = vadd.f32 %v24461_v26, %v23823_v48  ;;  %v19170_v30 = vadd.f32 %v24475_v44, %v23844_v52  ;;  %v7982_v63 = vmax.f32 %v7769_v53, %v7897_v60 }
 0x523   :  { %v7520_v13 = vsel %vm6880_vm2, %v24501_v1, %v15352_v35  ;;  %v24626_v11 = vadd.f32 %v24131_v46, %v6628_v7  ;;  %vm6883_vm3 = vcmp.gt.f32.partialorder %v24529_v47, 0.0  ;;  %vm6882_vm6 = vcmp.gt.f32.partialorder %v24542_v29, 0.0  ;;  %v24635_v26 = vpop.f32.mrb[118].mxu0  ;;  %v7771_v7 = vld [vmem:[#allocation2 + $0x2b0] ss:$2 sm:$0xff] }
 0x524   :  { %7649 = vst.msk [vmem:[#allocation2 + $0x2f0] sm:$0xff] %vm7554_vm5, %v7520_v13  ;;  %v7014_v50 = vmin.f32 %v24613_v17, 0.0  ;;  %v7017_v48 = vmin.f32 %v24616_v2, 0.0  ;;  %v20206_v1 = vpop.eup %20205  ;;  %vm6885_vm7 = vcmp.gt.f32.partialorder %v24548_v41, 0.0  ;;  %v24640_v52 = vadd.f32 %v24131_v46, %v6631_v14  ;;  %8046 = vst.msk [vmem:[#allocation3 + $0x150] sm:$0xff] %vm7554_vm5, %v7982_v63  ;;  %v24644_v21 = vpop.f32.mrb[119].mxu0 }
 0x525   :  { %v7016_v4 = vmin.f32 %v24626_v11, 0.0  ;;  %v6630_v44 = vmul.f32 %v24111_v55, %v19169_v12  ;;  %v15355_v27 = vadd.f32 -1.0, %v20206_v1  ;;  %v24651_v55 = vld [vmem:[%s26574_s4] ss:$0 sm:$0xff]  ;;  %v7899_v14 = vld [vmem:[#allocation2 + $0x2b1] ss:$2 sm:$0xff] }
 0x526   :  { %v20208_v40 = vpop.eup %20207  ;;  %v8174_v33 = vld [vmem:[#allocation3 + $0x131] sm:$0xff]  ;;  %v7242_v9 = vmul.f32 1.442695, %v7014_v50  ;;  %v7248_v32 = vmul.f32 1.442695, %v7017_v48  ;;  %v7019_v3 = vmin.f32 %v24640_v52, 0.0  ;;  %v6633_v19 = vmul.f32 %v24651_v55, %v19170_v30 }
 0x527   :  { %v20210_v37 = vpop.eup %20209  ;;  %v15354_v16 = vadd.f32 -1.0, %v20208_v40  ;;  %18235 = vmatprep.mubr.msk.f32.mxu1 %vm7554_vm5, %v8174_v33  ;;  %v7246_v34 = vmul.f32 1.442695, %v7016_v4  ;;  %v7523_v53 = vsel %vm6883_vm3, %v24529_v47, %v15355_v27  ;;  %v24658_v35 = vadd.f32 %v24131_v46, %v6630_v44  ;;  %v24665_v63 = vpop.f32.mrb[120].mxu0  ;;  %v24681_v4 = vld [vmem:[%s26574_s4 + $0x1] ss:$0 sm:$0xff] }
 0x528   :  { %v20212_v23 = vpop.eup %20211  ;;  %v15357_v60 = vadd.f32 -1.0, %v20210_v37  ;;  %20215 = vpow2.f32 %v7242_v9  ;;  %v8175_v49 = vld [vmem:[#allocation3 + $0x139] sm:$0xff]  ;;  %7652 = vst.msk [vmem:[#allocation2 + $0x308] sm:$0xff] %vm7554_vm5, %v7523_v53  ;;  %v7252_v30 = vmul.f32 1.442695, %v7019_v3  ;;  %vm6884_vm1 = vcmp.gt.f32.partialorder %v24551_v58, 0.0 }
 0x529   :  { %v7522_v12 = vsel %vm6882_vm6, %v24542_v29, %v15354_v16  ;;  %v15356_v13 = vadd.f32 -1.0, %v20212_v23  ;;  %20217 = vpow2.f32 %v7248_v32  ;;  %18236 = vmatmul.mubr.msk.f32.gmra.mrb[118].mxu1 %vm7554_vm5, %v8175_v49  ;;  %v8176_v47 = vld [vmem:[#allocation3 + $0x141] sm:$0xff]  ;;  %v7018_v29 = vmin.f32 %v24658_v35, 0.0  ;;  %v24674_v50 = vpop.f32.mrb[121].mxu0 }
 0x52a   :  { %7651 = vst.msk [vmem:[#allocation2 + $0x300] sm:$0xff] %vm7554_vm5, %v7522_v12  ;;  %v7525_v46 = vsel %vm6885_vm7, %v24548_v41, %v15357_v60  ;;  %20219 = vpow2.f32 %v7246_v34  ;;  %18238 = vmatprep.mubr.msk.f32.mxu1 %vm7554_vm5, %v8176_v47  ;;  %v20214_v48 = vpop.eup %20213  ;;  %v24684_v41 = vadd.f32 %v24681_v4, %v6633_v19  ;;  %v19171_v44 = vadd.f32 %v24483_v24, %v23852_v15  ;;  %v7773_v40 = vld [vmem:[#allocation2 + $0x2c0] ss:$2 sm:$0xff]  ;;  %v7901_v27 = vld [vmem:[#allocation2 + $0x2c1] ss:$2 sm:$0xff] }
 0x52b   :  { %7654 = vst.msk [vmem:[#allocation2 + $0x318] sm:$0xff] %vm7554_vm5, %v7525_v46  ;;  %v7524_v1 = vsel %vm6884_vm1, %v24551_v58, %v15356_v13  ;;  %20221 = vpow2.f32 %v7252_v30  ;;  %v15359_v33 = vadd.f32 -1.0, %v20214_v48  ;;  %v7250_v9 = vmul.f32 1.442695, %v7018_v29  ;;  %v8177_v32 = vld [vmem:[#allocation3 + $0x149] sm:$0xff]  ;;  %v24691_v16 = vpop.f32.mrb[122].mxu0 }
 0x52c   :  { %7653 = vst.msk [vmem:[#allocation2 + $0x310] sm:$0xff] %vm7554_vm5, %v7524_v1  ;;  %v19172_v58 = vadd.f32 %v24509_v5, %v23873_v39  ;;  %v7983_v37 = vmax.f32 %v7771_v7, %v7899_v14  ;;  %vm6887_vm8 = vcmp.gt.f32.partialorder %v24571_v36, 0.0  ;;  %v7021_v34 = vmin.f32 %v24684_v41, 0.0  ;;  %v24699_v3 = vpop.f32.mrb[123].mxu0  ;;  %v26628_v7 = vld [vmem:[#allocation31_spill] sm:$0xff] }
 0x52d   :  { %18239 = vmatmul.mubr.msk.f32.gmra.mrb[120].mxu1 %vm7554_vm5, %v8177_v32  ;;  %v6632_v15 = vmul.f32 %v24651_v55, %v19171_v44  ;;  %v19173_v24 = vadd.f32 %v24516_v8, %v23880_v45  ;;  %v7527_v19 = vsel %vm6887_vm8, %v24571_v36, %v15359_v33  ;;  %20223 = vpow2.f32 %v7250_v9  ;;  %v7775_v1 = vld [vmem:[#allocation2 + $0x2d0] ss:$2 sm:$0xff] }
 0x52e   :  { %v6635_v39 = vmul.f32 %v24651_v55, %v19172_v58  ;;  %8047 = vst.msk [vmem:[#allocation3 + $0x158] sm:$0xff] %vm7554_vm5, %v7983_v37  ;;  %v19174_v5 = vadd.f32 %v24525_v28, %v23907_v20  ;;  %7656 = vst.msk [vmem:[#allocation2 + $0x328] sm:$0xff] %vm7554_vm5, %v7527_v19  ;;  %v7256_v23 = vmul.f32 1.442695, %v7021_v34  ;;  %v7984_v8 = vmax.f32 %v7773_v40, %v7901_v27 }
 0x52f   :  { %v24708_v53 = vadd.f32 %v24681_v4, %v6632_v15  ;;  %v6634_v45 = vmul.f32 %v24651_v55, %v19173_v24  ;;  %v19175_v49 = vadd.f32 %v24536_v57, %v23917_v18  ;;  %v19176_v20 = vadd.f32 %v24562_v22, %v26628_v7  ;;  %v24719_v28 = vpop.f32.mrb[124].mxu0  ;;  %v7903_v24 = vld [vmem:[#allocation2 + $0x2d1] ss:$2 sm:$0xff] }
 0x530   :  { %v24712_v60 = vadd.f32 %v24681_v4, %v6635_v39  ;;  %v6637_v36 = vmul.f32 %v24651_v55, %v19174_v5  ;;  %vm6886_vm9 = vcmp.gt.f32.partialorder %v24613_v17, 0.0  ;;  %20225 = vpow2.f32 %v7256_v23  ;;  %8048 = vst.msk [vmem:[#allocation3 + $0x160] sm:$0xff] %vm7554_vm5, %v7984_v8  ;;  %v24733_v22 = vpop.f32.mrb[125].mxu0 }
 0x531   :  { %v7020_v14 = vmin.f32 %v24708_v53, 0.0  ;;  %v24724_v12 = vadd.f32 %v24681_v4, %v6634_v45  ;;  %vm6889_vm10 = vcmp.gt.f32.partialorder %v24616_v2, 0.0  ;;  %vm6888_vm11 = vcmp.gt.f32.partialorder %v24626_v11, 0.0 }
 0x532   :  { %v20216_v13 = vpop.eup %20215  ;;  %v7023_v18 = vmin.f32 %v24712_v60, 0.0  ;;  %v24731_v57 = vadd.f32 %v24681_v4, %v6637_v36  ;;  %v6636_v48 = vmul.f32 %v24651_v55, %v19175_v49  ;;  %vm6891_vm12 = vcmp.gt.f32.partialorder %v24640_v52, 0.0  ;;  %v7905_v36 = vld [vmem:[#allocation2 + $0x2e1] ss:$2 sm:$0xff] }
 0x533   :  { %v20218_v30 = vpop.eup %20217  ;;  %v15358_v47 = vadd.f32 -1.0, %v20216_v13  ;;  %v7254_v46 = vmul.f32 1.442695, %v7020_v14  ;;  %v7022_v29 = vmin.f32 %v24724_v12, 0.0  ;;  %v24739_v9 = vpop.f32.mrb[126].mxu0  ;;  %v6639_v8 = vmul.f32 %v24651_v55, %v19176_v20 }
 0x534   :  { %v20220_v44 = vpop.eup %20219  ;;  %v15361_v40 = vadd.f32 -1.0, %v20218_v30  ;;  %v7260_v27 = vmul.f32 1.442695, %v7023_v18  ;;  %v7025_v33 = vmin.f32 %v24731_v57, 0.0  ;;  %v24749_v23 = vpop.f32.mrb[127].mxu0  ;;  %v24756_v45 = vadd.f32 %v24681_v4, %v6636_v48  ;;  %v26629_v18 = vld [vmem:[#allocation32_spill] sm:$0xff] }
 0x535   :  { %v20222_v32 = vpop.eup %20221  ;;  %v7526_v58 = vsel %vm6886_vm9, %v24613_v17, %v15358_v47  ;;  %v15360_v37 = vadd.f32 -1.0, %v20220_v44  ;;  %20227 = vpow2.f32 %v7254_v46  ;;  %v8178_v34 = vld [vmem:[#allocation3 + $0x151] sm:$0xff]  ;;  %v7258_v15 = vmul.f32 1.442695, %v7022_v29 }
 0x536   :  { %7655 = vst.msk [vmem:[#allocation2 + $0x320] sm:$0xff] %vm7554_vm5, %v7526_v58  ;;  %v7529_v19 = vsel %vm6889_vm10, %v24616_v2, %v15361_v40  ;;  %v15363_v39 = vadd.f32 -1.0, %v20222_v32  ;;  %20229 = vpow2.f32 %v7260_v27  ;;  %18241 = vmatprep.mubr.msk.f32.mxu1 %vm7554_vm5, %v8178_v34  ;;  %v7264_v5 = vmul.f32 1.442695, %v7025_v33  ;;  %v7777_v2 = vld [vmem:[#allocation2 + $0x2e0] ss:$2 sm:$0xff] }
 0x537   :  { %7658 = vst.msk [vmem:[#allocation2 + $0x338] sm:$0xff] %vm7554_vm5, %v7529_v19  ;;  %v7528_v17 = vsel %vm6888_vm11, %v24626_v11, %v15360_v37  ;;  %20231 = vpow2.f32 %v7258_v15  ;;  %v20224_v49 = vpop.eup %20223  ;;  %v8179_v14 = vld [vmem:[#allocation3 + $0x159] sm:$0xff]  ;;  %v7985_v13 = vmax.f32 %v7775_v1, %v7903_v24  ;;  %v19177_v11 = vadd.f32 %v24573_v54, %v26629_v18 }
 0x538   :  { %7657 = vst.msk [vmem:[#allocation2 + $0x330] sm:$0xff] %vm7554_vm5, %v7528_v17  ;;  %v7531_v7 = vsel %vm6891_vm12, %v24640_v52, %v15363_v39  ;;  %20233 = vpow2.f32 %v7264_v5  ;;  %vm6890_vm13 = vcmp.gt.f32.partialorder %v24658_v35, 0.0  ;;  %v15362_v20 = vadd.f32 -1.0, %v20224_v49  ;;  %18242 = vmatmul.mubr.msk.f32.gmra.mrb[122].mxu1 %vm7554_vm5, %v8179_v14  ;;  %v26630_v46 = vld [vmem:[#allocation33_spill] sm:$0xff]  ;;  %v7781_v18 = vld [vmem:[#allocation2 + $0x300] ss:$2 sm:$0xff] }
 0x539   :  { %7660 = vst.msk [vmem:[#allocation2 + $0x348] sm:$0xff] %vm7554_vm5, %v7531_v7  ;;  %v7024_v30 = vmin.f32 %v24756_v45, 0.0  ;;  %v24770_v47 = vadd.f32 %v24681_v4, %v6639_v8  ;;  %8049 = vst.msk [vmem:[#allocation3 + $0x168] sm:$0xff] %vm7554_vm5, %v7985_v13  ;;  %v6638_v52 = vmul.f32 %v24651_v55, %v19177_v11  ;;  %v19178_v29 = vadd.f32 %v24579_v31, %v26630_v46  ;;  %v7779_v1 = vld [vmem:[#allocation2 + $0x2f0] ss:$2 sm:$0xff] }
 0x53a   :  { %v7986_v54 = vmax.f32 %v7777_v2, %v7905_v36  ;;  %v19179_v48 = vadd.f32 %v24585_v10, %v23986_v42  ;;  %v7907_v44 = vld [vmem:[#allocation2 + $0x2f1] ss:$2 sm:$0xff]  ;;  %v20226_v40 = vpop.eup %20225  ;;  %v7530_v27 = vsel %vm6890_vm13, %v24658_v35, %v15362_v20  ;;  %vm6893_vm14 = vcmp.gt.f32.partialorder %v24684_v41, 0.0 }
 0x53b   :  { %v7262_v33 = vmul.f32 1.442695, %v7024_v30  ;;  %v7027_v32 = vmin.f32 %v24770_v47, 0.0  ;;  %7659 = vst.msk [vmem:[#allocation2 + $0x340] sm:$0xff] %vm7554_vm5, %v7530_v27  ;;  %v15365_v58 = vadd.f32 -1.0, %v20226_v40  ;;  %v24783_v37 = vadd.f32 %v24681_v4, %v6638_v52 }
 0x53c   :  { %v6641_v31 = vmul.f32 %v24651_v55, %v19178_v29  ;;  %8050 = vst.msk [vmem:[#allocation3 + $0x170] sm:$0xff] %vm7554_vm5, %v7986_v54  ;;  %v6640_v42 = vmul.f32 %v24651_v55, %v19179_v48  ;;  %v19180_v35 = vadd.f32 %v24602_v6, %v24007_v51  ;;  %v7987_v34 = vmax.f32 %v7779_v1, %v7907_v44  ;;  %v7909_v52 = vld [vmem:[#allocation2 + $0x301] ss:$2 sm:$0xff]  ;;  %v7783_v40 = vld [vmem:[#allocation2 + $0x310] ss:$2 sm:$0xff] }
 0x53d   :  { %20235 = vpow2.f32 %v7262_v33  ;;  %v7268_v10 = vmul.f32 1.442695, %v7027_v32  ;;  %v7533_v15 = vsel %vm6893_vm14, %v24684_v41, %v15365_v58  ;;  %vm6892_vm15 = vcmp.gt.f32.partialorder %v24708_v53, 0.0  ;;  %v7911_v27 = vld [vmem:[#allocation2 + $0x311] ss:$2 sm:$0xff] }
 0x53e   :  { %v7026_v24 = vmin.f32 %v24783_v37, 0.0  ;;  %v24794_v19 = vadd.f32 %v24681_v4, %v6641_v31  ;;  %7662 = vst.msk [vmem:[#allocation2 + $0x358] sm:$0xff] %vm7554_vm5, %v7533_v15  ;;  %v24798_v5 = vadd.f32 %v24681_v4, %v6640_v42  ;;  %v6643_v17 = vmul.f32 %v24651_v55, %v19180_v35  ;;  %8051 = vst.msk [vmem:[#allocation3 + $0x178] sm:$0xff] %vm7554_vm5, %v7987_v34 }
 0x53f   :  { %v20228_v39 = vpop.eup %20227  ;;  %20237 = vpow2.f32 %v7268_v10  ;;  %v19181_v51 = vadd.f32 %v24609_v62, %v24015_v59  ;;  %vm6895_vm0 = vcmp.gt.f32.partialorder %v24712_v60, 0.0  ;;  %vm6894_vm2 = vcmp.gt.f32.partialorder %v24724_v12, 0.0  ;;  %v8135_v59 = vld [vmem:[%s26572_s2 + $0x18] sm:$0x1] }
 0x540   :  { %v20230_v6 = vpop.eup %20229  ;;  %v15364_v41 = vadd.f32 -1.0, %v20228_v39  ;;  %v7266_v8 = vmul.f32 1.442695, %v7026_v24  ;;  %v7029_v2 = vmin.f32 %v24794_v19, 0.0  ;;  %v8180_v7 = vld [vmem:[#allocation3 + $0x161] sm:$0xff]  ;;  %v7028_v14 = vmin.f32 %v24798_v5, 0.0 }
 0x541   :  { %v20232_v36 = vpop.eup %20231  ;;  %v15367_v49 = vadd.f32 -1.0, %v20230_v6  ;;  %v24809_v13 = vadd.f32 %v24681_v4, %v6643_v17  ;;  %18244 = vmatprep.mubr.msk.f32.mxu1 %vm7554_vm5, %v8180_v7  ;;  %vm6897_vm3 = vcmp.gt.f32.partialorder %v24731_v57, 0.0  ;;  %v6642_v44 = vmul.f32 %v24651_v55, %v19181_v51 }
 0x542   :  { %v20234_v62 = vpop.eup %20233  ;;  %v7532_v11 = vsel %vm6892_vm15, %v24708_v53, %v15364_v41  ;;  %v15366_v20 = vadd.f32 -1.0, %v20232_v36  ;;  %20239 = vpow2.f32 %v7266_v8  ;;  %v7272_v30 = vmul.f32 1.442695, %v7029_v2  ;;  %v8134_v53 = vld [vmem:[%s26572_s2 + $0x10] sm:$0xff] }
 0x543   :  { %7661 = vst.msk [vmem:[#allocation2 + $0x350] sm:$0xff] %vm7554_vm5, %v7532_v11  ;;  %v7535_v46 = vsel %vm6895_vm0, %v24712_v60, %v15367_v49  ;;  %v15369_v29 = vadd.f32 -1.0, %v20234_v62  ;;  %v8181_v54 = vld [vmem:[#allocation3 + $0x169] sm:$0xff]  ;;  %v7270_v48 = vmul.f32 1.442695, %v7028_v14  ;;  %v7031_v60 = vmin.f32 %v24809_v13, 0.0 }
 0x544   :  { %7664 = vst.msk [vmem:[#allocation2 + $0x368] sm:$0xff] %vm7554_vm5, %v7535_v46  ;;  %v7534_v1 = vsel %vm6894_vm2, %v24724_v12, %v15366_v20  ;;  %20241 = vpow2.f32 %v7272_v30  ;;  %18245 = vmatmul.mubr.msk.f32.gmra.mrb[124].mxu1 %vm7554_vm5, %v8181_v54  ;;  %v19182_v32 = vadd.f32 %v24635_v26, %v24036_v56  ;;  %v7988_v58 = vmax.f32 %v7781_v18, %v7909_v52  ;;  %v7913_v14 = vld [vmem:[#allocation2 + $0x321] ss:$2 sm:$0xff] }
 0x545   :  { %7663 = vst.msk [vmem:[#allocation2 + $0x360] sm:$0xff] %vm7554_vm5, %v7534_v1  ;;  %v7537_v33 = vsel %vm6897_vm3, %v24731_v57, %v15369_v29  ;;  %20243 = vpow2.f32 %v7270_v48  ;;  %v7276_v12 = vmul.f32 1.442695, %v7031_v60  ;;  %v8182_v31 = vld [vmem:[#allocation3 + $0x171] sm:$0xff]  ;;  %v24839_v42 = vadd.f32 %v24681_v4, %v6642_v44 }
 0x546   :  { %7666 = vst.msk [vmem:[#allocation2 + $0x378] sm:$0xff] %vm7554_vm5, %v7537_v33  ;;  %v19183_v10 = vadd.f32 %v24644_v21, %v24053_v38  ;;  %v19014_v35 = vpack.c.bf16 %v8135_v59, %v8134_v53  ;;  %18247 = vmatprep.mubr.msk.f32.mxu1 %vm7554_vm5, %v8182_v31  ;;  %v6645_v57 = vmul.f32 %v24651_v55, %v19182_v32  ;;  %8052 = vst.msk [vmem:[#allocation3 + $0x180] sm:$0xff] %vm7554_vm5, %v7988_v58  ;;  %v7787_v33 = vld [vmem:[#allocation2 + $0x330] ss:$2 sm:$0xff]  ;;  %v7915_v32 = vld [vmem:[#allocation2 + $0x331] ss:$2 sm:$0xff] }
 0x547   :  { %v20236_v34 = vpop.eup %20235  ;;  %v19184_v56 = vadd.f32 %v24665_v63, %v24086_v0  ;;  %v7989_v26 = vmax.f32 %v7783_v40, %v7911_v27  ;;  %v19185_v15 = vadd.f32 %v24674_v50, %v24095_v61  ;;  %vm6896_vm6 = vcmp.gt.f32.partialorder %v24756_v45, 0.0  ;;  %v10090_v21 = vld [vmem:[#allocation3 + $0x5b] sm:$0xff] }
 0x548   :  { %v15368_v24 = vadd.f32 -1.0, %v20236_v34  ;;  %20245 = vpow2.f32 %v7276_v12  ;;  %v7030_v38 = vmin.f32 %v24839_v42, 0.0  ;;  %19016 = vmatprep.subr.msk.bf16.mxu1 %vm22901_vm4, %v19014_v35  ;;  %v24855_v17 = vadd.f32 %v24681_v4, %v6645_v57  ;;  %v26633_v57 = vld [vmem:[#allocation35_spill] sm:$0xff] }
 0x549   :  { %v20238_v39 = vpop.eup %20237  ;;  %v6644_v51 = vmul.f32 %v24651_v55, %v19183_v10  ;;  %19019 = vmatpush3.bf16.msk.msra.mxu1 %vm22901_vm4, %v19014_v35  ;;  %v6647_v0 = vmul.f32 %v24651_v55, %v19184_v56  ;;  %8053 = vst.msk [vmem:[#allocation3 + $0x188] sm:$0xff] %vm7554_vm5, %v7989_v26  ;;  %v6646_v61 = vmul.f32 %v24651_v55, %v19185_v15  ;;  %vm6899_vm7 = vcmp.gt.f32.partialorder %v24770_v47, 0.0  ;;  %v26634_v56 = vld [vmem:[#allocation36_spill] sm:$0xff] }
 0x54a   :  { %v7536_v63 = vsel %vm6896_vm6, %v24756_v45, %v15368_v24  ;;  %v15371_v50 = vadd.f32 -1.0, %v20238_v39  ;;  %v7274_v6 = vmul.f32 1.442695, %v7030_v38  ;;  %v19186_v41 = vadd.f32 %v24691_v16, %v24106_v25  ;;  %v7785_v16 = vld [vmem:[#allocation2 + $0x320] ss:$2 sm:$0xff] }
 0x54b   :  { %7665 = vst.msk [vmem:[#allocation2 + $0x370] sm:$0xff] %vm7554_vm5, %v7536_v63  ;;  %v7033_v8 = vmin.f32 %v24855_v17, 0.0  ;;  %v24870_v2 = vadd.f32 %v24681_v4, %v6644_v51  ;;  %v24873_v36 = vadd.f32 %v24681_v4, %v6647_v0  ;;  %v24877_v7 = vadd.f32 %v24681_v4, %v6646_v61  ;;  %v7789_v39 = vld [vmem:[#allocation2 + $0x340] ss:$2 sm:$0xff]  ;;  %v7917_v51 = vld [vmem:[#allocation2 + $0x341] ss:$2 sm:$0xff] }
 0x54c   :  { %v20240_v49 = vpop.eup %20239  ;;  %v7539_v45 = vsel %vm6899_vm7, %v24770_v47, %v15371_v50  ;;  %20247 = vpow2.f32 %v7274_v6  ;;  %v6649_v25 = vmul.f32 %v24651_v55, %v19186_v41  ;;  %vm6898_vm1 = vcmp.gt.f32.partialorder %v24783_v37, 0.0 }
 0x54d   :  { %7668 = vst.msk [vmem:[#allocation2 + $0x388] sm:$0xff] %vm7554_vm5, %v7539_v45  ;;  %v15370_v18 = vadd.f32 -1.0, %v20240_v49  ;;  %v7280_v59 = vmul.f32 1.442695, %v7033_v8  ;;  %v7032_v62 = vmin.f32 %v24870_v2, 0.0  ;;  %vm6901_vm8 = vcmp.gt.f32.partialorder %v24794_v19, 0.0 }
 0x54e   :  { %v20242_v11 = vpop.eup %20241  ;;  %vm6900_vm9 = vcmp.gt.f32.partialorder %v24798_v5, 0.0  ;;  %v8183_v47 = vld [vmem:[#allocation3 + $0x179] sm:$0xff]  ;;  %v7035_v20 = vmin.f32 %v24873_v36, 0.0  ;;  %v7034_v30 = vmin.f32 %v24877_v7, 0.0  ;;  %v24891_v44 = vadd.f32 %v24681_v4, %v6649_v25 }
 0x54f   :  { %v20244_v52 = vpop.eup %20243  ;;  %v7538_v46 = vsel %vm6898_vm1, %v24783_v37, %v15370_v18  ;;  %v15373_v29 = vadd.f32 -1.0, %v20242_v11  ;;  %20249 = vpow2.f32 %v7280_v59  ;;  %18248 = vmatmul.mubr.msk.f32.gmra.mrb[126].mxu1 %vm7554_vm5, %v8183_v47  ;;  %v7278_v54 = vmul.f32 1.442695, %v7032_v62  ;;  %v26635_v8 = vld [vmem:[#allocation37_spill] sm:$0xff]  ;;  %v7793_v62 = vld [vmem:[#allocation2 + $0x360] ss:$2 sm:$0xff] }
 0x550   :  { %7667 = vst.msk [vmem:[#allocation2 + $0x380] sm:$0xff] %vm7554_vm5, %v7538_v46  ;;  %v15372_v48 = vadd.f32 -1.0, %v20244_v52  ;;  %v7284_v53 = vmul.f32 1.442695, %v7035_v20  ;;  %v8184_v1 = vld [vmem:[#allocation3 + $0x181] sm:$0xff]  ;;  %v7990_v37 = vmax.f32 %v7785_v16, %v7913_v14  ;;  %v19187_v27 = vadd.f32 %v24699_v3, %v24146_v43 }
 0x551   :  { %v7282_v60 = vmul.f32 1.442695, %v7034_v30  ;;  %v7541_v40 = vsel %vm6901_vm8, %v24794_v19, %v15373_v29  ;;  %20251 = vpow2.f32 %v7278_v54  ;;  %18250 = vmatprep.mubr.msk.f32.mxu1 %vm7554_vm5, %v8184_v1  ;;  %vm6903_vm10 = vcmp.gt.f32.partialorder %v24809_v13, 0.0  ;;  %v26632_v3 = vld [vmem:[#allocation34_spill] sm:$0xff]  ;;  %v7791_v45 = vld [vmem:[#allocation2 + $0x350] ss:$2 sm:$0xff] }
 0x552   :  { %v20246_v58 = vpop.eup %20245  ;;  %7670 = vst.msk [vmem:[#allocation2 + $0x398] sm:$0xff] %vm7554_vm5, %v7541_v40  ;;  %v7540_v12 = vsel %vm6900_vm9, %v24798_v5, %v15372_v48  ;;  %20253 = vpow2.f32 %v7284_v53  ;;  %v7037_v19 = vmin.f32 %v24891_v44, 0.0  ;;  %8054 = vst.msk [vmem:[#allocation3 + $0x190] sm:$0xff] %vm7554_vm5, %v7990_v37  ;;  %v6648_v43 = vmul.f32 %v24651_v55, %v19187_v27  ;;  %v7919_v25 = vld [vmem:[#allocation2 + $0x351] ss:$2 sm:$0xff] }
 0x553   :  { %7669 = vst.msk [vmem:[#allocation2 + $0x390] sm:$0xff] %vm7554_vm5, %v7540_v12  ;;  %v15375_v31 = vadd.f32 -1.0, %v20246_v58  ;;  %20255 = vpow2.f32 %v7282_v60  ;;  %v19188_v10 = vadd.f32 %v24719_v28, %v26632_v3  ;;  %v7991_v34 = vmax.f32 %v7787_v33, %v7915_v32  ;;  %v7921_v11 = vld [vmem:[#allocation2 + $0x361] ss:$2 sm:$0xff]  ;;  %v7795_v29 = vld [vmem:[#allocation2 + $0x370] ss:$2 sm:$0xff] }
 0x554   :  { %v7288_v35 = vmul.f32 1.442695, %v7037_v19  ;;  %v19189_v5 = vadd.f32 %v24733_v22, %v26633_v57  ;;  %v19190_v26 = vadd.f32 %v24739_v9, %v26634_v56  ;;  %v24916_v24 = vadd.f32 %v24681_v4, %v6648_v43  ;;  %v7923_v54 = vld [vmem:[#allocation2 + $0x371] ss:$2 sm:$0xff] }
 0x555   :  { %v7543_v15 = vsel %vm6903_vm10, %v24809_v13, %v15375_v31  ;;  %v6651_v38 = vmul.f32 %v24651_v55, %v19188_v10  ;;  %vm7682_vm11 = vcmask 199680   ;;  %8055 = vst.msk [vmem:[#allocation3 + $0x198] sm:$0xff] %vm7554_vm5, %v7991_v34  ;;  %vm6902_vm12 = vcmp.gt.f32.partialorder %v24839_v42, 0.0  ;;  %v15520_v10 = vld [vmem:[%s26572_s2 + $0x40] sm:$0xff] }
 0x556   :  { %v20248_v0 = vpop.eup %20247  ;;  %7672 = vst.msk [vmem:[#allocation2 + $0x3a8] sm:$0xff] %vm7554_vm5, %v7543_v15  ;;  %20257 = vpow2.f32 %v7288_v35  ;;  %v6650_v28 = vmul.f32 %v24651_v55, %v19189_v5  ;;  %v6653_v22 = vmul.f32 %v24651_v55, %v19190_v26  ;;  %v7036_v13 = vmin.f32 %v24916_v24, 0.0 }
 0x557   :  { %v15374_v9 = vadd.f32 -1.0, %v20248_v0  ;;  %v24926_v61 = vadd.f32 %v24681_v4, %v6651_v38  ;;  %v20494_v63 = vmov 0.0   ;;  %v7992_v41 = vmax.f32 %v7789_v39, %v7917_v51  ;;  %v7797_v48 = vld [vmem:[#allocation2 + $0x380] ss:$2 sm:$0xff]  ;;  %v7925_v53 = vld [vmem:[#allocation2 + $0x381] ss:$2 sm:$0xff] }
 0x558   :  { %7684 = vst.msk [vmem:[#allocation2 + $0x3fc] sm:$0xf] %vm7682_vm11, %v20494_v63  ;;  %14495 = vst [vmem:[#allocation6 + $0xfc] sm:$0xf] %v20494_v63  ;;  %v24932_v50 = vadd.f32 %v24681_v4, %v6650_v28  ;;  %v24935_v6 = vadd.f32 %v24681_v4, %v6653_v22  ;;  %v19191_v49 = vadd.f32 %v24749_v23, %v26635_v8  ;;  %vm6905_vm13 = vcmp.gt.f32.partialorder %v24855_v17, 0.0 }
 0x559   :  { %v20250_v16 = vpop.eup %20249  ;;  %v7542_v14 = vsel %vm6902_vm12, %v24839_v42, %v15374_v9  ;;  %v7286_v18 = vmul.f32 1.442695, %v7036_v13  ;;  %v7039_v59 = vmin.f32 %v24926_v61, 0.0  ;;  %vm6904_vm14 = vcmp.gt.f32.partialorder %v24870_v2, 0.0  ;;  %v8185_v23 = vld [vmem:[#allocation3 + $0x189] sm:$0xff]  ;;  %8056 = vst.msk [vmem:[#allocation3 + $0x1a0] sm:$0xff] %vm7554_vm5, %v7992_v41 }
 0x55a   :  { %7671 = vst.msk [vmem:[#allocation2 + $0x3a0] sm:$0xff] %vm7554_vm5, %v7542_v14  ;;  %v15377_v47 = vadd.f32 -1.0, %v20250_v16  ;;  %vm6907_vm15 = vcmp.gt.f32.partialorder %v24873_v36, 0.0  ;;  %v7038_v20 = vmin.f32 %v24932_v50, 0.0  ;;  %18251 = vmatmul.mubr.msk.f32.gmra.mrb[128].mxu1 %vm7554_vm5, %v8185_v23  ;;  %v7041_v52 = vmin.f32 %v24935_v6, 0.0 }
 0x55b   :  { %v20252_v42 = vpop.eup %20251  ;;  %20259 = vpow2.f32 %v7286_v18  ;;  %v7292_v30 = vmul.f32 1.442695, %v7039_v59  ;;  %v6652_v46 = vmul.f32 %v24651_v55, %v19191_v49  ;;  %v7993_v27 = vmax.f32 %v7791_v45, %v7919_v25  ;;  %v7799_v33 = vld [vmem:[#allocation2 + $0x390] ss:$2 sm:$0xff]  ;;  %v7927_v31 = vld [vmem:[#allocation2 + $0x391] ss:$2 sm:$0xff] }
 0x55c   :  { %v20254_v1 = vpop.eup %20253  ;;  %v7545_v60 = vsel %vm6905_vm13, %v24855_v17, %v15377_v47  ;;  %v15376_v40 = vadd.f32 -1.0, %v20252_v42  ;;  %v7290_v37 = vmul.f32 1.442695, %v7038_v20  ;;  %v8186_v12 = vld [vmem:[#allocation3 + $0x191] sm:$0xff]  ;;  %v7296_v55 = vmul.f32 1.442695, %v7041_v52 }
 0x55d   :  { %v20256_v32 = vpop.eup %20255  ;;  %7674 = vst.msk [vmem:[#allocation2 + $0x3b8] sm:$0xff] %vm7554_vm5, %v7545_v60  ;;  %v15379_v58 = vadd.f32 -1.0, %v20254_v1  ;;  %20261 = vpow2.f32 %v7292_v30  ;;  %v24955_v19 = vadd.f32 %v24681_v4, %v6652_v46  ;;  %18253 = vmatprep.mubr.msk.f32.mxu1 %vm7554_vm5, %v8186_v12  ;;  %8057 = vst.msk [vmem:[#allocation3 + $0x1a8] sm:$0xff] %vm7554_vm5, %v7993_v27  ;;  %v7994_v3 = vmax.f32 %v7793_v62, %v7921_v11  ;;  %v15521_v4 = vld [vmem:[%s26572_s2 + $0x48] sm:$0xff] }
 0x55e   :  { %v7544_v43 = vsel %vm6904_vm14, %v24870_v2, %v15376_v40  ;;  %v15378_v17 = vadd.f32 -1.0, %v20256_v32  ;;  %20263 = vpow2.f32 %v7290_v37  ;;  %vm6906_vm0 = vcmp.gt.f32.partialorder %v24877_v7, 0.0 }
 0x55f   :  { %7673 = vst.msk [vmem:[#allocation2 + $0x3b0] sm:$0xff] %vm7554_vm5, %v7544_v43  ;;  %v7547_v2 = vsel %vm6907_vm15, %v24873_v36, %v15379_v58  ;;  %20265 = vpow2.f32 %v7296_v55  ;;  %v7040_v35 = vmin.f32 %v24955_v19, 0.0  ;;  %8058 = vst.msk [vmem:[#allocation3 + $0x1b0] sm:$0xff] %vm7554_vm5, %v7994_v3  ;;  %v7995_v5 = vmax.f32 %v7795_v29, %v7923_v54  ;;  %v15522_v43 = vld [vmem:[%s26572_s2 + $0x50] sm:$0xff]  ;;  %v8068_v3 = vld [vmem:[#allocation3] sm:$0xff] }
 0x560   :  { %v20258_v34 = vpop.eup %20257  ;;  %7676 = vst.msk [vmem:[#allocation2 + $0x3c8] sm:$0xff] %vm7554_vm5, %v7547_v2  ;;  %v7546_v57 = vsel %vm6906_vm0, %v24877_v7, %v15378_v17  ;;  %v7996_v56 = vmax.f32 %v7797_v48, %v7925_v53  ;;  %v7997_v26 = vmax.f32 %v7799_v33, %v7927_v31  ;;  %v8187_v38 = vld [vmem:[#allocation3 + $0x199] sm:$0xff]  ;;  %v24978_v51 = vpack.c.bf16 %v15521_v4, %v15520_v10  ;;  %v15523_v17 = vld [vmem:[%s26572_s2 + $0x58] sm:$0x1]  ;;  %v8069_v4 = vld [vmem:[#allocation3 + $0x8] sm:$0xff] }
 0x561   :  { %7675 = vst.msk [vmem:[#allocation2 + $0x3c0] sm:$0xff] %vm7554_vm5, %v7546_v57  ;;  %v15381_v15 = vadd.f32 -1.0, %v20258_v34  ;;  %v7294_v36 = vmul.f32 1.442695, %v7040_v35  ;;  %v7801_v39 = vld [vmem:[#allocation2 + $0x3a0] ss:$2 sm:$0xff]  ;;  %18254 = vmatmul.mubr.msk.f32.gmra.mrb[130].mxu1 %vm7554_vm5, %v8187_v38  ;;  %v19024_v10 = vpack.c.bf16 %v15523_v17, %v15522_v43 }
 0x562   :  { %vm6909_vm2 = vcmp.gt.f32.partialorder %v24891_v44, 0.0  ;;  %8059 = vst.msk [vmem:[#allocation3 + $0x1b8] sm:$0xff] %vm7554_vm5, %v7995_v5  ;;  %8060 = vst.msk [vmem:[#allocation3 + $0x1c0] sm:$0xff] %vm7554_vm5, %v7996_v56  ;;  %v7929_v7 = vld [vmem:[#allocation2 + $0x3a1] ss:$2 sm:$0xff]  ;;  %19021 = vmatprep.subr.bf16.mxu1 %v24978_v51  ;;  %vm6908_vm3 = vcmp.gt.f32.partialorder %v24916_v24, 0.0 }
 0x563   :  { %8061 = vst.msk [vmem:[#allocation3 + $0x1c8] sm:$0xff] %vm7554_vm5, %v7997_v26  ;;  %v7549_v0 = vsel %vm6909_vm2, %v24891_v44, %v15381_v15  ;;  %20267 = vpow2.f32 %v7294_v36  ;;  %v7998_v28 = vmax.f32 %v7801_v39, %v7929_v7  ;;  %vm6911_vm6 = vcmp.gt.f32.partialorder %v24926_v61, 0.0  ;;  %v8070_v2 = vld [vmem:[#allocation3 + $0x10] sm:$0xff]  ;;  %v15589_v35 = vld [vmem:[%s26572_s2 + $0x60] sm:$0xff]  ;;  %v15590_v34 = vld [vmem:[%s26572_s2 + $0x68] sm:$0xff] }
 0x564   :  { %7678 = vst.msk [vmem:[#allocation2 + $0x3d8] sm:$0xff] %vm7554_vm5, %v7549_v0  ;;  %v8188_v9 = vld [vmem:[#allocation3 + $0x1a1] sm:$0xff]  ;;  %vm6910_vm7 = vcmp.gt.f32.partialorder %v24932_v50, 0.0  ;;  %vm6913_vm1 = vcmp.gt.f32.partialorder %v24935_v6, 0.0  ;;  %vm6912_vm8 = vcmp.gt.f32.partialorder %v24955_v19, 0.0  ;;  %v25039_v57 = vpack.c.bf16 %v15590_v34, %v15589_v35  ;;  %v8071_v5 = vld [vmem:[#allocation3 + $0x18] sm:$0xff] }
 0x565   :  { %v20260_v22 = vpop.eup %20259  ;;  %8062 = vst.msk [vmem:[#allocation3 + $0x1d0] sm:$0xff] %vm7554_vm5, %v7998_v28  ;;  %18256 = vmatprep.mubr.msk.f32.mxu1 %vm7554_vm5, %v8188_v9  ;;  %v8072_v56 = vld [vmem:[#allocation3 + $0x20] sm:$0xff]  ;;  %v8073_v26 = vld [vmem:[#allocation3 + $0x28] sm:$0xff]  ;;  %v8074_v15 = vld [vmem:[#allocation3 + $0x30] sm:$0xff]  ;;  %vm12025_vm9 = vcmask 408576   ;;  %vm12089_vm14 = vcmask 404480  }
 0x566   :  { %v15380_v13 = vadd.f32 -1.0, %v20260_v22  ;;  %v7803_v41 = vld [vmem:[#allocation2 + $0x3b0] ss:$2 sm:$0xff]  ;;  %v7931_v8 = vld [vmem:[#allocation2 + $0x3b1] ss:$2 sm:$0xff]  ;;  %v8076_v36 = vld [vmem:[#allocation3 + $0x40] sm:$0xff] }
 0x567   :  { %v20262_v49 = vpop.eup %20261  ;;  %v8189_v45 = vld [vmem:[#allocation3 + $0x1a9] sm:$0xff]  ;;  %v7999_v44 = vmax.f32 %v7803_v41, %v7931_v8  ;;  %v8075_v38 = vld [vmem:[#allocation3 + $0x38] sm:$0xff]  ;;  %v8080_v0 = vld [vmem:[#allocation3 + $0x60] sm:$0xff]  ;;  %12091 = vst.msk [vmem:[#allocation4 + $0x1fc] sm:$0xf] %vm12089_vm14, %v20494_v63 }
 0x568   :  { %v20264_v25 = vpop.eup %20263  ;;  %v7548_v16 = vsel %vm6908_vm3, %v24916_v24, %v15380_v13  ;;  %v15383_v14 = vadd.f32 -1.0, %v20262_v49  ;;  %18257 = vmatmul.mubr.msk.f32.gmra.mrb[132].mxu1 %vm7554_vm5, %v8189_v45  ;;  %v7805_v18 = vld [vmem:[#allocation2 + $0x3c0] ss:$2 sm:$0xff]  ;;  %v7933_v59 = vld [vmem:[#allocation2 + $0x3c1] ss:$2 sm:$0xff]  ;;  %v8079_v7 = vld [vmem:[#allocation3 + $0x58] sm:$0xff] }
 0x569   :  { %v20266_v62 = vpop.eup %20265  ;;  %7677 = vst.msk [vmem:[#allocation2 + $0x3d0] sm:$0xff] %vm7554_vm5, %v7548_v16  ;;  %v15382_v11 = vadd.f32 -1.0, %v20264_v25  ;;  %v8190_v47 = vld [vmem:[#allocation3 + $0x1b1] sm:$0xff]  ;;  %v8191_v23 = vld [vmem:[#allocation3 + $0x1b9] sm:$0xff]  ;;  %8063 = vst.msk [vmem:[#allocation3 + $0x1d8] sm:$0xff] %vm7554_vm5, %v7999_v44  ;;  %v8000_v20 = vmax.f32 %v7805_v18, %v7933_v59 }
 0x56a   :  { %v7551_v42 = vsel %vm6911_vm6, %v24926_v61, %v15383_v14  ;;  %v15385_v24 = vadd.f32 -1.0, %v20266_v62  ;;  %18259 = vmatprep.mubr.msk.f32.mxu1 %vm7554_vm5, %v8190_v47  ;;  %v8192_v30 = vld [vmem:[#allocation3 + $0x1c1] sm:$0xff]  ;;  %v8082_v22 = vld [vmem:[#allocation3 + $0x70] sm:$0xff]  ;;  %v8083_v9 = vld [vmem:[#allocation3 + $0x78] sm:$0xff] }
 0x56b   :  { %7680 = vst.msk [vmem:[#allocation2 + $0x3e8] sm:$0xff] %vm7554_vm5, %v7551_v42  ;;  %v7550_v52 = vsel %vm6910_vm7, %v24932_v50, %v15382_v11  ;;  %8064 = vst.msk [vmem:[#allocation3 + $0x1e0] sm:$0xff] %vm7554_vm5, %v8000_v20  ;;  %v8077_v39 = vld [vmem:[#allocation3 + $0x48] sm:$0xff]  ;;  %v8084_v13 = vld [vmem:[#allocation3 + $0x80] sm:$0xff] }
 0x56c   :  { %7679 = vst.msk [vmem:[#allocation2 + $0x3e0] sm:$0xff] %vm7554_vm5, %v7550_v52  ;;  %v7553_v46 = vsel %vm6913_vm1, %v24935_v6, %v15385_v24  ;;  %18260 = vmatmul.mubr.msk.f32.gmra.mrb[134].mxu1 %vm7554_vm5, %v8191_v23  ;;  %v8193_v29 = vld [vmem:[#allocation3 + $0x1c9] sm:$0xff]  ;;  %v8087_v49 = vld [vmem:[#allocation3 + $0x98] sm:$0xff]  ;;  %v8088_v45 = vld [vmem:[#allocation3 + $0xa0] sm:$0xff] }
 0x56d   :  { %v20268_v61 = vpop.eup %20267  ;;  %7683 = vst.msk [vmem:[#allocation2 + $0x3f8] sm:$0xf] %vm7682_vm11, %v7553_v46  ;;  %18262 = vmatprep.mubr.msk.f32.mxu1 %vm7554_vm5, %v8192_v30  ;;  %v8081_v28 = vld [vmem:[#allocation3 + $0x68] sm:$0xff]  ;;  %v8086_v8 = vld [vmem:[#allocation3 + $0x90] sm:$0xff]  ;;  %v8091_v16 = vld [vmem:[#allocation3 + $0xb8] sm:$0xff] }
 0x56e   :  { %v15384_v54 = vadd.f32 -1.0, %v20268_v61  ;;  %v8085_v41 = vld [vmem:[#allocation3 + $0x88] sm:$0xff]  ;;  %v8090_v25 = vld [vmem:[#allocation3 + $0xb0] sm:$0xff]  ;;  %v8092_v14 = vld [vmem:[#allocation3 + $0xc0] sm:$0xff] }
 0x56f   :  { %v8089_v44 = vld [vmem:[#allocation3 + $0xa8] sm:$0xff]  ;;  %v8094_v59 = vld [vmem:[#allocation3 + $0xd0] sm:$0xff]  ;;  %v8095_v62 = vld [vmem:[#allocation3 + $0xd8] sm:$0xff] }
 0x570   :  { %v7552_v50 = vsel %vm6912_vm8, %v24955_v19, %v15384_v54  ;;  %18263 = vmatmul.mubr.msk.f32.gmra.mrb[136].mxu1 %vm7554_vm5, %v8193_v29  ;;  %v8194_v48 = vld [vmem:[#allocation3 + $0x1d1] sm:$0xff]  ;;  %v8093_v18 = vld [vmem:[#allocation3 + $0xc8] sm:$0xff]  ;;  %v8096_v11 = vld [vmem:[#allocation3 + $0xe0] sm:$0xff] }
 0x571   :  { %v7807_v53 = vld [vmem:[#allocation2 + $0x3d0] ss:$2 sm:$0xff]  ;;  %v7935_v1 = vld [vmem:[#allocation2 + $0x3d1] ss:$2 sm:$0xff]  ;;  %7681 = vst.msk [vmem:[#allocation2 + $0x3f0] sm:$0xff] %vm7554_vm5, %v7552_v50  ;;  %18265 = vmatprep.mubr.msk.f32.mxu1 %vm7554_vm5, %v8194_v48  ;;  %v8097_v47 = vld [vmem:[#allocation3 + $0xe8] sm:$0xff] }
 0x572   :  { %v8001_v6 = vmax.f32 %v7807_v53, %v7935_v1  ;;  %v8195_v60 = vld [vmem:[#allocation3 + $0x1d9] sm:$0xff]  ;;  %v8098_v23 = vld [vmem:[#allocation3 + $0xf0] sm:$0xff]  ;;  %v8101_v24 = vld [vmem:[#allocation3 + $0x108] sm:$0xff] }
 0x573   :  { %v7809_v40 = vld [vmem:[#allocation2 + $0x3e0] ss:$2 sm:$0xff]  ;;  %v7937_v37 = vld [vmem:[#allocation2 + $0x3e1] ss:$2 sm:$0xff]  ;;  %v8099_v20 = vld [vmem:[#allocation3 + $0xf8] sm:$0xff] }
 0x574   :  { %8065 = vst.msk [vmem:[#allocation3 + $0x1e8] sm:$0xff] %vm7554_vm5, %v8001_v6  ;;  %18266 = vmatmul.mubr.msk.f32.gmra.mrb[138].mxu1 %vm7554_vm5, %v8195_v60  ;;  %v8002_v27 = vmax.f32 %v7809_v40, %v7937_v37  ;;  %v8100_v42 = vld [vmem:[#allocation3 + $0x100] sm:$0xff]  ;;  %v8102_v30 = vld [vmem:[#allocation3 + $0x110] sm:$0xff]  ;;  %v8103_v52 = vld [vmem:[#allocation3 + $0x118] sm:$0xff] }
 0x575   :  { %v8104_v46 = vld [vmem:[#allocation3 + $0x120] sm:$0xff]  ;;  %v8105_v61 = vld [vmem:[#allocation3 + $0x128] sm:$0xff]  ;;  %v8106_v29 = vld [vmem:[#allocation3 + $0x130] sm:$0xff] }
 0x576   :  { %8066 = vst.msk [vmem:[#allocation3 + $0x1f0] sm:$0xff] %vm7554_vm5, %v8002_v27  ;;  %v8107_v54 = vld [vmem:[#allocation3 + $0x138] sm:$0xff]  ;;  %v8108_v50 = vld [vmem:[#allocation3 + $0x140] sm:$0xff]  ;;  %v8109_v48 = vld [vmem:[#allocation3 + $0x148] sm:$0xff] }
 0x577   :  { %v8110_v53 = vld [vmem:[#allocation3 + $0x150] sm:$0xff]  ;;  %v8111_v1 = vld [vmem:[#allocation3 + $0x158] sm:$0xff]  ;;  %v8112_v6 = vld [vmem:[#allocation3 + $0x160] sm:$0xff] }
 0x578   :  { %v7811_v33 = vld [vmem:[#allocation2 + $0x3f0] ss:$2 sm:$0xff]  ;;  %v7939_v32 = vld [vmem:[#allocation2 + $0x3f1] ss:$2 sm:$0xff]  ;;  %v8113_v60 = vld [vmem:[#allocation3 + $0x168] sm:$0xff] }
 0x579   :  { %v8003_v58 = vmax.f32 %v7811_v33, %v7939_v32  ;;  %v8114_v40 = vld [vmem:[#allocation3 + $0x170] sm:$0xff]  ;;  %v8115_v37 = vld [vmem:[#allocation3 + $0x178] sm:$0xff]  ;;  %v8116_v27 = vld [vmem:[#allocation3 + $0x180] sm:$0xff] }
 0x57a   :  { %v8117_v33 = vld [vmem:[#allocation3 + $0x188] sm:$0xff]  ;;  %v8118_v32 = vld [vmem:[#allocation3 + $0x190] sm:$0xff]  ;;  %v8124_v43 = vld [vmem:[#allocation3 + $0x1c0] sm:$0xff] }
 0x57b   :  { %v8196_v12 = vld [vmem:[#allocation3 + $0x1e1] sm:$0xff]  ;;  %8067 = vst.msk [vmem:[#allocation3 + $0x1f8] sm:$0xff] %vm7554_vm5, %v8003_v58  ;;  %v8119_v58 = vld [vmem:[#allocation3 + $0x198] sm:$0xff] }
 0x57c   :  { %18268 = vmatprep.mubr.msk.f32.mxu1 %vm7554_vm5, %v8196_v12  ;;  %v8120_v12 = vld [vmem:[#allocation3 + $0x1a0] sm:$0xff]  ;;  %v8125_v17 = vld [vmem:[#allocation3 + $0x1c8] sm:$0xff] }
 0x57d   :  { %v8197_v55 = vld [vmem:[#allocation3 + $0x1e9] sm:$0xff] }
 0x57e   :  { %18269 = vmatmul.mubr.msk.f32.gmra.mrb[140].mxu1 %vm7554_vm5, %v8197_v55  ;;  %v8121_v55 = vld [vmem:[#allocation3 + $0x1a8] sm:$0xff]  ;;  %v8130_v35 = vld [vmem:[#allocation3 + $0x1f0] sm:$0xff] }
 0x582   :  { %v8198_v19 = vld [vmem:[#allocation3 + $0x1f1] sm:$0xff]  ;;  %v8199_v31 = vld [vmem:[#allocation3 + $0x1f9] sm:$0xf] }
 0x583   :  { %18271 = vmatprep.mubr.msk.f32.mxu1 %vm7554_vm5, %v8198_v19  ;;  %v8122_v19 = vld [vmem:[#allocation3 + $0x1b0] sm:$0xff]  ;;  %v8131_v34 = vld [vmem:[#allocation3 + $0x1f8] sm:$0xf] }
 0x584   :  { %18272 = vmatmul.mubr.msk.f32.gmra.mrb[142].mxu1 %vm7554_vm5, %v8199_v31  ;;  %v8123_v31 = vld [vmem:[#allocation3 + $0x1b8] sm:$0xff] }
 0x585   :  { %18282 = vmatprep.mubr.msk.f32.mxu1 %vm7554_vm5, %v8068_v3  ;;  %v8126_v3 = vld [vmem:[#allocation3 + $0x1d0] sm:$0xff] }
 0x588   :  { %18283 = vmatmul.mubr.msk.f32.vlgmr.msra.gmra.mrb[80].mxu1 %vm7554_vm5, %v8069_v4  ;;  %v8128_v4 = vld [vmem:[#allocation3 + $0x1e0] sm:$0xff] }
 0x589   :  { %18285 = vmatprep.mubr.msk.f32.mxu1 %vm7554_vm5, %v8070_v2  ;;  %19023 = vmatpush3.bf16.msra.mxu1 %v24978_v51  ;;  %v8078_v51 = vld [vmem:[#allocation3 + $0x50] sm:$0xff]  ;;  %v8129_v2 = vld [vmem:[#allocation3 + $0x1e8] sm:$0xff] }
 0x58a   :  { %19026 = vmatprep.subr.msk.bf16.mxu1 %vm22901_vm4, %v19024_v10 }
 0x58c   :  { %18286 = vmatmul.mubr.msk.f32.gmra.mrb[82].mxu1 %vm7554_vm5, %v8071_v5  ;;  %v15591_v5 = vld [vmem:[%s26572_s2 + $0x70] sm:$0xff] }
 0x58d   :  { %18288 = vmatprep.mubr.msk.f32.mxu1 %vm7554_vm5, %v8072_v56  ;;  %19029 = vmatpush3.bf16.msk.msra.mxu1 %vm22901_vm4, %v19024_v10  ;;  %v8127_v10 = vld [vmem:[#allocation3 + $0x1d8] sm:$0xff] }
 0x58e   :  { %19031 = vmatprep.subr.bf16.mxu1 %v25039_v57  ;;  %v15592_v56 = vld [vmem:[%s26572_s2 + $0x78] sm:$0x1] }
 0x590   :  { %18289 = vmatmul.mubr.msk.f32.gmra.mrb[84].mxu1 %vm7554_vm5, %v8073_v26  ;;  %v9366_v26 = vld [vmem:[#allocation3 + $0x2] sm:$0xff] }
 0x591   :  { %18291 = vmatprep.mubr.msk.f32.mxu1 %vm7554_vm5, %v8074_v15  ;;  %v19034_v15 = vpack.c.bf16 %v15592_v56, %v15591_v5  ;;  %v9422_v5 = vld [vmem:[#allocation3 + $0x1c2] sm:$0xff]  ;;  %v9423_v56 = vld [vmem:[#allocation3 + $0x1ca] sm:$0xff] }
 0x594   :  { %18292 = vmatmul.mubr.msk.f32.gmra.mrb[86].mxu1 %vm7554_vm5, %v8075_v38  ;;  %v9367_v38 = vld [vmem:[#allocation3 + $0xa] sm:$0xff] }
 0x595   :  { %18294 = vmatprep.mubr.msk.f32.mxu1 %vm7554_vm5, %v8076_v36  ;;  %v9368_v36 = vld [vmem:[#allocation3 + $0x12] sm:$0xff] }
 0x598   :  { %18295 = vmatmul.mubr.msk.f32.gmra.mrb[88].mxu1 %vm7554_vm5, %v8077_v39  ;;  %v15658_v39 = vld [vmem:[%s26572_s2 + $0x80] sm:$0xff] }
 0x599   :  { %18297 = vmatprep.mubr.msk.f32.mxu1 %vm7554_vm5, %v8078_v51  ;;  %v15659_v51 = vld [vmem:[%s26572_s2 + $0x88] sm:$0xff] }
 0x59c   :  { %18298 = vmatmul.mubr.msk.f32.gmra.mrb[90].mxu1 %vm7554_vm5, %v8079_v7  ;;  %v25123_v7 = vpack.c.bf16 %v15659_v51, %v15658_v39  ;;  %v9428_v39 = vld [vmem:[#allocation3 + $0x1f2] sm:$0xff]  ;;  %v9429_v51 = vld [vmem:[#allocation3 + $0x1fa] sm:$0xf] }
 0x59d   :  { %18300 = vmatprep.mubr.msk.f32.mxu1 %vm7554_vm5, %v8080_v0  ;;  %v9369_v0 = vld [vmem:[#allocation3 + $0x1a] sm:$0xff] }
 0x5a0   :  { %18301 = vmatmul.mubr.msk.f32.gmra.mrb[92].mxu1 %vm7554_vm5, %v8081_v28  ;;  %v9370_v28 = vld [vmem:[#allocation3 + $0x22] sm:$0xff] }
 0x5a1   :  { %18303 = vmatprep.mubr.msk.f32.mxu1 %vm7554_vm5, %v8082_v22  ;;  %v9371_v22 = vld [vmem:[#allocation3 + $0x2a] sm:$0xff] }
 0x5a4   :  { %18304 = vmatmul.mubr.msk.f32.gmra.mrb[94].mxu1 %vm7554_vm5, %v8083_v9  ;;  %v9373_v9 = vld [vmem:[#allocation3 + $0x3a] sm:$0xff] }
 0x5a5   :  { %18306 = vmatprep.mubr.msk.f32.mxu1 %vm7554_vm5, %v8084_v13  ;;  %v9374_v13 = vld [vmem:[#allocation3 + $0x42] sm:$0xff] }
 0x5a8   :  { %18307 = vmatmul.mubr.msk.f32.gmra.mrb[96].mxu1 %vm7554_vm5, %v8085_v41  ;;  %v9375_v41 = vld [vmem:[#allocation3 + $0x4a] sm:$0xff] }
 0x5a9   :  { %18309 = vmatprep.mubr.msk.f32.mxu1 %vm7554_vm5, %v8086_v8  ;;  %v9376_v8 = vld [vmem:[#allocation3 + $0x52] sm:$0xff] }
 0x5ac   :  { %18310 = vmatmul.mubr.msk.f32.gmra.mrb[98].mxu1 %vm7554_vm5, %v8087_v49  ;;  %v9377_v49 = vld [vmem:[#allocation3 + $0x5a] sm:$0xff] }
 0x5ad   :  { %18312 = vmatprep.mubr.msk.f32.mxu1 %vm7554_vm5, %v8088_v45  ;;  %v9378_v45 = vld [vmem:[#allocation3 + $0x62] sm:$0xff] }
 0x5b0   :  { %18313 = vmatmul.mubr.msk.f32.gmra.mrb[100].mxu1 %vm7554_vm5, %v8089_v44  ;;  %v9379_v44 = vld [vmem:[#allocation3 + $0x6a] sm:$0xff] }
 0x5b1   :  { %18315 = vmatprep.mubr.msk.f32.mxu1 %vm7554_vm5, %v8090_v25  ;;  %v9380_v25 = vld [vmem:[#allocation3 + $0x72] sm:$0xff] }
 0x5b4   :  { %18316 = vmatmul.mubr.msk.f32.gmra.mrb[102].mxu1 %vm7554_vm5, %v8091_v16  ;;  %v9381_v16 = vld [vmem:[#allocation3 + $0x7a] sm:$0xff] }
 0x5b5   :  { %18318 = vmatprep.mubr.msk.f32.mxu1 %vm7554_vm5, %v8092_v14  ;;  %v9382_v14 = vld [vmem:[#allocation3 + $0x82] sm:$0xff] }
 0x5b8   :  { %18319 = vmatmul.mubr.msk.f32.gmra.mrb[104].mxu1 %vm7554_vm5, %v8093_v18  ;;  %v9383_v18 = vld [vmem:[#allocation3 + $0x8a] sm:$0xff] }
 0x5b9   :  { %18321 = vmatprep.mubr.msk.f32.mxu1 %vm7554_vm5, %v8094_v59  ;;  %v9384_v59 = vld [vmem:[#allocation3 + $0x92] sm:$0xff] }
 0x5bc   :  { %18322 = vmatmul.mubr.msk.f32.gmra.mrb[106].mxu1 %vm7554_vm5, %v8095_v62  ;;  %v9385_v62 = vld [vmem:[#allocation3 + $0x9a] sm:$0xff] }
 0x5bd   :  { %18324 = vmatprep.mubr.msk.f32.mxu1 %vm7554_vm5, %v8096_v11  ;;  %v9386_v11 = vld [vmem:[#allocation3 + $0xa2] sm:$0xff] }
 0x5c0   :  { %18325 = vmatmul.mubr.msk.f32.gmra.mrb[108].mxu1 %vm7554_vm5, %v8097_v47  ;;  %v9387_v47 = vld [vmem:[#allocation3 + $0xaa] sm:$0xff] }
 0x5c1   :  { %18327 = vmatprep.mubr.msk.f32.mxu1 %vm7554_vm5, %v8098_v23  ;;  %v9388_v23 = vld [vmem:[#allocation3 + $0xb2] sm:$0xff] }
 0x5c4   :  { %18328 = vmatmul.mubr.msk.f32.gmra.mrb[110].mxu1 %vm7554_vm5, %v8099_v20  ;;  %v9389_v20 = vld [vmem:[#allocation3 + $0xba] sm:$0xff] }
 0x5c5   :  { %18330 = vmatprep.mubr.msk.f32.mxu1 %vm7554_vm5, %v8100_v42  ;;  %v9390_v42 = vld [vmem:[#allocation3 + $0xc2] sm:$0xff] }
 0x5c8   :  { %18331 = vmatmul.mubr.msk.f32.gmra.mrb[112].mxu1 %vm7554_vm5, %v8101_v24  ;;  %v9391_v24 = vld [vmem:[#allocation3 + $0xca] sm:$0xff] }
 0x5c9   :  { %18333 = vmatprep.mubr.msk.f32.mxu1 %vm7554_vm5, %v8102_v30  ;;  %v9392_v30 = vld [vmem:[#allocation3 + $0xd2] sm:$0xff] }
 0x5cc   :  { %18334 = vmatmul.mubr.msk.f32.gmra.mrb[114].mxu1 %vm7554_vm5, %v8103_v52  ;;  %v9393_v52 = vld [vmem:[#allocation3 + $0xda] sm:$0xff] }
 0x5cd   :  { %18336 = vmatprep.mubr.msk.f32.mxu1 %vm7554_vm5, %v8104_v46  ;;  %v9394_v46 = vld [vmem:[#allocation3 + $0xe2] sm:$0xff] }
 0x5d0   :  { %18337 = vmatmul.mubr.msk.f32.gmra.mrb[116].mxu1 %vm7554_vm5, %v8105_v61  ;;  %v9395_v61 = vld [vmem:[#allocation3 + $0xea] sm:$0xff] }
 0x5d1   :  { %18339 = vmatprep.mubr.msk.f32.mxu1 %vm7554_vm5, %v8106_v29  ;;  %v9396_v29 = vld [vmem:[#allocation3 + $0xf2] sm:$0xff] }
 0x5d4   :  { %18340 = vmatmul.mubr.msk.f32.gmra.mrb[118].mxu1 %vm7554_vm5, %v8107_v54  ;;  %v9397_v54 = vld [vmem:[#allocation3 + $0xfa] sm:$0xff] }
 0x5d5   :  { %18342 = vmatprep.mubr.msk.f32.mxu1 %vm7554_vm5, %v8108_v50  ;;  %v9398_v50 = vld [vmem:[#allocation3 + $0x102] sm:$0xff] }
 0x5d8   :  { %18343 = vmatmul.mubr.msk.f32.gmra.mrb[120].mxu1 %vm7554_vm5, %v8109_v48  ;;  %v9399_v48 = vld [vmem:[#allocation3 + $0x10a] sm:$0xff] }
 0x5d9   :  { %18345 = vmatprep.mubr.msk.f32.mxu1 %vm7554_vm5, %v8110_v53  ;;  %v9400_v53 = vld [vmem:[#allocation3 + $0x112] sm:$0xff] }
 0x5dc   :  { %18346 = vmatmul.mubr.msk.f32.gmra.mrb[122].mxu1 %vm7554_vm5, %v8111_v1  ;;  %v9401_v1 = vld [vmem:[#allocation3 + $0x11a] sm:$0xff] }
 0x5dd   :  { %18348 = vmatprep.mubr.msk.f32.mxu1 %vm7554_vm5, %v8112_v6  ;;  %v9402_v6 = vld [vmem:[#allocation3 + $0x122] sm:$0xff] }
 0x5e0   :  { %18349 = vmatmul.mubr.msk.f32.gmra.mrb[124].mxu1 %vm7554_vm5, %v8113_v60  ;;  %v9403_v60 = vld [vmem:[#allocation3 + $0x12a] sm:$0xff] }
 0x5e1   :  { %18351 = vmatprep.mubr.msk.f32.mxu1 %vm7554_vm5, %v8114_v40  ;;  %v9404_v40 = vld [vmem:[#allocation3 + $0x132] sm:$0xff] }
 0x5e4   :  { %18352 = vmatmul.mubr.msk.f32.gmra.mrb[126].mxu1 %vm7554_vm5, %v8115_v37  ;;  %v9405_v37 = vld [vmem:[#allocation3 + $0x13a] sm:$0xff] }
 0x5e5   :  { %18354 = vmatprep.mubr.msk.f32.mxu1 %vm7554_vm5, %v8116_v27  ;;  %v9406_v27 = vld [vmem:[#allocation3 + $0x142] sm:$0xff] }
 0x5e8   :  { %18355 = vmatmul.mubr.msk.f32.gmra.mrb[128].mxu1 %vm7554_vm5, %v8117_v33  ;;  %v9407_v33 = vld [vmem:[#allocation3 + $0x14a] sm:$0xff] }
 0x5e9   :  { %18357 = vmatprep.mubr.msk.f32.mxu1 %vm7554_vm5, %v8118_v32  ;;  %v9408_v32 = vld [vmem:[#allocation3 + $0x152] sm:$0xff] }
 0x5ec   :  { %18358 = vmatmul.mubr.msk.f32.gmra.mrb[130].mxu1 %vm7554_vm5, %v8119_v58  ;;  %v9409_v58 = vld [vmem:[#allocation3 + $0x15a] sm:$0xff] }
 0x5ed   :  { %18360 = vmatprep.mubr.msk.f32.mxu1 %vm7554_vm5, %v8120_v12  ;;  %v9410_v12 = vld [vmem:[#allocation3 + $0x162] sm:$0xff] }
 0x5f0   :  { %18361 = vmatmul.mubr.msk.f32.gmra.mrb[132].mxu1 %vm7554_vm5, %v8121_v55  ;;  %v9411_v55 = vld [vmem:[#allocation3 + $0x16a] sm:$0xff] }
 0x5f1   :  { %18363 = vmatprep.mubr.msk.f32.mxu1 %vm7554_vm5, %v8122_v19  ;;  %v9412_v19 = vld [vmem:[#allocation3 + $0x172] sm:$0xff] }
 0x5f4   :  { %18364 = vmatmul.mubr.msk.f32.gmra.mrb[134].mxu1 %vm7554_vm5, %v8123_v31  ;;  %v9413_v31 = vld [vmem:[#allocation3 + $0x17a] sm:$0xff] }
 0x5f5   :  { %18366 = vmatprep.mubr.msk.f32.mxu1 %vm7554_vm5, %v8124_v43  ;;  %v9414_v43 = vld [vmem:[#allocation3 + $0x182] sm:$0xff] }
 0x5f8   :  { %18367 = vmatmul.mubr.msk.f32.gmra.mrb[136].mxu1 %vm7554_vm5, %v8125_v17  ;;  %v9415_v17 = vld [vmem:[#allocation3 + $0x18a] sm:$0xff] }
 0x5f9   :  { %18369 = vmatprep.mubr.msk.f32.mxu1 %vm7554_vm5, %v8126_v3  ;;  %v9416_v3 = vld [vmem:[#allocation3 + $0x192] sm:$0xff] }
 0x5fc   :  { %18370 = vmatmul.mubr.msk.f32.gmra.mrb[138].mxu1 %vm7554_vm5, %v8127_v10  ;;  %v9417_v10 = vld [vmem:[#allocation3 + $0x19a] sm:$0xff] }
 0x5fd   :  { %18372 = vmatprep.mubr.msk.f32.mxu1 %vm7554_vm5, %v8128_v4  ;;  %v9418_v4 = vld [vmem:[#allocation3 + $0x1a2] sm:$0xff] }
 0x600   :  { %18373 = vmatmul.mubr.msk.f32.gmra.mrb[140].mxu1 %vm7554_vm5, %v8129_v2  ;;  %v9419_v2 = vld [vmem:[#allocation3 + $0x1aa] sm:$0xff] }
 0x601   :  { %18375 = vmatprep.mubr.msk.f32.mxu1 %vm7554_vm5, %v8130_v35  ;;  %v9420_v35 = vld [vmem:[#allocation3 + $0x1b2] sm:$0xff] }
 0x604   :  { %18376 = vmatmul.mubr.msk.f32.gmra.mrb[142].mxu1 %vm7554_vm5, %v8131_v34  ;;  %v9421_v34 = vld [vmem:[#allocation3 + $0x1ba] sm:$0xff] }
 0x605   :  { %18386 = vmatprep.mubr.msk.f32.mxu1 %vm7554_vm5, %v9366_v26  ;;  %v9424_v26 = vld [vmem:[#allocation3 + $0x1d2] sm:$0xff] }
 0x608   :  { %18387 = vmatmul.mubr.msk.f32.vlgmr.msra.gmra.mrb[80].mxu1 %vm7554_vm5, %v9367_v38  ;;  %v9426_v38 = vld [vmem:[#allocation3 + $0x1e2] sm:$0xff] }
 0x609   :  { %18389 = vmatprep.mubr.msk.f32.mxu1 %vm7554_vm5, %v9368_v36  ;;  %19033 = vmatpush3.bf16.msra.mxu1 %v25039_v57  ;;  %v9372_v57 = vld [vmem:[#allocation3 + $0x32] sm:$0xff]  ;;  %v9427_v36 = vld [vmem:[#allocation3 + $0x1ea] sm:$0xff] }
 0x60a   :  { %19036 = vmatprep.subr.msk.bf16.mxu1 %vm22901_vm4, %v19034_v15 }
 0x60c   :  { %18390 = vmatmul.mubr.msk.f32.gmra.mrb[82].mxu1 %vm7554_vm5, %v9369_v0  ;;  %v15660_v0 = vld [vmem:[%s26572_s2 + $0x90] sm:$0xff] }
 0x60d   :  { %18392 = vmatprep.mubr.msk.f32.mxu1 %vm7554_vm5, %v9370_v28  ;;  %19039 = vmatpush3.bf16.msk.msra.mxu1 %vm22901_vm4, %v19034_v15  ;;  %v9425_v15 = vld [vmem:[#allocation3 + $0x1da] sm:$0xff]  ;;  %v15661_v28 = vld [vmem:[%s26572_s2 + $0x98] sm:$0x1] }
 0x60e   :  { %19041 = vmatprep.subr.bf16.mxu1 %v25123_v7 }
 0x610   :  { %18393 = vmatmul.mubr.msk.f32.gmra.mrb[84].mxu1 %vm7554_vm5, %v9371_v22  ;;  %v10079_v22 = vld [vmem:[#allocation3 + $0x3] sm:$0xff] }
 0x611   :  { %18395 = vmatprep.mubr.msk.f32.mxu1 %vm7554_vm5, %v9372_v57  ;;  %v19044_v57 = vpack.c.bf16 %v15661_v28, %v15660_v0  ;;  %v10139_v0 = vld [vmem:[#allocation3 + $0x1e3] sm:$0xff]  ;;  %v10140_v28 = vld [vmem:[#allocation3 + $0x1eb] sm:$0xff] }
 0x614   :  { %18396 = vmatmul.mubr.msk.f32.gmra.mrb[86].mxu1 %vm7554_vm5, %v9373_v9  ;;  %v10080_v9 = vld [vmem:[#allocation3 + $0xb] sm:$0xff] }
 0x615   :  { %18398 = vmatprep.mubr.msk.f32.mxu1 %vm7554_vm5, %v9374_v13  ;;  %v10081_v13 = vld [vmem:[#allocation3 + $0x13] sm:$0xff] }
 0x618   :  { %18399 = vmatmul.mubr.msk.f32.gmra.mrb[88].mxu1 %vm7554_vm5, %v9375_v41  ;;  %v10082_v41 = vld [vmem:[#allocation3 + $0x1b] sm:$0xff] }
 0x619   :  { %18401 = vmatprep.mubr.msk.f32.mxu1 %vm7554_vm5, %v9376_v8  ;;  %v10083_v8 = vld [vmem:[#allocation3 + $0x23] sm:$0xff] }
 0x61c   :  { %18402 = vmatmul.mubr.msk.f32.gmra.mrb[90].mxu1 %vm7554_vm5, %v9377_v49  ;;  %v10084_v49 = vld [vmem:[#allocation3 + $0x2b] sm:$0xff] }
 0x61d   :  { %18404 = vmatprep.mubr.msk.f32.mxu1 %vm7554_vm5, %v9378_v45  ;;  %v10085_v45 = vld [vmem:[#allocation3 + $0x33] sm:$0xff] }
 0x620   :  { %18405 = vmatmul.mubr.msk.f32.gmra.mrb[92].mxu1 %vm7554_vm5, %v9379_v44  ;;  %v10086_v44 = vld [vmem:[#allocation3 + $0x3b] sm:$0xff] }
 0x621   :  { %18407 = vmatprep.mubr.msk.f32.mxu1 %vm7554_vm5, %v9380_v25  ;;  %v10088_v25 = vld [vmem:[#allocation3 + $0x4b] sm:$0xff] }
 0x624   :  { %18408 = vmatmul.mubr.msk.f32.gmra.mrb[94].mxu1 %vm7554_vm5, %v9381_v16  ;;  %v10089_v16 = vld [vmem:[#allocation3 + $0x53] sm:$0xff] }
 0x625   :  { %18410 = vmatprep.mubr.msk.f32.mxu1 %vm7554_vm5, %v9382_v14  ;;  %v10091_v14 = vld [vmem:[#allocation3 + $0x63] sm:$0xff] }
 0x628   :  { %18411 = vmatmul.mubr.msk.f32.gmra.mrb[96].mxu1 %vm7554_vm5, %v9383_v18  ;;  %v10092_v18 = vld [vmem:[#allocation3 + $0x6b] sm:$0xff] }
 0x629   :  { %18413 = vmatprep.mubr.msk.f32.mxu1 %vm7554_vm5, %v9384_v59  ;;  %v10093_v59 = vld [vmem:[#allocation3 + $0x73] sm:$0xff] }
 0x62c   :  { %18414 = vmatmul.mubr.msk.f32.gmra.mrb[98].mxu1 %vm7554_vm5, %v9385_v62  ;;  %v10094_v62 = vld [vmem:[#allocation3 + $0x7b] sm:$0xff] }
 0x62d   :  { %18416 = vmatprep.mubr.msk.f32.mxu1 %vm7554_vm5, %v9386_v11  ;;  %v10095_v11 = vld [vmem:[#allocation3 + $0x83] sm:$0xff] }
 0x630   :  { %18417 = vmatmul.mubr.msk.f32.gmra.mrb[100].mxu1 %vm7554_vm5, %v9387_v47  ;;  %v10096_v47 = vld [vmem:[#allocation3 + $0x8b] sm:$0xff] }
 0x631   :  { %18419 = vmatprep.mubr.msk.f32.mxu1 %vm7554_vm5, %v9388_v23  ;;  %v10097_v23 = vld [vmem:[#allocation3 + $0x93] sm:$0xff] }
 0x634   :  { %18420 = vmatmul.mubr.msk.f32.gmra.mrb[102].mxu1 %vm7554_vm5, %v9389_v20  ;;  %v10098_v20 = vld [vmem:[#allocation3 + $0x9b] sm:$0xff] }
 0x635   :  { %18422 = vmatprep.mubr.msk.f32.mxu1 %vm7554_vm5, %v9390_v42  ;;  %v10099_v42 = vld [vmem:[#allocation3 + $0xa3] sm:$0xff] }
 0x638   :  { %18423 = vmatmul.mubr.msk.f32.gmra.mrb[104].mxu1 %vm7554_vm5, %v9391_v24  ;;  %v10100_v24 = vld [vmem:[#allocation3 + $0xab] sm:$0xff] }
 0x639   :  { %18425 = vmatprep.mubr.msk.f32.mxu1 %vm7554_vm5, %v9392_v30  ;;  %v10101_v30 = vld [vmem:[#allocation3 + $0xb3] sm:$0xff] }
 0x63c   :  { %18426 = vmatmul.mubr.msk.f32.gmra.mrb[106].mxu1 %vm7554_vm5, %v9393_v52  ;;  %v10102_v52 = vld [vmem:[#allocation3 + $0xbb] sm:$0xff] }
 0x63d   :  { %18428 = vmatprep.mubr.msk.f32.mxu1 %vm7554_vm5, %v9394_v46  ;;  %v10103_v46 = vld [vmem:[#allocation3 + $0xc3] sm:$0xff] }
 0x640   :  { %18429 = vmatmul.mubr.msk.f32.gmra.mrb[108].mxu1 %vm7554_vm5, %v9395_v61  ;;  %v10104_v61 = vld [vmem:[#allocation3 + $0xcb] sm:$0xff] }
 0x641   :  { %18431 = vmatprep.mubr.msk.f32.mxu1 %vm7554_vm5, %v9396_v29  ;;  %v10105_v29 = vld [vmem:[#allocation3 + $0xd3] sm:$0xff] }
 0x644   :  { %18432 = vmatmul.mubr.msk.f32.gmra.mrb[110].mxu1 %vm7554_vm5, %v9397_v54  ;;  %v10106_v54 = vld [vmem:[#allocation3 + $0xdb] sm:$0xff] }
 0x645   :  { %18434 = vmatprep.mubr.msk.f32.mxu1 %vm7554_vm5, %v9398_v50  ;;  %v10107_v50 = vld [vmem:[#allocation3 + $0xe3] sm:$0xff] }
 0x648   :  { %18435 = vmatmul.mubr.msk.f32.gmra.mrb[112].mxu1 %vm7554_vm5, %v9399_v48  ;;  %v10108_v48 = vld [vmem:[#allocation3 + $0xeb] sm:$0xff] }
 0x649   :  { %18437 = vmatprep.mubr.msk.f32.mxu1 %vm7554_vm5, %v9400_v53  ;;  %v10109_v53 = vld [vmem:[#allocation3 + $0xf3] sm:$0xff] }
 0x64c   :  { %18438 = vmatmul.mubr.msk.f32.gmra.mrb[114].mxu1 %vm7554_vm5, %v9401_v1  ;;  %v10110_v1 = vld [vmem:[#allocation3 + $0xfb] sm:$0xff] }
 0x64d   :  { %18440 = vmatprep.mubr.msk.f32.mxu1 %vm7554_vm5, %v9402_v6  ;;  %v10111_v6 = vld [vmem:[#allocation3 + $0x103] sm:$0xff] }
 0x650   :  { %18441 = vmatmul.mubr.msk.f32.gmra.mrb[116].mxu1 %vm7554_vm5, %v9403_v60  ;;  %v10112_v60 = vld [vmem:[#allocation3 + $0x10b] sm:$0xff] }
 0x651   :  { %18443 = vmatprep.mubr.msk.f32.mxu1 %vm7554_vm5, %v9404_v40  ;;  %v10113_v40 = vld [vmem:[#allocation3 + $0x113] sm:$0xff] }
 0x654   :  { %18444 = vmatmul.mubr.msk.f32.gmra.mrb[118].mxu1 %vm7554_vm5, %v9405_v37  ;;  %v10114_v37 = vld [vmem:[#allocation3 + $0x11b] sm:$0xff] }
 0x655   :  { %18446 = vmatprep.mubr.msk.f32.mxu1 %vm7554_vm5, %v9406_v27  ;;  %v10115_v27 = vld [vmem:[#allocation3 + $0x123] sm:$0xff] }
 0x658   :  { %18447 = vmatmul.mubr.msk.f32.gmra.mrb[120].mxu1 %vm7554_vm5, %v9407_v33  ;;  %v10116_v33 = vld [vmem:[#allocation3 + $0x12b] sm:$0xff] }
 0x659   :  { %18449 = vmatprep.mubr.msk.f32.mxu1 %vm7554_vm5, %v9408_v32  ;;  %v10117_v32 = vld [vmem:[#allocation3 + $0x133] sm:$0xff] }
 0x65c   :  { %18450 = vmatmul.mubr.msk.f32.gmra.mrb[122].mxu1 %vm7554_vm5, %v9409_v58  ;;  %v10118_v58 = vld [vmem:[#allocation3 + $0x13b] sm:$0xff] }
 0x65d   :  { %18452 = vmatprep.mubr.msk.f32.mxu1 %vm7554_vm5, %v9410_v12  ;;  %v10119_v12 = vld [vmem:[#allocation3 + $0x143] sm:$0xff] }
 0x660   :  { %18453 = vmatmul.mubr.msk.f32.gmra.mrb[124].mxu1 %vm7554_vm5, %v9411_v55  ;;  %v10120_v55 = vld [vmem:[#allocation3 + $0x14b] sm:$0xff] }
 0x661   :  { %18455 = vmatprep.mubr.msk.f32.mxu1 %vm7554_vm5, %v9412_v19  ;;  %v10121_v19 = vld [vmem:[#allocation3 + $0x153] sm:$0xff] }
 0x664   :  { %18456 = vmatmul.mubr.msk.f32.gmra.mrb[126].mxu1 %vm7554_vm5, %v9413_v31  ;;  %v10122_v31 = vld [vmem:[#allocation3 + $0x15b] sm:$0xff] }
 0x665   :  { %18458 = vmatprep.mubr.msk.f32.mxu1 %vm7554_vm5, %v9414_v43  ;;  %v10123_v43 = vld [vmem:[#allocation3 + $0x163] sm:$0xff] }
 0x668   :  { %18459 = vmatmul.mubr.msk.f32.gmra.mrb[128].mxu1 %vm7554_vm5, %v9415_v17  ;;  %v10124_v17 = vld [vmem:[#allocation3 + $0x16b] sm:$0xff] }
 0x669   :  { %18461 = vmatprep.mubr.msk.f32.mxu1 %vm7554_vm5, %v9416_v3  ;;  %v10125_v3 = vld [vmem:[#allocation3 + $0x173] sm:$0xff] }
 0x66c   :  { %18462 = vmatmul.mubr.msk.f32.gmra.mrb[130].mxu1 %vm7554_vm5, %v9417_v10  ;;  %v10126_v10 = vld [vmem:[#allocation3 + $0x17b] sm:$0xff] }
 0x66d   :  { %18464 = vmatprep.mubr.msk.f32.mxu1 %vm7554_vm5, %v9418_v4  ;;  %v10127_v4 = vld [vmem:[#allocation3 + $0x183] sm:$0xff] }
 0x670   :  { %18465 = vmatmul.mubr.msk.f32.gmra.mrb[132].mxu1 %vm7554_vm5, %v9419_v2  ;;  %v10128_v2 = vld [vmem:[#allocation3 + $0x18b] sm:$0xff] }
 0x671   :  { %18467 = vmatprep.mubr.msk.f32.mxu1 %vm7554_vm5, %v9420_v35  ;;  %v10129_v35 = vld [vmem:[#allocation3 + $0x193] sm:$0xff] }
 0x674   :  { %18468 = vmatmul.mubr.msk.f32.gmra.mrb[134].mxu1 %vm7554_vm5, %v9421_v34  ;;  %v10130_v34 = vld [vmem:[#allocation3 + $0x19b] sm:$0xff] }
 0x675   :  { %18470 = vmatprep.mubr.msk.f32.mxu1 %vm7554_vm5, %v9422_v5  ;;  %v10131_v5 = vld [vmem:[#allocation3 + $0x1a3] sm:$0xff] }
 0x678   :  { %18471 = vmatmul.mubr.msk.f32.gmra.mrb[136].mxu1 %vm7554_vm5, %v9423_v56  ;;  %v10132_v56 = vld [vmem:[#allocation3 + $0x1ab] sm:$0xff] }
 0x679   :  { %18473 = vmatprep.mubr.msk.f32.mxu1 %vm7554_vm5, %v9424_v26  ;;  %v10133_v26 = vld [vmem:[#allocation3 + $0x1b3] sm:$0xff] }
 0x67c   :  { %18474 = vmatmul.mubr.msk.f32.gmra.mrb[138].mxu1 %vm7554_vm5, %v9425_v15  ;;  %v10134_v15 = vld [vmem:[#allocation3 + $0x1bb] sm:$0xff] }
 0x67d   :  { %18476 = vmatprep.mubr.msk.f32.mxu1 %vm7554_vm5, %v9426_v38  ;;  %v10135_v38 = vld [vmem:[#allocation3 + $0x1c3] sm:$0xff] }
 0x680   :  { %18477 = vmatmul.mubr.msk.f32.gmra.mrb[140].mxu1 %vm7554_vm5, %v9427_v36  ;;  %v10136_v36 = vld [vmem:[#allocation3 + $0x1cb] sm:$0xff] }
 0x681   :  { %18479 = vmatprep.mubr.msk.f32.mxu1 %vm7554_vm5, %v9428_v39  ;;  %v10137_v39 = vld [vmem:[#allocation3 + $0x1d3] sm:$0xff] }
 0x684   :  { %18480 = vmatmul.mubr.msk.f32.gmra.mrb[142].mxu1 %vm7554_vm5, %v9429_v51  ;;  %v10138_v51 = vld [vmem:[#allocation3 + $0x1db] sm:$0xff] }
 0x685   :  { %18490 = vmatprep.mubr.msk.f32.mxu1 %vm7554_vm5, %v10079_v22  ;;  %v10141_v22 = vld [vmem:[#allocation3 + $0x1f3] sm:$0xff] }
 0x688   :  { %18491 = vmatmul.mubr.msk.f32.vlgmr.msra.gmra.mrb[80].mxu1 %vm7554_vm5, %v10080_v9  ;;  %v10792_v9 = vld [vmem:[#allocation3 + $0x4] sm:$0xff] }
 0x689   :  { %18493 = vmatprep.mubr.msk.f32.mxu1 %vm7554_vm5, %v10081_v13  ;;  %19043 = vmatpush3.bf16.msra.mxu1 %v25123_v7  ;;  %v10087_v7 = vld [vmem:[#allocation3 + $0x43] sm:$0xff]  ;;  %v15793_v13 = vld [vmem:[%s26573_s3 + $0x38] sm:$0xff] }
 0x68a   :  { %19046 = vmatprep.subr.msk.bf16.mxu1 %vm22901_vm4, %v19044_v57 }
 0x68c   :  { %18494 = vmatmul.mubr.msk.f32.gmra.mrb[82].mxu1 %vm7554_vm5, %v10082_v41  ;;  %v15794_v41 = vld [vmem:[%s26573_s3 + $0x40] sm:$0xff] }
 0x68d   :  { %18496 = vmatprep.mubr.msk.f32.mxu1 %vm7554_vm5, %v10083_v8  ;;  %19049 = vmatpush3.bf16.msk.msra.mxu1 %vm22901_vm4, %v19044_v57  ;;  %v10142_v57 = vld [vmem:[#allocation3 + $0x1fb] sm:$0xf]  ;;  %v19050_v8 = vpack.c.bf16 %v15794_v41, %v15793_v13  ;;  %v10853_v13 = vld [vmem:[#allocation3 + $0x1ec] sm:$0xff]  ;;  %vm12458_vm4 = vcmask 1041408  }
 0x68e   :  { %v10854_v41 = vld [vmem:[#allocation3 + $0x1f4] sm:$0xff] }
 0x68f   :  { %19051 = vmatprep.subr.bf16.mxu1 %v19050_v8 }
 0x690   :  { %18497 = vmatmul.mubr.msk.f32.gmra.mrb[84].mxu1 %vm7554_vm5, %v10084_v49  ;;  %v10793_v49 = vld [vmem:[#allocation3 + $0xc] sm:$0xff] }
 0x691   :  { %18499 = vmatprep.mubr.msk.f32.mxu1 %vm7554_vm5, %v10085_v45  ;;  %v10794_v45 = vld [vmem:[#allocation3 + $0x14] sm:$0xff] }
 0x694   :  { %18500 = vmatmul.mubr.msk.f32.gmra.mrb[86].mxu1 %vm7554_vm5, %v10086_v44  ;;  %v10795_v44 = vld [vmem:[#allocation3 + $0x1c] sm:$0xff] }
 0x695   :  { %18502 = vmatprep.mubr.msk.f32.mxu1 %vm7554_vm5, %v10087_v7  ;;  %v10796_v7 = vld [vmem:[#allocation3 + $0x24] sm:$0xff] }
 0x698   :  { %18503 = vmatmul.mubr.msk.f32.gmra.mrb[88].mxu1 %vm7554_vm5, %v10088_v25  ;;  %v10797_v25 = vld [vmem:[#allocation3 + $0x2c] sm:$0xff] }
 0x699   :  { %18505 = vmatprep.mubr.msk.f32.mxu1 %vm7554_vm5, %v10089_v16  ;;  %v10798_v16 = vld [vmem:[#allocation3 + $0x34] sm:$0xff] }
 0x69c   :  { %18506 = vmatmul.mubr.msk.f32.gmra.mrb[90].mxu1 %vm7554_vm5, %v10090_v21  ;;  %v10799_v21 = vld [vmem:[#allocation3 + $0x3c] sm:$0xff] }
 0x69d   :  { %18508 = vmatprep.mubr.msk.f32.mxu1 %vm7554_vm5, %v10091_v14  ;;  %v10800_v14 = vld [vmem:[#allocation3 + $0x44] sm:$0xff] }
 0x6a0   :  { %18509 = vmatmul.mubr.msk.f32.gmra.mrb[92].mxu1 %vm7554_vm5, %v10092_v18  ;;  %v10801_v18 = vld [vmem:[#allocation3 + $0x4c] sm:$0xff] }
 0x6a1   :  { %18511 = vmatprep.mubr.msk.f32.mxu1 %vm7554_vm5, %v10093_v59  ;;  %v10802_v59 = vld [vmem:[#allocation3 + $0x54] sm:$0xff] }
 0x6a4   :  { %18512 = vmatmul.mubr.msk.f32.gmra.mrb[94].mxu1 %vm7554_vm5, %v10094_v62  ;;  %v10803_v62 = vld [vmem:[#allocation3 + $0x5c] sm:$0xff] }
 0x6a5   :  { %18514 = vmatprep.mubr.msk.f32.mxu1 %vm7554_vm5, %v10095_v11  ;;  %v10804_v11 = vld [vmem:[#allocation3 + $0x64] sm:$0xff] }
 0x6a8   :  { %18515 = vmatmul.mubr.msk.f32.gmra.mrb[96].mxu1 %vm7554_vm5, %v10096_v47  ;;  %v10805_v47 = vld [vmem:[#allocation3 + $0x6c] sm:$0xff] }
 0x6a9   :  { %18517 = vmatprep.mubr.msk.f32.mxu1 %vm7554_vm5, %v10097_v23  ;;  %v10806_v23 = vld [vmem:[#allocation3 + $0x74] sm:$0xff] }
 0x6ac   :  { %18518 = vmatmul.mubr.msk.f32.gmra.mrb[98].mxu1 %vm7554_vm5, %v10098_v20  ;;  %v10807_v20 = vld [vmem:[#allocation3 + $0x7c] sm:$0xff] }
 0x6ad   :  { %18520 = vmatprep.mubr.msk.f32.mxu1 %vm7554_vm5, %v10099_v42  ;;  %v10808_v42 = vld [vmem:[#allocation3 + $0x84] sm:$0xff] }
 0x6b0   :  { %18521 = vmatmul.mubr.msk.f32.gmra.mrb[100].mxu1 %vm7554_vm5, %v10100_v24  ;;  %v10809_v24 = vld [vmem:[#allocation3 + $0x8c] sm:$0xff] }
 0x6b1   :  { %18523 = vmatprep.mubr.msk.f32.mxu1 %vm7554_vm5, %v10101_v30  ;;  %v10810_v30 = vld [vmem:[#allocation3 + $0x94] sm:$0xff] }
 0x6b4   :  { %18524 = vmatmul.mubr.msk.f32.gmra.mrb[102].mxu1 %vm7554_vm5, %v10102_v52  ;;  %v10811_v52 = vld [vmem:[#allocation3 + $0x9c] sm:$0xff] }
 0x6b5   :  { %18526 = vmatprep.mubr.msk.f32.mxu1 %vm7554_vm5, %v10103_v46  ;;  %v10812_v46 = vld [vmem:[#allocation3 + $0xa4] sm:$0xff] }
 0x6b8   :  { %18527 = vmatmul.mubr.msk.f32.gmra.mrb[104].mxu1 %vm7554_vm5, %v10104_v61  ;;  %v10813_v61 = vld [vmem:[#allocation3 + $0xac] sm:$0xff] }
 0x6b9   :  { %18529 = vmatprep.mubr.msk.f32.mxu1 %vm7554_vm5, %v10105_v29  ;;  %v10814_v29 = vld [vmem:[#allocation3 + $0xb4] sm:$0xff] }
 0x6bc   :  { %18530 = vmatmul.mubr.msk.f32.gmra.mrb[106].mxu1 %vm7554_vm5, %v10106_v54  ;;  %v10815_v54 = vld [vmem:[#allocation3 + $0xbc] sm:$0xff] }
 0x6bd   :  { %18532 = vmatprep.mubr.msk.f32.mxu1 %vm7554_vm5, %v10107_v50  ;;  %v10816_v50 = vld [vmem:[#allocation3 + $0xc4] sm:$0xff] }
 0x6c0   :  { %18533 = vmatmul.mubr.msk.f32.gmra.mrb[108].mxu1 %vm7554_vm5, %v10108_v48  ;;  %v10817_v48 = vld [vmem:[#allocation3 + $0xcc] sm:$0xff] }
 0x6c1   :  { %18535 = vmatprep.mubr.msk.f32.mxu1 %vm7554_vm5, %v10109_v53  ;;  %v10818_v53 = vld [vmem:[#allocation3 + $0xd4] sm:$0xff] }
 0x6c4   :  { %18536 = vmatmul.mubr.msk.f32.gmra.mrb[110].mxu1 %vm7554_vm5, %v10110_v1  ;;  %v10819_v1 = vld [vmem:[#allocation3 + $0xdc] sm:$0xff] }
 0x6c5   :  { %18538 = vmatprep.mubr.msk.f32.mxu1 %vm7554_vm5, %v10111_v6  ;;  %v10820_v6 = vld [vmem:[#allocation3 + $0xe4] sm:$0xff] }
 0x6c8   :  { %18539 = vmatmul.mubr.msk.f32.gmra.mrb[112].mxu1 %vm7554_vm5, %v10112_v60  ;;  %v10821_v60 = vld [vmem:[#allocation3 + $0xec] sm:$0xff] }
 0x6c9   :  { %18541 = vmatprep.mubr.msk.f32.mxu1 %vm7554_vm5, %v10113_v40  ;;  %v10822_v40 = vld [vmem:[#allocation3 + $0xf4] sm:$0xff] }
 0x6cc   :  { %18542 = vmatmul.mubr.msk.f32.gmra.mrb[114].mxu1 %vm7554_vm5, %v10114_v37  ;;  %v10823_v37 = vld [vmem:[#allocation3 + $0xfc] sm:$0xff] }
 0x6cd   :  { %18544 = vmatprep.mubr.msk.f32.mxu1 %vm7554_vm5, %v10115_v27  ;;  %v10824_v27 = vld [vmem:[#allocation3 + $0x104] sm:$0xff] }
 0x6d0   :  { %18545 = vmatmul.mubr.msk.f32.gmra.mrb[116].mxu1 %vm7554_vm5, %v10116_v33  ;;  %v10825_v33 = vld [vmem:[#allocation3 + $0x10c] sm:$0xff] }
 0x6d1   :  { %18547 = vmatprep.mubr.msk.f32.mxu1 %vm7554_vm5, %v10117_v32  ;;  %v10826_v32 = vld [vmem:[#allocation3 + $0x114] sm:$0xff] }
 0x6d4   :  { %18548 = vmatmul.mubr.msk.f32.gmra.mrb[118].mxu1 %vm7554_vm5, %v10118_v58  ;;  %v10827_v58 = vld [vmem:[#allocation3 + $0x11c] sm:$0xff] }
 0x6d5   :  { %18550 = vmatprep.mubr.msk.f32.mxu1 %vm7554_vm5, %v10119_v12  ;;  %v10828_v12 = vld [vmem:[#allocation3 + $0x124] sm:$0xff] }
 0x6d8   :  { %18551 = vmatmul.mubr.msk.f32.gmra.mrb[120].mxu1 %vm7554_vm5, %v10120_v55  ;;  %v10829_v55 = vld [vmem:[#allocation3 + $0x12c] sm:$0xff] }
 0x6d9   :  { %18553 = vmatprep.mubr.msk.f32.mxu1 %vm7554_vm5, %v10121_v19  ;;  %v10830_v19 = vld [vmem:[#allocation3 + $0x134] sm:$0xff] }
 0x6dc   :  { %18554 = vmatmul.mubr.msk.f32.gmra.mrb[122].mxu1 %vm7554_vm5, %v10122_v31  ;;  %v10831_v31 = vld [vmem:[#allocation3 + $0x13c] sm:$0xff] }
 0x6dd   :  { %18556 = vmatprep.mubr.msk.f32.mxu1 %vm7554_vm5, %v10123_v43  ;;  %v10832_v43 = vld [vmem:[#allocation3 + $0x144] sm:$0xff] }
 0x6e0   :  { %18557 = vmatmul.mubr.msk.f32.gmra.mrb[124].mxu1 %vm7554_vm5, %v10124_v17  ;;  %v10833_v17 = vld [vmem:[#allocation3 + $0x14c] sm:$0xff] }
 0x6e1   :  { %18559 = vmatprep.mubr.msk.f32.mxu1 %vm7554_vm5, %v10125_v3  ;;  %v10834_v3 = vld [vmem:[#allocation3 + $0x154] sm:$0xff] }
 0x6e4   :  { %18560 = vmatmul.mubr.msk.f32.gmra.mrb[126].mxu1 %vm7554_vm5, %v10126_v10  ;;  %v10835_v10 = vld [vmem:[#allocation3 + $0x15c] sm:$0xff] }
 0x6e5   :  { %18562 = vmatprep.mubr.msk.f32.mxu1 %vm7554_vm5, %v10127_v4  ;;  %v10836_v4 = vld [vmem:[#allocation3 + $0x164] sm:$0xff] }
 0x6e8   :  { %18563 = vmatmul.mubr.msk.f32.gmra.mrb[128].mxu1 %vm7554_vm5, %v10128_v2  ;;  %v10837_v2 = vld [vmem:[#allocation3 + $0x16c] sm:$0xff] }
 0x6e9   :  { %18565 = vmatprep.mubr.msk.f32.mxu1 %vm7554_vm5, %v10129_v35  ;;  %v10838_v35 = vld [vmem:[#allocation3 + $0x174] sm:$0xff] }
 0x6ec   :  { %18566 = vmatmul.mubr.msk.f32.gmra.mrb[130].mxu1 %vm7554_vm5, %v10130_v34  ;;  %v10839_v34 = vld [vmem:[#allocation3 + $0x17c] sm:$0xff] }
 0x6ed   :  { %18568 = vmatprep.mubr.msk.f32.mxu1 %vm7554_vm5, %v10131_v5  ;;  %v10840_v5 = vld [vmem:[#allocation3 + $0x184] sm:$0xff] }
 0x6f0   :  { %18569 = vmatmul.mubr.msk.f32.gmra.mrb[132].mxu1 %vm7554_vm5, %v10132_v56  ;;  %v10841_v56 = vld [vmem:[#allocation3 + $0x18c] sm:$0xff] }
 0x6f1   :  { %18571 = vmatprep.mubr.msk.f32.mxu1 %vm7554_vm5, %v10133_v26  ;;  %v10842_v26 = vld [vmem:[#allocation3 + $0x194] sm:$0xff] }
 0x6f4   :  { %18572 = vmatmul.mubr.msk.f32.gmra.mrb[134].mxu1 %vm7554_vm5, %v10134_v15  ;;  %v10843_v15 = vld [vmem:[#allocation3 + $0x19c] sm:$0xff] }
 0x6f5   :  { %18574 = vmatprep.mubr.msk.f32.mxu1 %vm7554_vm5, %v10135_v38  ;;  %v10844_v38 = vld [vmem:[#allocation3 + $0x1a4] sm:$0xff] }
 0x6f8   :  { %18575 = vmatmul.mubr.msk.f32.gmra.mrb[136].mxu1 %vm7554_vm5, %v10136_v36  ;;  %v10845_v36 = vld [vmem:[#allocation3 + $0x1ac] sm:$0xff] }
 0x6f9   :  { %18577 = vmatprep.mubr.msk.f32.mxu1 %vm7554_vm5, %v10137_v39  ;;  %v10846_v39 = vld [vmem:[#allocation3 + $0x1b4] sm:$0xff] }
 0x6fc   :  { %18578 = vmatmul.mubr.msk.f32.gmra.mrb[138].mxu1 %vm7554_vm5, %v10138_v51  ;;  %v10847_v51 = vld [vmem:[#allocation3 + $0x1bc] sm:$0xff] }
 0x6fd   :  { %18580 = vmatprep.mubr.msk.f32.mxu1 %vm7554_vm5, %v10139_v0  ;;  %v10848_v0 = vld [vmem:[#allocation3 + $0x1c4] sm:$0xff] }
 0x700   :  { %18581 = vmatmul.mubr.msk.f32.gmra.mrb[140].mxu1 %vm7554_vm5, %v10140_v28  ;;  %v10849_v28 = vld [vmem:[#allocation3 + $0x1cc] sm:$0xff] }
 0x701   :  { %18583 = vmatprep.mubr.msk.f32.mxu1 %vm7554_vm5, %v10141_v22  ;;  %v10850_v22 = vld [vmem:[#allocation3 + $0x1d4] sm:$0xff] }
 0x704   :  { %18584 = vmatmul.mubr.msk.f32.gmra.mrb[142].mxu1 %vm7554_vm5, %v10142_v57  ;;  %v10851_v57 = vld [vmem:[#allocation3 + $0x1dc] sm:$0xff] }
 0x705   :  { %18594 = vmatprep.mubr.msk.f32.mxu1 %vm7554_vm5, %v10792_v9  ;;  %v10852_v9 = vld [vmem:[#allocation3 + $0x1e4] sm:$0xff] }
 0x708   :  { %18595 = vmatmul.mubr.msk.f32.vlgmr.msra.gmra.mrb[80].mxu1 %vm7554_vm5, %v10793_v49  ;;  %v15795_v49 = vld [vmem:[%s26573_s3 + $0x48] sm:$0xff] }
 0x709   :  { %18597 = vmatprep.mubr.msk.f32.mxu1 %vm7554_vm5, %v10794_v45  ;;  %19053 = vmatpush3.bf16.msra.mxu1 %v19050_v8  ;;  %v10855_v8 = vld [vmem:[#allocation3 + $0x1fc] sm:$0xf]  ;;  %v15796_v45 = vld [vmem:[%s26573_s3 + $0x50] sm:$0xff] }
 0x70c   :  { %18598 = vmatmul.mubr.msk.f32.gmra.mrb[82].mxu1 %vm7554_vm5, %v10795_v44  ;;  %v19054_v44 = vpack.c.bf16 %v15796_v45, %v15795_v49 }
 0x70d   :  { %18600 = vmatprep.mubr.msk.f32.mxu1 %vm7554_vm5, %v10796_v7  ;;  %v15797_v7 = vld [vmem:[%s26573_s3 + $0x58] sm:$0xff] }
 0x70e   :  { %19055 = vmatprep.subr.bf16.mxu1 %v19054_v44 }
 0x70f   :  { %19057 = vmatpush3.bf16.msra.mxu1 %v19054_v44 }
 0x710   :  { %18601 = vmatmul.mubr.msk.f32.gmra.mrb[84].mxu1 %vm7554_vm5, %v10797_v25  ;;  %v15798_v25 = vld [vmem:[%s26573_s3 + $0x60] sm:$0xff] }
 0x711   :  { %18603 = vmatprep.mubr.msk.f32.mxu1 %vm7554_vm5, %v10798_v16  ;;  %v19058_v16 = vpack.c.bf16 %v15798_v25, %v15797_v7 }
 0x713   :  { %19059 = vmatprep.subr.bf16.mxu1 %v19058_v16 }
 0x714   :  { %18604 = vmatmul.mubr.msk.f32.gmra.mrb[86].mxu1 %vm7554_vm5, %v10799_v21  ;;  %v15799_v21 = vld [vmem:[%s26573_s3 + $0x68] sm:$0x3] }
 0x715   :  { %18606 = vmatprep.mubr.msk.f32.mxu1 %vm7554_vm5, %v10800_v14  ;;  %19061 = vmatpush3.bf16.msra.mxu1 %v19058_v16  ;;  %v25354_v14 = vld [vmem:[%s26574_s4 + $0x2] ss:$0 sm:$0xff] }
 0x716   :  { %18702 = vmatprep.subr.msk.mxu1 %vm12458_vm4, %v15799_v21 }
 0x718   :  { %18607 = vmatmul.mubr.msk.f32.gmra.mrb[88].mxu1 %vm7554_vm5, %v10801_v18  ;;  %v25359_v18 = vld [vmem:[%s26574_s4 + $0x3] ss:$0 sm:$0xff] }
 0x719   :  { %18609 = vmatprep.mubr.msk.f32.mxu1 %vm7554_vm5, %v10802_v59  ;;  %18703 = vmatpush3.msk.msra.mxu1 %vm12458_vm4, %v15799_v21 }
 0x71c   :  { %18610 = vmatmul.mubr.msk.f32.gmra.mrb[90].mxu1 %vm7554_vm5, %v10803_v62 }
 0x71d   :  { %18612 = vmatprep.mubr.msk.f32.mxu1 %vm7554_vm5, %v10804_v11 }
 0x720   :  { %18613 = vmatmul.mubr.msk.f32.gmra.mrb[92].mxu1 %vm7554_vm5, %v10805_v47 }
 0x721   :  { %18615 = vmatprep.mubr.msk.f32.mxu1 %vm7554_vm5, %v10806_v23 }
 0x724   :  { %18616 = vmatmul.mubr.msk.f32.gmra.mrb[94].mxu1 %vm7554_vm5, %v10807_v20 }
 0x725   :  { %18618 = vmatprep.mubr.msk.f32.mxu1 %vm7554_vm5, %v10808_v42 }
 0x728   :  { %18619 = vmatmul.mubr.msk.f32.gmra.mrb[96].mxu1 %vm7554_vm5, %v10809_v24 }
 0x729   :  { %18621 = vmatprep.mubr.msk.f32.mxu1 %vm7554_vm5, %v10810_v30 }
 0x72c   :  { %18622 = vmatmul.mubr.msk.f32.gmra.mrb[98].mxu1 %vm7554_vm5, %v10811_v52 }
 0x72d   :  { %18624 = vmatprep.mubr.msk.f32.mxu1 %vm7554_vm5, %v10812_v46 }
 0x730   :  { %18625 = vmatmul.mubr.msk.f32.gmra.mrb[100].mxu1 %vm7554_vm5, %v10813_v61 }
 0x731   :  { %18627 = vmatprep.mubr.msk.f32.mxu1 %vm7554_vm5, %v10814_v29 }
 0x734   :  { %18628 = vmatmul.mubr.msk.f32.gmra.mrb[102].mxu1 %vm7554_vm5, %v10815_v54 }
 0x735   :  { %18630 = vmatprep.mubr.msk.f32.mxu1 %vm7554_vm5, %v10816_v50  ;;  %v12315_v50 = vld [vmem:[%s26573_s3] sm:$0xff] }
 0x738   :  { %18631 = vmatmul.mubr.msk.f32.gmra.mrb[104].mxu1 %vm7554_vm5, %v10817_v48  ;;  %v12316_v48 = vld [vmem:[%s26573_s3 + $0x8] sm:$0xff] }
 0x739   :  { %18633 = vmatprep.mubr.msk.f32.mxu1 %vm7554_vm5, %v10818_v53 }
 0x73c   :  { %18634 = vmatmul.mubr.msk.f32.gmra.mrb[106].mxu1 %vm7554_vm5, %v10819_v1 }
 0x73d   :  { %18636 = vmatprep.mubr.msk.f32.mxu1 %vm7554_vm5, %v10820_v6 }
 0x740   :  { %18637 = vmatmul.mubr.msk.f32.gmra.mrb[108].mxu1 %vm7554_vm5, %v10821_v60  ;;  %v25385_v60 = vpack.c.bf16 %v12316_v48, %v12315_v50 }
 0x741   :  { %18639 = vmatprep.mubr.msk.f32.mxu1 %vm7554_vm5, %v10822_v40 }
 0x742   :  { %19063 = vmatprep.subr.bf16.mxu1 %v25385_v60 }
 0x744   :  { %18640 = vmatmul.mubr.msk.f32.gmra.mrb[110].mxu1 %vm7554_vm5, %v10823_v37 }
 0x745   :  { %18642 = vmatprep.mubr.msk.f32.mxu1 %vm7554_vm5, %v10824_v27 }
 0x748   :  { %18643 = vmatmul.mubr.msk.f32.gmra.mrb[112].mxu1 %vm7554_vm5, %v10825_v33 }
 0x749   :  { %18645 = vmatprep.mubr.msk.f32.mxu1 %vm7554_vm5, %v10826_v32 }
 0x74c   :  { %18646 = vmatmul.mubr.msk.f32.gmra.mrb[114].mxu1 %vm7554_vm5, %v10827_v58 }
 0x74d   :  { %18648 = vmatprep.mubr.msk.f32.mxu1 %vm7554_vm5, %v10828_v12 }
 0x750   :  { %18649 = vmatmul.mubr.msk.f32.gmra.mrb[116].mxu1 %vm7554_vm5, %v10829_v55 }
 0x751   :  { %18651 = vmatprep.mubr.msk.f32.mxu1 %vm7554_vm5, %v10830_v19 }
 0x754   :  { %18652 = vmatmul.mubr.msk.f32.gmra.mrb[118].mxu1 %vm7554_vm5, %v10831_v31 }
 0x755   :  { %18654 = vmatprep.mubr.msk.f32.mxu1 %vm7554_vm5, %v10832_v43 }
 0x758   :  { %18655 = vmatmul.mubr.msk.f32.gmra.mrb[120].mxu1 %vm7554_vm5, %v10833_v17 }
 0x759   :  { %18657 = vmatprep.mubr.msk.f32.mxu1 %vm7554_vm5, %v10834_v3 }
 0x75c   :  { %18658 = vmatmul.mubr.msk.f32.gmra.mrb[122].mxu1 %vm7554_vm5, %v10835_v10 }
 0x75d   :  { %18660 = vmatprep.mubr.msk.f32.mxu1 %vm7554_vm5, %v10836_v4 }
 0x760   :  { %18661 = vmatmul.mubr.msk.f32.gmra.mrb[124].mxu1 %vm7554_vm5, %v10837_v2 }
 0x761   :  { %18663 = vmatprep.mubr.msk.f32.mxu1 %vm7554_vm5, %v10838_v35 }
 0x764   :  { %18664 = vmatmul.mubr.msk.f32.gmra.mrb[126].mxu1 %vm7554_vm5, %v10839_v34 }
 0x765   :  { %18666 = vmatprep.mubr.msk.f32.mxu1 %vm7554_vm5, %v10840_v5 }
 0x768   :  { %18667 = vmatmul.mubr.msk.f32.gmra.mrb[128].mxu1 %vm7554_vm5, %v10841_v56 }
 0x769   :  { %18669 = vmatprep.mubr.msk.f32.mxu1 %vm7554_vm5, %v10842_v26 }
 0x76c   :  { %18670 = vmatmul.mubr.msk.f32.gmra.mrb[130].mxu1 %vm7554_vm5, %v10843_v15 }
 0x76d   :  { %18672 = vmatprep.mubr.msk.f32.mxu1 %vm7554_vm5, %v10844_v38 }
 0x770   :  { %18673 = vmatmul.mubr.msk.f32.gmra.mrb[132].mxu1 %vm7554_vm5, %v10845_v36 }
 0x771   :  { %18675 = vmatprep.mubr.msk.f32.mxu1 %vm7554_vm5, %v10846_v39 }
 0x774   :  { %18676 = vmatmul.mubr.msk.f32.gmra.mrb[134].mxu1 %vm7554_vm5, %v10847_v51 }
 0x775   :  { %18678 = vmatprep.mubr.msk.f32.mxu1 %vm7554_vm5, %v10848_v0 }
 0x778   :  { %18679 = vmatmul.mubr.msk.f32.gmra.mrb[136].mxu1 %vm7554_vm5, %v10849_v28 }
 0x779   :  { %18681 = vmatprep.mubr.msk.f32.mxu1 %vm7554_vm5, %v10850_v22 }
 0x77c   :  { %18682 = vmatmul.mubr.msk.f32.gmra.mrb[138].mxu1 %vm7554_vm5, %v10851_v57 }
 0x77d   :  { %18684 = vmatprep.mubr.msk.f32.mxu1 %vm7554_vm5, %v10852_v9 }
 0x780   :  { %18685 = vmatmul.mubr.msk.f32.gmra.mrb[140].mxu1 %vm7554_vm5, %v10853_v13 }
 0x781   :  { %18687 = vmatprep.mubr.msk.f32.mxu1 %vm7554_vm5, %v10854_v41 }
 0x784   :  { %18688 = vmatmul.mubr.msk.f32.gmra.mrb[142].mxu1 %vm7554_vm5, %v10855_v8 }
 0x7db   :  { %v18596_v59 = vpop.f32.mrb[80].mxu1 }
 0x7dc   :  { %v11510_v62 = vmul.f32 %v18596_v59, %v25354_v14  ;;  %v11122_v11 = vpop.f32.mrb[81].mxu1 }
 0x7dd   :  { %v11509_v47 = vmul.f32 %v25354_v14, %v11122_v11 }
 0x7de   :  { %v25364_v23 = vadd.f32 %v25359_v18, %v11510_v62 }
 0x7df   :  { %v25367_v20 = vadd.f32 %v25359_v18, %v11509_v47  ;;  %v18599_v42 = vpop.f32.mrb[82].mxu1 }
 0x7e0   :  { %v11706_v24 = vmin.f32 %v25364_v23, 0.0  ;;  %v11512_v30 = vmul.f32 %v18599_v42, %v25354_v14  ;;  %v11132_v52 = vpop.f32.mrb[83].mxu1  ;;  %vm11642_vm5 = vcmp.gt.f32.partialorder %v25364_v23, 0.0 }
 0x7e1   :  { %v11705_v46 = vmin.f32 %v25367_v20, 0.0  ;;  %v11511_v61 = vmul.f32 %v25354_v14, %v11132_v52  ;;  %vm11641_vm10 = vcmp.gt.f32.partialorder %v25367_v20, 0.0 }
 0x7e2   :  { %v11771_v29 = vmul.f32 1.442695, %v11706_v24  ;;  %v25374_v54 = vadd.f32 %v25359_v18, %v11512_v30 }
 0x7e3   :  { %v11769_v53 = vmul.f32 1.442695, %v11705_v46  ;;  %v25383_v1 = vadd.f32 %v25359_v18, %v11511_v61  ;;  %v18602_v6 = vpop.f32.mrb[84].mxu1 }
 0x7e4   :  { %20269 = vpow2.f32 %v11771_v29  ;;  %v11708_v40 = vmin.f32 %v25374_v54, 0.0  ;;  %v11514_v37 = vmul.f32 %v18602_v6, %v25354_v14  ;;  %v11142_v27 = vpop.f32.mrb[85].mxu1  ;;  %vm11644_vm11 = vcmp.gt.f32.partialorder %v25374_v54, 0.0 }
 0x7e5   :  { %20271 = vpow2.f32 %v11769_v53  ;;  %v11707_v33 = vmin.f32 %v25383_v1, 0.0  ;;  %v11513_v32 = vmul.f32 %v25354_v14, %v11142_v27  ;;  %vm11643_vm12 = vcmp.gt.f32.partialorder %v25383_v1, 0.0 }
 0x7e6   :  { %v11775_v58 = vmul.f32 1.442695, %v11708_v40  ;;  %v25393_v12 = vadd.f32 %v25359_v18, %v11514_v37 }
 0x7e7   :  { %v11773_v55 = vmul.f32 1.442695, %v11707_v33  ;;  %v25396_v19 = vadd.f32 %v25359_v18, %v11513_v32  ;;  %v18605_v31 = vpop.f32.mrb[86].mxu1 }
 0x7e8   :  { %20273 = vpow2.f32 %v11775_v58  ;;  %v11710_v43 = vmin.f32 %v25393_v12, 0.0  ;;  %v11516_v17 = vmul.f32 %v18605_v31, %v25354_v14  ;;  %v11152_v3 = vpop.f32.mrb[87].mxu1  ;;  %vm11646_vm13 = vcmp.gt.f32.partialorder %v25393_v12, 0.0 }
 0x7e9   :  { %20275 = vpow2.f32 %v11773_v55  ;;  %v11709_v10 = vmin.f32 %v25396_v19, 0.0  ;;  %v11515_v4 = vmul.f32 %v25354_v14, %v11152_v3  ;;  %vm11645_vm15 = vcmp.gt.f32.partialorder %v25396_v19, 0.0 }
 0x7ea   :  { %v11779_v2 = vmul.f32 1.442695, %v11710_v43  ;;  %v25403_v35 = vadd.f32 %v25359_v18, %v11516_v17 }
 0x7eb   :  { %v11777_v34 = vmul.f32 1.442695, %v11709_v10  ;;  %v25406_v5 = vadd.f32 %v25359_v18, %v11515_v4  ;;  %v18608_v56 = vpop.f32.mrb[88].mxu1  ;;  %v12318_v4 = vld [vmem:[%s26573_s3 + $0x18] sm:$0xff] }
 0x7ec   :  { %20277 = vpow2.f32 %v11779_v2  ;;  %v11712_v26 = vmin.f32 %v25403_v35, 0.0  ;;  %v11518_v15 = vmul.f32 %v18608_v56, %v25354_v14  ;;  %v11162_v38 = vpop.f32.mrb[89].mxu1  ;;  %vm11648_vm0 = vcmp.gt.f32.partialorder %v25403_v35, 0.0 }
 0x7ed   :  { %20279 = vpow2.f32 %v11777_v34  ;;  %v11711_v36 = vmin.f32 %v25406_v5, 0.0  ;;  %v11517_v39 = vmul.f32 %v25354_v14, %v11162_v38  ;;  %vm11647_vm2 = vcmp.gt.f32.partialorder %v25406_v5, 0.0 }
 0x7ee   :  { %v20270_v51 = vpop.eup %20269  ;;  %v11783_v0 = vmul.f32 1.442695, %v11712_v26  ;;  %v25414_v28 = vadd.f32 %v25359_v18, %v11518_v15 }
 0x7ef   :  { %v20272_v22 = vpop.eup %20271  ;;  %v15730_v57 = vadd.f32 -1.0, %v20270_v51  ;;  %v11781_v9 = vmul.f32 1.442695, %v11711_v36  ;;  %v25418_v13 = vadd.f32 %v25359_v18, %v11517_v39  ;;  %v18611_v41 = vpop.f32.mrb[90].mxu1 }
 0x7f0   :  { %v15729_v8 = vadd.f32 -1.0, %v20272_v22  ;;  %20281 = vpow2.f32 %v11783_v0  ;;  %v11714_v49 = vmin.f32 %v25414_v28, 0.0  ;;  %v11172_v45 = vpop.f32.mrb[91].mxu1  ;;  %v11520_v59 = vmul.f32 %v18611_v41, %v25354_v14 }
 0x7f1   :  { %v11962_v44 = vsel %vm11642_vm5, %v25364_v23, %v15730_v57  ;;  %20283 = vpow2.f32 %v11781_v9  ;;  %v11713_v7 = vmin.f32 %v25418_v13, 0.0  ;;  %v11519_v62 = vmul.f32 %v25354_v14, %v11172_v45 }
 0x7f2   :  { %v20274_v25 = vpop.eup %20273  ;;  %12027 = vst.msk [vmem:[#allocation4 + $0x8] sm:$0xff] %vm12025_vm9, %v11962_v44  ;;  %v11961_v16 = vsel %vm11641_vm10, %v25367_v20, %v15729_v8  ;;  %v11787_v21 = vmul.f32 1.442695, %v11714_v49  ;;  %v25432_v30 = vadd.f32 %v25359_v18, %v11520_v59  ;;  %vm11650_vm3 = vcmp.gt.f32.partialorder %v25414_v28, 0.0  ;;  %v12319_v8 = vld [vmem:[%s26573_s3 + $0x20] sm:$0xff]  ;;  %v12320_v49 = vld [vmem:[%s26573_s3 + $0x28] sm:$0xff] }
 0x7f3   :  { %v20276_v11 = vpop.eup %20275  ;;  %12026 = vst.msk [vmem:[#allocation4] sm:$0xff] %vm12025_vm9, %v11961_v16  ;;  %v15732_v47 = vadd.f32 -1.0, %v20274_v25  ;;  %v11785_v23 = vmul.f32 1.442695, %v11713_v7  ;;  %v18614_v42 = vpop.f32.mrb[92].mxu1  ;;  %v25435_v20 = vadd.f32 %v25359_v18, %v11519_v62  ;;  %vm11649_vm6 = vcmp.gt.f32.partialorder %v25418_v13, 0.0 }
 0x7f4   :  { %v15731_v24 = vadd.f32 -1.0, %v20276_v11  ;;  %20285 = vpow2.f32 %v11787_v21  ;;  %v11182_v52 = vpop.f32.mrb[93].mxu1  ;;  %v11522_v61 = vmul.f32 %v18614_v42, %v25354_v14  ;;  %v11716_v63 = vmin.f32 %v25432_v30, 0.0 }
 0x7f5   :  { %v11964_v46 = vsel %vm11644_vm11, %v25374_v54, %v15732_v47  ;;  %20287 = vpow2.f32 %v11785_v23  ;;  %v11521_v29 = vmul.f32 %v25354_v14, %v11182_v52  ;;  %v11715_v6 = vmin.f32 %v25435_v20, 0.0 }
 0x7f6   :  { %v20278_v50 = vpop.eup %20277  ;;  %12029 = vst.msk [vmem:[#allocation4 + $0x18] sm:$0xff] %vm12025_vm9, %v11964_v46  ;;  %v11963_v48 = vsel %vm11643_vm12, %v25383_v1, %v15731_v24  ;;  %v25454_v40 = vadd.f32 %v25359_v18, %v11522_v61  ;;  %v11791_v33 = vmul.f32 1.442695, %v11716_v63  ;;  %vm11652_vm7 = vcmp.gt.f32.partialorder %v25432_v30, 0.0 }
 0x7f7   :  { %v20280_v53 = vpop.eup %20279  ;;  %12028 = vst.msk [vmem:[#allocation4 + $0x10] sm:$0xff] %vm12025_vm9, %v11963_v48  ;;  %v15734_v54 = vadd.f32 -1.0, %v20278_v50  ;;  %v25457_v37 = vadd.f32 %v25359_v18, %v11521_v29  ;;  %v18617_v27 = vpop.f32.mrb[94].mxu1  ;;  %v11789_v31 = vmul.f32 1.442695, %v11715_v6  ;;  %vm11651_vm1 = vcmp.gt.f32.partialorder %v25435_v20, 0.0 }
 0x7f8   :  { %v15733_v1 = vadd.f32 -1.0, %v20280_v53  ;;  %v11524_v32 = vmul.f32 %v18617_v27, %v25354_v14  ;;  %v11192_v58 = vpop.f32.mrb[95].mxu1  ;;  %v11718_v43 = vmin.f32 %v25454_v40, 0.0  ;;  %20289 = vpow2.f32 %v11791_v33 }
 0x7f9   :  { %v11966_v55 = vsel %vm11646_vm13, %v25393_v12, %v15734_v54  ;;  %v11717_v10 = vmin.f32 %v25457_v37, 0.0  ;;  %v12317_v12 = vld [vmem:[%s26573_s3 + $0x10] sm:$0xff]  ;;  %20291 = vpow2.f32 %v11789_v31  ;;  %v11523_v39 = vmul.f32 %v25354_v14, %v11192_v58 }
 0x7fa   :  { %v20282_v17 = vpop.eup %20281  ;;  %12031 = vst.msk [vmem:[#allocation4 + $0x28] sm:$0xff] %vm12025_vm9, %v11966_v55  ;;  %v11965_v3 = vsel %vm11645_vm15, %v25396_v19, %v15733_v1  ;;  %v11795_v56 = vmul.f32 1.442695, %v11718_v43  ;;  %v25480_v19 = vadd.f32 %v25359_v18, %v11524_v32  ;;  %v12092_v15 = vld [vmem:[#allocation4] ss:$2 sm:$0xff]  ;;  %v25488_v41 = vpack.c.bf16 %v12318_v4, %v12317_v12 }
 0x7fb   :  { %v20284_v2 = vpop.eup %20283  ;;  %12030 = vst.msk [vmem:[#allocation4 + $0x20] sm:$0xff] %vm12025_vm9, %v11965_v3  ;;  %v15736_v34 = vadd.f32 -1.0, %v20282_v17  ;;  %v18620_v26 = vpop.f32.mrb[96].mxu1  ;;  %v11793_v36 = vmul.f32 1.442695, %v11717_v10  ;;  %v25502_v44 = vadd.f32 %v25359_v18, %v11523_v39  ;;  %v25511_v42 = vpack.c.bf16 %v12320_v49, %v12319_v8 }
 0x7fc   :  { %v15735_v38 = vadd.f32 -1.0, %v20284_v2  ;;  %v11526_v51 = vmul.f32 %v18620_v26, %v25354_v14  ;;  %v11202_v0 = vpop.f32.mrb[97].mxu1  ;;  %v12156_v22 = vld [vmem:[#allocation4 + $0x1] ss:$2 sm:$0xff]  ;;  %20293 = vpow2.f32 %v11795_v56  ;;  %v11720_v9 = vmin.f32 %v25480_v19, 0.0 }
 0x7fd   :  { %v11968_v57 = vsel %vm11648_vm0, %v25403_v35, %v15736_v34  ;;  %20295 = vpow2.f32 %v11793_v36  ;;  %v11525_v59 = vmul.f32 %v25354_v14, %v11202_v0  ;;  %v12219_v11 = vmax.f32 %v12092_v15, %v12156_v22 }
 0x7fe   :  { %v20286_v45 = vpop.eup %20285  ;;  %12033 = vst.msk [vmem:[#allocation4 + $0x38] sm:$0xff] %vm12025_vm9, %v11968_v57  ;;  %v11967_v35 = vsel %vm11647_vm2, %v25406_v5, %v15735_v38  ;;  %v25505_v7 = vadd.f32 %v25359_v18, %v11526_v51  ;;  %v11799_v21 = vmul.f32 1.442695, %v11720_v9  ;;  %v11719_v5 = vmin.f32 %v25502_v44, 0.0  ;;  %v12094_v26 = vld [vmem:[#allocation4 + $0x10] ss:$2 sm:$0xff] }
 0x7ff   :  { %v20288_v25 = vpop.eup %20287  ;;  %12032 = vst.msk [vmem:[#allocation4 + $0x30] sm:$0xff] %vm12025_vm9, %v11967_v35  ;;  %v15738_v16 = vadd.f32 -1.0, %v20286_v45  ;;  %v18623_v62 = vpop.f32.mrb[98].mxu1  ;;  %v25518_v46 = vadd.f32 %v25359_v18, %v11525_v59  ;;  %12251 = vst.msk [vmem:[#allocation5] sm:$0xff] %vm12025_vm9, %v12219_v11  ;;  %vm11654_vm8 = vcmp.gt.f32.partialorder %v25454_v40, 0.0  ;;  %vm11653_vm5 = vcmp.gt.f32.partialorder %v25457_v37, 0.0 }
 0x800   :  { %v15737_v47 = vadd.f32 -1.0, %v20288_v25  ;;  %v11212_v23 = vpop.f32.mrb[99].mxu1  ;;  %20297 = vpow2.f32 %v11799_v21  ;;  %v11722_v52 = vmin.f32 %v25505_v7, 0.0  ;;  %v11797_v48 = vmul.f32 1.442695, %v11719_v5 }
 0x801   :  { %v11970_v24 = vsel %vm11650_vm3, %v25414_v28, %v15738_v16  ;;  %v11528_v63 = vmul.f32 %v18623_v62, %v25354_v14  ;;  %v11527_v28 = vmul.f32 %v25354_v14, %v11212_v23  ;;  %v11721_v6 = vmin.f32 %v25518_v46, 0.0  ;;  %v12158_v0 = vld [vmem:[#allocation4 + $0x11] ss:$2 sm:$0xff] }
 0x802   :  { %v12096_v61 = vld [vmem:[#allocation4 + $0x20] ss:$2 sm:$0xff]  ;;  %v12160_v29 = vld [vmem:[#allocation4 + $0x21] ss:$2 sm:$0xff]  ;;  %12035 = vst.msk [vmem:[#allocation4 + $0x48] sm:$0xff] %vm12025_vm9, %v11970_v24  ;;  %v11969_v50 = vsel %vm11649_vm6, %v25418_v13, %v15737_v47  ;;  %v20290_v1 = vpop.eup %20289  ;;  %20299 = vpow2.f32 %v11797_v48  ;;  %vm11656_vm10 = vcmp.gt.f32.partialorder %v25480_v19, 0.0  ;;  %v12220_v47 = vmax.f32 %v12094_v26, %v12158_v0 }
 0x803   :  { %v12221_v53 = vmax.f32 %v12096_v61, %v12160_v29  ;;  %12034 = vst.msk [vmem:[#allocation4 + $0x40] sm:$0xff] %vm12025_vm9, %v11969_v50  ;;  %v11803_v54 = vmul.f32 1.442695, %v11722_v52  ;;  %v18626_v27 = vpop.f32.mrb[100].mxu1  ;;  %v25531_v33 = vadd.f32 %v25359_v18, %v11528_v63  ;;  %v25534_v13 = vadd.f32 %v25359_v18, %v11527_v28  ;;  %v20292_v55 = vpop.eup %20291 }
 0x804   :  { %v11530_v32 = vmul.f32 %v18626_v27, %v25354_v14  ;;  %v11222_v58 = vpop.f32.mrb[101].mxu1  ;;  %v15740_v31 = vadd.f32 -1.0, %v20290_v1  ;;  %v11801_v43 = vmul.f32 1.442695, %v11721_v6  ;;  %v15739_v3 = vadd.f32 -1.0, %v20292_v55  ;;  %12252 = vst.msk [vmem:[#allocation5 + $0x8] sm:$0xff] %vm12025_vm9, %v12220_v47 }
 0x805   :  { %12253 = vst.msk [vmem:[#allocation5 + $0x10] sm:$0xff] %vm12025_vm9, %v12221_v53  ;;  %20301 = vpow2.f32 %v11803_v54  ;;  %v11529_v17 = vmul.f32 %v25354_v14, %v11222_v58  ;;  %v11724_v10 = vmin.f32 %v25531_v33, 0.0  ;;  %v11723_v2 = vmin.f32 %v25534_v13, 0.0 }
 0x806   :  { %v20294_v12 = vpop.eup %20293  ;;  %v11972_v4 = vsel %vm11652_vm7, %v25432_v30, %v15740_v31  ;;  %20303 = vpow2.f32 %v11801_v43  ;;  %v25547_v34 = vadd.f32 %v25359_v18, %v11530_v32  ;;  %v11971_v38 = vsel %vm11651_vm1, %v25435_v20, %v15739_v3  ;;  %v12098_v49 = vld [vmem:[#allocation4 + $0x30] ss:$2 sm:$0xff]  ;;  %v12162_v59 = vld [vmem:[#allocation4 + $0x31] ss:$2 sm:$0xff] }
 0x807   :  { %v18629_v56 = vpop.f32.mrb[102].mxu1  ;;  %v20296_v15 = vpop.eup %20295  ;;  %12037 = vst.msk [vmem:[#allocation4 + $0x58] sm:$0xff] %vm12025_vm9, %v11972_v4  ;;  %v15742_v36 = vadd.f32 -1.0, %v20294_v12  ;;  %v11807_v39 = vmul.f32 1.442695, %v11724_v10  ;;  %v25554_v51 = vadd.f32 %v25359_v18, %v11529_v17  ;;  %12036 = vst.msk [vmem:[#allocation4 + $0x50] sm:$0xff] %vm12025_vm9, %v11971_v38  ;;  %v12222_v50 = vmax.f32 %v12098_v49, %v12162_v59 }
 0x808   :  { %v11232_v30 = vpop.f32.mrb[103].mxu1  ;;  %v15741_v22 = vadd.f32 -1.0, %v20296_v15  ;;  %vm11655_vm11 = vcmp.gt.f32.partialorder %v25502_v44, 0.0  ;;  %v11805_v57 = vmul.f32 1.442695, %v11723_v2  ;;  %v11726_v9 = vmin.f32 %v25547_v34, 0.0 }
 0x809   :  { %v11974_v8 = vsel %vm11654_vm8, %v25454_v40, %v15742_v36  ;;  %vm11658_vm12 = vcmp.gt.f32.partialorder %v25505_v7, 0.0  ;;  %20305 = vpow2.f32 %v11807_v39  ;;  %v11725_v20 = vmin.f32 %v25554_v51, 0.0  ;;  %12254 = vst.msk [vmem:[#allocation5 + $0x18] sm:$0xff] %vm12025_vm9, %v12222_v50 }
 0x80a   :  { %v20298_v45 = vpop.eup %20297  ;;  %12039 = vst.msk [vmem:[#allocation4 + $0x68] sm:$0xff] %vm12025_vm9, %v11974_v8  ;;  %v11973_v35 = vsel %vm11653_vm5, %v25457_v37, %v15741_v22  ;;  %20307 = vpow2.f32 %v11805_v57  ;;  %v11811_v25 = vmul.f32 1.442695, %v11726_v9  ;;  %v11532_v16 = vmul.f32 %v18629_v56, %v25354_v14 }
 0x80b   :  { %v18632_v21 = vpop.f32.mrb[104].mxu1  ;;  %12038 = vst.msk [vmem:[#allocation4 + $0x60] sm:$0xff] %vm12025_vm9, %v11973_v35  ;;  %v15744_v40 = vadd.f32 -1.0, %v20298_v45  ;;  %v11809_v62 = vmul.f32 1.442695, %v11725_v20  ;;  %v11531_v11 = vmul.f32 %v25354_v14, %v11232_v30  ;;  %vm11657_vm13 = vcmp.gt.f32.partialorder %v25518_v46, 0.0 }
 0x80c   :  { %v11242_v5 = vpop.f32.mrb[105].mxu1  ;;  %20309 = vpow2.f32 %v11811_v25  ;;  %v25572_v23 = vadd.f32 %v25359_v18, %v11532_v16  ;;  %v11534_v37 = vmul.f32 %v18632_v21, %v25354_v14  ;;  %v20300_v52 = vpop.eup %20299  ;;  %vm11660_vm15 = vcmp.gt.f32.partialorder %v25531_v33, 0.0  ;;  %v12322_v39 = vld [vmem:[#allocation5 + $0x1] sm:$0xff]  ;;  %v12323_v0 = vld [vmem:[#allocation5 + $0x9] sm:$0xff] }
 0x80d   :  { %v11533_v24 = vmul.f32 %v25354_v14, %v11242_v5  ;;  %v11976_v61 = vsel %vm11656_vm10, %v25480_v19, %v15744_v40  ;;  %20311 = vpow2.f32 %v11809_v62  ;;  %v25580_v29 = vadd.f32 %v25359_v18, %v11531_v11  ;;  %18704 = vmatprep.mubr.msk.f32.mxu1 %vm12025_vm9, %v12322_v39  ;;  %v12100_v20 = vld [vmem:[#allocation4 + $0x40] ss:$2 sm:$0xff]  ;;  %v12164_v16 = vld [vmem:[#allocation4 + $0x41] ss:$2 sm:$0xff] }
 0x80e   :  { %12041 = vst.msk [vmem:[#allocation4 + $0x78] sm:$0xff] %vm12025_vm9, %v11976_v61  ;;  %v15743_v63 = vadd.f32 -1.0, %v20300_v52  ;;  %v11728_v28 = vmin.f32 %v25572_v23, 0.0  ;;  %v25587_v53 = vadd.f32 %v25359_v18, %v11534_v37  ;;  %vm11659_vm0 = vcmp.gt.f32.partialorder %v25534_v13, 0.0  ;;  %18705 = vmatmul.mubr.msk.f32.vlgmr.msra.gmra.mrb[144].mxu1 %vm12025_vm9, %v12323_v0  ;;  %v12166_v50 = vld [vmem:[#allocation4 + $0x51] ss:$2 sm:$0xff] }
 0x80f   :  { %v20302_v48 = vpop.eup %20301  ;;  %v18635_v54 = vpop.f32.mrb[106].mxu1  ;;  %v11727_v6 = vmin.f32 %v25580_v29, 0.0  ;;  %v25592_v27 = vadd.f32 %v25359_v18, %v11533_v24  ;;  %vm11662_vm2 = vcmp.gt.f32.partialorder %v25547_v34, 0.0  ;;  %vm11661_vm3 = vcmp.gt.f32.partialorder %v25554_v51, 0.0  ;;  %19065 = vmatpush3.bf16.msra.mxu1 %v25385_v60  ;;  %v12102_v60 = vld [vmem:[#allocation4 + $0x50] ss:$2 sm:$0xff] }
 0x810   :  { %v15746_v19 = vadd.f32 -1.0, %v20302_v48  ;;  %v11252_v1 = vpop.f32.mrb[107].mxu1  ;;  %v20304_v32 = vpop.eup %20303  ;;  %v11975_v58 = vsel %vm11655_vm11, %v25502_v44, %v15743_v63  ;;  %v11815_v55 = vmul.f32 1.442695, %v11728_v28  ;;  %v11730_v31 = vmin.f32 %v25587_v53, 0.0  ;;  %v12324_v25 = vld [vmem:[#allocation5 + $0x11] sm:$0xff]  ;;  %19067 = vmatprep.subr.bf16.mxu1 %v25488_v41 }
 0x811   :  { %12040 = vst.msk [vmem:[#allocation4 + $0x70] sm:$0xff] %vm12025_vm9, %v11975_v58  ;;  %v15745_v17 = vadd.f32 -1.0, %v20304_v32  ;;  %v11813_v3 = vmul.f32 1.442695, %v11727_v6  ;;  %v11729_v44 = vmin.f32 %v25592_v27, 0.0  ;;  %v11536_v12 = vmul.f32 %v18635_v54, %v25354_v14  ;;  %18707 = vmatprep.mubr.msk.f32.mxu1 %vm12025_vm9, %v12324_v25 }
 0x812   :  { %v11978_v43 = vsel %vm11658_vm12, %v25505_v7, %v15746_v19  ;;  %20313 = vpow2.f32 %v11815_v55  ;;  %v11819_v10 = vmul.f32 1.442695, %v11730_v31  ;;  %v11535_v7 = vmul.f32 %v25354_v14, %v11252_v1 }
 0x813   :  { %12043 = vst.msk [vmem:[#allocation4 + $0x88] sm:$0xff] %vm12025_vm9, %v11978_v43  ;;  %v18638_v4 = vpop.f32.mrb[108].mxu1  ;;  %v20306_v2 = vpop.eup %20305  ;;  %v11977_v56 = vsel %vm11657_vm13, %v25518_v46, %v15745_v17  ;;  %20315 = vpow2.f32 %v11813_v3  ;;  %v11817_v30 = vmul.f32 1.442695, %v11729_v44  ;;  %v25615_v22 = vadd.f32 %v25359_v18, %v11536_v12  ;;  %19069 = vmatpush3.bf16.msra.mxu1 %v25488_v41  ;;  %v12321_v41 = vld [vmem:[%s26573_s3 + $0x30] sm:$0x3] }
 0x814   :  { %v11538_v26 = vmul.f32 %v18638_v4, %v25354_v14  ;;  %v11262_v15 = vpop.f32.mrb[109].mxu1  ;;  %v20308_v38 = vpop.eup %20307  ;;  %12042 = vst.msk [vmem:[#allocation4 + $0x80] sm:$0xff] %vm12025_vm9, %v11977_v56  ;;  %v15748_v36 = vadd.f32 -1.0, %v20306_v2  ;;  %20317 = vpow2.f32 %v11819_v10  ;;  %v25619_v46 = vadd.f32 %v25359_v18, %v11535_v7  ;;  %19071 = vmatprep.subr.bf16.mxu1 %v25511_v42  ;;  %v12104_v2 = vld [vmem:[#allocation4 + $0x60] ss:$2 sm:$0xff] }
 0x815   :  { %v15747_v57 = vadd.f32 -1.0, %v20308_v38  ;;  %v11537_v8 = vmul.f32 %v25354_v14, %v11262_v15  ;;  %20319 = vpow2.f32 %v11817_v30  ;;  %v11732_v35 = vmin.f32 %v25615_v22, 0.0  ;;  %v12168_v15 = vld [vmem:[#allocation4 + $0x61] ss:$2 sm:$0xff] }
 0x816   :  { %v25622_v9 = vadd.f32 %v25359_v18, %v11538_v26  ;;  %v20310_v49 = vpop.eup %20309  ;;  %v11980_v45 = vsel %vm11660_vm15, %v25531_v33, %v15748_v36  ;;  %vm11664_vm6 = vcmp.gt.f32.partialorder %v25572_v23, 0.0  ;;  %v11731_v33 = vmin.f32 %v25619_v46, 0.0 }
 0x817   :  { %v18641_v21 = vpop.f32.mrb[110].mxu1  ;;  %v20312_v59 = vpop.eup %20311  ;;  %12045 = vst.msk [vmem:[#allocation4 + $0x98] sm:$0xff] %vm12025_vm9, %v11980_v45  ;;  %v11979_v40 = vsel %vm11659_vm0, %v25534_v13, %v15747_v57  ;;  %v15750_v62 = vadd.f32 -1.0, %v20310_v49  ;;  %vm11663_vm7 = vcmp.gt.f32.partialorder %v25580_v29, 0.0  ;;  %v11823_v5 = vmul.f32 1.442695, %v11732_v35  ;;  %19073 = vmatpush3.bf16.msra.mxu1 %v25511_v42 }
 0x818   :  { %v11272_v11 = vpop.f32.mrb[111].mxu1  ;;  %12044 = vst.msk [vmem:[#allocation4 + $0x90] sm:$0xff] %vm12025_vm9, %v11979_v40  ;;  %v15749_v47 = vadd.f32 -1.0, %v20312_v59  ;;  %v11734_v37 = vmin.f32 %v25622_v9, 0.0  ;;  %v11821_v24 = vmul.f32 1.442695, %v11731_v33  ;;  %v25647_v52 = vadd.f32 %v25359_v18, %v11537_v8  ;;  %18764 = vmatprep.subr.msk.mxu1 %vm12458_vm4, %v12321_v41 }
 0x819   :  { %v11982_v13 = vsel %vm11662_vm2, %v25547_v34, %v15750_v62  ;;  %v12223_v61 = vmax.f32 %v12100_v20, %v12164_v16  ;;  %20321 = vpow2.f32 %v11823_v5  ;;  %v11540_v28 = vmul.f32 %v18641_v21, %v25354_v14  ;;  %v12170_v20 = vld [vmem:[#allocation4 + $0x71] ss:$2 sm:$0xff] }
 0x81a   :  { %12047 = vst.msk [vmem:[#allocation4 + $0xa8] sm:$0xff] %vm12025_vm9, %v11982_v13  ;;  %v11981_v48 = vsel %vm11661_vm3, %v25554_v51, %v15749_v47  ;;  %v11827_v63 = vmul.f32 1.442695, %v11734_v37  ;;  %vm11666_vm1 = vcmp.gt.f32.partialorder %v25587_v53, 0.0  ;;  %20323 = vpow2.f32 %v11821_v24 }
 0x81b   :  { %v18644_v54 = vpop.f32.mrb[112].mxu1  ;;  %12046 = vst.msk [vmem:[#allocation4 + $0xa0] sm:$0xff] %vm12025_vm9, %v11981_v48  ;;  %v11733_v34 = vmin.f32 %v25647_v52, 0.0  ;;  %12255 = vst.msk [vmem:[#allocation5 + $0x20] sm:$0xff] %vm12025_vm9, %v12223_v61  ;;  %v11539_v19 = vmul.f32 %v25354_v14, %v11272_v11  ;;  %v25661_v1 = vadd.f32 %v25359_v18, %v11540_v28  ;;  %v12224_v32 = vmax.f32 %v12102_v60, %v12166_v50 }
 0x81c   :  { %v11282_v6 = vpop.f32.mrb[113].mxu1  ;;  %v20314_v51 = vpop.eup %20313  ;;  %20325 = vpow2.f32 %v11827_v63  ;;  %v11542_v58 = vmul.f32 %v18644_v54, %v25354_v14  ;;  %vm11665_vm8 = vcmp.gt.f32.partialorder %v25592_v27, 0.0  ;;  %vm11668_vm5 = vcmp.gt.f32.partialorder %v25615_v22, 0.0  ;;  %18765 = vmatpush3.msk.msra.mxu1 %vm12458_vm4, %v12321_v41 }
 0x81d   :  { %v20316_v55 = vpop.eup %20315  ;;  %v15752_v31 = vadd.f32 -1.0, %v20314_v51  ;;  %v11825_v43 = vmul.f32 1.442695, %v11733_v34  ;;  %v25666_v17 = vadd.f32 %v25359_v18, %v11539_v19  ;;  %v11541_v3 = vmul.f32 %v25354_v14, %v11282_v6  ;;  %12256 = vst.msk [vmem:[#allocation5 + $0x28] sm:$0xff] %vm12025_vm9, %v12224_v32  ;;  %v12108_v19 = vld [vmem:[#allocation4 + $0x80] ss:$2 sm:$0xff] }
 0x81e   :  { %v20318_v10 = vpop.eup %20317  ;;  %v15751_v44 = vadd.f32 -1.0, %v20316_v55  ;;  %v11736_v12 = vmin.f32 %v25661_v1, 0.0  ;;  %v25676_v4 = vadd.f32 %v25359_v18, %v11542_v58  ;;  %vm11667_vm10 = vcmp.gt.f32.partialorder %v25619_v46, 0.0  ;;  %v12172_v6 = vld [vmem:[#allocation4 + $0x81] ss:$2 sm:$0xff] }
 0x81f   :  { %v18647_v56 = vpop.f32.mrb[114].mxu1  ;;  %v11984_v7 = vsel %vm11664_vm6, %v25572_v23, %v15752_v31  ;;  %v15754_v26 = vadd.f32 -1.0, %v20318_v10  ;;  %20327 = vpow2.f32 %v11825_v43  ;;  %v20320_v36 = vpop.eup %20319  ;;  %v11735_v23 = vmin.f32 %v25666_v17, 0.0  ;;  %v12110_v41 = vld [vmem:[#allocation4 + $0x90] ss:$2 sm:$0xff] }
 0x820   :  { %v11292_v38 = vpop.f32.mrb[115].mxu1  ;;  %12049 = vst.msk [vmem:[#allocation4 + $0xb8] sm:$0xff] %vm12025_vm9, %v11984_v7  ;;  %v11983_v39 = vsel %vm11663_vm7, %v25580_v29, %v15751_v44  ;;  %v11831_v30 = vmul.f32 1.442695, %v11736_v12  ;;  %v15753_v0 = vadd.f32 -1.0, %v20320_v36  ;;  %v11738_v57 = vmin.f32 %v25676_v4, 0.0 }
 0x821   :  { %12048 = vst.msk [vmem:[#allocation4 + $0xb0] sm:$0xff] %vm12025_vm9, %v11983_v39  ;;  %v11986_v42 = vsel %vm11666_vm1, %v25587_v53, %v15754_v26  ;;  %v25696_v8 = vadd.f32 %v25359_v18, %v11541_v3  ;;  %v12106_v29 = vld [vmem:[#allocation4 + $0x70] ss:$2 sm:$0xff]  ;;  %v11829_v45 = vmul.f32 1.442695, %v11735_v23  ;;  %v12225_v35 = vmax.f32 %v12104_v2, %v12168_v15 }
 0x822   :  { %12051 = vst.msk [vmem:[#allocation4 + $0xc8] sm:$0xff] %vm12025_vm9, %v11986_v42  ;;  %v12325_v49 = vld [vmem:[#allocation5 + $0x19] sm:$0xff]  ;;  %20329 = vpow2.f32 %v11831_v30  ;;  %v11544_v25 = vmul.f32 %v18647_v56, %v25354_v14  ;;  %v11985_v53 = vsel %vm11665_vm8, %v25592_v27, %v15753_v0  ;;  %vm11670_vm11 = vcmp.gt.f32.partialorder %v25622_v9, 0.0  ;;  %v12176_v0 = vld [vmem:[#allocation4 + $0xa1] ss:$2 sm:$0xff] }
 0x823   :  { %v18650_v16 = vpop.f32.mrb[116].mxu1  ;;  %18708 = vmatmul.mubr.msk.f32.gmra.mrb[146].mxu1 %vm12025_vm9, %v12325_v49  ;;  %v11835_v21 = vmul.f32 1.442695, %v11738_v57  ;;  %v11737_v59 = vmin.f32 %v25696_v8, 0.0  ;;  %v20322_v62 = vpop.eup %20321  ;;  %12050 = vst.msk [vmem:[#allocation4 + $0xc0] sm:$0xff] %vm12025_vm9, %v11985_v53  ;;  %20331 = vpow2.f32 %v11829_v45  ;;  %12257 = vst.msk [vmem:[#allocation5 + $0x30] sm:$0xff] %vm12025_vm9, %v12225_v35  ;;  %v11543_v11 = vmul.f32 %v25354_v14, %v11292_v38 }
 0x824   :  { %v11302_v40 = vpop.f32.mrb[117].mxu1  ;;  %v25709_v33 = vadd.f32 %v25359_v18, %v11544_v25  ;;  %v12226_v27 = vmax.f32 %v12106_v29, %v12170_v20  ;;  %v20324_v47 = vpop.eup %20323  ;;  %v15756_v5 = vadd.f32 -1.0, %v20322_v62  ;;  %v12326_v37 = vld [vmem:[#allocation5 + $0x21] sm:$0xff]  ;;  %v11546_v24 = vmul.f32 %v18650_v16, %v25354_v14 }
 0x825   :  { %20333 = vpow2.f32 %v11835_v21  ;;  %v11833_v13 = vmul.f32 1.442695, %v11737_v59  ;;  %v15755_v60 = vadd.f32 -1.0, %v20324_v47  ;;  %vm11669_vm12 = vcmp.gt.f32.partialorder %v25647_v52, 0.0  ;;  %18710 = vmatprep.mubr.msk.f32.mxu1 %vm12025_vm9, %v12326_v37  ;;  %v12112_v42 = vld [vmem:[#allocation4 + $0xa0] ss:$2 sm:$0xff] }
 0x826   :  { %v20326_v61 = vpop.eup %20325  ;;  %v11740_v50 = vmin.f32 %v25709_v33, 0.0  ;;  %v25718_v48 = vadd.f32 %v25359_v18, %v11543_v11  ;;  %12258 = vst.msk [vmem:[#allocation5 + $0x38] sm:$0xff] %vm12025_vm9, %v12226_v27  ;;  %v11988_v28 = vsel %vm11668_vm5, %v25615_v22, %v15756_v5  ;;  %v25725_v34 = vadd.f32 %v25359_v18, %v11546_v24 }
 0x827   :  { %v18653_v63 = vpop.f32.mrb[118].mxu1  ;;  %v15758_v54 = vadd.f32 -1.0, %v20326_v61  ;;  %20335 = vpow2.f32 %v11833_v13  ;;  %12053 = vst.msk [vmem:[#allocation4 + $0xd8] sm:$0xff] %vm12025_vm9, %v11988_v28  ;;  %v11987_v32 = vsel %vm11667_vm10, %v25619_v46, %v15755_v60  ;;  %vm11672_vm13 = vcmp.gt.f32.partialorder %v25661_v1, 0.0  ;;  %v12174_v46 = vld [vmem:[#allocation4 + $0x91] ss:$2 sm:$0xff] }
 0x828   :  { %v11312_v51 = vpop.f32.mrb[119].mxu1  ;;  %v11839_v58 = vmul.f32 1.442695, %v11740_v50  ;;  %v11739_v55 = vmin.f32 %v25718_v48, 0.0  ;;  %12052 = vst.msk [vmem:[#allocation4 + $0xd0] sm:$0xff] %vm12025_vm9, %v11987_v32  ;;  %vm11671_vm15 = vcmp.gt.f32.partialorder %v25666_v17, 0.0  ;;  %v11545_v3 = vmul.f32 %v25354_v14, %v11302_v40 }
 0x829   :  { %v20328_v22 = vpop.eup %20327  ;;  %v11990_v31 = vsel %vm11670_vm11, %v25622_v9, %v15758_v54  ;;  %v11742_v43 = vmin.f32 %v25725_v34, 0.0  ;;  %v12227_v12 = vmax.f32 %v12108_v19, %v12172_v6  ;;  %v11548_v9 = vmul.f32 %v18653_v63, %v25354_v14  ;;  %v12114_v13 = vld [vmem:[#allocation4 + $0xb0] ss:$2 sm:$0xff]  ;;  %v12178_v24 = vld [vmem:[#allocation4 + $0xb1] ss:$2 sm:$0xff] }
 0x82a   :  { %12055 = vst.msk [vmem:[#allocation4 + $0xe8] sm:$0xff] %vm12025_vm9, %v11990_v31  ;;  %v15757_v10 = vadd.f32 -1.0, %v20328_v22  ;;  %20337 = vpow2.f32 %v11839_v58  ;;  %v11837_v44 = vmul.f32 1.442695, %v11739_v55  ;;  %v12327_v56 = vld [vmem:[#allocation5 + $0x29] sm:$0xff]  ;;  %v25742_v26 = vadd.f32 %v25359_v18, %v11545_v3 }
 0x82b   :  { %v18656_v2 = vpop.f32.mrb[120].mxu1  ;;  %v11843_v7 = vmul.f32 1.442695, %v11742_v43  ;;  %v11547_v15 = vmul.f32 %v25354_v14, %v11312_v51  ;;  %18711 = vmatmul.mubr.msk.f32.gmra.mrb[148].mxu1 %vm12025_vm9, %v12327_v56  ;;  %12259 = vst.msk [vmem:[#allocation5 + $0x40] sm:$0xff] %vm12025_vm9, %v12227_v12  ;;  %v12228_v30 = vmax.f32 %v12110_v41, %v12174_v46  ;;  %vm11674_vm0 = vcmp.gt.f32.partialorder %v25676_v4, 0.0 }
 0x82c   :  { %v11322_v38 = vpop.f32.mrb[121].mxu1  ;;  %v20330_v36 = vpop.eup %20329  ;;  %v11989_v39 = vsel %vm11669_vm12, %v25647_v52, %v15757_v10  ;;  %20339 = vpow2.f32 %v11837_v44  ;;  %v11550_v23 = vmul.f32 %v18656_v2, %v25354_v14  ;;  %v11741_v20 = vmin.f32 %v25742_v26, 0.0  ;;  %v25814_v46 = vld [vmem:[%s26574_s4 + $0x2] ss:$0 sm:$0xff] }
 0x82d   :  { %12054 = vst.msk [vmem:[#allocation4 + $0xe0] sm:$0xff] %vm12025_vm9, %v11989_v39  ;;  %v15760_v57 = vadd.f32 -1.0, %v20330_v36  ;;  %v12328_v29 = vld [vmem:[#allocation5 + $0x31] sm:$0xff]  ;;  %20341 = vpow2.f32 %v11843_v7  ;;  %v20332_v52 = vpop.eup %20331  ;;  %v25757_v49 = vadd.f32 %v25359_v18, %v11548_v9  ;;  %v25760_v45 = vadd.f32 %v25359_v18, %v11547_v15  ;;  %12260 = vst.msk [vmem:[#allocation5 + $0x48] sm:$0xff] %vm12025_vm9, %v12228_v30  ;;  %v12116_v44 = vld [vmem:[#allocation4 + $0xc0] ss:$2 sm:$0xff] }
 0x82e   :  { %18713 = vmatprep.mubr.msk.f32.mxu1 %vm12025_vm9, %v12328_v29  ;;  %v25764_v35 = vadd.f32 %v25359_v18, %v11550_v23  ;;  %v11549_v25 = vmul.f32 %v25354_v14, %v11322_v38  ;;  %v15759_v59 = vadd.f32 -1.0, %v20332_v52  ;;  %v11841_v40 = vmul.f32 1.442695, %v11741_v20  ;;  %v12180_v38 = vld [vmem:[#allocation4 + $0xc1] ss:$2 sm:$0xff] }
 0x82f   :  { %v18659_v16 = vpop.f32.mrb[122].mxu1  ;;  %v20334_v53 = vpop.eup %20333  ;;  %v11992_v21 = vsel %vm11672_vm13, %v25661_v1, %v15760_v57  ;;  %v12229_v62 = vmax.f32 %v12112_v42, %v12176_v0  ;;  %vm11673_vm2 = vcmp.gt.f32.partialorder %v25696_v8, 0.0  ;;  %vm11676_vm3 = vcmp.gt.f32.partialorder %v25709_v33, 0.0  ;;  %v12118_v52 = vld [vmem:[#allocation4 + $0xd0] ss:$2 sm:$0xff] }
 0x830   :  { %v11332_v11 = vpop.f32.mrb[123].mxu1  ;;  %12057 = vst.msk [vmem:[#allocation4 + $0xf8] sm:$0xff] %vm12025_vm9, %v11992_v21  ;;  %v15762_v27 = vadd.f32 -1.0, %v20334_v53  ;;  %v11744_v47 = vmin.f32 %v25757_v49, 0.0  ;;  %v11991_v37 = vsel %vm11671_vm15, %v25666_v17, %v15759_v59  ;;  %vm11675_vm6 = vcmp.gt.f32.partialorder %v25718_v48, 0.0 }
 0x831   :  { %v20336_v5 = vpop.eup %20335  ;;  %20343 = vpow2.f32 %v11841_v40  ;;  %v11743_v1 = vmin.f32 %v25760_v45, 0.0  ;;  %12261 = vst.msk [vmem:[#allocation5 + $0x50] sm:$0xff] %vm12025_vm9, %v12229_v62  ;;  %12056 = vst.msk [vmem:[#allocation4 + $0xf0] sm:$0xff] %vm12025_vm9, %v11991_v37  ;;  %v11746_v63 = vmin.f32 %v25764_v35, 0.0  ;;  %v25787_v19 = vadd.f32 %v25359_v18, %v11549_v25  ;;  %v12182_v40 = vld [vmem:[#allocation4 + $0xd1] ss:$2 sm:$0xff] }
 0x832   :  { %v11994_v61 = vsel %vm11674_vm0, %v25676_v4, %v15762_v27  ;;  %v15761_v60 = vadd.f32 -1.0, %v20336_v5  ;;  %v11847_v50 = vmul.f32 1.442695, %v11744_v47  ;;  %v12329_v28 = vld [vmem:[#allocation5 + $0x39] sm:$0xff]  ;;  %v11552_v6 = vmul.f32 %v18659_v16, %v25354_v14 }
 0x833   :  { %v18662_v17 = vpop.f32.mrb[124].mxu1  ;;  %12059 = vst.msk [vmem:[#allocation4 + $0x108] sm:$0xff] %vm12025_vm9, %v11994_v61  ;;  %v11845_v54 = vmul.f32 1.442695, %v11743_v1  ;;  %v11551_v51 = vmul.f32 %v25354_v14, %v11332_v11  ;;  %18714 = vmatmul.mubr.msk.f32.gmra.mrb[150].mxu1 %vm12025_vm9, %v12329_v28  ;;  %v11851_v55 = vmul.f32 1.442695, %v11746_v63  ;;  %v12230_v22 = vmax.f32 %v12114_v13, %v12178_v24 }
 0x834   :  { %v11342_v32 = vpop.f32.mrb[125].mxu1  ;;  %v20338_v58 = vpop.eup %20337  ;;  %v11993_v4 = vsel %vm11673_vm2, %v25696_v8, %v15761_v60  ;;  %20345 = vpow2.f32 %v11847_v50  ;;  %vm11678_vm7 = vcmp.gt.f32.partialorder %v25725_v34, 0.0  ;;  %v12330_v18 = vld [vmem:[#allocation5 + $0x41] sm:$0xff]  ;;  %v11745_v14 = vmin.f32 %v25787_v19, 0.0 }
 0x835   :  { %12058 = vst.msk [vmem:[#allocation4 + $0x100] sm:$0xff] %vm12025_vm9, %v11993_v4  ;;  %v15764_v31 = vadd.f32 -1.0, %v20338_v58  ;;  %20347 = vpow2.f32 %v11845_v54  ;;  %18716 = vmatprep.mubr.msk.f32.mxu1 %vm12025_vm9, %v12330_v18  ;;  %v25802_v8 = vld [vmem:[%s26574_s4 + $0x3] ss:$0 sm:$0xff]  ;;  %12262 = vst.msk [vmem:[#allocation5 + $0x58] sm:$0xff] %vm12025_vm9, %v12230_v22  ;;  %v11554_v10 = vmul.f32 %v25814_v46, %v18662_v17  ;;  %v11553_v15 = vmul.f32 %v25814_v46, %v11342_v32 }
 0x836   :  { %v20340_v43 = vpop.eup %20339  ;;  %20349 = vpow2.f32 %v11851_v55  ;;  %v25805_v3 = vadd.f32 %v25802_v8, %v11552_v6  ;;  %v25808_v41 = vadd.f32 %v25802_v8, %v11551_v51  ;;  %v11849_v9 = vmul.f32 1.442695, %v11745_v14  ;;  %v12120_v58 = vld [vmem:[#allocation4 + $0xe0] ss:$2 sm:$0xff]  ;;  %v12184_v18 = vld [vmem:[#allocation4 + $0xe1] ss:$2 sm:$0xff] }
 0x837   :  { %v18665_v12 = vpop.f32.mrb[126].mxu1  ;;  %v20342_v2 = vpop.eup %20341  ;;  %v11996_v56 = vsel %vm11676_vm3, %v25709_v33, %v15764_v31  ;;  %v15763_v7 = vadd.f32 -1.0, %v20340_v43  ;;  %vm11677_vm1 = vcmp.gt.f32.partialorder %v25742_v26, 0.0  ;;  %vm11680_vm8 = vcmp.gt.f32.partialorder %v25757_v49, 0.0 }
 0x838   :  { %v11352_v36 = vpop.f32.mrb[127].mxu1  ;;  %12061 = vst.msk [vmem:[#allocation4 + $0x118] sm:$0xff] %vm12025_vm9, %v11996_v56  ;;  %v15766_v39 = vadd.f32 -1.0, %v20342_v2  ;;  %v12331_v30 = vld [vmem:[#allocation5 + $0x49] sm:$0xff]  ;;  %v11748_v23 = vmin.f32 %v25805_v3, 0.0  ;;  %vm11679_vm5 = vcmp.gt.f32.partialorder %v25760_v45, 0.0  ;;  %20351 = vpow2.f32 %v11849_v9 }
 0x839   :  { %v11995_v33 = vsel %vm11675_vm6, %v25718_v48, %v15763_v7  ;;  %18717 = vmatmul.mubr.msk.f32.gmra.mrb[152].mxu1 %vm12025_vm9, %v12331_v30  ;;  %v11747_v42 = vmin.f32 %v25808_v41, 0.0  ;;  %v25832_v0 = vadd.f32 %v25802_v8, %v11554_v10  ;;  %v25839_v20 = vadd.f32 %v25802_v8, %v11553_v15  ;;  %v12122_v10 = vld [vmem:[#allocation4 + $0xf0] ss:$2 sm:$0xff]  ;;  %v12186_v7 = vld [vmem:[#allocation4 + $0xf1] ss:$2 sm:$0xff] }
 0x83a   :  { %12060 = vst.msk [vmem:[#allocation4 + $0x110] sm:$0xff] %vm12025_vm9, %v11995_v33  ;;  %v11998_v57 = vsel %vm11678_vm7, %v25725_v34, %v15766_v39  ;;  %v11855_v29 = vmul.f32 1.442695, %v11748_v23  ;;  %v12231_v48 = vmax.f32 %v12116_v44, %v12180_v38  ;;  %v11556_v59 = vmul.f32 %v25814_v46, %v18665_v12 }
 0x83b   :  { %v18668_v25 = vpop.f32.mrb[128].mxu1  ;;  %v20344_v16 = vpop.eup %20343  ;;  %12063 = vst.msk [vmem:[#allocation4 + $0x128] sm:$0xff] %vm12025_vm9, %v11998_v57  ;;  %v11853_v53 = vmul.f32 1.442695, %v11747_v42  ;;  %v11750_v21 = vmin.f32 %v25832_v0, 0.0  ;;  %vm11682_vm10 = vcmp.gt.f32.partialorder %v25764_v35, 0.0  ;;  %v11555_v37 = vmul.f32 %v25814_v46, %v11352_v36 }
 0x83c   :  { %v11362_v62 = vpop.f32.mrb[129].mxu1  ;;  %v15765_v11 = vadd.f32 -1.0, %v20344_v16  ;;  %20353 = vpow2.f32 %v11855_v29  ;;  %v11749_v34 = vmin.f32 %v25839_v20, 0.0  ;;  %12263 = vst.msk [vmem:[#allocation5 + $0x60] sm:$0xff] %vm12025_vm9, %v12231_v48  ;;  %v12332_v27 = vld [vmem:[#allocation5 + $0x51] sm:$0xff]  ;;  %v25848_v5 = vadd.f32 %v25802_v8, %v11556_v59 }
 0x83d   :  { %20355 = vpow2.f32 %v11853_v53  ;;  %v11859_v47 = vmul.f32 1.442695, %v11750_v21  ;;  %18719 = vmatprep.mubr.msk.f32.mxu1 %vm12025_vm9, %v12332_v27  ;;  %v12232_v61 = vmax.f32 %v12118_v52, %v12182_v40  ;;  %v11558_v60 = vmul.f32 %v25814_v46, %v18668_v25 }
 0x83e   :  { %v20346_v1 = vpop.eup %20345  ;;  %v11997_v13 = vsel %vm11677_vm1, %v25742_v26, %v15765_v11  ;;  %v11857_v24 = vmul.f32 1.442695, %v11749_v34  ;;  %vm11681_vm11 = vcmp.gt.f32.partialorder %v25787_v19, 0.0  ;;  %v11752_v28 = vmin.f32 %v25848_v5, 0.0  ;;  %v12124_v11 = vld [vmem:[#allocation4 + $0x100] ss:$2 sm:$0xff] }
 0x83f   :  { %v18671_v50 = vpop.f32.mrb[130].mxu1  ;;  %v20348_v63 = vpop.eup %20347  ;;  %12062 = vst.msk [vmem:[#allocation4 + $0x120] sm:$0xff] %vm12025_vm9, %v11997_v13  ;;  %v15768_v17 = vadd.f32 -1.0, %v20346_v1  ;;  %20357 = vpow2.f32 %v11859_v47  ;;  %v25860_v26 = vadd.f32 %v25802_v8, %v11555_v37  ;;  %12264 = vst.msk [vmem:[#allocation5 + $0x68] sm:$0xff] %vm12025_vm9, %v12232_v61  ;;  %v25864_v32 = vadd.f32 %v25802_v8, %v11558_v60  ;;  %v12188_v34 = vld [vmem:[#allocation4 + $0x101] ss:$2 sm:$0xff] }
 0x840   :  { %v11372_v54 = vpop.f32.mrb[131].mxu1  ;;  %v20350_v6 = vpop.eup %20349  ;;  %v15767_v51 = vadd.f32 -1.0, %v20348_v63  ;;  %20359 = vpow2.f32 %v11857_v24  ;;  %v11863_v22 = vmul.f32 1.442695, %v11752_v28  ;;  %v11557_v31 = vmul.f32 %v25814_v46, %v11362_v62 }
 0x841   :  { %v12000_v4 = vsel %vm11680_vm8, %v25757_v49, %v15768_v17  ;;  %v15770_v55 = vadd.f32 -1.0, %v20350_v6  ;;  %vm11684_vm12 = vcmp.gt.f32.partialorder %v25805_v3, 0.0  ;;  %vm11683_vm13 = vcmp.gt.f32.partialorder %v25808_v41, 0.0  ;;  %v12190_v6 = vld [vmem:[#allocation4 + $0x111] ss:$2 sm:$0xff] }
 0x842   :  { %12065 = vst.msk [vmem:[#allocation4 + $0x138] sm:$0xff] %vm12025_vm9, %v12000_v4  ;;  %v11999_v14 = vsel %vm11679_vm5, %v25760_v45, %v15767_v51  ;;  %v11751_v43 = vmin.f32 %v25860_v26, 0.0  ;;  %v20352_v49 = vpop.eup %20351  ;;  %vm11686_vm15 = vcmp.gt.f32.partialorder %v25832_v0, 0.0  ;;  %20361 = vpow2.f32 %v11863_v22 }
 0x843   :  { %v18674_v44 = vpop.f32.mrb[132].mxu1  ;;  %12064 = vst.msk [vmem:[#allocation4 + $0x130] sm:$0xff] %vm12025_vm9, %v11999_v14  ;;  %v12002_v12 = vsel %vm11682_vm10, %v25764_v35, %v15770_v55  ;;  %v12333_v2 = vld [vmem:[#allocation5 + $0x59] sm:$0xff]  ;;  %v11754_v45 = vmin.f32 %v25864_v32, 0.0  ;;  %v25884_v56 = vadd.f32 %v25802_v8, %v11557_v31  ;;  %v15769_v15 = vadd.f32 -1.0, %v20352_v49 }
 0x844   :  { %v11382_v9 = vpop.f32.mrb[133].mxu1  ;;  %12067 = vst.msk [vmem:[#allocation4 + $0x148] sm:$0xff] %vm12025_vm9, %v12002_v12  ;;  %18720 = vmatmul.mubr.msk.f32.gmra.mrb[154].mxu1 %vm12025_vm9, %v12333_v2  ;;  %v11861_v38 = vmul.f32 1.442695, %v11751_v43  ;;  %v12233_v36 = vmax.f32 %v12120_v58, %v12184_v18  ;;  %v11560_v35 = vmul.f32 %v25814_v46, %v18671_v50  ;;  %vm11685_vm0 = vcmp.gt.f32.partialorder %v25839_v20, 0.0 }
 0x845   :  { %v11867_v39 = vmul.f32 1.442695, %v11754_v45  ;;  %v11753_v30 = vmin.f32 %v25884_v56, 0.0  ;;  %v11559_v23 = vmul.f32 %v25814_v46, %v11372_v54  ;;  %v12001_v42 = vsel %vm11681_vm11, %v25787_v19, %v15769_v15  ;;  %v12126_v50 = vld [vmem:[#allocation4 + $0x110] ss:$2 sm:$0xff] }
 0x846   :  { %v20354_v33 = vpop.eup %20353  ;;  %20363 = vpow2.f32 %v11861_v38  ;;  %12265 = vst.msk [vmem:[#allocation5 + $0x70] sm:$0xff] %vm12025_vm9, %v12233_v36  ;;  %v25897_v57 = vadd.f32 %v25802_v8, %v11560_v35  ;;  %v12234_v29 = vmax.f32 %v12122_v10, %v12186_v7  ;;  %12066 = vst.msk [vmem:[#allocation4 + $0x140] sm:$0xff] %vm12025_vm9, %v12001_v42  ;;  %v12334_v16 = vld [vmem:[#allocation5 + $0x61] sm:$0xff]  ;;  %v11562_v62 = vmul.f32 %v25814_v46, %v18674_v44 }
 0x847   :  { %v18677_v48 = vpop.f32.mrb[134].mxu1  ;;  %v20356_v52 = vpop.eup %20355  ;;  %v15772_v25 = vadd.f32 -1.0, %v20354_v33  ;;  %20365 = vpow2.f32 %v11867_v39  ;;  %v11865_v53 = vmul.f32 1.442695, %v11753_v30  ;;  %v25901_v21 = vadd.f32 %v25802_v8, %v11559_v23  ;;  %18722 = vmatprep.mubr.msk.f32.mxu1 %vm12025_vm9, %v12334_v16  ;;  %v12128_v42 = vld [vmem:[#allocation4 + $0x120] ss:$2 sm:$0xff] }
 0x848   :  { %v11392_v59 = vpop.f32.mrb[135].mxu1  ;;  %v15771_v19 = vadd.f32 -1.0, %v20356_v52  ;;  %v11756_v40 = vmin.f32 %v25897_v57, 0.0  ;;  %12266 = vst.msk [vmem:[#allocation5 + $0x78] sm:$0xff] %vm12025_vm9, %v12234_v29  ;;  %vm11688_vm2 = vcmp.gt.f32.partialorder %v25848_v5, 0.0  ;;  %v25917_v60 = vadd.f32 %v25802_v8, %v11562_v62 }
 0x849   :  { %v20358_v27 = vpop.eup %20357  ;;  %v12004_v47 = vsel %vm11684_vm12, %v25805_v3, %v15772_v25  ;;  %20367 = vpow2.f32 %v11865_v53  ;;  %v11755_v37 = vmin.f32 %v25901_v21, 0.0  ;;  %v11561_v28 = vmul.f32 %v25814_v46, %v11382_v9  ;;  %v12192_v53 = vld [vmem:[#allocation4 + $0x121] ss:$2 sm:$0xff] }
 0x84a   :  { %v20360_v1 = vpop.eup %20359  ;;  %12069 = vst.msk [vmem:[#allocation4 + $0x158] sm:$0xff] %vm12025_vm9, %v12004_v47  ;;  %v12003_v13 = vsel %vm11683_vm13, %v25808_v41, %v15771_v19  ;;  %v15774_v24 = vadd.f32 -1.0, %v20358_v27  ;;  %v11871_v61 = vmul.f32 1.442695, %v11756_v40  ;;  %v12235_v54 = vmax.f32 %v12124_v11, %v12188_v34  ;;  %v12130_v27 = vld [vmem:[#allocation4 + $0x130] ss:$2 sm:$0xff] }
 0x84b   :  { %v18680_v63 = vpop.f32.mrb[136].mxu1  ;;  %12068 = vst.msk [vmem:[#allocation4 + $0x150] sm:$0xff] %vm12025_vm9, %v12003_v13  ;;  %v15773_v3 = vadd.f32 -1.0, %v20360_v1  ;;  %v11869_v17 = vmul.f32 1.442695, %v11755_v37  ;;  %vm11687_vm3 = vcmp.gt.f32.partialorder %v25860_v26, 0.0  ;;  %v25931_v31 = vadd.f32 %v25802_v8, %v11561_v28 }
 0x84c   :  { %v11402_v51 = vpop.f32.mrb[137].mxu1  ;;  %v12006_v41 = vsel %vm11686_vm15, %v25832_v0, %v15774_v24  ;;  %20369 = vpow2.f32 %v11871_v61  ;;  %v11758_v58 = vmin.f32 %v25917_v60, 0.0  ;;  %v20362_v4 = vpop.eup %20361  ;;  %12267 = vst.msk [vmem:[#allocation5 + $0x80] sm:$0xff] %vm12025_vm9, %v12235_v54  ;;  %v11564_v0 = vmul.f32 %v25814_v46, %v18677_v48  ;;  %v12194_v47 = vld [vmem:[#allocation4 + $0x131] ss:$2 sm:$0xff] }
 0x84d   :  { %12071 = vst.msk [vmem:[#allocation4 + $0x168] sm:$0xff] %vm12025_vm9, %v12006_v41  ;;  %v12005_v55 = vsel %vm11685_vm0, %v25839_v20, %v15773_v3  ;;  %v12335_v22 = vld [vmem:[#allocation5 + $0x69] sm:$0xff]  ;;  %20371 = vpow2.f32 %v11869_v17  ;;  %v15776_v18 = vadd.f32 -1.0, %v20362_v4  ;;  %v11563_v43 = vmul.f32 %v25814_v46, %v11392_v59 }
 0x84e   :  { %12070 = vst.msk [vmem:[#allocation4 + $0x160] sm:$0xff] %vm12025_vm9, %v12005_v55  ;;  %18723 = vmatmul.mubr.msk.f32.gmra.mrb[156].mxu1 %vm12025_vm9, %v12335_v22  ;;  %v11875_v14 = vmul.f32 1.442695, %v11758_v58  ;;  %v12236_v10 = vmax.f32 %v12126_v50, %v12190_v6  ;;  %vm11690_vm6 = vcmp.gt.f32.partialorder %v25864_v32, 0.0  ;;  %v11757_v49 = vmin.f32 %v25931_v31, 0.0 }
 0x84f   :  { %v18683_v44 = vpop.f32.mrb[138].mxu1  ;;  %v12336_v20 = vld [vmem:[#allocation5 + $0x71] sm:$0xff]  ;;  %v25941_v12 = vadd.f32 %v25802_v8, %v11564_v0  ;;  %v11566_v2 = vmul.f32 %v25814_v46, %v18680_v63  ;;  %v12008_v9 = vsel %vm11688_vm2, %v25848_v5, %v15776_v18  ;;  %v25949_v15 = vadd.f32 %v25802_v8, %v11563_v43  ;;  %v12132_v22 = vld [vmem:[#allocation4 + $0x140] ss:$2 sm:$0xff]  ;;  %v12196_v0 = vld [vmem:[#allocation4 + $0x141] ss:$2 sm:$0xff] }
 0x850   :  { %v11412_v45 = vpop.f32.mrb[139].mxu1  ;;  %v20364_v7 = vpop.eup %20363  ;;  %18725 = vmatprep.mubr.msk.f32.mxu1 %vm12025_vm9, %v12336_v20  ;;  %20373 = vpow2.f32 %v11875_v14  ;;  %12268 = vst.msk [vmem:[#allocation5 + $0x88] sm:$0xff] %vm12025_vm9, %v12236_v10  ;;  %v11565_v38 = vmul.f32 %v25814_v46, %v11402_v51  ;;  %12073 = vst.msk [vmem:[#allocation4 + $0x178] sm:$0xff] %vm12025_vm9, %v12008_v9  ;;  %vm11689_vm7 = vcmp.gt.f32.partialorder %v25884_v56, 0.0  ;;  %v11873_v39 = vmul.f32 1.442695, %v11757_v49 }
 0x851   :  { %v20366_v36 = vpop.eup %20365  ;;  %v15775_v35 = vadd.f32 -1.0, %v20364_v7  ;;  %v11760_v30 = vmin.f32 %v25941_v12, 0.0  ;;  %vm11692_vm1 = vcmp.gt.f32.partialorder %v25897_v57, 0.0  ;;  %v11759_v23 = vmin.f32 %v25949_v15, 0.0 }
 0x852   :  { %v15778_v5 = vadd.f32 -1.0, %v20366_v36  ;;  %v25959_v33 = vadd.f32 %v25802_v8, %v11566_v2  ;;  %20375 = vpow2.f32 %v11873_v39  ;;  %v25965_v16 = vadd.f32 %v25802_v8, %v11565_v38  ;;  %v12198_v7 = vld [vmem:[#allocation4 + $0x151] ss:$2 sm:$0xff] }
 0x853   :  { %v18686_v29 = vpop.f32.mrb[140].mxu1  ;;  %v20368_v48 = vpop.eup %20367  ;;  %v12007_v52 = vsel %vm11687_vm3, %v25860_v26, %v15775_v35  ;;  %v11879_v25 = vmul.f32 1.442695, %v11760_v30  ;;  %vm11691_vm8 = vcmp.gt.f32.partialorder %v25901_v21, 0.0  ;;  %v12337_v62 = vld [vmem:[#allocation5 + $0x79] sm:$0xff]  ;;  %v12237_v1 = vmax.f32 %v12128_v42, %v12192_v53 }
 0x854   :  { %v11422_v59 = vpop.f32.mrb[141].mxu1  ;;  %12072 = vst.msk [vmem:[#allocation4 + $0x170] sm:$0xff] %vm12025_vm9, %v12007_v52  ;;  %v12010_v19 = vsel %vm11690_vm6, %v25864_v32, %v15778_v5  ;;  %v15777_v40 = vadd.f32 -1.0, %v20368_v48  ;;  %v11877_v11 = vmul.f32 1.442695, %v11759_v23  ;;  %18726 = vmatmul.mubr.msk.f32.gmra.mrb[158].mxu1 %vm12025_vm9, %v12337_v62  ;;  %v11762_v26 = vmin.f32 %v25959_v33, 0.0 }
 0x855   :  { %12075 = vst.msk [vmem:[#allocation4 + $0x188] sm:$0xff] %vm12025_vm9, %v12010_v19  ;;  %20377 = vpow2.f32 %v11879_v25  ;;  %v11761_v34 = vmin.f32 %v25965_v16, 0.0  ;;  %v11568_v13 = vmul.f32 %v25814_v46, %v18683_v44  ;;  %v11567_v28 = vmul.f32 %v25814_v46, %v11412_v45  ;;  %12269 = vst.msk [vmem:[#allocation5 + $0x90] sm:$0xff] %vm12025_vm9, %v12237_v1  ;;  %v12134_v45 = vld [vmem:[#allocation4 + $0x150] ss:$2 sm:$0xff] }
 0x856   :  { %v20370_v37 = vpop.eup %20369  ;;  %v12009_v32 = vsel %vm11689_vm7, %v25884_v56, %v15777_v40  ;;  %20379 = vpow2.f32 %v11877_v11  ;;  %v11883_v3 = vmul.f32 1.442695, %v11762_v26  ;;  %v12238_v6 = vmax.f32 %v12130_v27, %v12194_v47  ;;  %v12136_v39 = vld [vmem:[#allocation4 + $0x160] ss:$2 sm:$0xff]  ;;  %v12200_v30 = vld [vmem:[#allocation4 + $0x161] ss:$2 sm:$0xff] }
 0x857   :  { %v18689_v24 = vpop.f32.mrb[142].mxu1  ;;  %v20372_v61 = vpop.eup %20371  ;;  %12074 = vst.msk [vmem:[#allocation4 + $0x180] sm:$0xff] %vm12025_vm9, %v12009_v32  ;;  %v15780_v50 = vadd.f32 -1.0, %v20370_v37  ;;  %v12338_v63 = vld [vmem:[#allocation5 + $0x81] sm:$0xff]  ;;  %v11881_v17 = vmul.f32 1.442695, %v11761_v34  ;;  %v25985_v56 = vadd.f32 %v25802_v8, %v11568_v13  ;;  %v11570_v51 = vmul.f32 %v25814_v46, %v18686_v29 }
 0x858   :  { %v15779_v54 = vadd.f32 -1.0, %v20372_v61  ;;  %18728 = vmatprep.mubr.msk.f32.mxu1 %vm12025_vm9, %v12338_v63  ;;  %v11432_v41 = vpop.f32.mrb[143].mxu1  ;;  %20381 = vpow2.f32 %v11883_v3  ;;  %v25992_v4 = vadd.f32 %v25802_v8, %v11567_v28  ;;  %v11569_v55 = vmul.f32 %v25814_v46, %v11422_v59  ;;  %12270 = vst.msk [vmem:[#allocation5 + $0x98] sm:$0xff] %vm12025_vm9, %v12238_v6  ;;  %v15866_v37 = vld [vmem:[%s26573_s3 + $0x70] sm:$0xff]  ;;  %v15867_v61 = vld [vmem:[%s26573_s3 + $0x78] sm:$0xff] }
 0x859   :  { %v12012_v58 = vsel %vm11692_vm1, %v25897_v57, %v15780_v50  ;;  %vm11694_vm5 = vcmp.gt.f32.partialorder %v25917_v60, 0.0  ;;  %20383 = vpow2.f32 %v11881_v17  ;;  %v11764_v57 = vmin.f32 %v25985_v56, 0.0 }
 0x85a   :  { %v20374_v18 = vpop.eup %20373  ;;  %12077 = vst.msk [vmem:[#allocation4 + $0x198] sm:$0xff] %vm12025_vm9, %v12012_v58  ;;  %v12011_v14 = vsel %vm11691_vm8, %v25901_v21, %v15779_v54  ;;  %vm11693_vm10 = vcmp.gt.f32.partialorder %v25931_v31, 0.0  ;;  %v11763_v10 = vmin.f32 %v25992_v4, 0.0  ;;  %v26006_v44 = vadd.f32 %v25802_v8, %v11570_v51 }
 0x85b   :  { %12076 = vst.msk [vmem:[#allocation4 + $0x190] sm:$0xff] %vm12025_vm9, %v12011_v14  ;;  %v15782_v43 = vadd.f32 -1.0, %v20374_v18  ;;  %v11887_v20 = vmul.f32 1.442695, %v11764_v57  ;;  %v26009_v21 = vadd.f32 %v25802_v8, %v11569_v55  ;;  %v12239_v49 = vmax.f32 %v12132_v22, %v12196_v0  ;;  %v12138_v42 = vld [vmem:[#allocation4 + $0x170] ss:$2 sm:$0xff] }
 0x85c   :  { %v11572_v2 = vmul.f32 %v25814_v46, %v18689_v24  ;;  %v20376_v9 = vpop.eup %20375  ;;  %vm11696_vm11 = vcmp.gt.f32.partialorder %v25941_v12, 0.0  ;;  %v11885_v36 = vmul.f32 1.442695, %v11763_v10  ;;  %v11766_v35 = vmin.f32 %v26006_v44, 0.0  ;;  %v12202_v29 = vld [vmem:[#allocation4 + $0x171] ss:$2 sm:$0xff] }
 0x85d   :  { %v12014_v38 = vsel %vm11694_vm5, %v25917_v60, %v15782_v43  ;;  %v15781_v5 = vadd.f32 -1.0, %v20376_v9  ;;  %20385 = vpow2.f32 %v11887_v20  ;;  %v11765_v23 = vmin.f32 %v26009_v21, 0.0  ;;  %12271 = vst.msk [vmem:[#allocation5 + $0xa0] sm:$0xff] %vm12025_vm9, %v12239_v49  ;;  %v12339_v52 = vld [vmem:[#allocation5 + $0x89] sm:$0xff] }
 0x85e   :  { %12079 = vst.msk [vmem:[#allocation4 + $0x1a8] sm:$0xff] %vm12025_vm9, %v12014_v38  ;;  %20387 = vpow2.f32 %v11885_v36  ;;  %v11891_v60 = vmul.f32 1.442695, %v11766_v35  ;;  %v26021_v25 = vadd.f32 %v25802_v8, %v11572_v2  ;;  %v11571_v53 = vmul.f32 %v25814_v46, %v11432_v41  ;;  %v12140_v59 = vld [vmem:[#allocation4 + $0x180] ss:$2 sm:$0xff]  ;;  %18729 = vmatmul.mubr.msk.f32.gmra.mrb[160].mxu1 %vm12025_vm9, %v12339_v52 }
 0x85f   :  { %v20378_v48 = vpop.eup %20377  ;;  %v12013_v40 = vsel %vm11693_vm10, %v25931_v31, %v15781_v5  ;;  %v11889_v11 = vmul.f32 1.442695, %v11765_v23  ;;  %v12240_v26 = vmax.f32 %v12134_v45, %v12198_v7  ;;  %v12204_v34 = vld [vmem:[#allocation4 + $0x181] ss:$2 sm:$0xff]  ;;  %vm11695_vm12 = vcmp.gt.f32.partialorder %v25949_v15, 0.0  ;;  %v12340_v47 = vld [vmem:[#allocation5 + $0x91] sm:$0xff] }
 0x860   :  { %v20380_v19 = vpop.eup %20379  ;;  %v15784_v62 = vadd.f32 -1.0, %v20378_v48  ;;  %12078 = vst.msk [vmem:[#allocation4 + $0x1a0] sm:$0xff] %vm12025_vm9, %v12013_v40  ;;  %20389 = vpow2.f32 %v11891_v60  ;;  %v11768_v46 = vmin.f32 %v26021_v25, 0.0  ;;  %18731 = vmatprep.mubr.msk.f32.mxu1 %vm12025_vm9, %v12340_v47  ;;  %v26039_v32 = vadd.f32 %v25802_v8, %v11571_v53 }
 0x861   :  { %v15783_v27 = vadd.f32 -1.0, %v20380_v19  ;;  %20391 = vpow2.f32 %v11889_v11  ;;  %12272 = vst.msk [vmem:[#allocation5 + $0xa8] sm:$0xff] %vm12025_vm9, %v12240_v26  ;;  %v12241_v1 = vmax.f32 %v12136_v39, %v12200_v30  ;;  %v12242_v3 = vmax.f32 %v12138_v42, %v12202_v29 }
 0x862   :  { %v12016_v31 = vsel %vm11696_vm11, %v25941_v12, %v15784_v62  ;;  %v12142_v13 = vld [vmem:[#allocation4 + $0x190] ss:$2 sm:$0xff]  ;;  %v12206_v24 = vld [vmem:[#allocation4 + $0x191] ss:$2 sm:$0xff]  ;;  %v20382_v50 = vpop.eup %20381  ;;  %v11895_v63 = vmul.f32 1.442695, %v11768_v46  ;;  %v12243_v8 = vmax.f32 %v12140_v59, %v12204_v34 }
 0x863   :  { %12081 = vst.msk [vmem:[#allocation4 + $0x1b8] sm:$0xff] %vm12025_vm9, %v12016_v31  ;;  %v12015_v12 = vsel %vm11695_vm12, %v25949_v15, %v15783_v27  ;;  %v20384_v17 = vpop.eup %20383  ;;  %v15786_v28 = vadd.f32 -1.0, %v20382_v50  ;;  %v11767_v54 = vmin.f32 %v26039_v32, 0.0  ;;  %12273 = vst.msk [vmem:[#allocation5 + $0xb0] sm:$0xff] %vm12025_vm9, %v12241_v1  ;;  %v12244_v6 = vmax.f32 %v12142_v13, %v12206_v24  ;;  %v15869_v50 = vld [vmem:[%s26573_s3 + $0x88] sm:$0xff] }
 0x864   :  { %12080 = vst.msk [vmem:[#allocation4 + $0x1b0] sm:$0xff] %vm12025_vm9, %v12015_v12  ;;  %vm11698_vm13 = vcmp.gt.f32.partialorder %v25959_v33, 0.0  ;;  %v15785_v51 = vadd.f32 -1.0, %v20384_v17  ;;  %v12341_v41 = vld [vmem:[#allocation5 + $0x99] sm:$0xff]  ;;  %20393 = vpow2.f32 %v11895_v63  ;;  %12274 = vst.msk [vmem:[#allocation5 + $0xb8] sm:$0xff] %vm12025_vm9, %v12242_v3  ;;  %v26055_v15 = vpack.c.bf16 %v15867_v61, %v15866_v37  ;;  %v12284_v3 = vld [vmem:[#allocation5 + $0x8] sm:$0xff] }
 0x865   :  { %12275 = vst.msk [vmem:[#allocation5 + $0xc0] sm:$0xff] %vm12025_vm9, %v12243_v8  ;;  %v12018_v58 = vsel %vm11698_vm13, %v25959_v33, %v15786_v28  ;;  %vm11697_vm15 = vcmp.gt.f32.partialorder %v25965_v16, 0.0  ;;  %18732 = vmatmul.mubr.msk.f32.gmra.mrb[162].mxu1 %vm12025_vm9, %v12341_v41  ;;  %v11893_v55 = vmul.f32 1.442695, %v11767_v54  ;;  %12276 = vst.msk [vmem:[#allocation5 + $0xc8] sm:$0xff] %vm12025_vm9, %v12244_v6  ;;  %vm11700_vm0 = vcmp.gt.f32.partialorder %v25985_v56, 0.0 }
 0x866   :  { %12083 = vst.msk [vmem:[#allocation4 + $0x1c8] sm:$0xff] %vm12025_vm9, %v12018_v58  ;;  %v12017_v22 = vsel %vm11697_vm15, %v25965_v16, %v15785_v51  ;;  %19075 = vmatprep.subr.bf16.mxu1 %v26055_v15  ;;  %vm11699_vm2 = vcmp.gt.f32.partialorder %v25992_v4, 0.0  ;;  %vm11702_vm3 = vcmp.gt.f32.partialorder %v26006_v44, 0.0  ;;  %vm11701_vm6 = vcmp.gt.f32.partialorder %v26009_v21, 0.0  ;;  %v15868_v61 = vld [vmem:[%s26573_s3 + $0x80] sm:$0xff]  ;;  %v15870_v8 = vld [vmem:[%s26573_s3 + $0x90] sm:$0xff] }
 0x867   :  { %v20386_v0 = vpop.eup %20385  ;;  %12082 = vst.msk [vmem:[#allocation4 + $0x1c0] sm:$0xff] %vm12025_vm9, %v12017_v22  ;;  %20395 = vpow2.f32 %v11893_v55  ;;  %v12144_v18 = vld [vmem:[#allocation4 + $0x1a0] ss:$2 sm:$0xff]  ;;  %v12208_v14 = vld [vmem:[#allocation4 + $0x1a1] ss:$2 sm:$0xff]  ;;  %vm11704_vm7 = vcmp.gt.f32.partialorder %v26021_v25, 0.0  ;;  %v19078_v63 = vpack.c.bf16 %v15869_v50, %v15868_v61 }
 0x868   :  { %v20388_v33 = vpop.eup %20387  ;;  %v15788_v57 = vadd.f32 -1.0, %v20386_v0  ;;  %v12342_v43 = vld [vmem:[#allocation5 + $0xa1] sm:$0xff]  ;;  %v12245_v10 = vmax.f32 %v12144_v18, %v12208_v14  ;;  %vm11703_vm1 = vcmp.gt.f32.partialorder %v26039_v32, 0.0  ;;  %v15871_v17 = vld [vmem:[%s26573_s3 + $0x98] sm:$0xff]  ;;  %v12285_v28 = vld [vmem:[#allocation5 + $0x10] sm:$0xff] }
 0x869   :  { %v15787_v20 = vadd.f32 -1.0, %v20388_v33  ;;  %18734 = vmatprep.mubr.msk.f32.mxu1 %vm12025_vm9, %v12342_v43  ;;  %v12283_v12 = vld [vmem:[#allocation5] sm:$0xff]  ;;  %v19082_v54 = vpack.c.bf16 %v15871_v17, %v15870_v8  ;;  %v12286_v6 = vld [vmem:[#allocation5 + $0x18] sm:$0xff]  ;;  %v12288_v41 = vld [vmem:[#allocation5 + $0x28] sm:$0xff] }
 0x86a   :  { %v20390_v49 = vpop.eup %20389  ;;  %v12020_v16 = vsel %vm11700_vm0, %v25985_v56, %v15788_v57  ;;  %v12343_v2 = vld [vmem:[#allocation5 + $0xa9] sm:$0xff]  ;;  %12277 = vst.msk [vmem:[#allocation5 + $0xd0] sm:$0xff] %vm12025_vm9, %v12245_v10  ;;  %v12287_v51 = vld [vmem:[#allocation5 + $0x20] sm:$0xff]  ;;  %v12290_v18 = vld [vmem:[#allocation5 + $0x38] sm:$0xff] }
 0x86b   :  { %v12146_v45 = vld [vmem:[#allocation4 + $0x1b0] ss:$2 sm:$0xff]  ;;  %v12210_v7 = vld [vmem:[#allocation4 + $0x1b1] ss:$2 sm:$0xff]  ;;  %v20392_v9 = vpop.eup %20391  ;;  %12085 = vst.msk [vmem:[#allocation4 + $0x1d8] sm:$0xff] %vm12025_vm9, %v12020_v16  ;;  %v12019_v38 = vsel %vm11699_vm2, %v25992_v4, %v15787_v20  ;;  %v15790_v36 = vadd.f32 -1.0, %v20390_v49  ;;  %18735 = vmatmul.mubr.msk.f32.gmra.mrb[164].mxu1 %vm12025_vm9, %v12343_v2 }
 0x86c   :  { %v12344_v35 = vld [vmem:[#allocation5 + $0xb1] sm:$0xff]  ;;  %v12246_v39 = vmax.f32 %v12146_v45, %v12210_v7  ;;  %12084 = vst.msk [vmem:[#allocation4 + $0x1d0] sm:$0xff] %vm12025_vm9, %v12019_v38  ;;  %v15789_v56 = vadd.f32 -1.0, %v20392_v9  ;;  %v12345_v30 = vld [vmem:[#allocation5 + $0xb9] sm:$0xff]  ;;  %v12346_v23 = vld [vmem:[#allocation5 + $0xc1] sm:$0xff] }
 0x86d   :  { %18737 = vmatprep.mubr.msk.f32.mxu1 %vm12025_vm9, %v12344_v35  ;;  %v12022_v5 = vsel %vm11702_vm3, %v26006_v44, %v15790_v36  ;;  %v15872_v58 = vld [vmem:[%s26573_s3 + $0xa0] sm:$0x3]  ;;  %v15906_v55 = vld [vmem:[%s26573_s3 + $0xa8] sm:$0xff]  ;;  %v12289_v22 = vld [vmem:[#allocation5 + $0x30] sm:$0xff] }
 0x86e   :  { %12278 = vst.msk [vmem:[#allocation5 + $0xd8] sm:$0xff] %vm12025_vm9, %v12246_v39  ;;  %v20394_v4 = vpop.eup %20393  ;;  %12087 = vst.msk [vmem:[#allocation4 + $0x1e8] sm:$0xff] %vm12025_vm9, %v12022_v5  ;;  %v12021_v42 = vsel %vm11701_vm6, %v26009_v21, %v15789_v56  ;;  %v12148_v29 = vld [vmem:[#allocation4 + $0x1c0] ss:$2 sm:$0xff]  ;;  %v12212_v48 = vld [vmem:[#allocation4 + $0x1c1] ss:$2 sm:$0xff] }
 0x86f   :  { %12086 = vst.msk [vmem:[#allocation4 + $0x1e0] sm:$0xff] %vm12025_vm9, %v12021_v42  ;;  %v15792_v52 = vadd.f32 -1.0, %v20394_v4  ;;  %18738 = vmatmul.mubr.msk.f32.gmra.mrb[166].mxu1 %vm12025_vm9, %v12345_v30  ;;  %v12247_v60 = vmax.f32 %v12148_v29, %v12212_v48  ;;  %v12291_v14 = vld [vmem:[#allocation5 + $0x40] sm:$0xff]  ;;  %v12292_v33 = vld [vmem:[#allocation5 + $0x48] sm:$0xff]  ;;  %v12293_v57 = vld [vmem:[#allocation5 + $0x50] sm:$0xff] }
 0x870   :  { %18740 = vmatprep.mubr.msk.f32.mxu1 %vm12025_vm9, %v12346_v23  ;;  %v12294_v43 = vld [vmem:[#allocation5 + $0x58] sm:$0xff]  ;;  %v12295_v10 = vld [vmem:[#allocation5 + $0x60] sm:$0xff]  ;;  %v12296_v20 = vld [vmem:[#allocation5 + $0x68] sm:$0xff] }
 0x871   :  { %v20396_v44 = vpop.eup %20395  ;;  %v12024_v53 = vsel %vm11704_vm7, %v26021_v25, %v15792_v52  ;;  %v12347_v59 = vld [vmem:[#allocation5 + $0xc9] sm:$0xff]  ;;  %12279 = vst.msk [vmem:[#allocation5 + $0xe0] sm:$0xff] %vm12025_vm9, %v12247_v60  ;;  %v12298_v16 = vld [vmem:[#allocation5 + $0x78] sm:$0xff]  ;;  %v12299_v2 = vld [vmem:[#allocation5 + $0x80] sm:$0xff] }
 0x872   :  { %12090 = vst.msk [vmem:[#allocation4 + $0x1f8] sm:$0xf] %vm12089_vm14, %v12024_v53  ;;  %v15791_v21 = vadd.f32 -1.0, %v20396_v44  ;;  %v12297_v49 = vld [vmem:[#allocation5 + $0x70] sm:$0xff]  ;;  %v12300_v45 = vld [vmem:[#allocation5 + $0x88] sm:$0xff]  ;;  %v12302_v9 = vld [vmem:[#allocation5 + $0x98] sm:$0xff] }
 0x873   :  { %18741 = vmatmul.mubr.msk.f32.gmra.mrb[168].mxu1 %vm12025_vm9, %v12347_v59  ;;  %v12150_v19 = vld [vmem:[#allocation4 + $0x1d0] ss:$2 sm:$0xff]  ;;  %v12214_v40 = vld [vmem:[#allocation4 + $0x1d1] ss:$2 sm:$0xff]  ;;  %v12303_v38 = vld [vmem:[#allocation5 + $0xa0] sm:$0xff] }
 0x874   :  { %v12023_v62 = vsel %vm11703_vm1, %v26039_v32, %v15791_v21  ;;  %v12248_v26 = vmax.f32 %v12150_v19, %v12214_v40  ;;  %v12301_v7 = vld [vmem:[#allocation5 + $0x90] sm:$0xff]  ;;  %v12304_v36 = vld [vmem:[#allocation5 + $0xa8] sm:$0xff]  ;;  %v12306_v39 = vld [vmem:[#allocation5 + $0xb8] sm:$0xff] }
 0x875   :  { %v12348_v11 = vld [vmem:[#allocation5 + $0xd1] sm:$0xff]  ;;  %12088 = vst.msk [vmem:[#allocation4 + $0x1f0] sm:$0xff] %vm12025_vm9, %v12023_v62  ;;  %v12307_v56 = vld [vmem:[#allocation5 + $0xc0] sm:$0xff]  ;;  %v12308_v30 = vld [vmem:[#allocation5 + $0xc8] sm:$0xff] }
 0x876   :  { %18743 = vmatprep.mubr.msk.f32.mxu1 %vm12025_vm9, %v12348_v11  ;;  %12280 = vst.msk [vmem:[#allocation5 + $0xe8] sm:$0xff] %vm12025_vm9, %v12248_v26  ;;  %v12152_v25 = vld [vmem:[#allocation4 + $0x1e0] ss:$2 sm:$0xff]  ;;  %v12216_v34 = vld [vmem:[#allocation4 + $0x1e1] ss:$2 sm:$0xff]  ;;  %v12305_v35 = vld [vmem:[#allocation5 + $0xb0] sm:$0xff] }
 0x877   :  { %v12249_v27 = vmax.f32 %v12152_v25, %v12216_v34  ;;  %v12309_v5 = vld [vmem:[#allocation5 + $0xd0] sm:$0xff]  ;;  %v12310_v23 = vld [vmem:[#allocation5 + $0xd8] sm:$0xff]  ;;  %v15909_v60 = vld [vmem:[%s26573_s3 + $0xc0] sm:$0xff] }
 0x878   :  { %v12349_v47 = vld [vmem:[#allocation5 + $0xd9] sm:$0xff]  ;;  %v13011_v44 = vld [vmem:[#allocation5 + $0x2] sm:$0xff]  ;;  %v13012_v59 = vld [vmem:[#allocation5 + $0xa] sm:$0xff] }
 0x879   :  { %18744 = vmatmul.mubr.msk.f32.gmra.mrb[170].mxu1 %vm12025_vm9, %v12349_v47  ;;  %12281 = vst.msk [vmem:[#allocation5 + $0xf0] sm:$0xff] %vm12025_vm9, %v12249_v27  ;;  %v12311_v4 = vld [vmem:[#allocation5 + $0xe0] sm:$0xff]  ;;  %v15908_v52 = vld [vmem:[%s26573_s3 + $0xb8] sm:$0xff]  ;;  %v15910_v21 = vld [vmem:[%s26573_s3 + $0xc8] sm:$0xff] }
 0x87a   :  { %v19090_v53 = vpack.c.bf16 %v15909_v60, %v15908_v52  ;;  %v15911_v19 = vld [vmem:[%s26573_s3 + $0xd0] sm:$0xff]  ;;  %v13014_v11 = vld [vmem:[#allocation5 + $0x1a] sm:$0xff]  ;;  %v13015_v26 = vld [vmem:[#allocation5 + $0x22] sm:$0xff] }
 0x87b   :  { %v13013_v40 = vld [vmem:[#allocation5 + $0x12] sm:$0xff]  ;;  %v19094_v62 = vpack.c.bf16 %v15911_v19, %v15910_v21  ;;  %v13016_v25 = vld [vmem:[#allocation5 + $0x2a] sm:$0xff]  ;;  %v15946_v27 = vld [vmem:[%s26573_s3 + $0xe0] sm:$0xff] }
 0x87c   :  { %v12154_v46 = vld [vmem:[#allocation4 + $0x1f0] ss:$2 sm:$0xff]  ;;  %v12218_v37 = vld [vmem:[#allocation4 + $0x1f1] ss:$2 sm:$0xff]  ;;  %v15947_v47 = vld [vmem:[%s26573_s3 + $0xe8] sm:$0xff] }
 0x87d   :  { %v12350_v31 = vld [vmem:[#allocation5 + $0xe1] sm:$0xff]  ;;  %v12250_v32 = vmax.f32 %v12154_v46, %v12218_v37  ;;  %v15912_v34 = vld [vmem:[%s26573_s3 + $0xd8] sm:$0x3]  ;;  %v26190_v37 = vpack.c.bf16 %v15947_v47, %v15946_v27  ;;  %v13024_v50 = vld [vmem:[#allocation5 + $0x6a] sm:$0xff] }
 0x87e   :  { %18746 = vmatprep.mubr.msk.f32.mxu1 %vm12025_vm9, %v12350_v31  ;;  %v12312_v42 = vld [vmem:[#allocation5 + $0xe8] sm:$0xff]  ;;  %v13017_v46 = vld [vmem:[#allocation5 + $0x32] sm:$0xff]  ;;  %v13018_v31 = vld [vmem:[#allocation5 + $0x3a] sm:$0xff] }
 0x87f   :  { %12282 = vst.msk [vmem:[#allocation5 + $0xf8] sm:$0xff] %vm12025_vm9, %v12250_v32  ;;  %v13019_v32 = vld [vmem:[#allocation5 + $0x42] sm:$0xff]  ;;  %v13028_v8 = vld [vmem:[#allocation5 + $0x8a] sm:$0xff]  ;;  %v13029_v17 = vld [vmem:[#allocation5 + $0x92] sm:$0xff] }
 0x880   :  { %v12351_v1 = vld [vmem:[#allocation5 + $0xe9] sm:$0xff]  ;;  %v13422_v52 = vld [vmem:[#allocation5 + $0x7b] sm:$0xff] }
 0x881   :  { %18747 = vmatmul.mubr.msk.f32.gmra.mrb[172].mxu1 %vm12025_vm9, %v12351_v1  ;;  %v12313_v29 = vld [vmem:[#allocation5 + $0xf0] sm:$0xff]  ;;  %v13023_v61 = vld [vmem:[#allocation5 + $0x62] sm:$0xff] }
 0x882   :  { %v13020_v1 = vld [vmem:[#allocation5 + $0x4a] sm:$0xff] }
 0x883   :  { %v13423_v60 = vld [vmem:[#allocation5 + $0x83] sm:$0xff]  ;;  %v13428_v19 = vld [vmem:[#allocation5 + $0xab] sm:$0xff] }
 0x884   :  { %v13427_v21 = vld [vmem:[#allocation5 + $0xa3] sm:$0xff]  ;;  %v13436_v47 = vld [vmem:[#allocation5 + $0xeb] sm:$0xff] }
 0x885   :  { %v13435_v27 = vld [vmem:[#allocation5 + $0xe3] sm:$0xff] }
 0x886   :  { %v12352_v13 = vld [vmem:[#allocation5 + $0xf1] sm:$0xff]  ;;  %v12353_v24 = vld [vmem:[#allocation5 + $0xf9] sm:$0xf] }
 0x887   :  { %18749 = vmatprep.mubr.msk.f32.mxu1 %vm12025_vm9, %v12352_v13  ;;  %v12314_v48 = vld [vmem:[#allocation5 + $0xf8] sm:$0xf] }
 0x888   :  { %18750 = vmatmul.mubr.msk.f32.gmra.mrb[174].mxu1 %vm12025_vm9, %v12353_v24  ;;  %v13021_v13 = vld [vmem:[#allocation5 + $0x52] sm:$0xff]  ;;  %v13022_v24 = vld [vmem:[#allocation5 + $0x5a] sm:$0xff] }
 0x889   :  { %18766 = vmatprep.mubr.msk.f32.mxu1 %vm12025_vm9, %v12283_v12  ;;  %v13025_v12 = vld [vmem:[#allocation5 + $0x72] sm:$0xff] }
 0x88c   :  { %18767 = vmatmul.mubr.msk.f32.vlgmr.msra.gmra.mrb[144].mxu1 %vm12025_vm9, %v12284_v3  ;;  %v13027_v3 = vld [vmem:[#allocation5 + $0x82] sm:$0xff] }
 0x88d   :  { %18769 = vmatprep.mubr.msk.f32.mxu1 %vm12025_vm9, %v12285_v28  ;;  %19077 = vmatpush3.bf16.msra.mxu1 %v26055_v15  ;;  %v15907_v15 = vld [vmem:[%s26573_s3 + $0xb0] sm:$0xff]  ;;  %v13030_v28 = vld [vmem:[#allocation5 + $0x9a] sm:$0xff] }
 0x88e   :  { %19079 = vmatprep.subr.bf16.mxu1 %v19078_v63  ;;  %v26131_v0 = vpack.c.bf16 %v15907_v15, %v15906_v55  ;;  %v13036_v55 = vld [vmem:[#allocation5 + $0xca] sm:$0xff]  ;;  %v13037_v15 = vld [vmem:[#allocation5 + $0xd2] sm:$0xff] }
 0x890   :  { %18770 = vmatmul.mubr.msk.f32.gmra.mrb[146].mxu1 %vm12025_vm9, %v12286_v6  ;;  %v13032_v6 = vld [vmem:[#allocation5 + $0xaa] sm:$0xff] }
 0x891   :  { %18772 = vmatprep.mubr.msk.f32.mxu1 %vm12025_vm9, %v12287_v51  ;;  %19081 = vmatpush3.bf16.msra.mxu1 %v19078_v63  ;;  %v13026_v63 = vld [vmem:[#allocation5 + $0x7a] sm:$0xff]  ;;  %v13033_v51 = vld [vmem:[#allocation5 + $0xb2] sm:$0xff] }
 0x892   :  { %19083 = vmatprep.subr.bf16.mxu1 %v19082_v54 }
 0x894   :  { %18773 = vmatmul.mubr.msk.f32.gmra.mrb[148].mxu1 %vm12025_vm9, %v12288_v41  ;;  %v13034_v41 = vld [vmem:[#allocation5 + $0xba] sm:$0xff] }
 0x895   :  { %18775 = vmatprep.mubr.msk.f32.mxu1 %vm12025_vm9, %v12289_v22  ;;  %19085 = vmatpush3.bf16.msra.mxu1 %v19082_v54  ;;  %v13031_v54 = vld [vmem:[#allocation5 + $0xa2] sm:$0xff]  ;;  %v13038_v22 = vld [vmem:[#allocation5 + $0xda] sm:$0xff] }
 0x896   :  { %18826 = vmatprep.subr.msk.mxu1 %vm12458_vm4, %v15872_v58 }
 0x898   :  { %18776 = vmatmul.mubr.msk.f32.gmra.mrb[150].mxu1 %vm12025_vm9, %v12290_v18  ;;  %v13040_v18 = vld [vmem:[#allocation5 + $0xea] sm:$0xff] }
 0x899   :  { %18778 = vmatprep.mubr.msk.f32.mxu1 %vm12025_vm9, %v12291_v14  ;;  %18827 = vmatpush3.msk.msra.mxu1 %vm12458_vm4, %v15872_v58  ;;  %v13035_v58 = vld [vmem:[#allocation5 + $0xc2] sm:$0xff]  ;;  %v13041_v14 = vld [vmem:[#allocation5 + $0xf2] sm:$0xff] }
 0x89a   :  { %19087 = vmatprep.subr.bf16.mxu1 %v26131_v0 }
 0x89c   :  { %18779 = vmatmul.mubr.msk.f32.gmra.mrb[152].mxu1 %vm12025_vm9, %v12292_v33  ;;  %v13042_v33 = vld [vmem:[#allocation5 + $0xfa] sm:$0xf] }
 0x89d   :  { %18781 = vmatprep.mubr.msk.f32.mxu1 %vm12025_vm9, %v12293_v57  ;;  %v15948_v57 = vld [vmem:[%s26573_s3 + $0xf0] sm:$0xff] }
 0x8a0   :  { %18782 = vmatmul.mubr.msk.f32.gmra.mrb[154].mxu1 %vm12025_vm9, %v12294_v43  ;;  %v15949_v43 = vld [vmem:[%s26573_s3 + $0xf8] sm:$0xff] }
 0x8a1   :  { %18784 = vmatprep.mubr.msk.f32.mxu1 %vm12025_vm9, %v12295_v10  ;;  %v13407_v10 = vld [vmem:[#allocation5 + $0x3] sm:$0xff] }
 0x8a4   :  { %18785 = vmatmul.mubr.msk.f32.gmra.mrb[156].mxu1 %vm12025_vm9, %v12296_v20  ;;  %v19102_v20 = vpack.c.bf16 %v15949_v43, %v15948_v57  ;;  %v13828_v57 = vld [vmem:[#allocation5 + $0xcc] sm:$0xff]  ;;  %v13829_v43 = vld [vmem:[#allocation5 + $0xd4] sm:$0xff] }
 0x8a5   :  { %18787 = vmatprep.mubr.msk.f32.mxu1 %vm12025_vm9, %v12297_v49  ;;  %v13408_v49 = vld [vmem:[#allocation5 + $0xb] sm:$0xff] }
 0x8a8   :  { %18788 = vmatmul.mubr.msk.f32.gmra.mrb[158].mxu1 %vm12025_vm9, %v12298_v16  ;;  %v15950_v16 = vld [vmem:[%s26573_s3 + $0x100] sm:$0xff] }
 0x8a9   :  { %18790 = vmatprep.mubr.msk.f32.mxu1 %vm12025_vm9, %v12299_v2  ;;  %v15951_v2 = vld [vmem:[%s26573_s3 + $0x108] sm:$0xff] }
 0x8ac   :  { %18791 = vmatmul.mubr.msk.f32.gmra.mrb[160].mxu1 %vm12025_vm9, %v12300_v45  ;;  %v13409_v45 = vld [vmem:[#allocation5 + $0x13] sm:$0xff] }
 0x8ad   :  { %18793 = vmatprep.mubr.msk.f32.mxu1 %vm12025_vm9, %v12301_v7  ;;  %v19106_v7 = vpack.c.bf16 %v15951_v2, %v15950_v16  ;;  %v13833_v16 = vld [vmem:[#allocation5 + $0xf4] sm:$0xff]  ;;  %v13834_v2 = vld [vmem:[#allocation5 + $0xfc] sm:$0xf] }
 0x8b0   :  { %18794 = vmatmul.mubr.msk.f32.gmra.mrb[162].mxu1 %vm12025_vm9, %v12302_v9  ;;  %v13410_v9 = vld [vmem:[#allocation5 + $0x1b] sm:$0xff] }
 0x8b1   :  { %18796 = vmatprep.mubr.msk.f32.mxu1 %vm12025_vm9, %v12303_v38  ;;  %v13411_v38 = vld [vmem:[#allocation5 + $0x23] sm:$0xff] }
 0x8b4   :  { %18797 = vmatmul.mubr.msk.f32.gmra.mrb[164].mxu1 %vm12025_vm9, %v12304_v36  ;;  %v13412_v36 = vld [vmem:[#allocation5 + $0x2b] sm:$0xff] }
 0x8b5   :  { %18799 = vmatprep.mubr.msk.f32.mxu1 %vm12025_vm9, %v12305_v35  ;;  %v15952_v35 = vld [vmem:[%s26573_s3 + $0x110] sm:$0x3] }
 0x8b8   :  { %18800 = vmatmul.mubr.msk.f32.gmra.mrb[166].mxu1 %vm12025_vm9, %v12306_v39  ;;  %v13413_v39 = vld [vmem:[#allocation5 + $0x33] sm:$0xff] }
 0x8b9   :  { %18802 = vmatprep.mubr.msk.f32.mxu1 %vm12025_vm9, %v12307_v56  ;;  %v13414_v56 = vld [vmem:[#allocation5 + $0x3b] sm:$0xff] }
 0x8bc   :  { %18803 = vmatmul.mubr.msk.f32.gmra.mrb[168].mxu1 %vm12025_vm9, %v12308_v30  ;;  %v13415_v30 = vld [vmem:[#allocation5 + $0x43] sm:$0xff] }
 0x8bd   :  { %18805 = vmatprep.mubr.msk.f32.mxu1 %vm12025_vm9, %v12309_v5  ;;  %v13416_v5 = vld [vmem:[#allocation5 + $0x4b] sm:$0xff] }
 0x8c0   :  { %18806 = vmatmul.mubr.msk.f32.gmra.mrb[170].mxu1 %vm12025_vm9, %v12310_v23  ;;  %v13417_v23 = vld [vmem:[#allocation5 + $0x53] sm:$0xff] }
 0x8c1   :  { %18808 = vmatprep.mubr.msk.f32.mxu1 %vm12025_vm9, %v12311_v4  ;;  %v13418_v4 = vld [vmem:[#allocation5 + $0x5b] sm:$0xff] }
 0x8c4   :  { %18809 = vmatmul.mubr.msk.f32.gmra.mrb[172].mxu1 %vm12025_vm9, %v12312_v42  ;;  %v13419_v42 = vld [vmem:[#allocation5 + $0x63] sm:$0xff] }
 0x8c5   :  { %18811 = vmatprep.mubr.msk.f32.mxu1 %vm12025_vm9, %v12313_v29  ;;  %v13420_v29 = vld [vmem:[#allocation5 + $0x6b] sm:$0xff] }
 0x8c8   :  { %18812 = vmatmul.mubr.msk.f32.gmra.mrb[174].mxu1 %vm12025_vm9, %v12314_v48  ;;  %v13421_v48 = vld [vmem:[#allocation5 + $0x73] sm:$0xff] }
 0x8c9   :  { %18828 = vmatprep.mubr.msk.f32.mxu1 %vm12025_vm9, %v13011_v44  ;;  %v13424_v44 = vld [vmem:[#allocation5 + $0x8b] sm:$0xff] }
 0x8cc   :  { %18829 = vmatmul.mubr.msk.f32.vlgmr.msra.gmra.mrb[144].mxu1 %vm12025_vm9, %v13012_v59  ;;  %v13426_v59 = vld [vmem:[#allocation5 + $0x9b] sm:$0xff] }
 0x8cd   :  { %18831 = vmatprep.mubr.msk.f32.mxu1 %vm12025_vm9, %v13013_v40  ;;  %19089 = vmatpush3.bf16.msra.mxu1 %v26131_v0  ;;  %v13039_v0 = vld [vmem:[#allocation5 + $0xe2] sm:$0xff]  ;;  %v13429_v40 = vld [vmem:[#allocation5 + $0xb3] sm:$0xff] }
 0x8ce   :  { %19091 = vmatprep.subr.bf16.mxu1 %v19090_v53 }
 0x8d0   :  { %18832 = vmatmul.mubr.msk.f32.gmra.mrb[146].mxu1 %vm12025_vm9, %v13014_v11  ;;  %v13431_v11 = vld [vmem:[#allocation5 + $0xc3] sm:$0xff] }
 0x8d1   :  { %18834 = vmatprep.mubr.msk.f32.mxu1 %vm12025_vm9, %v13015_v26  ;;  %19093 = vmatpush3.bf16.msra.mxu1 %v19090_v53  ;;  %v13425_v53 = vld [vmem:[#allocation5 + $0x93] sm:$0xff]  ;;  %v13432_v26 = vld [vmem:[#allocation5 + $0xcb] sm:$0xff] }
 0x8d2   :  { %19095 = vmatprep.subr.bf16.mxu1 %v19094_v62 }
 0x8d4   :  { %18835 = vmatmul.mubr.msk.f32.gmra.mrb[148].mxu1 %vm12025_vm9, %v13016_v25  ;;  %v13433_v25 = vld [vmem:[#allocation5 + $0xd3] sm:$0xff] }
 0x8d5   :  { %18837 = vmatprep.mubr.msk.f32.mxu1 %vm12025_vm9, %v13017_v46  ;;  %19097 = vmatpush3.bf16.msra.mxu1 %v19094_v62  ;;  %v13430_v62 = vld [vmem:[#allocation5 + $0xbb] sm:$0xff]  ;;  %v13437_v46 = vld [vmem:[#allocation5 + $0xf3] sm:$0xff] }
 0x8d6   :  { %18888 = vmatprep.subr.msk.mxu1 %vm12458_vm4, %v15912_v34 }
 0x8d8   :  { %18838 = vmatmul.mubr.msk.f32.gmra.mrb[150].mxu1 %vm12025_vm9, %v13018_v31  ;;  %v13803_v31 = vld [vmem:[#allocation5 + $0x4] sm:$0xff] }
 0x8d9   :  { %18840 = vmatprep.mubr.msk.f32.mxu1 %vm12025_vm9, %v13019_v32  ;;  %18889 = vmatpush3.msk.msra.mxu1 %vm12458_vm4, %v15912_v34  ;;  %v13434_v34 = vld [vmem:[#allocation5 + $0xdb] sm:$0xff]  ;;  %v13804_v32 = vld [vmem:[#allocation5 + $0xc] sm:$0xff] }
 0x8da   :  { %19099 = vmatprep.subr.bf16.mxu1 %v26190_v37 }
 0x8dc   :  { %18841 = vmatmul.mubr.msk.f32.gmra.mrb[152].mxu1 %vm12025_vm9, %v13020_v1  ;;  %v13805_v1 = vld [vmem:[#allocation5 + $0x14] sm:$0xff] }
 0x8dd   :  { %18843 = vmatprep.mubr.msk.f32.mxu1 %vm12025_vm9, %v13021_v13  ;;  %v13806_v13 = vld [vmem:[#allocation5 + $0x1c] sm:$0xff] }
 0x8e0   :  { %18844 = vmatmul.mubr.msk.f32.gmra.mrb[154].mxu1 %vm12025_vm9, %v13022_v24  ;;  %v13807_v24 = vld [vmem:[#allocation5 + $0x24] sm:$0xff] }
 0x8e1   :  { %18846 = vmatprep.mubr.msk.f32.mxu1 %vm12025_vm9, %v13023_v61  ;;  %v13808_v61 = vld [vmem:[#allocation5 + $0x2c] sm:$0xff] }
 0x8e4   :  { %18847 = vmatmul.mubr.msk.f32.gmra.mrb[156].mxu1 %vm12025_vm9, %v13024_v50  ;;  %v13809_v50 = vld [vmem:[#allocation5 + $0x34] sm:$0xff] }
 0x8e5   :  { %18849 = vmatprep.mubr.msk.f32.mxu1 %vm12025_vm9, %v13025_v12  ;;  %v13810_v12 = vld [vmem:[#allocation5 + $0x3c] sm:$0xff] }
 0x8e8   :  { %18850 = vmatmul.mubr.msk.f32.gmra.mrb[158].mxu1 %vm12025_vm9, %v13026_v63  ;;  %v13811_v63 = vld [vmem:[#allocation5 + $0x44] sm:$0xff] }
 0x8e9   :  { %18852 = vmatprep.mubr.msk.f32.mxu1 %vm12025_vm9, %v13027_v3  ;;  %v13812_v3 = vld [vmem:[#allocation5 + $0x4c] sm:$0xff] }
 0x8ec   :  { %18853 = vmatmul.mubr.msk.f32.gmra.mrb[160].mxu1 %vm12025_vm9, %v13028_v8  ;;  %v13813_v8 = vld [vmem:[#allocation5 + $0x54] sm:$0xff] }
 0x8ed   :  { %18855 = vmatprep.mubr.msk.f32.mxu1 %vm12025_vm9, %v13029_v17  ;;  %v13814_v17 = vld [vmem:[#allocation5 + $0x5c] sm:$0xff] }
 0x8f0   :  { %18856 = vmatmul.mubr.msk.f32.gmra.mrb[162].mxu1 %vm12025_vm9, %v13030_v28  ;;  %v13815_v28 = vld [vmem:[#allocation5 + $0x64] sm:$0xff] }
 0x8f1   :  { %18858 = vmatprep.mubr.msk.f32.mxu1 %vm12025_vm9, %v13031_v54  ;;  %v13816_v54 = vld [vmem:[#allocation5 + $0x6c] sm:$0xff] }
 0x8f4   :  { %18859 = vmatmul.mubr.msk.f32.gmra.mrb[164].mxu1 %vm12025_vm9, %v13032_v6  ;;  %v13817_v6 = vld [vmem:[#allocation5 + $0x74] sm:$0xff] }
 0x8f5   :  { %18861 = vmatprep.mubr.msk.f32.mxu1 %vm12025_vm9, %v13033_v51  ;;  %v13818_v51 = vld [vmem:[#allocation5 + $0x7c] sm:$0xff] }
 0x8f8   :  { %18862 = vmatmul.mubr.msk.f32.gmra.mrb[166].mxu1 %vm12025_vm9, %v13034_v41  ;;  %v13819_v41 = vld [vmem:[#allocation5 + $0x84] sm:$0xff] }
 0x8f9   :  { %18864 = vmatprep.mubr.msk.f32.mxu1 %vm12025_vm9, %v13035_v58  ;;  %v13820_v58 = vld [vmem:[#allocation5 + $0x8c] sm:$0xff] }
 0x8fc   :  { %18865 = vmatmul.mubr.msk.f32.gmra.mrb[168].mxu1 %vm12025_vm9, %v13036_v55  ;;  %v13821_v55 = vld [vmem:[#allocation5 + $0x94] sm:$0xff] }
 0x8fd   :  { %18867 = vmatprep.mubr.msk.f32.mxu1 %vm12025_vm9, %v13037_v15  ;;  %v13822_v15 = vld [vmem:[#allocation5 + $0x9c] sm:$0xff] }
 0x900   :  { %18868 = vmatmul.mubr.msk.f32.gmra.mrb[170].mxu1 %vm12025_vm9, %v13038_v22  ;;  %v13823_v22 = vld [vmem:[#allocation5 + $0xa4] sm:$0xff] }
 0x901   :  { %18870 = vmatprep.mubr.msk.f32.mxu1 %vm12025_vm9, %v13039_v0  ;;  %v13824_v0 = vld [vmem:[#allocation5 + $0xac] sm:$0xff] }
 0x904   :  { %18871 = vmatmul.mubr.msk.f32.gmra.mrb[172].mxu1 %vm12025_vm9, %v13040_v18  ;;  %v13825_v18 = vld [vmem:[#allocation5 + $0xb4] sm:$0xff] }
 0x905   :  { %18873 = vmatprep.mubr.msk.f32.mxu1 %vm12025_vm9, %v13041_v14  ;;  %v13826_v14 = vld [vmem:[#allocation5 + $0xbc] sm:$0xff] }
 0x908   :  { %18874 = vmatmul.mubr.msk.f32.gmra.mrb[174].mxu1 %vm12025_vm9, %v13042_v33  ;;  %v13827_v33 = vld [vmem:[#allocation5 + $0xc4] sm:$0xff] }
 0x909   :  { %18890 = vmatprep.mubr.msk.f32.mxu1 %vm12025_vm9, %v13407_v10  ;;  %v13830_v10 = vld [vmem:[#allocation5 + $0xdc] sm:$0xff] }
 0x90c   :  { %18891 = vmatmul.mubr.msk.f32.vlgmr.msra.gmra.mrb[144].mxu1 %vm12025_vm9, %v13408_v49  ;;  %v13832_v49 = vld [vmem:[#allocation5 + $0xec] sm:$0xff] }
 0x90d   :  { %18893 = vmatprep.mubr.msk.f32.mxu1 %vm12025_vm9, %v13409_v45  ;;  %19101 = vmatpush3.bf16.msra.mxu1 %v26190_v37  ;;  %v13438_v37 = vld [vmem:[#allocation5 + $0xfb] sm:$0xf]  ;;  %v26304_v45 = vld [vmem:[%s26574_s4 + $0x4] ss:$0 sm:$0xff] }
 0x90e   :  { %19103 = vmatprep.subr.bf16.mxu1 %v19102_v20 }
 0x910   :  { %18894 = vmatmul.mubr.msk.f32.gmra.mrb[146].mxu1 %vm12025_vm9, %v13410_v9 }
 0x911   :  { %18896 = vmatprep.mubr.msk.f32.mxu1 %vm12025_vm9, %v13411_v38  ;;  %19105 = vmatpush3.bf16.msra.mxu1 %v19102_v20  ;;  %v13831_v20 = vld [vmem:[#allocation5 + $0xe4] sm:$0xff] }
 0x912   :  { %19107 = vmatprep.subr.bf16.mxu1 %v19106_v7 }
 0x914   :  { %18897 = vmatmul.mubr.msk.f32.gmra.mrb[148].mxu1 %vm12025_vm9, %v13412_v36 }
 0x915   :  { %18899 = vmatprep.mubr.msk.f32.mxu1 %vm12025_vm9, %v13413_v39  ;;  %19109 = vmatpush3.bf16.msra.mxu1 %v19106_v7  ;;  %v26309_v7 = vld [vmem:[%s26574_s4 + $0x5] ss:$0 sm:$0xff]  ;;  %s20495_s4 = smov [#allocation7]  }
 0x916   :  { %18950 = vmatprep.subr.msk.mxu1 %vm12458_vm4, %v15952_v35  ;;  %s14596_s26 = sshll.u32 %s20495_s4, 4  ;;  %s14597_s26 = int_to_ptr.vmem [resolvable:$true] %s14596_s26 }
 0x917   :  { %s20469_s27 = scalar_lea.vmem %s14597_s26, 2048  ;;  %p20474_p1 = scmp.lt.s32.totalorder %s14597_s26, %s14597_s26 }
 0x918   :  { %18900 = vmatmul.mubr.msk.f32.gmra.mrb[150].mxu1 %vm12025_vm9, %v13414_v56  ;;  %p20470_p0 = scmp.ne.s32.totalorder %s14597_s26, %s20469_s27  ;;  %p20475_p2 = scmp.lt.s32.totalorder %s20469_s27, %s20469_s27 }
 0x919   :  { %18902 = vmatprep.mubr.msk.f32.mxu1 %vm12025_vm9, %v13415_v30  ;;  %18951 = vmatpush3.msk.msra.mxu1 %vm12458_vm4, %v15952_v35 }
 0x91a   :  { %p20476_p3 = por %p20475_p2, %p20474_p1 }
 0x91c   :  { %18903 = vmatmul.mubr.msk.f32.gmra.mrb[152].mxu1 %vm12025_vm9, %v13416_v5  ;;  %p20477_p4 = pnand %p20476_p3, %p20470_p0 }
 0x91d   :  { %18905 = vmatprep.mubr.msk.f32.mxu1 %vm12025_vm9, %v13417_v23 }
 0x920   :  { %18906 = vmatmul.mubr.msk.f32.gmra.mrb[154].mxu1 %vm12025_vm9, %v13418_v4 }
 0x921   :  { %18908 = vmatprep.mubr.msk.f32.mxu1 %vm12025_vm9, %v13419_v42 }
 0x924   :  { %18909 = vmatmul.mubr.msk.f32.gmra.mrb[156].mxu1 %vm12025_vm9, %v13420_v29 }
 0x925   :  { %18911 = vmatprep.mubr.msk.f32.mxu1 %vm12025_vm9, %v13421_v48 }
 0x928   :  { %18912 = vmatmul.mubr.msk.f32.gmra.mrb[158].mxu1 %vm12025_vm9, %v13422_v52 }
 0x929   :  { %18914 = vmatprep.mubr.msk.f32.mxu1 %vm12025_vm9, %v13423_v60 }
 0x92c   :  { %18915 = vmatmul.mubr.msk.f32.gmra.mrb[160].mxu1 %vm12025_vm9, %v13424_v44 }
 0x92d   :  { %18917 = vmatprep.mubr.msk.f32.mxu1 %vm12025_vm9, %v13425_v53 }
 0x930   :  { %18918 = vmatmul.mubr.msk.f32.gmra.mrb[162].mxu1 %vm12025_vm9, %v13426_v59 }
 0x931   :  { %18920 = vmatprep.mubr.msk.f32.mxu1 %vm12025_vm9, %v13427_v21 }
 0x934   :  { %18921 = vmatmul.mubr.msk.f32.gmra.mrb[164].mxu1 %vm12025_vm9, %v13428_v19 }
 0x935   :  { %18923 = vmatprep.mubr.msk.f32.mxu1 %vm12025_vm9, %v13429_v40 }
 0x938   :  { %18924 = vmatmul.mubr.msk.f32.gmra.mrb[166].mxu1 %vm12025_vm9, %v13430_v62 }
 0x939   :  { %18926 = vmatprep.mubr.msk.f32.mxu1 %vm12025_vm9, %v13431_v11 }
 0x93c   :  { %18927 = vmatmul.mubr.msk.f32.gmra.mrb[168].mxu1 %vm12025_vm9, %v13432_v26 }
 0x93d   :  { %18929 = vmatprep.mubr.msk.f32.mxu1 %vm12025_vm9, %v13433_v25 }
 0x940   :  { %18930 = vmatmul.mubr.msk.f32.gmra.mrb[170].mxu1 %vm12025_vm9, %v13434_v34 }
 0x941   :  { %18932 = vmatprep.mubr.msk.f32.mxu1 %vm12025_vm9, %v13435_v27 }
 0x944   :  { %18933 = vmatmul.mubr.msk.f32.gmra.mrb[172].mxu1 %vm12025_vm9, %v13436_v47 }
 0x945   :  { %18935 = vmatprep.mubr.msk.f32.mxu1 %vm12025_vm9, %v13437_v46 }
 0x948   :  { %18936 = vmatmul.mubr.msk.f32.gmra.mrb[174].mxu1 %vm12025_vm9, %v13438_v37 }
 0x949   :  { %18952 = vmatprep.mubr.msk.f32.mxu1 %vm12025_vm9, %v13803_v31 }
 0x94c   :  { %18953 = vmatmul.mubr.msk.f32.vlgmr.msra.gmra.mrb[144].mxu1 %vm12025_vm9, %v13804_v32 }
 0x94d   :  { %18955 = vmatprep.mubr.msk.f32.mxu1 %vm12025_vm9, %v13805_v1 }
 0x950   :  { %18956 = vmatmul.mubr.msk.f32.gmra.mrb[146].mxu1 %vm12025_vm9, %v13806_v13 }
 0x951   :  { %18958 = vmatprep.mubr.msk.f32.mxu1 %vm12025_vm9, %v13807_v24 }
 0x954   :  { %18959 = vmatmul.mubr.msk.f32.gmra.mrb[148].mxu1 %vm12025_vm9, %v13808_v61 }
 0x955   :  { %18961 = vmatprep.mubr.msk.f32.mxu1 %vm12025_vm9, %v13809_v50 }
 0x958   :  { %18962 = vmatmul.mubr.msk.f32.gmra.mrb[150].mxu1 %vm12025_vm9, %v13810_v12 }
 0x959   :  { %18964 = vmatprep.mubr.msk.f32.mxu1 %vm12025_vm9, %v13811_v63 }
 0x95c   :  { %18965 = vmatmul.mubr.msk.f32.gmra.mrb[152].mxu1 %vm12025_vm9, %v13812_v3 }
 0x95d   :  { %18967 = vmatprep.mubr.msk.f32.mxu1 %vm12025_vm9, %v13813_v8 }
 0x960   :  { %18968 = vmatmul.mubr.msk.f32.gmra.mrb[154].mxu1 %vm12025_vm9, %v13814_v17 }
 0x961   :  { %18970 = vmatprep.mubr.msk.f32.mxu1 %vm12025_vm9, %v13815_v28 }
 0x964   :  { %18971 = vmatmul.mubr.msk.f32.gmra.mrb[156].mxu1 %vm12025_vm9, %v13816_v54 }
 0x965   :  { %18973 = vmatprep.mubr.msk.f32.mxu1 %vm12025_vm9, %v13817_v6 }
 0x968   :  { %18974 = vmatmul.mubr.msk.f32.gmra.mrb[158].mxu1 %vm12025_vm9, %v13818_v51 }
 0x969   :  { %18976 = vmatprep.mubr.msk.f32.mxu1 %vm12025_vm9, %v13819_v41 }
 0x96c   :  { %18977 = vmatmul.mubr.msk.f32.gmra.mrb[160].mxu1 %vm12025_vm9, %v13820_v58 }
 0x96d   :  { %18979 = vmatprep.mubr.msk.f32.mxu1 %vm12025_vm9, %v13821_v55 }
 0x970   :  { %18980 = vmatmul.mubr.msk.f32.gmra.mrb[162].mxu1 %vm12025_vm9, %v13822_v15 }
 0x971   :  { %18982 = vmatprep.mubr.msk.f32.mxu1 %vm12025_vm9, %v13823_v22 }
 0x974   :  { %18983 = vmatmul.mubr.msk.f32.gmra.mrb[164].mxu1 %vm12025_vm9, %v13824_v0 }
 0x975   :  { %18985 = vmatprep.mubr.msk.f32.mxu1 %vm12025_vm9, %v13825_v18 }
 0x978   :  { %18986 = vmatmul.mubr.msk.f32.gmra.mrb[166].mxu1 %vm12025_vm9, %v13826_v14 }
 0x979   :  { %18988 = vmatprep.mubr.msk.f32.mxu1 %vm12025_vm9, %v13827_v33 }
 0x97c   :  { %18989 = vmatmul.mubr.msk.f32.gmra.mrb[168].mxu1 %vm12025_vm9, %v13828_v57 }
 0x97d   :  { %18991 = vmatprep.mubr.msk.f32.mxu1 %vm12025_vm9, %v13829_v43 }
 0x980   :  { %18992 = vmatmul.mubr.msk.f32.gmra.mrb[170].mxu1 %vm12025_vm9, %v13830_v10 }
 0x981   :  { %18994 = vmatprep.mubr.msk.f32.mxu1 %vm12025_vm9, %v13831_v20 }
 0x984   :  { %18995 = vmatmul.mubr.msk.f32.gmra.mrb[172].mxu1 %vm12025_vm9, %v13832_v49 }
 0x985   :  { %18997 = vmatprep.mubr.msk.f32.mxu1 %vm12025_vm9, %v13833_v16 }
 0x988   :  { %18998 = vmatmul.mubr.msk.f32.gmra.mrb[174].mxu1 %vm12025_vm9, %v13834_v2 }
 0xa1f   :  { %v18954_v9 = vpop.f32.mrb[144].mxu1 }
 0xa20   :  { %v14204_v38 = vmul.f32 %v18954_v9, %v26304_v45  ;;  %v14008_v36 = vpop.f32.mrb[145].mxu1 }
 0xa21   :  { %v14203_v35 = vmul.f32 %v26304_v45, %v14008_v36 }
 0xa22   :  { %v14240_v39 = vadd.f32 %v26309_v7, %v14204_v38 }
 0xa23   :  { %v26315_v56 = vadd.f32 %v26309_v7, %v14203_v35  ;;  %v18957_v30 = vpop.f32.mrb[146].mxu1 }
 0xa24   :  { %v14304_v5 = vmin.f32 %v14240_v39, 0.0  ;;  %v14206_v23 = vmul.f32 %v18957_v30, %v26304_v45  ;;  %v14018_v4 = vpop.f32.mrb[147].mxu1  ;;  %vm14272_vm4 = vcmp.gt.f32.partialorder %v14240_v39, 0.0 }
 0xa25   :  { %v14303_v42 = vmin.f32 %v26315_v56, 0.0  ;;  %v14205_v29 = vmul.f32 %v26304_v45, %v14018_v4  ;;  %vm14271_vm9 = vcmp.gt.f32.partialorder %v26315_v56, 0.0 }
 0xa26   :  { %v14337_v48 = vmul.f32 1.442695, %v14304_v5  ;;  %v26321_v52 = vadd.f32 %v26309_v7, %v14206_v23 }
 0xa27   :  { %v14335_v60 = vmul.f32 1.442695, %v14303_v42  ;;  %v26324_v44 = vadd.f32 %v26309_v7, %v14205_v29  ;;  %v18960_v53 = vpop.f32.mrb[148].mxu1 }
 0xa28   :  { %20397 = vpow2.f32 %v14337_v48  ;;  %v14306_v59 = vmin.f32 %v26321_v52, 0.0  ;;  %v14208_v21 = vmul.f32 %v18960_v53, %v26304_v45  ;;  %v14028_v19 = vpop.f32.mrb[149].mxu1  ;;  %vm14274_vm14 = vcmp.gt.f32.partialorder %v26321_v52, 0.0 }
 0xa29   :  { %20399 = vpow2.f32 %v14335_v60  ;;  %v14305_v40 = vmin.f32 %v26324_v44, 0.0  ;;  %v14207_v62 = vmul.f32 %v26304_v45, %v14028_v19  ;;  %vm14273_vm8 = vcmp.gt.f32.partialorder %v26324_v44, 0.0 }
 0xa2a   :  { %v14341_v11 = vmul.f32 1.442695, %v14306_v59  ;;  %v26331_v26 = vadd.f32 %v26309_v7, %v14208_v21 }
 0xa2b   :  { %v14339_v25 = vmul.f32 1.442695, %v14305_v40  ;;  %v26334_v34 = vadd.f32 %v26309_v7, %v14207_v62  ;;  %v18963_v27 = vpop.f32.mrb[150].mxu1 }
 0xa2c   :  { %20401 = vpow2.f32 %v14341_v11  ;;  %v14308_v47 = vmin.f32 %v26331_v26, 0.0  ;;  %v14210_v46 = vmul.f32 %v18963_v27, %v26304_v45  ;;  %v14038_v37 = vpop.f32.mrb[151].mxu1  ;;  %vm14276_vm5 = vcmp.gt.f32.partialorder %v26331_v26, 0.0 }
 0xa2d   :  { %20403 = vpow2.f32 %v14339_v25  ;;  %v14307_v31 = vmin.f32 %v26334_v34, 0.0  ;;  %v14209_v32 = vmul.f32 %v26304_v45, %v14038_v37  ;;  %vm14275_vm10 = vcmp.gt.f32.partialorder %v26334_v34, 0.0 }
 0xa2e   :  { %v14345_v1 = vmul.f32 1.442695, %v14308_v47  ;;  %v26341_v13 = vadd.f32 %v26309_v7, %v14210_v46 }
 0xa2f   :  { %v14343_v24 = vmul.f32 1.442695, %v14307_v31  ;;  %v26344_v61 = vadd.f32 %v26309_v7, %v14209_v32  ;;  %v18966_v50 = vpop.f32.mrb[152].mxu1 }
 0xa30   :  { %20405 = vpow2.f32 %v14345_v1  ;;  %v14310_v12 = vmin.f32 %v26341_v13, 0.0  ;;  %v14212_v63 = vmul.f32 %v18966_v50, %v26304_v45  ;;  %v14048_v3 = vpop.f32.mrb[153].mxu1  ;;  %vm14278_vm11 = vcmp.gt.f32.partialorder %v26341_v13, 0.0 }
 0xa31   :  { %20407 = vpow2.f32 %v14343_v24  ;;  %v14309_v8 = vmin.f32 %v26344_v61, 0.0  ;;  %v14211_v17 = vmul.f32 %v26304_v45, %v14048_v3  ;;  %vm14277_vm12 = vcmp.gt.f32.partialorder %v26344_v61, 0.0 }
 0xa32   :  { %v20398_v28 = vpop.eup %20397  ;;  %v14349_v54 = vmul.f32 1.442695, %v14310_v12  ;;  %v26351_v6 = vadd.f32 %v26309_v7, %v14212_v63 }
 0xa33   :  { %v20400_v51 = vpop.eup %20399  ;;  %v15989_v41 = vadd.f32 -1.0, %v20398_v28  ;;  %v14347_v58 = vmul.f32 1.442695, %v14309_v8  ;;  %v26354_v55 = vadd.f32 %v26309_v7, %v14211_v17  ;;  %v18969_v15 = vpop.f32.mrb[154].mxu1 }
 0xa34   :  { %v15988_v22 = vadd.f32 -1.0, %v20400_v51  ;;  %20409 = vpow2.f32 %v14349_v54  ;;  %v14312_v0 = vmin.f32 %v26351_v6, 0.0  ;;  %v14058_v18 = vpop.f32.mrb[155].mxu1  ;;  %v14214_v20 = vmul.f32 %v18969_v15, %v26304_v45 }
 0xa35   :  { %v14432_v14 = vsel %vm14272_vm4, %v14240_v39, %v15989_v41  ;;  %20411 = vpow2.f32 %v14347_v58  ;;  %v14311_v33 = vmin.f32 %v26354_v55, 0.0  ;;  %v14213_v49 = vmul.f32 %v26304_v45, %v14058_v18 }
 0xa36   :  { %v20402_v57 = vpop.eup %20401  ;;  %14464 = vst [vmem:[#allocation6 + $0x8] sm:$0xff] %v14432_v14  ;;  %v14431_v43 = vsel %vm14271_vm9, %v26315_v56, %v15988_v22  ;;  %v14353_v10 = vmul.f32 1.442695, %v14312_v0  ;;  %v26365_v35 = vadd.f32 %v26309_v7, %v14214_v20  ;;  %vm14280_vm13 = vcmp.gt.f32.partialorder %v26351_v6, 0.0 }
 0xa37   :  { %v20404_v16 = vpop.eup %20403  ;;  %14463 = vst [vmem:[#allocation6] sm:$0xff] %v14431_v43  ;;  %v15991_v2 = vadd.f32 -1.0, %v20402_v57  ;;  %v14351_v9 = vmul.f32 1.442695, %v14311_v33  ;;  %v18972_v38 = vpop.f32.mrb[156].mxu1  ;;  %v26368_v39 = vadd.f32 %v26309_v7, %v14213_v49  ;;  %vm14279_vm15 = vcmp.gt.f32.partialorder %v26354_v55, 0.0 }
 0xa38   :  { %v15990_v36 = vadd.f32 -1.0, %v20404_v16  ;;  %20413 = vpow2.f32 %v14353_v10  ;;  %v14068_v56 = vpop.f32.mrb[157].mxu1  ;;  %v14216_v5 = vmul.f32 %v18972_v38, %v26304_v45  ;;  %v14314_v29 = vmin.f32 %v26365_v35, 0.0 }
 0xa39   :  { %v14434_v30 = vsel %vm14274_vm14, %v26321_v52, %v15991_v2  ;;  %20415 = vpow2.f32 %v14351_v9  ;;  %v14215_v23 = vmul.f32 %v26304_v45, %v14068_v56  ;;  %v14313_v53 = vmin.f32 %v26368_v39, 0.0 }
 0xa3a   :  { %v20406_v4 = vpop.eup %20405  ;;  %14466 = vst [vmem:[#allocation6 + $0x18] sm:$0xff] %v14434_v30  ;;  %v14433_v42 = vsel %vm14273_vm8, %v26324_v44, %v15990_v36  ;;  %v26378_v52 = vadd.f32 %v26309_v7, %v14216_v5  ;;  %v14357_v44 = vmul.f32 1.442695, %v14314_v29  ;;  %vm14282_vm0 = vcmp.gt.f32.partialorder %v26365_v35, 0.0 }
 0xa3b   :  { %v20408_v48 = vpop.eup %20407  ;;  %14465 = vst [vmem:[#allocation6 + $0x10] sm:$0xff] %v14433_v42  ;;  %v15993_v60 = vadd.f32 -1.0, %v20406_v4  ;;  %v26381_v59 = vadd.f32 %v26309_v7, %v14215_v23  ;;  %v18975_v21 = vpop.f32.mrb[158].mxu1  ;;  %v14355_v25 = vmul.f32 1.442695, %v14313_v53  ;;  %vm14281_vm2 = vcmp.gt.f32.partialorder %v26368_v39, 0.0 }
 0xa3c   :  { %v15992_v19 = vadd.f32 -1.0, %v20408_v48  ;;  %v14218_v40 = vmul.f32 %v18975_v21, %v26304_v45  ;;  %v14078_v62 = vpop.f32.mrb[159].mxu1  ;;  %v14316_v27 = vmin.f32 %v26378_v52, 0.0  ;;  %20417 = vpow2.f32 %v14357_v44 }
 0xa3d   :  { %v14436_v11 = vsel %vm14276_vm5, %v26331_v26, %v15993_v60  ;;  %v14315_v32 = vmin.f32 %v26381_v59, 0.0  ;;  %20419 = vpow2.f32 %v14355_v25  ;;  %v14217_v17 = vmul.f32 %v26304_v45, %v14078_v62 }
 0xa3e   :  { %v20410_v47 = vpop.eup %20409  ;;  %v14496_v46 = vld [vmem:[#allocation6] ss:$2 sm:$0xff]  ;;  %v14528_v37 = vld [vmem:[#allocation6 + $0x1] ss:$2 sm:$0xff]  ;;  %14468 = vst [vmem:[#allocation6 + $0x28] sm:$0xff] %v14436_v11  ;;  %v14435_v31 = vsel %vm14275_vm10, %v26334_v34, %v15992_v19  ;;  %v26392_v8 = vadd.f32 %v26309_v7, %v14218_v40  ;;  %vm14284_vm3 = vcmp.gt.f32.partialorder %v26378_v52, 0.0 }
 0xa3f   :  { %v20412_v1 = vpop.eup %20411  ;;  %v14559_v24 = vmax.f32 %v14496_v46, %v14528_v37  ;;  %14467 = vst [vmem:[#allocation6 + $0x20] sm:$0xff] %v14435_v31  ;;  %v15995_v26 = vadd.f32 -1.0, %v20410_v47  ;;  %v14361_v50 = vmul.f32 1.442695, %v14316_v27  ;;  %v18978_v12 = vpop.f32.mrb[160].mxu1  ;;  %v26406_v33 = vadd.f32 %v26309_v7, %v14217_v17 }
 0xa40   :  { %v15994_v63 = vadd.f32 -1.0, %v20412_v1  ;;  %v14359_v3 = vmul.f32 1.442695, %v14315_v32  ;;  %v14088_v34 = vpop.f32.mrb[161].mxu1  ;;  %v14220_v54 = vmul.f32 %v18978_v12, %v26304_v45  ;;  %v14318_v0 = vmin.f32 %v26392_v8, 0.0 }
 0xa41   :  { %14575 = vst [vmem:[#allocation7] sm:$0xff] %v14559_v24  ;;  %v14438_v28 = vsel %vm14278_vm11, %v26341_v13, %v15995_v26  ;;  %20421 = vpow2.f32 %v14361_v50  ;;  %v14219_v51 = vmul.f32 %v26304_v45, %v14088_v34  ;;  %v14317_v9 = vmin.f32 %v26406_v33, 0.0 }
 0xa42   :  { %v20414_v41 = vpop.eup %20413  ;;  %v14498_v58 = vld [vmem:[#allocation6 + $0x10] ss:$2 sm:$0xff]  ;;  %v14530_v15 = vld [vmem:[#allocation6 + $0x11] ss:$2 sm:$0xff]  ;;  %14470 = vst [vmem:[#allocation6 + $0x38] sm:$0xff] %v14438_v28  ;;  %v14437_v22 = vsel %vm14277_vm12, %v26344_v61, %v15994_v63  ;;  %20423 = vpow2.f32 %v14359_v3  ;;  %v26409_v57 = vadd.f32 %v26309_v7, %v14220_v54  ;;  %vm14283_vm6 = vcmp.gt.f32.partialorder %v26381_v59, 0.0 }
 0xa43   :  { %v20416_v18 = vpop.eup %20415  ;;  %v14560_v13 = vmax.f32 %v14498_v58, %v14530_v15  ;;  %14469 = vst [vmem:[#allocation6 + $0x30] sm:$0xff] %v14437_v22  ;;  %v15997_v14 = vadd.f32 -1.0, %v20414_v41  ;;  %v18981_v43 = vpop.f32.mrb[162].mxu1  ;;  %v14365_v20 = vmul.f32 1.442695, %v14318_v0  ;;  %v26412_v61 = vadd.f32 %v26309_v7, %v14219_v51 }
 0xa44   :  { %v15996_v10 = vadd.f32 -1.0, %v20416_v18  ;;  %v14222_v49 = vmul.f32 %v18981_v43, %v26304_v45  ;;  %v14098_v16 = vpop.f32.mrb[163].mxu1  ;;  %v14320_v30 = vmin.f32 %v26409_v57, 0.0  ;;  %v14363_v23 = vmul.f32 1.442695, %v14317_v9 }
 0xa45   :  { %14576 = vst [vmem:[#allocation7 + $0x8] sm:$0xff] %v14560_v13  ;;  %v14440_v2 = vsel %vm14280_vm13, %v26351_v6, %v15997_v14  ;;  %20425 = vpow2.f32 %v14365_v20  ;;  %v14319_v4 = vmin.f32 %v26412_v61, 0.0  ;;  %vm14286_vm7 = vcmp.gt.f32.partialorder %v26392_v8, 0.0 }
 0xa46   :  { %v14500_v38 = vld [vmem:[#allocation6 + $0x20] ss:$2 sm:$0xff]  ;;  %v14532_v36 = vld [vmem:[#allocation6 + $0x21] ss:$2 sm:$0xff]  ;;  %14472 = vst [vmem:[#allocation6 + $0x48] sm:$0xff] %v14440_v2  ;;  %v14439_v56 = vsel %vm14279_vm15, %v26354_v55, %v15996_v10  ;;  %v26425_v6 = vadd.f32 %v26309_v7, %v14222_v49  ;;  %v20418_v29 = vpop.eup %20417  ;;  %v14221_v55 = vmul.f32 %v26304_v45, %v14098_v16  ;;  %20427 = vpow2.f32 %v14363_v23 }
 0xa47   :  { %v14561_v5 = vmax.f32 %v14500_v38, %v14532_v36  ;;  %14471 = vst [vmem:[#allocation6 + $0x40] sm:$0xff] %v14439_v56  ;;  %v18984_v42 = vpop.f32.mrb[164].mxu1  ;;  %v14369_v48 = vmul.f32 1.442695, %v14320_v30  ;;  %v20420_v21 = vpop.eup %20419  ;;  %v15999_v19 = vadd.f32 -1.0, %v20418_v29  ;;  %vm14285_vm1 = vcmp.gt.f32.partialorder %v26406_v33, 0.0 }
 0xa48   :  { %v14224_v60 = vmul.f32 %v18984_v42, %v26304_v45  ;;  %v14108_v53 = vpop.f32.mrb[165].mxu1  ;;  %v14367_v44 = vmul.f32 1.442695, %v14319_v4  ;;  %v15998_v11 = vadd.f32 -1.0, %v20420_v21  ;;  %v14322_v25 = vmin.f32 %v26425_v6, 0.0 }
 0xa49   :  { %14577 = vst [vmem:[#allocation7 + $0x10] sm:$0xff] %v14561_v5  ;;  %20429 = vpow2.f32 %v14369_v48  ;;  %v26433_v27 = vadd.f32 %v26309_v7, %v14221_v55  ;;  %v14442_v37 = vsel %vm14282_vm0, %v26365_v35, %v15999_v19  ;;  %v14223_v28 = vmul.f32 %v26304_v45, %v14108_v53 }
 0xa4a   :  { %v14502_v40 = vld [vmem:[#allocation6 + $0x30] ss:$2 sm:$0xff]  ;;  %v14534_v62 = vld [vmem:[#allocation6 + $0x31] ss:$2 sm:$0xff]  ;;  %20431 = vpow2.f32 %v14367_v44  ;;  %v26439_v31 = vadd.f32 %v26309_v7, %v14224_v60  ;;  %14474 = vst [vmem:[#allocation6 + $0x58] sm:$0xff] %v14442_v37  ;;  %v14441_v24 = vsel %vm14281_vm2, %v26368_v39, %v15998_v11  ;;  %vm14288_vm4 = vcmp.gt.f32.partialorder %v26409_v57, 0.0 }
 0xa4b   :  { %v20422_v47 = vpop.eup %20421  ;;  %v14562_v46 = vmax.f32 %v14502_v40, %v14534_v62  ;;  %v18987_v32 = vpop.f32.mrb[166].mxu1  ;;  %v14373_v50 = vmul.f32 1.442695, %v14322_v25  ;;  %14473 = vst [vmem:[#allocation6 + $0x50] sm:$0xff] %v14441_v24  ;;  %v14321_v35 = vmin.f32 %v26433_v27, 0.0  ;;  %v26457_v18 = vadd.f32 %v26309_v7, %v14223_v28 }
 0xa4c   :  { %v20424_v1 = vpop.eup %20423  ;;  %v16001_v26 = vadd.f32 -1.0, %v20422_v47  ;;  %v14118_v12 = vpop.f32.mrb[167].mxu1  ;;  %v14324_v3 = vmin.f32 %v26439_v31, 0.0  ;;  %v14226_v54 = vmul.f32 %v18987_v32, %v26304_v45  ;;  %vm14287_vm9 = vcmp.gt.f32.partialorder %v26412_v61, 0.0 }
 0xa4d   :  { %14578 = vst [vmem:[#allocation7 + $0x18] sm:$0xff] %v14562_v46  ;;  %v16000_v63 = vadd.f32 -1.0, %v20424_v1  ;;  %20433 = vpow2.f32 %v14373_v50  ;;  %v14371_v58 = vmul.f32 1.442695, %v14321_v35  ;;  %v14225_v13 = vmul.f32 %v26304_v45, %v14118_v12 }
 0xa4e   :  { %v14504_v17 = vld [vmem:[#allocation6 + $0x40] ss:$2 sm:$0xff]  ;;  %v14536_v34 = vld [vmem:[#allocation6 + $0x41] ss:$2 sm:$0xff]  ;;  %v14444_v39 = vsel %vm14284_vm3, %v26378_v52, %v16001_v26  ;;  %v14377_v15 = vmul.f32 1.442695, %v14324_v3  ;;  %v26460_v52 = vadd.f32 %v26309_v7, %v14226_v54 }
 0xa4f   :  { %v14563_v51 = vmax.f32 %v14504_v17, %v14536_v34  ;;  %14476 = vst [vmem:[#allocation6 + $0x68] sm:$0xff] %v14444_v39  ;;  %v14443_v41 = vsel %vm14283_vm6, %v26381_v59, %v16000_v63  ;;  %v18990_v22 = vpop.f32.mrb[168].mxu1  ;;  %v20426_v0 = vpop.eup %20425  ;;  %20435 = vpow2.f32 %v14371_v58  ;;  %v14323_v20 = vmin.f32 %v26457_v18, 0.0 }
 0xa50   :  { %14475 = vst [vmem:[#allocation6 + $0x60] sm:$0xff] %v14443_v41  ;;  %v14228_v14 = vmul.f32 %v18990_v22, %v26304_v45  ;;  %v14128_v43 = vpop.f32.mrb[169].mxu1  ;;  %v16003_v10 = vadd.f32 -1.0, %v20426_v0  ;;  %20437 = vpow2.f32 %v14377_v15  ;;  %v20428_v49 = vpop.eup %20427  ;;  %v14326_v2 = vmin.f32 %v26460_v52, 0.0 }
 0xa51   :  { %14579 = vst [vmem:[#allocation7 + $0x20] sm:$0xff] %v14563_v51  ;;  %v14227_v59 = vmul.f32 %v26304_v45, %v14128_v43  ;;  %v26474_v9 = vadd.f32 %v26309_v7, %v14225_v13  ;;  %v16002_v23 = vadd.f32 -1.0, %v20428_v49  ;;  %v14375_v55 = vmul.f32 1.442695, %v14323_v20 }
 0xa52   :  { %v14446_v16 = vsel %vm14286_vm7, %v26392_v8, %v16003_v10  ;;  %v26477_v38 = vadd.f32 %v26309_v7, %v14228_v14  ;;  %v14506_v30 = vld [vmem:[#allocation6 + $0x50] ss:$2 sm:$0xff]  ;;  %v14538_v5 = vld [vmem:[#allocation6 + $0x51] ss:$2 sm:$0xff]  ;;  %v14381_v60 = vmul.f32 1.442695, %v14326_v2 }
 0xa53   :  { %v18993_v36 = vpop.f32.mrb[170].mxu1  ;;  %v20430_v56 = vpop.eup %20429  ;;  %14478 = vst [vmem:[#allocation6 + $0x78] sm:$0xff] %v14446_v16  ;;  %v26480_v4 = vadd.f32 %v26309_v7, %v14227_v59  ;;  %v14564_v8 = vmax.f32 %v14506_v30, %v14538_v5  ;;  %v14445_v53 = vsel %vm14285_vm1, %v26406_v33, %v16002_v23  ;;  %v14325_v19 = vmin.f32 %v26474_v9, 0.0 }
 0xa54   :  { %v14138_v42 = vpop.f32.mrb[171].mxu1  ;;  %v20432_v29 = vpop.eup %20431  ;;  %v16005_v48 = vadd.f32 -1.0, %v20430_v56  ;;  %v14230_v44 = vmul.f32 %v18993_v36, %v26304_v45  ;;  %14477 = vst [vmem:[#allocation6 + $0x70] sm:$0xff] %v14445_v53  ;;  %vm14290_vm14 = vcmp.gt.f32.partialorder %v26425_v6, 0.0  ;;  %20439 = vpow2.f32 %v14375_v55 }
 0xa55   :  { %v16004_v21 = vadd.f32 -1.0, %v20432_v29  ;;  %14580 = vst [vmem:[#allocation7 + $0x28] sm:$0xff] %v14564_v8  ;;  %v14328_v25 = vmin.f32 %v26477_v38, 0.0  ;;  %20441 = vpow2.f32 %v14381_v60  ;;  %v14379_v37 = vmul.f32 1.442695, %v14325_v19 }
 0xa56   :  { %v14448_v11 = vsel %vm14288_vm4, %v26409_v57, %v16005_v48  ;;  %vm14289_vm8 = vcmp.gt.f32.partialorder %v26433_v27, 0.0  ;;  %v14327_v24 = vmin.f32 %v26480_v4, 0.0  ;;  %v26498_v50 = vadd.f32 %v26309_v7, %v14230_v44 }
 0xa57   :  { %v14508_v40 = vld [vmem:[#allocation6 + $0x60] ss:$2 sm:$0xff]  ;;  %v14540_v62 = vld [vmem:[#allocation6 + $0x61] ss:$2 sm:$0xff]  ;;  %v20434_v47 = vpop.eup %20433  ;;  %14480 = vst [vmem:[#allocation6 + $0x88] sm:$0xff] %v14448_v11  ;;  %v14447_v46 = vsel %vm14287_vm9, %v26412_v61, %v16004_v21  ;;  %v18996_v32 = vpop.f32.mrb[172].mxu1  ;;  %20443 = vpow2.f32 %v14379_v37  ;;  %v14229_v12 = vmul.f32 %v26304_v45, %v14138_v42 }
 0xa58   :  { %v14565_v33 = vmax.f32 %v14508_v40, %v14540_v62  ;;  %14479 = vst [vmem:[#allocation6 + $0x80] sm:$0xff] %v14447_v46  ;;  %v16007_v1 = vadd.f32 -1.0, %v20434_v47  ;;  %v14385_v57 = vmul.f32 1.442695, %v14328_v25  ;;  %v14148_v26 = vpop.f32.mrb[173].mxu1  ;;  %v14232_v61 = vmul.f32 %v18996_v32, %v26304_v45 }
 0xa59   :  { %v20436_v63 = vpop.eup %20435  ;;  %v14383_v3 = vmul.f32 1.442695, %v14327_v24  ;;  %v14231_v17 = vmul.f32 %v26304_v45, %v14148_v26  ;;  %vm14292_vm5 = vcmp.gt.f32.partialorder %v26439_v31, 0.0  ;;  %v14330_v54 = vmin.f32 %v26498_v50, 0.0 }
 0xa5a   :  { %14581 = vst [vmem:[#allocation7 + $0x30] sm:$0xff] %v14565_v33  ;;  %v14450_v35 = vsel %vm14290_vm14, %v26425_v6, %v16007_v1  ;;  %20445 = vpow2.f32 %v14385_v57  ;;  %v20438_v39 = vpop.eup %20437  ;;  %v16006_v28 = vadd.f32 -1.0, %v20436_v63  ;;  %v26509_v51 = vadd.f32 %v26309_v7, %v14229_v12 }
 0xa5b   :  { %v18999_v34 = vpop.f32.mrb[174].mxu1  ;;  %14482 = vst [vmem:[#allocation6 + $0x98] sm:$0xff] %v14450_v35  ;;  %v16009_v58 = vadd.f32 -1.0, %v20438_v39  ;;  %20447 = vpow2.f32 %v14383_v3  ;;  %v26512_v6 = vadd.f32 %v26309_v7, %v14232_v61  ;;  %v26515_v15 = vadd.f32 %v26309_v7, %v14231_v17  ;;  %v14510_v22 = vld [vmem:[#allocation6 + $0x70] ss:$2 sm:$0xff] }
 0xa5c   :  { %v14158_v41 = vpop.f32.mrb[175].mxu1  ;;  %v14542_v0 = vld [vmem:[#allocation6 + $0x71] ss:$2 sm:$0xff]  ;;  %v14449_v13 = vsel %vm14289_vm8, %v26433_v27, %v16006_v28  ;;  %v14389_v14 = vmul.f32 1.442695, %v14330_v54  ;;  %v14234_v43 = vmul.f32 %v18999_v34, %v26304_v45  ;;  %v14329_v49 = vmin.f32 %v26509_v51, 0.0 }
 0xa5d   :  { %v14233_v10 = vmul.f32 %v26304_v45, %v14158_v41  ;;  %v14566_v59 = vmax.f32 %v14510_v22, %v14542_v0  ;;  %14481 = vst [vmem:[#allocation6 + $0x90] sm:$0xff] %v14449_v13  ;;  %v14452_v20 = vsel %vm14292_vm5, %v26439_v31, %v16009_v58  ;;  %v14332_v36 = vmin.f32 %v26512_v6, 0.0 }
 0xa5e   :  { %14484 = vst [vmem:[#allocation6 + $0xa8] sm:$0xff] %v14452_v20  ;;  %20449 = vpow2.f32 %v14389_v14  ;;  %v26528_v27 = vadd.f32 %v26309_v7, %v14234_v43  ;;  %v20440_v56 = vpop.eup %20439  ;;  %v14387_v30 = vmul.f32 1.442695, %v14329_v49  ;;  %v14331_v5 = vmin.f32 %v26515_v15, 0.0 }
 0xa5f   :  { %v14512_v16 = vld [vmem:[#allocation6 + $0x80] ss:$2 sm:$0xff]  ;;  %v14544_v2 = vld [vmem:[#allocation6 + $0x81] ss:$2 sm:$0xff]  ;;  %14582 = vst [vmem:[#allocation7 + $0x38] sm:$0xff] %v14566_v59  ;;  %v20442_v23 = vpop.eup %20441  ;;  %vm14291_vm10 = vcmp.gt.f32.partialorder %v26457_v18, 0.0  ;;  %v26534_v55 = vadd.f32 %v26309_v7, %v14233_v10 }
 0xa60   :  { %v14567_v45 = vmax.f32 %v14512_v16, %v14544_v2  ;;  %v16008_v31 = vadd.f32 -1.0, %v20440_v56  ;;  %v14393_v42 = vmul.f32 1.442695, %v14332_v36  ;;  %v14334_v29 = vmin.f32 %v26528_v27, 0.0 }
 0xa61   :  { %v16011_v8 = vadd.f32 -1.0, %v20442_v23  ;;  %20451 = vpow2.f32 %v14387_v30  ;;  %v14391_v48 = vmul.f32 1.442695, %v14331_v5  ;;  %v20444_v60 = vpop.eup %20443  ;;  %vm14294_vm11 = vcmp.gt.f32.partialorder %v26460_v52, 0.0 }
 0xa62   :  { %14583 = vst [vmem:[#allocation7 + $0x40] sm:$0xff] %v14567_v45  ;;  %v14451_v53 = vsel %vm14291_vm10, %v26457_v18, %v16008_v31  ;;  %20453 = vpow2.f32 %v14393_v42  ;;  %v14397_v21 = vmul.f32 1.442695, %v14334_v29  ;;  %vm14293_vm12 = vcmp.gt.f32.partialorder %v26474_v9, 0.0 }
 0xa63   :  { %14483 = vst [vmem:[#allocation6 + $0xa0] sm:$0xff] %v14451_v53  ;;  %v14454_v44 = vsel %vm14294_vm11, %v26460_v52, %v16011_v8  ;;  %v16010_v40 = vadd.f32 -1.0, %v20444_v60  ;;  %20455 = vpow2.f32 %v14391_v48  ;;  %v14333_v25 = vmin.f32 %v26534_v55, 0.0 }
 0xa64   :  { %v20446_v19 = vpop.eup %20445  ;;  %v14514_v62 = vld [vmem:[#allocation6 + $0x90] ss:$2 sm:$0xff]  ;;  %v14546_v11 = vld [vmem:[#allocation6 + $0x91] ss:$2 sm:$0xff]  ;;  %14486 = vst [vmem:[#allocation6 + $0xb8] sm:$0xff] %v14454_v44  ;;  %20457 = vpow2.f32 %v14397_v21  ;;  %vm14296_vm13 = vcmp.gt.f32.partialorder %v26477_v38, 0.0 }
 0xa65   :  { %v16013_v7 = vadd.f32 -1.0, %v20446_v19  ;;  %v20448_v18 = vpop.eup %20447  ;;  %v14568_v47 = vmax.f32 %v14514_v62, %v14546_v11  ;;  %v14453_v33 = vsel %vm14293_vm12, %v26474_v9, %v16010_v40  ;;  %v14395_v37 = vmul.f32 1.442695, %v14333_v25 }
 0xa66   :  { %14485 = vst [vmem:[#allocation6 + $0xb0] sm:$0xff] %v14453_v33  ;;  %v16012_v46 = vadd.f32 -1.0, %v20448_v18  ;;  %vm14295_vm15 = vcmp.gt.f32.partialorder %v26480_v4, 0.0  ;;  %vm14298_vm0 = vcmp.gt.f32.partialorder %v26498_v50, 0.0  ;;  %vm14297_vm2 = vcmp.gt.f32.partialorder %v26509_v51, 0.0 }
 0xa67   :  { %v14456_v52 = vsel %vm14296_vm13, %v26477_v38, %v16013_v7  ;;  %14584 = vst [vmem:[#allocation7 + $0x48] sm:$0xff] %v14568_v47  ;;  %20459 = vpow2.f32 %v14395_v37  ;;  %vm14300_vm3 = vcmp.gt.f32.partialorder %v26512_v6, 0.0  ;;  %vm14299_vm6 = vcmp.gt.f32.partialorder %v26515_v15, 0.0 }
 0xa68   :  { %14488 = vst [vmem:[#allocation6 + $0xc8] sm:$0xff] %v14456_v52  ;;  %v20450_v32 = vpop.eup %20449  ;;  %v14455_v1 = vsel %vm14295_vm15, %v26480_v4, %v16012_v46  ;;  %vm14302_vm7 = vcmp.gt.f32.partialorder %v26528_v27, 0.0  ;;  %vm14301_vm1 = vcmp.gt.f32.partialorder %v26534_v55, 0.0 }
 0xa69   :  { %14487 = vst [vmem:[#allocation6 + $0xc0] sm:$0xff] %v14455_v1  ;;  %v16015_v57 = vadd.f32 -1.0, %v20450_v32 }
 0xa6a   :  { %v14516_v24 = vld [vmem:[#allocation6 + $0xa0] ss:$2 sm:$0xff]  ;;  %v14548_v26 = vld [vmem:[#allocation6 + $0xa1] ss:$2 sm:$0xff] }
 0xa6b   :  { %v20452_v9 = vpop.eup %20451  ;;  %v14569_v12 = vmax.f32 %v14516_v24, %v14548_v26  ;;  %v14458_v38 = vsel %vm14298_vm0, %v26498_v50, %v16015_v57 }
 0xa6c   :  { %v20454_v61 = vpop.eup %20453  ;;  %14490 = vst [vmem:[#allocation6 + $0xd8] sm:$0xff] %v14458_v38  ;;  %v16014_v63 = vadd.f32 -1.0, %v20452_v9 }
 0xa6d   :  { %v20456_v35 = vpop.eup %20455  ;;  %14585 = vst [vmem:[#allocation7 + $0x50] sm:$0xff] %v14569_v12  ;;  %v14518_v3 = vld [vmem:[#allocation6 + $0xb0] ss:$2 sm:$0xff]  ;;  %v14550_v17 = vld [vmem:[#allocation6 + $0xb1] ss:$2 sm:$0xff]  ;;  %v16017_v4 = vadd.f32 -1.0, %v20454_v61 }
 0xa6e   :  { %v20458_v34 = vpop.eup %20457  ;;  %v14570_v39 = vmax.f32 %v14518_v3, %v14550_v17  ;;  %v14457_v28 = vsel %vm14297_vm2, %v26509_v51, %v16014_v63  ;;  %v16016_v54 = vadd.f32 -1.0, %v20456_v35 }
 0xa6f   :  { %14489 = vst [vmem:[#allocation6 + $0xd0] sm:$0xff] %v14457_v28  ;;  %v14460_v50 = vsel %vm14300_vm3, %v26512_v6, %v16017_v4  ;;  %v16019_v41 = vadd.f32 -1.0, %v20458_v34 }
 0xa70   :  { %14586 = vst [vmem:[#allocation7 + $0x58] sm:$0xff] %v14570_v39  ;;  %v14520_v58 = vld [vmem:[#allocation6 + $0xc0] ss:$2 sm:$0xff]  ;;  %v14552_v22 = vld [vmem:[#allocation6 + $0xc1] ss:$2 sm:$0xff]  ;;  %14492 = vst [vmem:[#allocation6 + $0xe8] sm:$0xff] %v14460_v50  ;;  %v14459_v0 = vsel %vm14299_vm6, %v26515_v15, %v16016_v54 }
 0xa71   :  { %v14571_v13 = vmax.f32 %v14520_v58, %v14552_v22  ;;  %14491 = vst [vmem:[#allocation6 + $0xe0] sm:$0xff] %v14459_v0  ;;  %v14462_v51 = vsel %vm14302_vm7, %v26528_v27, %v16019_v41  ;;  %v20460_v14 = vpop.eup %20459 }
 0xa72   :  { %14494 = vst [vmem:[#allocation6 + $0xf8] sm:$0xf] %v14462_v51  ;;  %v16018_v43 = vadd.f32 -1.0, %v20460_v14 }
 0xa73   :  { %14587 = vst [vmem:[#allocation7 + $0x60] sm:$0xff] %v14571_v13 }
 0xa74   :  { %v14461_v6 = vsel %vm14301_vm1, %v26534_v55, %v16018_v43 }
 0xa75   :  { %14493 = vst [vmem:[#allocation6 + $0xf0] sm:$0xff] %v14461_v6 }
 0xa76   :  { %v14522_v10 = vld [vmem:[#allocation6 + $0xd0] ss:$2 sm:$0xff]  ;;  %v14554_v59 = vld [vmem:[#allocation6 + $0xd1] ss:$2 sm:$0xff] }
 0xa77   :  { %v14572_v20 = vmax.f32 %v14522_v10, %v14554_v59 }
 0xa78   :  { %v14524_v49 = vld [vmem:[#allocation6 + $0xe0] ss:$2 sm:$0xff]  ;;  %v14556_v15 = vld [vmem:[#allocation6 + $0xe1] ss:$2 sm:$0xff] }
 0xa79   :  { %14588 = vst [vmem:[#allocation7 + $0x68] sm:$0xff] %v14572_v20  ;;  %v14573_v16 = vmax.f32 %v14524_v49, %v14556_v15 }
 0xa7b   :  { %14589 = vst [vmem:[#allocation7 + $0x70] sm:$0xff] %v14573_v16 }
 0xa7c   :  { %v14526_v2 = vld [vmem:[#allocation6 + $0xf0] ss:$2 sm:$0xff]  ;;  %v14558_v36 = vld [vmem:[#allocation6 + $0xf1] ss:$2 sm:$0xff] }
 0xa7d   :  { %v14574_v27 = vmax.f32 %v14526_v2, %v14558_v36 }
 0xa7f   :  { %14590 = vst [vmem:[#allocation7 + $0x78] sm:$0xff] %v14574_v27 }
 0xa80   :  { %20480 = shalt.err (!%p20477_p4)
}
 0xa81   :  { %s20481_s29 = scalar_lea.hbm %s26575_s5, 2048 }
 0xa82   :  { %p20482_p5 = scmp.ne.s32.totalorder %s26575_s5, %s20481_s29  ;;  %p20485_p6 = scmp.lt.u32.totalorder %s20481_s29, %s26575_s5 }
 0xa84   :  { %p20487_p7 = pnand %p20485_p6, %p20482_p5 }
 0xa86   :  { %20490 = shalt.err (!%p20487_p7)
}
 0xa87   :  { %s20496_s9 = smov 128   ;;  %s20497_s10 = smov 8  }
 0xa88   :  { %14602 = dma.vmem_to_hbm [thread:$0]  %s14597_s26, 2048, %s26575_s5, [#allocation8], %s20496_s9, %s20496_s9, %s20497_s10  }
 0xa89   :  { %20491 = dma.done.wait [#allocation8], 2048  }
 0xa8a   :  { %20492 = vsyncadd [#allocation8], 4294965248 }
 0xa8b   :  { %14606 = vsyncpa [#allocation8], 1 }

</bundles_post_ra>
